<compile_context>
chip_gen: v6e
topology: v6e:2x2x1
jax: 0.10.0
libtpu: 0.0.40
codegen_flags: <defaults>
</compile_context>

<pallas_src>
import functools

import jax
import jax.numpy as jnp
from jax import lax
from jax.experimental import pallas as pl
from jax.experimental.pallas import tpu as pltpu

# Scaled-down model constants (module hardcodes n_emb=32, n_enc=128, n_hid=2048).
V       = 20      # vocab size
N_EMB   = 16      # n_emb
N_ENC   = 32      # n_enc == LSTM hidden size H
N_HID   = 64      # n_hid
SCALE   = 1e-5    # LstmParameterizer scale (folded into hypernet dequant scales/bias)
LANE    = 128
B_SUB   = 16      # batch padded to the bf16 sublane granule (16)
NEG_BIG = -1e30   # bias on padded vocab lanes: exp underflows to 0, never wins max/onehot
MM_TILE_N  = 2048 # hypernet matmul N tile (int8 => 2 tile buffers fit easily in VMEM)
MAX_UNROLL = 8    # cap on the LSTM recurrence unroll

H_PAD = (N_ENC + LANE - 1) // LANE * LANE   # gate/lane-aligned hidden width (=n_enc when n_enc=128)
V_PAD = (V + LANE - 1) // LANE * LANE       # lane-dense vocab width for the fused CE

# Hypernetwork slab layout (already-transposed, per LstmParameterizer; enc then dec).
SZ_WIH     = 4 * N_ENC * N_EMB    # stored row-major as (N_EMB, 4*N_ENC)  == w_ih^T
SZ_WHH     = 4 * N_ENC * N_ENC    # stored row-major as (N_ENC, 4*N_ENC)  == w_hh^T
SZ_B       = 4 * N_ENC
SZ_BUILDER = SZ_WIH + SZ_WHH + 2 * SZ_B
N_HYPER    = 2 * SZ_BUILDER

_VMEM = pl.BlockSpec(memory_space=pltpu.MemorySpace.VMEM)


def _round_up(x, m):
    return (x + m - 1) // m * m


def _pad_gate_cols(w, h=N_ENC, hp=H_PAD):
    """(..., 4*h) -> (..., 4*hp): zero-pad each of the 4 gate blocks to hp lanes."""
    if hp == h:
        return w
    lead = w.shape[:-1]
    w4 = w.reshape(lead + (4, h))
    w4 = jnp.pad(w4, [(0, 0)] * len(lead) + [(0, 0), (0, hp - h)])
    return w4.reshape(lead + (4 * hp,))


def _pad_rows(w, h=N_ENC, hp=H_PAD):
    return w if hp == h else jnp.pad(w, ((0, hp - h), (0, 0)))


# ----------------------- hypernet matmul (int8 weight stream) ----------------

def _mm_bias_kernel(a_ref, q_ref, s_ref, b_ref, o_ref):
    # HBM streams int8; dequant (per-column scale, SCALE folded in) happens in the
    # bias/scale epilogue so DMA bytes -- the only thing that matters at M=1 -- are halved.
    a = a_ref[...].astype(jnp.bfloat16)
    w = q_ref[...].astype(jnp.bfloat16)          # int8 values are exact in bf16
    o_ref[...] = (jnp.dot(a, w, preferred_element_type=jnp.float32)
                  * s_ref[...] + b_ref[...])


def mm_bias_int8(a, w_q, w_scale, bias_eff, tile_n=MM_TILE_N):
    """o = (a @ dequant(w_q)) + bias, lane-tiled over N, weights streamed as int8."""
    M, K = a.shape
    N = w_q.shape[1]
    tn = min(tile_n, _round_up(N, LANE))
    Np = _round_up(N, tn)
    if Np != N:                                  # no-op in this model (padded at init)
        w_q = jnp.pad(w_q, ((0, 0), (0, Np - N)))
        w_scale = jnp.pad(w_scale, ((0, 0), (0, Np - N)))
        bias_eff = jnp.pad(bias_eff, ((0, 0), (0, Np - N)))
    out = pl.pallas_call(
        _mm_bias_kernel,
        out_shape=jax.ShapeDtypeStruct((M, Np), jnp.float32),
        grid=(Np // tn,),
        in_specs=[pl.BlockSpec((M, K), lambda j: (0, 0)),
                  pl.BlockSpec((K, tn), lambda j: (0, j)),
                  pl.BlockSpec((1, tn), lambda j: (0, j)),
                  pl.BlockSpec((1, tn), lambda j: (0, j))],
        out_specs=pl.BlockSpec((M, tn), lambda j: (0, j)),
        compiler_params=pltpu.CompilerParams(
            dimension_semantics=("parallel",),          # v7x megacore shards N tiles
            vmem_limit_bytes=32 * 1024 * 1024),         # explicit: safe on v5e defaults
    )(a, w_q, w_scale, bias_eff)
    return out


# ----------------------------- LSTM kernels --------------------------------

def _lstm_cell(z, c, hp):
    # PyTorch gate order (i, f, g, o); gate blocks are hp-wide so every slice is
    # 128-lane aligned.  Padded lanes stay exactly 0 (zero-padded weights/bias, c0=0).
    i = jax.nn.sigmoid(z[:, 0 * hp:1 * hp])
    f = jax.nn.sigmoid(z[:, 1 * hp:2 * hp])
    g = jnp.tanh(z[:, 2 * hp:3 * hp])
    o = jax.nn.sigmoid(z[:, 3 * hp:4 * hp])
    c_new = f * c + i * g
    return o * jnp.tanh(c_new), c_new


def _lstm_state_kernel(x_ref, h0_ref, c0_ref, wihT_ref, whhT_ref, b_ref,
                       hN_ref, cN_ref, xz_ref):
    Bp, Hp = h0_ref.shape
    T = xz_ref.shape[0] // Bp
    # Hoisted input projection: one (T*Bp, K)@(K, 4Hp) matmul instead of T tiny ones.
    xz_ref[...] = (jnp.dot(x_ref[...], wihT_ref[...],
                           preferred_element_type=jnp.float32) + b_ref[...])
    whhT = whhT_ref[...]

    def step(t, carry):
        h, c = carry
        base = pl.multiple_of(t * Bp, Bp)
        z = xz_ref[pl.ds(base, Bp), :] + jnp.dot(
            h.astype(whhT.dtype), whhT, preferred_element_type=jnp.float32)
        return _lstm_cell(z, c, Hp)

    h, c = lax.fori_loop(0, T, step, (h0_ref[...], c0_ref[...]),
                         unroll=min(T, MAX_UNROLL))
    hN_ref[...] = h
    cN_ref[...] = c


def lstm_state(x_flat, h0, c0, wihT, whhT, b):
    """Encoder-only single-layer LSTM: returns final (h, c) only (attention=None ->
    the per-step output sequence is dead and never materialized)."""
    TB = x_flat.shape[0]
    Bp, Hp = h0.shape
    return pl.pallas_call(
        _lstm_state_kernel,
        out_shape=(jax.ShapeDtypeStruct((Bp, Hp), jnp.float32),
                   jax.ShapeDtypeStruct((Bp, Hp), jnp.float32)),
        in_specs=[_VMEM] * 6,
        out_specs=(_VMEM, _VMEM),
        scratch_shapes=[pltpu.VMEM((TB, 4 * Hp), jnp.float32)],
    )(x_flat, h0, c0, wihT, whhT, b)


def _decoder_loss_kernel(x_ref, h0_ref, c0_ref, wihT_ref, whhT_ref, b_ref,
                         woutT_ref, bout_ref, lbl_ref, loss_ref, xz_ref,
                         *, b_real):
    Bp, Hp = h0_ref.shape
    T = lbl_ref.shape[0]
    Vp = woutT_ref.shape[1]           # padded to 128: softmax/CE is full-lane, unmasked
    xz_ref[...] = (jnp.dot(x_ref[...], wihT_ref[...],
                           preferred_element_type=jnp.float32) + b_ref[...])
    whhT = whhT_ref[...]
    woutT = woutT_ref[...]
    bout = bout_ref[...]              # padded vocab lanes carry -1e30 here
    # Padded batch rows are excluded from the loss.
    row_mask = (lax.broadcasted_iota(jnp.int32, (Bp, 1), 0) < b_real
                ).astype(jnp.float32)
    col_ids = lax.broadcasted_iota(jnp.int32, (Bp, Vp), 1)

    def step(t, carry):
        h, c, acc = carry
        base = pl.multiple_of(t * Bp, Bp)
        z = xz_ref[pl.ds(base, Bp), :] + jnp.dot(
            h.astype(whhT.dtype), whhT, preferred_element_type=jnp.float32)
        h_new, c_new = _lstm_cell(z, c, Hp)
        # Vocab projection + CE for this step, entirely in VMEM (no logits HBM bounce).
        logits = (jnp.dot(h_new.astype(woutT.dtype), woutT,
                          preferred_element_type=jnp.float32) + bout)   # (Bp, Vp)
        m = jnp.max(logits, axis=-1, keepdims=True)
        lse = m + jnp.log(jnp.sum(jnp.exp(logits - m), axis=-1, keepdims=True))
        onehot = (col_ids == lbl_ref[t]).astype(jnp.float32)            # labels < V <= Vp
        tgt = jnp.sum(logits * onehot, axis=-1, keepdims=True)
        acc = acc + jnp.sum((lse - tgt) * row_mask, axis=0, keepdims=True)
        return (h_new, c_new, acc)

    _, _, acc = lax.fori_loop(
        0, T, step,
        (h0_ref[...], c0_ref[...], jnp.zeros((1, 1), jnp.float32)),
        unroll=min(T, MAX_UNROLL))
    loss_ref[...] = acc * (1.0 / (T * b_real))      # CrossEntropyLoss mean reduction


def decoder_loss(x_flat, h0, c0, wihT, whhT, b, woutT, bout, labels, b_real):
    """Decoder LSTM + Linear(n_enc, V) + CrossEntropyLoss fused; returns scalar loss."""
    # TODO(synk): b_real is baked in (recompile per batch size); fine for this demo.
    T, Bp = labels.shape
    Hp = h0.shape[1]
    lbl = labels.reshape(T, Bp, 1).astype(jnp.int32)
    loss = pl.pallas_call(
        functools.partial(_decoder_loss_kernel, b_real=b_real),
        out_shape=jax.ShapeDtypeStruct((1, 1), jnp.float32),
        in_specs=[_VMEM] * 9,
        out_specs=_VMEM,
        scratch_shapes=[pltpu.VMEM((T * Bp, 4 * Hp), jnp.float32)],
    )(x_flat, h0, c0, wihT, whhT, b, woutT, bout, lbl)
    return loss[0, 0]


# ----------------------------- proj + reduce (fused) ------------------------

def _proj_reduce_kernel(h_ref, pwT_ref, pb_ref, w0T_ref, w1T_ref, rb_ref,
                        rep_ref, buf_ref, *, b_real):
    # proj: Conv1d(n_enc, n_hid, 1) with batch/length on sublanes, channels on lanes.
    buf_ref[...] = (jnp.dot(h_ref[...].astype(pwT_ref.dtype), pwT_ref[...],
                            preferred_element_type=jnp.float32) + pb_ref[...])
    w0T = w0T_ref[...]
    w1T = w1T_ref[...]
    rb = rb_ref[...]
    # reduce: Conv1d(n_hid, n_hid, 2, 2) repeated until length 1 (unrolled at trace time).
    # Even/odd rows come from strided sublane reads on the VMEM scratch -- one regroup per
    # level instead of O(L) single-row slice+concat.
    L = b_real
    while L > 1:
        L_out = L // 2                 # trailing odd position dropped, like the Conv1d
        even = buf_ref[pl.ds(0, L_out, stride=2), :]
        odd = buf_ref[pl.ds(1, L_out, stride=2), :]
        h = (jnp.dot(even.astype(w0T.dtype), w0T, preferred_element_type=jnp.float32)
             + jnp.dot(odd.astype(w1T.dtype), w1T, preferred_element_type=jnp.float32)
             + rb)                                                       # (L_out, n_hid)
        buf_ref[0:L_out, :] = h
        L = L_out
    rep_ref[...] = buf_ref[0:1, :]                                       # squeeze(2).squeeze(0)


def proj_reduce(enc_h, pwT, pb, w0T, w1T, rb, b_real):
    Bp = enc_h.shape[0]
    return pl.pallas_call(
        functools.partial(_proj_reduce_kernel, b_real=b_real),
        out_shape=jax.ShapeDtypeStruct((1, N_HID), jnp.float32),
        in_specs=[_VMEM] * 6,
        out_specs=_VMEM,
        scratch_shapes=[pltpu.VMEM((Bp, N_HID), jnp.float32)],
    )(enc_h, pwT, pb, w0T, w1T, rb)


# ----------------------------- parameters ----------------------------------

def init_params(key):
    ks = iter(jax.random.split(key, 48))

    def nrm(shape, s=0.1):
        return jax.random.normal(next(ks), shape, jnp.float32) * s

    p = {}
    # Embeddings stored bf16 so the wrapper gathers already-bf16 activations.
    p['ctx_emb'] = nrm((V, N_EMB)).astype(jnp.bfloat16)
    p['inp_emb'] = nrm((V, N_EMB)).astype(jnp.bfloat16)
    p['out_emb'] = nrm((V, N_EMB)).astype(jnp.bfloat16)

    # ctx_encoder LSTM(n_emb, n_enc): pre-transposed, gate-padded, bf16 at init.
    w_ih = nrm((4 * N_ENC, N_EMB))
    w_hh = nrm((4 * N_ENC, N_ENC))
    b_ih = nrm((4 * N_ENC,))
    b_hh = nrm((4 * N_ENC,))
    p['ctx_wihT'] = _pad_gate_cols(w_ih.T).astype(jnp.bfloat16)              # (N_EMB, 4Hp)
    p['ctx_whhT'] = _pad_rows(_pad_gate_cols(w_hh.T)).astype(jnp.bfloat16)   # (Hp, 4Hp)
    p['ctx_b'] = _pad_gate_cols((b_ih + b_hh).reshape(1, -1))                # (1, 4Hp) f32

    # proj = Conv1d(n_enc, n_hid, 1);  reduce = Conv1d(n_hid, n_hid, 2, 2)
    p['proj_wT'] = _pad_rows(nrm((N_HID, N_ENC)).T).astype(jnp.bfloat16)     # (Hp, n_hid)
    p['proj_b'] = nrm((N_HID,)).reshape(1, N_HID)
    red_w = nrm((N_HID, N_HID, 2))
    p['red_w0T'] = red_w[:, :, 0].T.astype(jnp.bfloat16)
    p['red_w1T'] = red_w[:, :, 1].T.astype(jnp.bfloat16)
    p['red_b'] = nrm((N_HID,)).reshape(1, N_HID)

    # Hypernetwork: 8 LstmParameterizer linears fused along N.  Columns are laid out so
    # the generated slabs are already the transposed (n_inp,4H)/(H,4H) weights the LSTM
    # kernels consume (pure re-indexing of the random Linear columns -> same model family).
    # Weights are int8-quantized per output column; the dequant scale and SCALE=1e-5 are
    # folded into per-column scales / the bias, applied inside the matmul kernel.
    w = nrm((N_HID, N_HYPER))
    b = nrm((N_HYPER,))
    absmax = jnp.maximum(jnp.max(jnp.abs(w), axis=0, keepdims=True), 1e-12)
    qscale = absmax / 127.0
    q = jnp.clip(jnp.round(w / qscale), -127, 127).astype(jnp.int8)          # (n_hid, N)
    col_scale = (qscale * SCALE).astype(jnp.float32)                         # (1, N)
    bias_eff = (b * SCALE).reshape(1, N_HYPER).astype(jnp.float32)
    np_pad = _round_up(N_HYPER, MM_TILE_N)        # pad to the mm tile at init: no per-call glue
    p['hyper_q'] = jnp.pad(q, ((0, 0), (0, np_pad - N_HYPER)))
    p['hyper_scale'] = jnp.pad(col_scale, ((0, 0), (0, np_pad - N_HYPER)))
    p['hyper_bias'] = jnp.pad(bias_eff, ((0, 0), (0, np_pad - N_HYPER)))

    # Decoder vocab head Linear(n_enc, V): pre-transposed, lane-padded to (Hp, V_PAD);
    # padded vocab lanes get a -1e30 bias so they never win the softmax/onehot.
    w_out = nrm((V, N_ENC))
    b_out = nrm((V,))
    woutT = jnp.zeros((H_PAD, V_PAD), jnp.float32).at[:N_ENC, :V].set(w_out.T)
    bout = jnp.full((1, V_PAD), NEG_BIG, jnp.float32).at[0, :V].set(b_out)
    p['out_wT'] = woutT.astype(jnp.bfloat16)
    p['out_b'] = bout
    return p


def split_hyper_half(vec):
    """One LstmParameterizer slab (transposed layout) -> gate-padded (wihT, whhT, bias)."""
    o = 0
    wihT = vec[o:o + SZ_WIH].reshape(N_EMB, 4 * N_ENC); o += SZ_WIH
    whhT = vec[o:o + SZ_WHH].reshape(N_ENC, 4 * N_ENC); o += SZ_WHH
    b_ih = vec[o:o + SZ_B]; o += SZ_B
    b_hh = vec[o:o + SZ_B]; o += SZ_B
    wihT = _pad_gate_cols(wihT).astype(jnp.bfloat16)                 # (N_EMB, 4Hp)
    whhT = _pad_rows(_pad_gate_cols(whhT)).astype(jnp.bfloat16)      # (Hp, 4Hp)
    bias = _pad_gate_cols((b_ih + b_hh).reshape(1, -1))              # (1, 4Hp) f32
    return wihT, whhT, bias


# ----------------------------- model forward --------------------------------

def inductor_forward(params, ctx, inp, out):
    _, B = ctx.shape
    Bp = _round_up(B, B_SUB)                       # bf16 sublane-granule batch padding

    def embed_flat(emb, ids):
        x = jnp.take(emb, ids, axis=0)             # (T, B, n_emb) bf16
        x = jnp.pad(x, ((0, 0), (0, Bp - B), (0, 0)))
        return x.reshape(-1, N_EMB)                # (T*Bp, n_emb)

    zeros = jnp.zeros((Bp, H_PAD), jnp.float32)

    # ---- ctx_encoder: Embedding + fixed-weight LSTM; only the final hidden h is needed.
    ctx_x = embed_flat(params['ctx_emb'], ctx)
    enc_h, _ = lstm_state(ctx_x, zeros, zeros,
                          params['ctx_wihT'], params['ctx_whhT'], params['ctx_b'])

    # ---- proj (Conv1d k=1) + reduce (Conv1d k=2 s=2) loop, fused in one kernel.
    rep = proj_reduce(enc_h, params['proj_wT'], params['proj_b'],
                      params['red_w0T'], params['red_w1T'], params['red_b'], B)  # (1, n_hid)

    # ---- hypernetwork: all 8 LstmParameterizer linears as ONE int8-streamed matmul.
    gen = mm_bias_int8(rep, params['hyper_q'], params['hyper_scale'],
                       params['hyper_bias'])[0]                                  # (Np,)
    enc_wihT, enc_whhT, enc_b = split_hyper_half(gen[:SZ_BUILDER])
    dec_wihT, dec_whhT, dec_b = split_hyper_half(gen[SZ_BUILDER:2 * SZ_BUILDER])

    # ---- teacher-forcing shift ----
    out_next = out[1:, :]
    out_prev = out[:-1, :]

    # ---- inp_encoder: Embedding + dynamic-weight LSTM (only final state consumed;
    #      attention=None so proc_inp is dead work and never materialized).
    inp_x = embed_flat(params['inp_emb'], inp)
    h_state, c_state = lstm_state(inp_x, zeros, zeros, enc_wihT, enc_whhT, enc_b)

    # ---- out_decoder + vocab head + CrossEntropyLoss(pred, out_next), fused ----
    dec_x = embed_flat(params['out_emb'], out_prev)
    labels = jnp.pad(out_next, ((0, 0), (0, Bp - B)))
    loss = decoder_loss(dec_x, h_state, c_state, dec_wihT, dec_whhT, dec_b,
                        params['out_wT'], params['out_b'], labels, B)
    return loss


# ----------------------------- driver ---------------------------------------

if __name__ == "__main__":
    key = jax.random.PRNGKey(0)
    kp, k1, k2, k3 = jax.random.split(key, 4)
    params = init_params(kp)

    B = 4
    T_ctx, T_inp, T_out = 6, 8, 7
    ctx = jax.random.randint(k1, (T_ctx, B), 0, V, dtype=jnp.int32)
    inp = jax.random.randint(k2, (T_inp, B), 0, V, dtype=jnp.int32)
    out = jax.random.randint(k3, (T_out, B), 0, V, dtype=jnp.int32)

    loss = jax.jit(inductor_forward)(params, ctx, inp, out)
    jax.block_until_ready(loss)
    assert loss.shape == () and jnp.isfinite(loss)
    print("KERNEL_OK")
</pallas_src>

<mosaic_0001>
module attributes {stable_mosaic.version = 11 : i64} {
  func.func @_mm_bias_kernel(%arg0: i32, %arg1: memref<1x64xf32, #tpu.memory_space<vmem>>, %arg2: memref<64x2048xi8, #tpu.memory_space<vmem>>, %arg3: memref<1x2048xf32, #tpu.memory_space<vmem>>, %arg4: memref<1x2048xf32, #tpu.memory_space<vmem>>, %arg5: memref<1x2048xf32, #tpu.memory_space<vmem>>) attributes {dimension_semantics = [#tpu.dimension_semantics<parallel>], iteration_bounds = array<i64: 7>, scalar_prefetch = 0 : i64, scratch_operands = 0 : i64, tpu.core_type = #tpu.core_type<tc>, window_params = [{pipeline_mode = #tpu.pipeline_mode<synchronous>, transform_indices = @transform_0, window_bounds = array<i64: 1, 64>}, {transform_indices = @transform_1, window_bounds = array<i64: 64, 2048>}, {transform_indices = @transform_2, window_bounds = array<i64: 1, 2048>}, {transform_indices = @transform_3, window_bounds = array<i64: 1, 2048>}, {transform_indices = @transform_4, window_bounds = array<i64: 1, 2048>}]} {
    %c0 = arith.constant 0 : index
    %c0_0 = arith.constant 0 : index
    %0 = vector.load %arg1[%c0, %c0_0] : memref<1x64xf32, #tpu.memory_space<vmem>>, vector<1x64xf32>
    %1 = arith.truncf %0 : vector<1x64xf32> to vector<1x64xbf16>
    %c0_1 = arith.constant 0 : index
    %c0_2 = arith.constant 0 : index
    %2 = vector.load %arg2[%c0_1, %c0_2] : memref<64x2048xi8, #tpu.memory_space<vmem>>, vector<64x2048xi8>
    %3 = arith.sitofp %2 : vector<64x2048xi8> to vector<64x2048xbf16>
    %cst = arith.constant dense<0.000000e+00> : vector<1x2048xf32>
    %4 = tpu.matmul %1, %3, %cst {dimension_numbers = #tpu.dot_dimension_numbers<[1], [0], [0], [1], [0, 0, 1, 1], [], []>} : vector<1x64xbf16>, vector<64x2048xbf16>, vector<1x2048xf32> -> vector<1x2048xf32>
    %c0_3 = arith.constant 0 : index
    %c0_4 = arith.constant 0 : index
    %5 = vector.load %arg3[%c0_3, %c0_4] : memref<1x2048xf32, #tpu.memory_space<vmem>>, vector<1x2048xf32>
    %6 = arith.mulf %4, %5 : vector<1x2048xf32>
    %c0_5 = arith.constant 0 : index
    %c0_6 = arith.constant 0 : index
    %7 = vector.load %arg4[%c0_5, %c0_6] : memref<1x2048xf32, #tpu.memory_space<vmem>>, vector<1x2048xf32>
    %8 = arith.addf %6, %7 : vector<1x2048xf32>
    %c0_7 = arith.constant 0 : index
    %c0_8 = arith.constant 0 : index
    %9 = vector.load %arg5[%c0_7, %c0_8] : memref<1x2048xf32, #tpu.memory_space<vmem>>, vector<1x2048xf32>
    tpu.vector_store %arg5[%c0_7, %c0_8], %8 {strides = array<i32>} : memref<1x2048xf32, #tpu.memory_space<vmem>>, vector<1x2048xf32>,
    return
  }
  func.func @transform_0(%arg0: i32) -> (i32, i32) {
    %c0_i32 = arith.constant 0 : i32
    %c0_i32_0 = arith.constant 0 : i32
    %c0_i32_1 = arith.constant 0 : i32
    return %c0_i32, %c0_i32_0 : i32, i32
  }
  func.func @transform_1(%arg0: i32) -> (i32, i32) {
    %c0_i32 = arith.constant 0 : i32
    %c0_i32_0 = arith.constant 0 : i32
    return %c0_i32, %arg0 : i32, i32
  }
  func.func @transform_2(%arg0: i32) -> (i32, i32) {
    %c0_i32 = arith.constant 0 : i32
    %c0_i32_0 = arith.constant 0 : i32
    return %c0_i32, %arg0 : i32, i32
  }
  func.func @transform_3(%arg0: i32) -> (i32, i32) {
    %c0_i32 = arith.constant 0 : i32
    %c0_i32_0 = arith.constant 0 : i32
    return %c0_i32, %arg0 : i32, i32
  }
  func.func @transform_4(%arg0: i32) -> (i32, i32) {
    %c0_i32 = arith.constant 0 : i32
    %c0_i32_0 = arith.constant 0 : i32
    return %c0_i32, %arg0 : i32, i32
  }
}

module attributes {stable_mosaic.version = 11 : i64} {
  func.func @_lstm_state_kernel(%arg0: memref<96x16xbf16, #tpu.memory_space<vmem>>, %arg1: memref<16x128xf32, #tpu.memory_space<vmem>>, %arg2: memref<16x128xf32, #tpu.memory_space<vmem>>, %arg3: memref<16x512xbf16, #tpu.memory_space<vmem>>, %arg4: memref<128x512xbf16, #tpu.memory_space<vmem>>, %arg5: memref<1x512xf32, #tpu.memory_space<vmem>>, %arg6: memref<16x128xf32, #tpu.memory_space<vmem>>, %arg7: memref<16x128xf32, #tpu.memory_space<vmem>>, %arg8: memref<96x512xf32, #tpu.memory_space<vmem>>) attributes {dimension_semantics = [], scalar_prefetch = 0 : i64, scratch_operands = 1 : i64, tpu.core_type = #tpu.core_type<tc>} {
    %c0 = arith.constant 0 : index
    %c0_0 = arith.constant 0 : index
    %0 = vector.load %arg0[%c0, %c0_0] : memref<96x16xbf16, #tpu.memory_space<vmem>>, vector<96x16xbf16>
    %c0_1 = arith.constant 0 : index
    %c0_2 = arith.constant 0 : index
    %1 = vector.load %arg3[%c0_1, %c0_2] : memref<16x512xbf16, #tpu.memory_space<vmem>>, vector<16x512xbf16>
    %cst = arith.constant dense<0.000000e+00> : vector<96x512xf32>
    %2 = tpu.matmul %0, %1, %cst {dimension_numbers = #tpu.dot_dimension_numbers<[1], [0], [0], [1], [0, 0, 1, 1], [], []>} : vector<96x16xbf16>, vector<16x512xbf16>, vector<96x512xf32> -> vector<96x512xf32>
    %c0_3 = arith.constant 0 : index
    %c0_4 = arith.constant 0 : index
    %3 = vector.load %arg5[%c0_3, %c0_4] : memref<1x512xf32, #tpu.memory_space<vmem>>, vector<1x512xf32>
    %4 = vector.broadcast %3 : vector<1x512xf32> to vector<96x512xf32>
    %5 = arith.addf %2, %4 : vector<96x512xf32>
    %c0_5 = arith.constant 0 : index
    %c0_6 = arith.constant 0 : index
    %6 = vector.load %arg8[%c0_5, %c0_6] : memref<96x512xf32, #tpu.memory_space<vmem>>, vector<96x512xf32>
    tpu.vector_store %arg8[%c0_5, %c0_6], %5 {strides = array<i32>} : memref<96x512xf32, #tpu.memory_space<vmem>>, vector<96x512xf32>,
    %c0_7 = arith.constant 0 : index
    %c0_8 = arith.constant 0 : index
    %7 = vector.load %arg4[%c0_7, %c0_8] : memref<128x512xbf16, #tpu.memory_space<vmem>>, vector<128x512xbf16>
    %c0_9 = arith.constant 0 : index
    %c0_10 = arith.constant 0 : index
    %8 = vector.load %arg1[%c0_9, %c0_10] : memref<16x128xf32, #tpu.memory_space<vmem>>, vector<16x128xf32>
    %c0_11 = arith.constant 0 : index
    %c0_12 = arith.constant 0 : index
    %9 = vector.load %arg2[%c0_11, %c0_12] : memref<16x128xf32, #tpu.memory_space<vmem>>, vector<16x128xf32>
    %c0_i32 = arith.constant 0 : i32
    %c16_i32 = arith.constant 16 : i32
    %10 = arith.muli %c0_i32, %c16_i32 : i32
    %11 = tpu.assume_multiple %10, 16 : i32
    %12 = arith.index_cast %11 : i32 to index
    %c0_13 = arith.constant 0 : index
    %13 = vector.load %arg8[%12, %c0_13] : memref<96x512xf32, #tpu.memory_space<vmem>>, vector<16x512xf32>
    %14 = arith.truncf %8 : vector<16x128xf32> to vector<16x128xbf16>
    %cst_14 = arith.constant dense<0.000000e+00> : vector<16x512xf32>
    %15 = tpu.matmul %14, %7, %cst_14 {dimension_numbers = #tpu.dot_dimension_numbers<[1], [0], [0], [1], [0, 0, 1, 1], [], []>} : vector<16x128xbf16>, vector<128x512xbf16>, vector<16x512xf32> -> vector<16x512xf32>
    %16 = arith.addf %13, %15 : vector<16x512xf32>
    %17 = vector.extract_strided_slice %16 {offsets = [0, 0], sizes = [16, 128], strides = [1, 1]} : vector<16x512xf32> to vector<16x128xf32>
    %18 = arith.negf %17 : vector<16x128xf32>
    %19 = math.exp %18 : vector<16x128xf32>
    %cst_15 = arith.constant 1.000000e+00 : f32
    %20 = vector.broadcast %cst_15 : f32 to vector<16x128xf32>
    %21 = arith.addf %20, %19 : vector<16x128xf32>
    %22 = arith.divf %20, %21 : vector<16x128xf32>
    %23 = vector.extract_strided_slice %16 {offsets = [0, 128], sizes = [16, 128], strides = [1, 1]} : vector<16x512xf32> to vector<16x128xf32>
    %24 = arith.negf %23 : vector<16x128xf32>
    %25 = math.exp %24 : vector<16x128xf32>
    %cst_16 = arith.constant 1.000000e+00 : f32
    %26 = vector.broadcast %cst_16 : f32 to vector<16x128xf32>
    %27 = arith.addf %26, %25 : vector<16x128xf32>
    %28 = arith.divf %26, %27 : vector<16x128xf32>
    %29 = vector.extract_strided_slice %16 {offsets = [0, 256], sizes = [16, 128], strides = [1, 1]} : vector<16x512xf32> to vector<16x128xf32>
    %30 = math.tanh %29 : vector<16x128xf32>
    %31 = vector.extract_strided_slice %16 {offsets = [0, 384], sizes = [16, 128], strides = [1, 1]} : vector<16x512xf32> to vector<16x128xf32>
    %32 = arith.negf %31 : vector<16x128xf32>
    %33 = math.exp %32 : vector<16x128xf32>
    %cst_17 = arith.constant 1.000000e+00 : f32
    %34 = vector.broadcast %cst_17 : f32 to vector<16x128xf32>
    %35 = arith.addf %34, %33 : vector<16x128xf32>
    %36 = arith.divf %34, %35 : vector<16x128xf32>
    %37 = arith.mulf %28, %9 : vector<16x128xf32>
    %38 = arith.mulf %22, %30 : vector<16x128xf32>
    %39 = arith.addf %37, %38 : vector<16x128xf32>
    %40 = math.tanh %39 : vector<16x128xf32>
    %41 = arith.mulf %36, %40 : vector<16x128xf32>
    %c1_i32 = arith.constant 1 : i32
    %c16_i32_18 = arith.constant 16 : i32
    %42 = arith.muli %c1_i32, %c16_i32_18 : i32
    %43 = tpu.assume_multiple %42, 16 : i32
    %44 = arith.index_cast %43 : i32 to index
    %c0_19 = arith.constant 0 : index
    %45 = vector.load %arg8[%44, %c0_19] : memref<96x512xf32, #tpu.memory_space<vmem>>, vector<16x512xf32>
    %46 = arith.truncf %41 : vector<16x128xf32> to vector<16x128xbf16>
    %cst_20 = arith.constant dense<0.000000e+00> : vector<16x512xf32>
    %47 = tpu.matmul %46, %7, %cst_20 {dimension_numbers = #tpu.dot_dimension_numbers<[1], [0], [0], [1], [0, 0, 1, 1], [], []>} : vector<16x128xbf16>, vector<128x512xbf16>, vector<16x512xf32> -> vector<16x512xf32>
    %48 = arith.addf %45, %47 : vector<16x512xf32>
    %49 = vector.extract_strided_slice %48 {offsets = [0, 0], sizes = [16, 128], strides = [1, 1]} : vector<16x512xf32> to vector<16x128xf32>
    %50 = arith.negf %49 : vector<16x128xf32>
    %51 = math.exp %50 : vector<16x128xf32>
    %cst_21 = arith.constant 1.000000e+00 : f32
    %52 = vector.broadcast %cst_21 : f32 to vector<16x128xf32>
    %53 = arith.addf %52, %51 : vector<16x128xf32>
    %54 = arith.divf %52, %53 : vector<16x128xf32>
    %55 = vector.extract_strided_slice %48 {offsets = [0, 128], sizes = [16, 128], strides = [1, 1]} : vector<16x512xf32> to vector<16x128xf32>
    %56 = arith.negf %55 : vector<16x128xf32>
    %57 = math.exp %56 : vector<16x128xf32>
    %cst_22 = arith.constant 1.000000e+00 : f32
    %58 = vector.broadcast %cst_22 : f32 to vector<16x128xf32>
    %59 = arith.addf %58, %57 : vector<16x128xf32>
    %60 = arith.divf %58, %59 : vector<16x128xf32>
    %61 = vector.extract_strided_slice %48 {offsets = [0, 256], sizes = [16, 128], strides = [1, 1]} : vector<16x512xf32> to vector<16x128xf32>
    %62 = math.tanh %61 : vector<16x128xf32>
    %63 = vector.extract_strided_slice %48 {offsets = [0, 384], sizes = [16, 128], strides = [1, 1]} : vector<16x512xf32> to vector<16x128xf32>
    %64 = arith.negf %63 : vector<16x128xf32>
    %65 = math.exp %64 : vector<16x128xf32>
    %cst_23 = arith.constant 1.000000e+00 : f32
    %66 = vector.broadcast %cst_23 : f32 to vector<16x128xf32>
    %67 = arith.addf %66, %65 : vector<16x128xf32>
    %68 = arith.divf %66, %67 : vector<16x128xf32>
    %69 = arith.mulf %60, %39 : vector<16x128xf32>
    %70 = arith.mulf %54, %62 : vector<16x128xf32>
    %71 = arith.addf %69, %70 : vector<16x128xf32>
    %72 = math.tanh %71 : vector<16x128xf32>
    %73 = arith.mulf %68, %72 : vector<16x128xf32>
    %c2_i32 = arith.constant 2 : i32
    %c16_i32_24 = arith.constant 16 : i32
    %74 = arith.muli %c2_i32, %c16_i32_24 : i32
    %75 = tpu.assume_multiple %74, 16 : i32
    %76 = arith.index_cast %75 : i32 to index
    %c0_25 = arith.constant 0 : index
    %77 = vector.load %arg8[%76, %c0_25] : memref<96x512xf32, #tpu.memory_space<vmem>>, vector<16x512xf32>
    %78 = arith.truncf %73 : vector<16x128xf32> to vector<16x128xbf16>
    %cst_26 = arith.constant dense<0.000000e+00> : vector<16x512xf32>
    %79 = tpu.matmul %78, %7, %cst_26 {dimension_numbers = #tpu.dot_dimension_numbers<[1], [0], [0], [1], [0, 0, 1, 1], [], []>} : vector<16x128xbf16>, vector<128x512xbf16>, vector<16x512xf32> -> vector<16x512xf32>
    %80 = arith.addf %77, %79 : vector<16x512xf32>
    %81 = vector.extract_strided_slice %80 {offsets = [0, 0], sizes = [16, 128], strides = [1, 1]} : vector<16x512xf32> to vector<16x128xf32>
    %82 = arith.negf %81 : vector<16x128xf32>
    %83 = math.exp %82 : vector<16x128xf32>
    %cst_27 = arith.constant 1.000000e+00 : f32
    %84 = vector.broadcast %cst_27 : f32 to vector<16x128xf32>
    %85 = arith.addf %84, %83 : vector<16x128xf32>
    %86 = arith.divf %84, %85 : vector<16x128xf32>
    %87 = vector.extract_strided_slice %80 {offsets = [0, 128], sizes = [16, 128], strides = [1, 1]} : vector<16x512xf32> to vector<16x128xf32>
    %88 = arith.negf %87 : vector<16x128xf32>
    %89 = math.exp %88 : vector<16x128xf32>
    %cst_28 = arith.constant 1.000000e+00 : f32
    %90 = vector.broadcast %cst_28 : f32 to vector<16x128xf32>
    %91 = arith.addf %90, %89 : vector<16x128xf32>
    %92 = arith.divf %90, %91 : vector<16x128xf32>
    %93 = vector.extract_strided_slice %80 {offsets = [0, 256], sizes = [16, 128], strides = [1, 1]} : vector<16x512xf32> to vector<16x128xf32>
    %94 = math.tanh %93 : vector<16x128xf32>
    %95 = vector.extract_strided_slice %80 {offsets = [0, 384], sizes = [16, 128], strides = [1, 1]} : vector<16x512xf32> to vector<16x128xf32>
    %96 = arith.negf %95 : vector<16x128xf32>
    %97 = math.exp %96 : vector<16x128xf32>
    %cst_29 = arith.constant 1.000000e+00 : f32
    %98 = vector.broadcast %cst_29 : f32 to vector<16x128xf32>
    %99 = arith.addf %98, %97 : vector<16x128xf32>
    %100 = arith.divf %98, %99 : vector<16x128xf32>
    %101 = arith.mulf %92, %71 : vector<16x128xf32>
    %102 = arith.mulf %86, %94 : vector<16x128xf32>
    %103 = arith.addf %101, %102 : vector<16x128xf32>
    %104 = math.tanh %103 : vector<16x128xf32>
    %105 = arith.mulf %100, %104 : vector<16x128xf32>
    %c3_i32 = arith.constant 3 : i32
    %c16_i32_30 = arith.constant 16 : i32
    %106 = arith.muli %c3_i32, %c16_i32_30 : i32
    %107 = tpu.assume_multiple %106, 16 : i32
    %108 = arith.index_cast %107 : i32 to index
    %c0_31 = arith.constant 0 : index
    %109 = vector.load %arg8[%108, %c0_31] : memref<96x512xf32, #tpu.memory_space<vmem>>, vector<16x512xf32>
    %110 = arith.truncf %105 : vector<16x128xf32> to vector<16x128xbf16>
    %cst_32 = arith.constant dense<0.000000e+00> : vector<16x512xf32>
    %111 = tpu.matmul %110, %7, %cst_32 {dimension_numbers = #tpu.dot_dimension_numbers<[1], [0], [0], [1], [0, 0, 1, 1], [], []>} : vector<16x128xbf16>, vector<128x512xbf16>, vector<16x512xf32> -> vector<16x512xf32>
    %112 = arith.addf %109, %111 : vector<16x512xf32>
    %113 = vector.extract_strided_slice %112 {offsets = [0, 0], sizes = [16, 128], strides = [1, 1]} : vector<16x512xf32> to vector<16x128xf32>
    %114 = arith.negf %113 : vector<16x128xf32>
    %115 = math.exp %114 : vector<16x128xf32>
    %cst_33 = arith.constant 1.000000e+00 : f32
    %116 = vector.broadcast %cst_33 : f32 to vector<16x128xf32>
    %117 = arith.addf %116, %115 : vector<16x128xf32>
    %118 = arith.divf %116, %117 : vector<16x128xf32>
    %119 = vector.extract_strided_slice %112 {offsets = [0, 128], sizes = [16, 128], strides = [1, 1]} : vector<16x512xf32> to vector<16x128xf32>
    %120 = arith.negf %119 : vector<16x128xf32>
    %121 = math.exp %120 : vector<16x128xf32>
    %cst_34 = arith.constant 1.000000e+00 : f32
    %122 = vector.broadcast %cst_34 : f32 to vector<16x128xf32>
    %123 = arith.addf %122, %121 : vector<16x128xf32>
    %124 = arith.divf %122, %123 : vector<16x128xf32>
    %125 = vector.extract_strided_slice %112 {offsets = [0, 256], sizes = [16, 128], strides = [1, 1]} : vector<16x512xf32> to vector<16x128xf32>
    %126 = math.tanh %125 : vector<16x128xf32>
    %127 = vector.extract_strided_slice %112 {offsets = [0, 384], sizes = [16, 128], strides = [1, 1]} : vector<16x512xf32> to vector<16x128xf32>
    %128 = arith.negf %127 : vector<16x128xf32>
    %129 = math.exp %128 : vector<16x128xf32>
    %cst_35 = arith.constant 1.000000e+00 : f32
    %130 = vector.broadcast %cst_35 : f32 to vector<16x128xf32>
    %131 = arith.addf %130, %129 : vector<16x128xf32>
    %132 = arith.divf %130, %131 : vector<16x128xf32>
    %133 = arith.mulf %124, %103 : vector<16x128xf32>
    %134 = arith.mulf %118, %126 : vector<16x128xf32>
    %135 = arith.addf %133, %134 : vector<16x128xf32>
    %136 = math.tanh %135 : vector<16x128xf32>
    %137 = arith.mulf %132, %136 : vector<16x128xf32>
    %c4_i32 = arith.constant 4 : i32
    %c16_i32_36 = arith.constant 16 : i32
    %138 = arith.muli %c4_i32, %c16_i32_36 : i32
    %139 = tpu.assume_multiple %138, 16 : i32
    %140 = arith.index_cast %139 : i32 to index
    %c0_37 = arith.constant 0 : index
    %141 = vector.load %arg8[%140, %c0_37] : memref<96x512xf32, #tpu.memory_space<vmem>>, vector<16x512xf32>
    %142 = arith.truncf %137 : vector<16x128xf32> to vector<16x128xbf16>
    %cst_38 = arith.constant dense<0.000000e+00> : vector<16x512xf32>
    %143 = tpu.matmul %142, %7, %cst_38 {dimension_numbers = #tpu.dot_dimension_numbers<[1], [0], [0], [1], [0, 0, 1, 1], [], []>} : vector<16x128xbf16>, vector<128x512xbf16>, vector<16x512xf32> -> vector<16x512xf32>
    %144 = arith.addf %141, %143 : vector<16x512xf32>
    %145 = vector.extract_strided_slice %144 {offsets = [0, 0], sizes = [16, 128], strides = [1, 1]} : vector<16x512xf32> to vector<16x128xf32>
    %146 = arith.negf %145 : vector<16x128xf32>
    %147 = math.exp %146 : vector<16x128xf32>
    %cst_39 = arith.constant 1.000000e+00 : f32
    %148 = vector.broadcast %cst_39 : f32 to vector<16x128xf32>
    %149 = arith.addf %148, %147 : vector<16x128xf32>
    %150 = arith.divf %148, %149 : vector<16x128xf32>
    %151 = vector.extract_strided_slice %144 {offsets = [0, 128], sizes = [16, 128], strides = [1, 1]} : vector<16x512xf32> to vector<16x128xf32>
    %152 = arith.negf %151 : vector<16x128xf32>
    %153 = math.exp %152 : vector<16x128xf32>
    %cst_40 = arith.constant 1.000000e+00 : f32
    %154 = vector.broadcast %cst_40 : f32 to vector<16x128xf32>
    %155 = arith.addf %154, %153 : vector<16x128xf32>
    %156 = arith.divf %154, %155 : vector<16x128xf32>
    %157 = vector.extract_strided_slice %144 {offsets = [0, 256], sizes = [16, 128], strides = [1, 1]} : vector<16x512xf32> to vector<16x128xf32>
    %158 = math.tanh %157 : vector<16x128xf32>
    %159 = vector.extract_strided_slice %144 {offsets = [0, 384], sizes = [16, 128], strides = [1, 1]} : vector<16x512xf32> to vector<16x128xf32>
    %160 = arith.negf %159 : vector<16x128xf32>
    %161 = math.exp %160 : vector<16x128xf32>
    %cst_41 = arith.constant 1.000000e+00 : f32
    %162 = vector.broadcast %cst_41 : f32 to vector<16x128xf32>
    %163 = arith.addf %162, %161 : vector<16x128xf32>
    %164 = arith.divf %162, %163 : vector<16x128xf32>
    %165 = arith.mulf %156, %135 : vector<16x128xf32>
    %166 = arith.mulf %150, %158 : vector<16x128xf32>
    %167 = arith.addf %165, %166 : vector<16x128xf32>
    %168 = math.tanh %167 : vector<16x128xf32>
    %169 = arith.mulf %164, %168 : vector<16x128xf32>
    %c5_i32 = arith.constant 5 : i32
    %c16_i32_42 = arith.constant 16 : i32
    %170 = arith.muli %c5_i32, %c16_i32_42 : i32
    %171 = tpu.assume_multiple %170, 16 : i32
    %172 = arith.index_cast %171 : i32 to index
    %c0_43 = arith.constant 0 : index
    %173 = vector.load %arg8[%172, %c0_43] : memref<96x512xf32, #tpu.memory_space<vmem>>, vector<16x512xf32>
    %174 = arith.truncf %169 : vector<16x128xf32> to vector<16x128xbf16>
    %cst_44 = arith.constant dense<0.000000e+00> : vector<16x512xf32>
    %175 = tpu.matmul %174, %7, %cst_44 {dimension_numbers = #tpu.dot_dimension_numbers<[1], [0], [0], [1], [0, 0, 1, 1], [], []>} : vector<16x128xbf16>, vector<128x512xbf16>, vector<16x512xf32> -> vector<16x512xf32>
    %176 = arith.addf %173, %175 : vector<16x512xf32>
    %177 = vector.extract_strided_slice %176 {offsets = [0, 0], sizes = [16, 128], strides = [1, 1]} : vector<16x512xf32> to vector<16x128xf32>
    %178 = arith.negf %177 : vector<16x128xf32>
    %179 = math.exp %178 : vector<16x128xf32>
    %cst_45 = arith.constant 1.000000e+00 : f32
    %180 = vector.broadcast %cst_45 : f32 to vector<16x128xf32>
    %181 = arith.addf %180, %179 : vector<16x128xf32>
    %182 = arith.divf %180, %181 : vector<16x128xf32>
    %183 = vector.extract_strided_slice %176 {offsets = [0, 128], sizes = [16, 128], strides = [1, 1]} : vector<16x512xf32> to vector<16x128xf32>
    %184 = arith.negf %183 : vector<16x128xf32>
    %185 = math.exp %184 : vector<16x128xf32>
    %cst_46 = arith.constant 1.000000e+00 : f32
    %186 = vector.broadcast %cst_46 : f32 to vector<16x128xf32>
    %187 = arith.addf %186, %185 : vector<16x128xf32>
    %188 = arith.divf %186, %187 : vector<16x128xf32>
    %189 = vector.extract_strided_slice %176 {offsets = [0, 256], sizes = [16, 128], strides = [1, 1]} : vector<16x512xf32> to vector<16x128xf32>
    %190 = math.tanh %189 : vector<16x128xf32>
    %191 = vector.extract_strided_slice %176 {offsets = [0, 384], sizes = [16, 128], strides = [1, 1]} : vector<16x512xf32> to vector<16x128xf32>
    %192 = arith.negf %191 : vector<16x128xf32>
    %193 = math.exp %192 : vector<16x128xf32>
    %cst_47 = arith.constant 1.000000e+00 : f32
    %194 = vector.broadcast %cst_47 : f32 to vector<16x128xf32>
    %195 = arith.addf %194, %193 : vector<16x128xf32>
    %196 = arith.divf %194, %195 : vector<16x128xf32>
    %197 = arith.mulf %188, %167 : vector<16x128xf32>
    %198 = arith.mulf %182, %190 : vector<16x128xf32>
    %199 = arith.addf %197, %198 : vector<16x128xf32>
    %200 = math.tanh %199 : vector<16x128xf32>
    %201 = arith.mulf %196, %200 : vector<16x128xf32>
    %c6_i32 = arith.constant 6 : i32
    %c0_48 = arith.constant 0 : index
    %c0_49 = arith.constant 0 : index
    %202 = vector.load %arg6[%c0_48, %c0_49] : memref<16x128xf32, #tpu.memory_space<vmem>>, vector<16x128xf32>
    tpu.vector_store %arg6[%c0_48, %c0_49], %201 {strides = array<i32>} : memref<16x128xf32, #tpu.memory_space<vmem>>, vector<16x128xf32>,
    %c0_50 = arith.constant 0 : index
    %c0_51 = arith.constant 0 : index
    %203 = vector.load %arg7[%c0_50, %c0_51] : memref<16x128xf32, #tpu.memory_space<vmem>>, vector<16x128xf32>
    tpu.vector_store %arg7[%c0_50, %c0_51], %199 {strides = array<i32>} : memref<16x128xf32, #tpu.memory_space<vmem>>, vector<16x128xf32>,
    return
  }
}

module attributes {stable_mosaic.version = 11 : i64} {
  func.func @_proj_reduce_kernel(%arg0: memref<16x128xf32, #tpu.memory_space<vmem>>, %arg1: memref<128x64xbf16, #tpu.memory_space<vmem>>, %arg2: memref<1x64xf32, #tpu.memory_space<vmem>>, %arg3: memref<64x64xbf16, #tpu.memory_space<vmem>>, %arg4: memref<64x64xbf16, #tpu.memory_space<vmem>>, %arg5: memref<1x64xf32, #tpu.memory_space<vmem>>, %arg6: memref<1x64xf32, #tpu.memory_space<vmem>>, %arg7: memref<16x64xf32, #tpu.memory_space<vmem>>) attributes {dimension_semantics = [], scalar_prefetch = 0 : i64, scratch_operands = 1 : i64, tpu.core_type = #tpu.core_type<tc>} {
    %c0 = arith.constant 0 : index
    %c0_0 = arith.constant 0 : index
    %0 = vector.load %arg0[%c0, %c0_0] : memref<16x128xf32, #tpu.memory_space<vmem>>, vector<16x128xf32>
    %1 = arith.truncf %0 : vector<16x128xf32> to vector<16x128xbf16>
    %c0_1 = arith.constant 0 : index
    %c0_2 = arith.constant 0 : index
    %2 = vector.load %arg1[%c0_1, %c0_2] : memref<128x64xbf16, #tpu.memory_space<vmem>>, vector<128x64xbf16>
    %cst = arith.constant dense<0.000000e+00> : vector<16x64xf32>
    %3 = tpu.matmul %1, %2, %cst {dimension_numbers = #tpu.dot_dimension_numbers<[1], [0], [0], [1], [0, 0, 1, 1], [], []>} : vector<16x128xbf16>, vector<128x64xbf16>, vector<16x64xf32> -> vector<16x64xf32>
    %c0_3 = arith.constant 0 : index
    %c0_4 = arith.constant 0 : index
    %4 = vector.load %arg2[%c0_3, %c0_4] : memref<1x64xf32, #tpu.memory_space<vmem>>, vector<1x64xf32>
    %5 = vector.broadcast %4 : vector<1x64xf32> to vector<16x64xf32>
    %6 = arith.addf %3, %5 : vector<16x64xf32>
    %c0_5 = arith.constant 0 : index
    %c0_6 = arith.constant 0 : index
    %7 = vector.load %arg7[%c0_5, %c0_6] : memref<16x64xf32, #tpu.memory_space<vmem>>, vector<16x64xf32>
    tpu.vector_store %arg7[%c0_5, %c0_6], %6 {strides = array<i32>} : memref<16x64xf32, #tpu.memory_space<vmem>>, vector<16x64xf32>,
    %c0_7 = arith.constant 0 : index
    %c0_8 = arith.constant 0 : index
    %8 = vector.load %arg3[%c0_7, %c0_8] : memref<64x64xbf16, #tpu.memory_space<vmem>>, vector<64x64xbf16>
    %c0_9 = arith.constant 0 : index
    %c0_10 = arith.constant 0 : index
    %9 = vector.load %arg4[%c0_9, %c0_10] : memref<64x64xbf16, #tpu.memory_space<vmem>>, vector<64x64xbf16>
    %c0_11 = arith.constant 0 : index
    %c0_12 = arith.constant 0 : index
    %10 = vector.load %arg5[%c0_11, %c0_12] : memref<1x64xf32, #tpu.memory_space<vmem>>, vector<1x64xf32>
    %c0_13 = arith.constant 0 : index
    %c0_14 = arith.constant 0 : index
    %11 = tpu.strided_load %arg7[%c0_13, %c0_14] {strides = array<i32: 2, 1>} : memref<16x64xf32, #tpu.memory_space<vmem>>, vector<2x64xf32>
    %c1 = arith.constant 1 : index
    %c0_15 = arith.constant 0 : index
    %12 = tpu.strided_load %arg7[%c1, %c0_15] {strides = array<i32: 2, 1>} : memref<16x64xf32, #tpu.memory_space<vmem>>, vector<2x64xf32>
    %13 = arith.truncf %11 : vector<2x64xf32> to vector<2x64xbf16>
    %cst_16 = arith.constant dense<0.000000e+00> : vector<2x64xf32>
    %14 = tpu.matmul %13, %8, %cst_16 {dimension_numbers = #tpu.dot_dimension_numbers<[1], [0], [0], [1], [0, 0, 1, 1], [], []>} : vector<2x64xbf16>, vector<64x64xbf16>, vector<2x64xf32> -> vector<2x64xf32>
    %15 = arith.truncf %12 : vector<2x64xf32> to vector<2x64xbf16>
    %cst_17 = arith.constant dense<0.000000e+00> : vector<2x64xf32>
    %16 = tpu.matmul %15, %9, %cst_17 {dimension_numbers = #tpu.dot_dimension_numbers<[1], [0], [0], [1], [0, 0, 1, 1], [], []>} : vector<2x64xbf16>, vector<64x64xbf16>, vector<2x64xf32> -> vector<2x64xf32>
    %17 = arith.addf %14, %16 : vector<2x64xf32>
    %18 = vector.broadcast %10 : vector<1x64xf32> to vector<2x64xf32>
    %19 = arith.addf %17, %18 : vector<2x64xf32>
    %c0_18 = arith.constant 0 : index
    %c0_19 = arith.constant 0 : index
    %20 = vector.load %arg7[%c0_18, %c0_19] : memref<16x64xf32, #tpu.memory_space<vmem>>, vector<2x64xf32>
    tpu.vector_store %arg7[%c0_18, %c0_19], %19 {strides = array<i32>} : memref<16x64xf32, #tpu.memory_space<vmem>>, vector<2x64xf32>,
    %c0_20 = arith.constant 0 : index
    %c0_21 = arith.constant 0 : index
    %21 = tpu.strided_load %arg7[%c0_20, %c0_21] {strides = array<i32: 2, 1>} : memref<16x64xf32, #tpu.memory_space<vmem>>, vector<1x64xf32>
    %c1_22 = arith.constant 1 : index
    %c0_23 = arith.constant 0 : index
    %22 = tpu.strided_load %arg7[%c1_22, %c0_23] {strides = array<i32: 2, 1>} : memref<16x64xf32, #tpu.memory_space<vmem>>, vector<1x64xf32>
    %23 = arith.truncf %21 : vector<1x64xf32> to vector<1x64xbf16>
    %cst_24 = arith.constant dense<0.000000e+00> : vector<1x64xf32>
    %24 = tpu.matmul %23, %8, %cst_24 {dimension_numbers = #tpu.dot_dimension_numbers<[1], [0], [0], [1], [0, 0, 1, 1], [], []>} : vector<1x64xbf16>, vector<64x64xbf16>, vector<1x64xf32> -> vector<1x64xf32>
    %25 = arith.truncf %22 : vector<1x64xf32> to vector<1x64xbf16>
    %cst_25 = arith.constant dense<0.000000e+00> : vector<1x64xf32>
    %26 = tpu.matmul %25, %9, %cst_25 {dimension_numbers = #tpu.dot_dimension_numbers<[1], [0], [0], [1], [0, 0, 1, 1], [], []>} : vector<1x64xbf16>, vector<64x64xbf16>, vector<1x64xf32> -> vector<1x64xf32>
    %27 = arith.addf %24, %26 : vector<1x64xf32>
    %28 = arith.addf %27, %10 : vector<1x64xf32>
    %c0_26 = arith.constant 0 : index
    %c0_27 = arith.constant 0 : index
    %29 = vector.load %arg7[%c0_26, %c0_27] : memref<16x64xf32, #tpu.memory_space<vmem>>, vector<1x64xf32>
    tpu.vector_store %arg7[%c0_26, %c0_27], %28 {strides = array<i32>} : memref<16x64xf32, #tpu.memory_space<vmem>>, vector<1x64xf32>,
    %c0_28 = arith.constant 0 : index
    %c0_29 = arith.constant 0 : index
    %30 = vector.load %arg7[%c0_28, %c0_29] : memref<16x64xf32, #tpu.memory_space<vmem>>, vector<1x64xf32>
    %c0_30 = arith.constant 0 : index
    %c0_31 = arith.constant 0 : index
    %31 = vector.load %arg6[%c0_30, %c0_31] : memref<1x64xf32, #tpu.memory_space<vmem>>, vector<1x64xf32>
    tpu.vector_store %arg6[%c0_30, %c0_31], %30 {strides = array<i32>} : memref<1x64xf32, #tpu.memory_space<vmem>>, vector<1x64xf32>,
    return
  }
}

module attributes {stable_mosaic.version = 11 : i64} {
  func.func @_lstm_state_kernel(%arg0: memref<128x16xbf16, #tpu.memory_space<vmem>>, %arg1: memref<16x128xf32, #tpu.memory_space<vmem>>, %arg2: memref<16x128xf32, #tpu.memory_space<vmem>>, %arg3: memref<16x512xbf16, #tpu.memory_space<vmem>>, %arg4: memref<128x512xbf16, #tpu.memory_space<vmem>>, %arg5: memref<1x512xf32, #tpu.memory_space<vmem>>, %arg6: memref<16x128xf32, #tpu.memory_space<vmem>>, %arg7: memref<16x128xf32, #tpu.memory_space<vmem>>, %arg8: memref<128x512xf32, #tpu.memory_space<vmem>>) attributes {dimension_semantics = [], scalar_prefetch = 0 : i64, scratch_operands = 1 : i64, tpu.core_type = #tpu.core_type<tc>} {
    %c0 = arith.constant 0 : index
    %c0_0 = arith.constant 0 : index
    %0 = vector.load %arg0[%c0, %c0_0] : memref<128x16xbf16, #tpu.memory_space<vmem>>, vector<128x16xbf16>
    %c0_1 = arith.constant 0 : index
    %c0_2 = arith.constant 0 : index
    %1 = vector.load %arg3[%c0_1, %c0_2] : memref<16x512xbf16, #tpu.memory_space<vmem>>, vector<16x512xbf16>
    %cst = arith.constant dense<0.000000e+00> : vector<128x512xf32>
    %2 = tpu.matmul %0, %1, %cst {dimension_numbers = #tpu.dot_dimension_numbers<[1], [0], [0], [1], [0, 0, 1, 1], [], []>} : vector<128x16xbf16>, vector<16x512xbf16>, vector<128x512xf32> -> vector<128x512xf32>
    %c0_3 = arith.constant 0 : index
    %c0_4 = arith.constant 0 : index
    %3 = vector.load %arg5[%c0_3, %c0_4] : memref<1x512xf32, #tpu.memory_space<vmem>>, vector<1x512xf32>
    %4 = vector.broadcast %3 : vector<1x512xf32> to vector<128x512xf32>
    %5 = arith.addf %2, %4 : vector<128x512xf32>
    %c0_5 = arith.constant 0 : index
    %c0_6 = arith.constant 0 : index
    %6 = vector.load %arg8[%c0_5, %c0_6] : memref<128x512xf32, #tpu.memory_space<vmem>>, vector<128x512xf32>
    tpu.vector_store %arg8[%c0_5, %c0_6], %5 {strides = array<i32>} : memref<128x512xf32, #tpu.memory_space<vmem>>, vector<128x512xf32>,
    %c0_7 = arith.constant 0 : index
    %c0_8 = arith.constant 0 : index
    %7 = vector.load %arg4[%c0_7, %c0_8] : memref<128x512xbf16, #tpu.memory_space<vmem>>, vector<128x512xbf16>
    %c0_9 = arith.constant 0 : index
    %c0_10 = arith.constant 0 : index
    %8 = vector.load %arg1[%c0_9, %c0_10] : memref<16x128xf32, #tpu.memory_space<vmem>>, vector<16x128xf32>
    %c0_11 = arith.constant 0 : index
    %c0_12 = arith.constant 0 : index
    %9 = vector.load %arg2[%c0_11, %c0_12] : memref<16x128xf32, #tpu.memory_space<vmem>>, vector<16x128xf32>
    %c0_i32 = arith.constant 0 : i32
    %c16_i32 = arith.constant 16 : i32
    %10 = arith.muli %c0_i32, %c16_i32 : i32
    %11 = tpu.assume_multiple %10, 16 : i32
    %12 = arith.index_cast %11 : i32 to index
    %c0_13 = arith.constant 0 : index
    %13 = vector.load %arg8[%12, %c0_13] : memref<128x512xf32, #tpu.memory_space<vmem>>, vector<16x512xf32>
    %14 = arith.truncf %8 : vector<16x128xf32> to vector<16x128xbf16>
    %cst_14 = arith.constant dense<0.000000e+00> : vector<16x512xf32>
    %15 = tpu.matmul %14, %7, %cst_14 {dimension_numbers = #tpu.dot_dimension_numbers<[1], [0], [0], [1], [0, 0, 1, 1], [], []>} : vector<16x128xbf16>, vector<128x512xbf16>, vector<16x512xf32> -> vector<16x512xf32>
    %16 = arith.addf %13, %15 : vector<16x512xf32>
    %17 = vector.extract_strided_slice %16 {offsets = [0, 0], sizes = [16, 128], strides = [1, 1]} : vector<16x512xf32> to vector<16x128xf32>
    %18 = arith.negf %17 : vector<16x128xf32>
    %19 = math.exp %18 : vector<16x128xf32>
    %cst_15 = arith.constant 1.000000e+00 : f32
    %20 = vector.broadcast %cst_15 : f32 to vector<16x128xf32>
    %21 = arith.addf %20, %19 : vector<16x128xf32>
    %22 = arith.divf %20, %21 : vector<16x128xf32>
    %23 = vector.extract_strided_slice %16 {offsets = [0, 128], sizes = [16, 128], strides = [1, 1]} : vector<16x512xf32> to vector<16x128xf32>
    %24 = arith.negf %23 : vector<16x128xf32>
    %25 = math.exp %24 : vector<16x128xf32>
    %cst_16 = arith.constant 1.000000e+00 : f32
    %26 = vector.broadcast %cst_16 : f32 to vector<16x128xf32>
    %27 = arith.addf %26, %25 : vector<16x128xf32>
    %28 = arith.divf %26, %27 : vector<16x128xf32>
    %29 = vector.extract_strided_slice %16 {offsets = [0, 256], sizes = [16, 128], strides = [1, 1]} : vector<16x512xf32> to vector<16x128xf32>
    %30 = math.tanh %29 : vector<16x128xf32>
    %31 = vector.extract_strided_slice %16 {offsets = [0, 384], sizes = [16, 128], strides = [1, 1]} : vector<16x512xf32> to vector<16x128xf32>
    %32 = arith.negf %31 : vector<16x128xf32>
    %33 = math.exp %32 : vector<16x128xf32>
    %cst_17 = arith.constant 1.000000e+00 : f32
    %34 = vector.broadcast %cst_17 : f32 to vector<16x128xf32>
    %35 = arith.addf %34, %33 : vector<16x128xf32>
    %36 = arith.divf %34, %35 : vector<16x128xf32>
    %37 = arith.mulf %28, %9 : vector<16x128xf32>
    %38 = arith.mulf %22, %30 : vector<16x128xf32>
    %39 = arith.addf %37, %38 : vector<16x128xf32>
    %40 = math.tanh %39 : vector<16x128xf32>
    %41 = arith.mulf %36, %40 : vector<16x128xf32>
    %c1_i32 = arith.constant 1 : i32
    %c16_i32_18 = arith.constant 16 : i32
    %42 = arith.muli %c1_i32, %c16_i32_18 : i32
    %43 = tpu.assume_multiple %42, 16 : i32
    %44 = arith.index_cast %43 : i32 to index
    %c0_19 = arith.constant 0 : index
    %45 = vector.load %arg8[%44, %c0_19] : memref<128x512xf32, #tpu.memory_space<vmem>>, vector<16x512xf32>
    %46 = arith.truncf %41 : vector<16x128xf32> to vector<16x128xbf16>
    %cst_20 = arith.constant dense<0.000000e+00> : vector<16x512xf32>
    %47 = tpu.matmul %46, %7, %cst_20 {dimension_numbers = #tpu.dot_dimension_numbers<[1], [0], [0], [1], [0, 0, 1, 1], [], []>} : vector<16x128xbf16>, vector<128x512xbf16>, vector<16x512xf32> -> vector<16x512xf32>
    %48 = arith.addf %45, %47 : vector<16x512xf32>
    %49 = vector.extract_strided_slice %48 {offsets = [0, 0], sizes = [16, 128], strides = [1, 1]} : vector<16x512xf32> to vector<16x128xf32>
    %50 = arith.negf %49 : vector<16x128xf32>
    %51 = math.exp %50 : vector<16x128xf32>
    %cst_21 = arith.constant 1.000000e+00 : f32
    %52 = vector.broadcast %cst_21 : f32 to vector<16x128xf32>
    %53 = arith.addf %52, %51 : vector<16x128xf32>
    %54 = arith.divf %52, %53 : vector<16x128xf32>
    %55 = vector.extract_strided_slice %48 {offsets = [0, 128], sizes = [16, 128], strides = [1, 1]} : vector<16x512xf32> to vector<16x128xf32>
    %56 = arith.negf %55 : vector<16x128xf32>
    %57 = math.exp %56 : vector<16x128xf32>
    %cst_22 = arith.constant 1.000000e+00 : f32
    %58 = vector.broadcast %cst_22 : f32 to vector<16x128xf32>
    %59 = arith.addf %58, %57 : vector<16x128xf32>
    %60 = arith.divf %58, %59 : vector<16x128xf32>
    %61 = vector.extract_strided_slice %48 {offsets = [0, 256], sizes = [16, 128], strides = [1, 1]} : vector<16x512xf32> to vector<16x128xf32>
    %62 = math.tanh %61 : vector<16x128xf32>
    %63 = vector.extract_strided_slice %48 {offsets = [0, 384], sizes = [16, 128], strides = [1, 1]} : vector<16x512xf32> to vector<16x128xf32>
    %64 = arith.negf %63 : vector<16x128xf32>
    %65 = math.exp %64 : vector<16x128xf32>
    %cst_23 = arith.constant 1.000000e+00 : f32
    %66 = vector.broadcast %cst_23 : f32 to vector<16x128xf32>
    %67 = arith.addf %66, %65 : vector<16x128xf32>
    %68 = arith.divf %66, %67 : vector<16x128xf32>
    %69 = arith.mulf %60, %39 : vector<16x128xf32>
    %70 = arith.mulf %54, %62 : vector<16x128xf32>
    %71 = arith.addf %69, %70 : vector<16x128xf32>
    %72 = math.tanh %71 : vector<16x128xf32>
    %73 = arith.mulf %68, %72 : vector<16x128xf32>
    %c2_i32 = arith.constant 2 : i32
    %c16_i32_24 = arith.constant 16 : i32
    %74 = arith.muli %c2_i32, %c16_i32_24 : i32
    %75 = tpu.assume_multiple %74, 16 : i32
    %76 = arith.index_cast %75 : i32 to index
    %c0_25 = arith.constant 0 : index
    %77 = vector.load %arg8[%76, %c0_25] : memref<128x512xf32, #tpu.memory_space<vmem>>, vector<16x512xf32>
    %78 = arith.truncf %73 : vector<16x128xf32> to vector<16x128xbf16>
    %cst_26 = arith.constant dense<0.000000e+00> : vector<16x512xf32>
    %79 = tpu.matmul %78, %7, %cst_26 {dimension_numbers = #tpu.dot_dimension_numbers<[1], [0], [0], [1], [0, 0, 1, 1], [], []>} : vector<16x128xbf16>, vector<128x512xbf16>, vector<16x512xf32> -> vector<16x512xf32>
    %80 = arith.addf %77, %79 : vector<16x512xf32>
    %81 = vector.extract_strided_slice %80 {offsets = [0, 0], sizes = [16, 128], strides = [1, 1]} : vector<16x512xf32> to vector<16x128xf32>
    %82 = arith.negf %81 : vector<16x128xf32>
    %83 = math.exp %82 : vector<16x128xf32>
    %cst_27 = arith.constant 1.000000e+00 : f32
    %84 = vector.broadcast %cst_27 : f32 to vector<16x128xf32>
    %85 = arith.addf %84, %83 : vector<16x128xf32>
    %86 = arith.divf %84, %85 : vector<16x128xf32>
    %87 = vector.extract_strided_slice %80 {offsets = [0, 128], sizes = [16, 128], strides = [1, 1]} : vector<16x512xf32> to vector<16x128xf32>
    %88 = arith.negf %87 : vector<16x128xf32>
    %89 = math.exp %88 : vector<16x128xf32>
    %cst_28 = arith.constant 1.000000e+00 : f32
    %90 = vector.broadcast %cst_28 : f32 to vector<16x128xf32>
    %91 = arith.addf %90, %89 : vector<16x128xf32>
    %92 = arith.divf %90, %91 : vector<16x128xf32>
    %93 = vector.extract_strided_slice %80 {offsets = [0, 256], sizes = [16, 128], strides = [1, 1]} : vector<16x512xf32> to vector<16x128xf32>
    %94 = math.tanh %93 : vector<16x128xf32>
    %95 = vector.extract_strided_slice %80 {offsets = [0, 384], sizes = [16, 128], strides = [1, 1]} : vector<16x512xf32> to vector<16x128xf32>
    %96 = arith.negf %95 : vector<16x128xf32>
    %97 = math.exp %96 : vector<16x128xf32>
    %cst_29 = arith.constant 1.000000e+00 : f32
    %98 = vector.broadcast %cst_29 : f32 to vector<16x128xf32>
    %99 = arith.addf %98, %97 : vector<16x128xf32>
    %100 = arith.divf %98, %99 : vector<16x128xf32>
    %101 = arith.mulf %92, %71 : vector<16x128xf32>
    %102 = arith.mulf %86, %94 : vector<16x128xf32>
    %103 = arith.addf %101, %102 : vector<16x128xf32>
    %104 = math.tanh %103 : vector<16x128xf32>
    %105 = arith.mulf %100, %104 : vector<16x128xf32>
    %c3_i32 = arith.constant 3 : i32
    %c16_i32_30 = arith.constant 16 : i32
    %106 = arith.muli %c3_i32, %c16_i32_30 : i32
    %107 = tpu.assume_multiple %106, 16 : i32
    %108 = arith.index_cast %107 : i32 to index
    %c0_31 = arith.constant 0 : index
    %109 = vector.load %arg8[%108, %c0_31] : memref<128x512xf32, #tpu.memory_space<vmem>>, vector<16x512xf32>
    %110 = arith.truncf %105 : vector<16x128xf32> to vector<16x128xbf16>
    %cst_32 = arith.constant dense<0.000000e+00> : vector<16x512xf32>
    %111 = tpu.matmul %110, %7, %cst_32 {dimension_numbers = #tpu.dot_dimension_numbers<[1], [0], [0], [1], [0, 0, 1, 1], [], []>} : vector<16x128xbf16>, vector<128x512xbf16>, vector<16x512xf32> -> vector<16x512xf32>
    %112 = arith.addf %109, %111 : vector<16x512xf32>
    %113 = vector.extract_strided_slice %112 {offsets = [0, 0], sizes = [16, 128], strides = [1, 1]} : vector<16x512xf32> to vector<16x128xf32>
    %114 = arith.negf %113 : vector<16x128xf32>
    %115 = math.exp %114 : vector<16x128xf32>
    %cst_33 = arith.constant 1.000000e+00 : f32
    %116 = vector.broadcast %cst_33 : f32 to vector<16x128xf32>
    %117 = arith.addf %116, %115 : vector<16x128xf32>
    %118 = arith.divf %116, %117 : vector<16x128xf32>
    %119 = vector.extract_strided_slice %112 {offsets = [0, 128], sizes = [16, 128], strides = [1, 1]} : vector<16x512xf32> to vector<16x128xf32>
    %120 = arith.negf %119 : vector<16x128xf32>
    %121 = math.exp %120 : vector<16x128xf32>
    %cst_34 = arith.constant 1.000000e+00 : f32
    %122 = vector.broadcast %cst_34 : f32 to vector<16x128xf32>
    %123 = arith.addf %122, %121 : vector<16x128xf32>
    %124 = arith.divf %122, %123 : vector<16x128xf32>
    %125 = vector.extract_strided_slice %112 {offsets = [0, 256], sizes = [16, 128], strides = [1, 1]} : vector<16x512xf32> to vector<16x128xf32>
    %126 = math.tanh %125 : vector<16x128xf32>
    %127 = vector.extract_strided_slice %112 {offsets = [0, 384], sizes = [16, 128], strides = [1, 1]} : vector<16x512xf32> to vector<16x128xf32>
    %128 = arith.negf %127 : vector<16x128xf32>
    %129 = math.exp %128 : vector<16x128xf32>
    %cst_35 = arith.constant 1.000000e+00 : f32
    %130 = vector.broadcast %cst_35 : f32 to vector<16x128xf32>
    %131 = arith.addf %130, %129 : vector<16x128xf32>
    %132 = arith.divf %130, %131 : vector<16x128xf32>
    %133 = arith.mulf %124, %103 : vector<16x128xf32>
    %134 = arith.mulf %118, %126 : vector<16x128xf32>
    %135 = arith.addf %133, %134 : vector<16x128xf32>
    %136 = math.tanh %135 : vector<16x128xf32>
    %137 = arith.mulf %132, %136 : vector<16x128xf32>
    %c4_i32 = arith.constant 4 : i32
    %c16_i32_36 = arith.constant 16 : i32
    %138 = arith.muli %c4_i32, %c16_i32_36 : i32
    %139 = tpu.assume_multiple %138, 16 : i32
    %140 = arith.index_cast %139 : i32 to index
    %c0_37 = arith.constant 0 : index
    %141 = vector.load %arg8[%140, %c0_37] : memref<128x512xf32, #tpu.memory_space<vmem>>, vector<16x512xf32>
    %142 = arith.truncf %137 : vector<16x128xf32> to vector<16x128xbf16>
    %cst_38 = arith.constant dense<0.000000e+00> : vector<16x512xf32>
    %143 = tpu.matmul %142, %7, %cst_38 {dimension_numbers = #tpu.dot_dimension_numbers<[1], [0], [0], [1], [0, 0, 1, 1], [], []>} : vector<16x128xbf16>, vector<128x512xbf16>, vector<16x512xf32> -> vector<16x512xf32>
    %144 = arith.addf %141, %143 : vector<16x512xf32>
    %145 = vector.extract_strided_slice %144 {offsets = [0, 0], sizes = [16, 128], strides = [1, 1]} : vector<16x512xf32> to vector<16x128xf32>
    %146 = arith.negf %145 : vector<16x128xf32>
    %147 = math.exp %146 : vector<16x128xf32>
    %cst_39 = arith.constant 1.000000e+00 : f32
    %148 = vector.broadcast %cst_39 : f32 to vector<16x128xf32>
    %149 = arith.addf %148, %147 : vector<16x128xf32>
    %150 = arith.divf %148, %149 : vector<16x128xf32>
    %151 = vector.extract_strided_slice %144 {offsets = [0, 128], sizes = [16, 128], strides = [1, 1]} : vector<16x512xf32> to vector<16x128xf32>
    %152 = arith.negf %151 : vector<16x128xf32>
    %153 = math.exp %152 : vector<16x128xf32>
    %cst_40 = arith.constant 1.000000e+00 : f32
    %154 = vector.broadcast %cst_40 : f32 to vector<16x128xf32>
    %155 = arith.addf %154, %153 : vector<16x128xf32>
    %156 = arith.divf %154, %155 : vector<16x128xf32>
    %157 = vector.extract_strided_slice %144 {offsets = [0, 256], sizes = [16, 128], strides = [1, 1]} : vector<16x512xf32> to vector<16x128xf32>
    %158 = math.tanh %157 : vector<16x128xf32>
    %159 = vector.extract_strided_slice %144 {offsets = [0, 384], sizes = [16, 128], strides = [1, 1]} : vector<16x512xf32> to vector<16x128xf32>
    %160 = arith.negf %159 : vector<16x128xf32>
    %161 = math.exp %160 : vector<16x128xf32>
    %cst_41 = arith.constant 1.000000e+00 : f32
    %162 = vector.broadcast %cst_41 : f32 to vector<16x128xf32>
    %163 = arith.addf %162, %161 : vector<16x128xf32>
    %164 = arith.divf %162, %163 : vector<16x128xf32>
    %165 = arith.mulf %156, %135 : vector<16x128xf32>
    %166 = arith.mulf %150, %158 : vector<16x128xf32>
    %167 = arith.addf %165, %166 : vector<16x128xf32>
    %168 = math.tanh %167 : vector<16x128xf32>
    %169 = arith.mulf %164, %168 : vector<16x128xf32>
    %c5_i32 = arith.constant 5 : i32
    %c16_i32_42 = arith.constant 16 : i32
    %170 = arith.muli %c5_i32, %c16_i32_42 : i32
    %171 = tpu.assume_multiple %170, 16 : i32
    %172 = arith.index_cast %171 : i32 to index
    %c0_43 = arith.constant 0 : index
    %173 = vector.load %arg8[%172, %c0_43] : memref<128x512xf32, #tpu.memory_space<vmem>>, vector<16x512xf32>
    %174 = arith.truncf %169 : vector<16x128xf32> to vector<16x128xbf16>
    %cst_44 = arith.constant dense<0.000000e+00> : vector<16x512xf32>
    %175 = tpu.matmul %174, %7, %cst_44 {dimension_numbers = #tpu.dot_dimension_numbers<[1], [0], [0], [1], [0, 0, 1, 1], [], []>} : vector<16x128xbf16>, vector<128x512xbf16>, vector<16x512xf32> -> vector<16x512xf32>
    %176 = arith.addf %173, %175 : vector<16x512xf32>
    %177 = vector.extract_strided_slice %176 {offsets = [0, 0], sizes = [16, 128], strides = [1, 1]} : vector<16x512xf32> to vector<16x128xf32>
    %178 = arith.negf %177 : vector<16x128xf32>
    %179 = math.exp %178 : vector<16x128xf32>
    %cst_45 = arith.constant 1.000000e+00 : f32
    %180 = vector.broadcast %cst_45 : f32 to vector<16x128xf32>
    %181 = arith.addf %180, %179 : vector<16x128xf32>
    %182 = arith.divf %180, %181 : vector<16x128xf32>
    %183 = vector.extract_strided_slice %176 {offsets = [0, 128], sizes = [16, 128], strides = [1, 1]} : vector<16x512xf32> to vector<16x128xf32>
    %184 = arith.negf %183 : vector<16x128xf32>
    %185 = math.exp %184 : vector<16x128xf32>
    %cst_46 = arith.constant 1.000000e+00 : f32
    %186 = vector.broadcast %cst_46 : f32 to vector<16x128xf32>
    %187 = arith.addf %186, %185 : vector<16x128xf32>
    %188 = arith.divf %186, %187 : vector<16x128xf32>
    %189 = vector.extract_strided_slice %176 {offsets = [0, 256], sizes = [16, 128], strides = [1, 1]} : vector<16x512xf32> to vector<16x128xf32>
    %190 = math.tanh %189 : vector<16x128xf32>
    %191 = vector.extract_strided_slice %176 {offsets = [0, 384], sizes = [16, 128], strides = [1, 1]} : vector<16x512xf32> to vector<16x128xf32>
    %192 = arith.negf %191 : vector<16x128xf32>
    %193 = math.exp %192 : vector<16x128xf32>
    %cst_47 = arith.constant 1.000000e+00 : f32
    %194 = vector.broadcast %cst_47 : f32 to vector<16x128xf32>
    %195 = arith.addf %194, %193 : vector<16x128xf32>
    %196 = arith.divf %194, %195 : vector<16x128xf32>
    %197 = arith.mulf %188, %167 : vector<16x128xf32>
    %198 = arith.mulf %182, %190 : vector<16x128xf32>
    %199 = arith.addf %197, %198 : vector<16x128xf32>
    %200 = math.tanh %199 : vector<16x128xf32>
    %201 = arith.mulf %196, %200 : vector<16x128xf32>
    %c6_i32 = arith.constant 6 : i32
    %c16_i32_48 = arith.constant 16 : i32
    %202 = arith.muli %c6_i32, %c16_i32_48 : i32
    %203 = tpu.assume_multiple %202, 16 : i32
    %204 = arith.index_cast %203 : i32 to index
    %c0_49 = arith.constant 0 : index
    %205 = vector.load %arg8[%204, %c0_49] : memref<128x512xf32, #tpu.memory_space<vmem>>, vector<16x512xf32>
    %206 = arith.truncf %201 : vector<16x128xf32> to vector<16x128xbf16>
    %cst_50 = arith.constant dense<0.000000e+00> : vector<16x512xf32>
    %207 = tpu.matmul %206, %7, %cst_50 {dimension_numbers = #tpu.dot_dimension_numbers<[1], [0], [0], [1], [0, 0, 1, 1], [], []>} : vector<16x128xbf16>, vector<128x512xbf16>, vector<16x512xf32> -> vector<16x512xf32>
    %208 = arith.addf %205, %207 : vector<16x512xf32>
    %209 = vector.extract_strided_slice %208 {offsets = [0, 0], sizes = [16, 128], strides = [1, 1]} : vector<16x512xf32> to vector<16x128xf32>
    %210 = arith.negf %209 : vector<16x128xf32>
    %211 = math.exp %210 : vector<16x128xf32>
    %cst_51 = arith.constant 1.000000e+00 : f32
    %212 = vector.broadcast %cst_51 : f32 to vector<16x128xf32>
    %213 = arith.addf %212, %211 : vector<16x128xf32>
    %214 = arith.divf %212, %213 : vector<16x128xf32>
    %215 = vector.extract_strided_slice %208 {offsets = [0, 128], sizes = [16, 128], strides = [1, 1]} : vector<16x512xf32> to vector<16x128xf32>
    %216 = arith.negf %215 : vector<16x128xf32>
    %217 = math.exp %216 : vector<16x128xf32>
    %cst_52 = arith.constant 1.000000e+00 : f32
    %218 = vector.broadcast %cst_52 : f32 to vector<16x128xf32>
    %219 = arith.addf %218, %217 : vector<16x128xf32>
    %220 = arith.divf %218, %219 : vector<16x128xf32>
    %221 = vector.extract_strided_slice %208 {offsets = [0, 256], sizes = [16, 128], strides = [1, 1]} : vector<16x512xf32> to vector<16x128xf32>
    %222 = math.tanh %221 : vector<16x128xf32>
    %223 = vector.extract_strided_slice %208 {offsets = [0, 384], sizes = [16, 128], strides = [1, 1]} : vector<16x512xf32> to vector<16x128xf32>
    %224 = arith.negf %223 : vector<16x128xf32>
    %225 = math.exp %224 : vector<16x128xf32>
    %cst_53 = arith.constant 1.000000e+00 : f32
    %226 = vector.broadcast %cst_53 : f32 to vector<16x128xf32>
    %227 = arith.addf %226, %225 : vector<16x128xf32>
    %228 = arith.divf %226, %227 : vector<16x128xf32>
    %229 = arith.mulf %220, %199 : vector<16x128xf32>
    %230 = arith.mulf %214, %222 : vector<16x128xf32>
    %231 = arith.addf %229, %230 : vector<16x128xf32>
    %232 = math.tanh %231 : vector<16x128xf32>
    %233 = arith.mulf %228, %232 : vector<16x128xf32>
    %c7_i32 = arith.constant 7 : i32
    %c16_i32_54 = arith.constant 16 : i32
    %234 = arith.muli %c7_i32, %c16_i32_54 : i32
    %235 = tpu.assume_multiple %234, 16 : i32
    %236 = arith.index_cast %235 : i32 to index
    %c0_55 = arith.constant 0 : index
    %237 = vector.load %arg8[%236, %c0_55] : memref<128x512xf32, #tpu.memory_space<vmem>>, vector<16x512xf32>
    %238 = arith.truncf %233 : vector<16x128xf32> to vector<16x128xbf16>
    %cst_56 = arith.constant dense<0.000000e+00> : vector<16x512xf32>
    %239 = tpu.matmul %238, %7, %cst_56 {dimension_numbers = #tpu.dot_dimension_numbers<[1], [0], [0], [1], [0, 0, 1, 1], [], []>} : vector<16x128xbf16>, vector<128x512xbf16>, vector<16x512xf32> -> vector<16x512xf32>
    %240 = arith.addf %237, %239 : vector<16x512xf32>
    %241 = vector.extract_strided_slice %240 {offsets = [0, 0], sizes = [16, 128], strides = [1, 1]} : vector<16x512xf32> to vector<16x128xf32>
    %242 = arith.negf %241 : vector<16x128xf32>
    %243 = math.exp %242 : vector<16x128xf32>
    %cst_57 = arith.constant 1.000000e+00 : f32
    %244 = vector.broadcast %cst_57 : f32 to vector<16x128xf32>
    %245 = arith.addf %244, %243 : vector<16x128xf32>
    %246 = arith.divf %244, %245 : vector<16x128xf32>
    %247 = vector.extract_strided_slice %240 {offsets = [0, 128], sizes = [16, 128], strides = [1, 1]} : vector<16x512xf32> to vector<16x128xf32>
    %248 = arith.negf %247 : vector<16x128xf32>
    %249 = math.exp %248 : vector<16x128xf32>
    %cst_58 = arith.constant 1.000000e+00 : f32
    %250 = vector.broadcast %cst_58 : f32 to vector<16x128xf32>
    %251 = arith.addf %250, %249 : vector<16x128xf32>
    %252 = arith.divf %250, %251 : vector<16x128xf32>
    %253 = vector.extract_strided_slice %240 {offsets = [0, 256], sizes = [16, 128], strides = [1, 1]} : vector<16x512xf32> to vector<16x128xf32>
    %254 = math.tanh %253 : vector<16x128xf32>
    %255 = vector.extract_strided_slice %240 {offsets = [0, 384], sizes = [16, 128], strides = [1, 1]} : vector<16x512xf32> to vector<16x128xf32>
    %256 = arith.negf %255 : vector<16x128xf32>
    %257 = math.exp %256 : vector<16x128xf32>
    %cst_59 = arith.constant 1.000000e+00 : f32
    %258 = vector.broadcast %cst_59 : f32 to vector<16x128xf32>
    %259 = arith.addf %258, %257 : vector<16x128xf32>
    %260 = arith.divf %258, %259 : vector<16x128xf32>
    %261 = arith.mulf %252, %231 : vector<16x128xf32>
    %262 = arith.mulf %246, %254 : vector<16x128xf32>
    %263 = arith.addf %261, %262 : vector<16x128xf32>
    %264 = math.tanh %263 : vector<16x128xf32>
    %265 = arith.mulf %260, %264 : vector<16x128xf32>
    %c8_i32 = arith.constant 8 : i32
    %c0_60 = arith.constant 0 : index
    %c0_61 = arith.constant 0 : index
    %266 = vector.load %arg6[%c0_60, %c0_61] : memref<16x128xf32, #tpu.memory_space<vmem>>, vector<16x128xf32>
    tpu.vector_store %arg6[%c0_60, %c0_61], %265 {strides = array<i32>} : memref<16x128xf32, #tpu.memory_space<vmem>>, vector<16x128xf32>,
    %c0_62 = arith.constant 0 : index
    %c0_63 = arith.constant 0 : index
    %267 = vector.load %arg7[%c0_62, %c0_63] : memref<16x128xf32, #tpu.memory_space<vmem>>, vector<16x128xf32>
    tpu.vector_store %arg7[%c0_62, %c0_63], %263 {strides = array<i32>} : memref<16x128xf32, #tpu.memory_space<vmem>>, vector<16x128xf32>,
    return
  }
}

module attributes {stable_mosaic.version = 11 : i64} {
  func.func @_decoder_loss_kernel(%arg0: memref<96x16xbf16, #tpu.memory_space<vmem>>, %arg1: memref<16x128xf32, #tpu.memory_space<vmem>>, %arg2: memref<16x128xf32, #tpu.memory_space<vmem>>, %arg3: memref<16x512xbf16, #tpu.memory_space<vmem>>, %arg4: memref<128x512xbf16, #tpu.memory_space<vmem>>, %arg5: memref<1x512xf32, #tpu.memory_space<vmem>>, %arg6: memref<128x128xbf16, #tpu.memory_space<vmem>>, %arg7: memref<1x128xf32, #tpu.memory_space<vmem>>, %arg8: memref<6x16x1xi32, #tpu.memory_space<vmem>>, %arg9: memref<1x1xf32, #tpu.memory_space<vmem>>, %arg10: memref<96x512xf32, #tpu.memory_space<vmem>>) attributes {dimension_semantics = [], scalar_prefetch = 0 : i64, scratch_operands = 1 : i64, tpu.core_type = #tpu.core_type<tc>} {
    %c0 = arith.constant 0 : index
    %c0_0 = arith.constant 0 : index
    %0 = vector.load %arg0[%c0, %c0_0] : memref<96x16xbf16, #tpu.memory_space<vmem>>, vector<96x16xbf16>
    %c0_1 = arith.constant 0 : index
    %c0_2 = arith.constant 0 : index
    %1 = vector.load %arg3[%c0_1, %c0_2] : memref<16x512xbf16, #tpu.memory_space<vmem>>, vector<16x512xbf16>
    %cst = arith.constant dense<0.000000e+00> : vector<96x512xf32>
    %2 = tpu.matmul %0, %1, %cst {dimension_numbers = #tpu.dot_dimension_numbers<[1], [0], [0], [1], [0, 0, 1, 1], [], []>} : vector<96x16xbf16>, vector<16x512xbf16>, vector<96x512xf32> -> vector<96x512xf32>
    %c0_3 = arith.constant 0 : index
    %c0_4 = arith.constant 0 : index
    %3 = vector.load %arg5[%c0_3, %c0_4] : memref<1x512xf32, #tpu.memory_space<vmem>>, vector<1x512xf32>
    %4 = vector.broadcast %3 : vector<1x512xf32> to vector<96x512xf32>
    %5 = arith.addf %2, %4 : vector<96x512xf32>
    %c0_5 = arith.constant 0 : index
    %c0_6 = arith.constant 0 : index
    %6 = vector.load %arg10[%c0_5, %c0_6] : memref<96x512xf32, #tpu.memory_space<vmem>>, vector<96x512xf32>
    tpu.vector_store %arg10[%c0_5, %c0_6], %5 {strides = array<i32>} : memref<96x512xf32, #tpu.memory_space<vmem>>, vector<96x512xf32>,
    %c0_7 = arith.constant 0 : index
    %c0_8 = arith.constant 0 : index
    %7 = vector.load %arg4[%c0_7, %c0_8] : memref<128x512xbf16, #tpu.memory_space<vmem>>, vector<128x512xbf16>
    %c0_9 = arith.constant 0 : index
    %c0_10 = arith.constant 0 : index
    %8 = vector.load %arg6[%c0_9, %c0_10] : memref<128x128xbf16, #tpu.memory_space<vmem>>, vector<128x128xbf16>
    %c0_11 = arith.constant 0 : index
    %c0_12 = arith.constant 0 : index
    %9 = vector.load %arg7[%c0_11, %c0_12] : memref<1x128xf32, #tpu.memory_space<vmem>>, vector<1x128xf32>
    %10 = tpu.iota {dimensions = array<i32: 0>} : vector<16x1xi32>
    %c4_i32 = arith.constant 4 : i32
    %11 = vector.broadcast %c4_i32 : i32 to vector<16x1xi32>
    %12 = arith.cmpi slt, %10, %11 : vector<16x1xi32>
    %13 = arith.extui %12 : vector<16x1xi1> to vector<16x1xi32>
    %14 = arith.sitofp %13 : vector<16x1xi32> to vector<16x1xf32>
    %15 = tpu.iota {dimensions = array<i32: 1>} : vector<16x128xi32>
    %c0_13 = arith.constant 0 : index
    %c0_14 = arith.constant 0 : index
    %16 = vector.load %arg1[%c0_13, %c0_14] : memref<16x128xf32, #tpu.memory_space<vmem>>, vector<16x128xf32>
    %c0_15 = arith.constant 0 : index
    %c0_16 = arith.constant 0 : index
    %17 = vector.load %arg2[%c0_15, %c0_16] : memref<16x128xf32, #tpu.memory_space<vmem>>, vector<16x128xf32>
    %cst_17 = arith.constant 0.000000e+00 : f32
    %18 = vector.broadcast %cst_17 : f32 to vector<1x1xf32>
    %c0_i32 = arith.constant 0 : i32
    %c16_i32 = arith.constant 16 : i32
    %19 = arith.muli %c0_i32, %c16_i32 : i32
    %20 = tpu.assume_multiple %19, 16 : i32
    %21 = arith.index_cast %20 : i32 to index
    %c0_18 = arith.constant 0 : index
    %22 = vector.load %arg10[%21, %c0_18] : memref<96x512xf32, #tpu.memory_space<vmem>>, vector<16x512xf32>
    %23 = arith.truncf %16 : vector<16x128xf32> to vector<16x128xbf16>
    %cst_19 = arith.constant dense<0.000000e+00> : vector<16x512xf32>
    %24 = tpu.matmul %23, %7, %cst_19 {dimension_numbers = #tpu.dot_dimension_numbers<[1], [0], [0], [1], [0, 0, 1, 1], [], []>} : vector<16x128xbf16>, vector<128x512xbf16>, vector<16x512xf32> -> vector<16x512xf32>
    %25 = arith.addf %22, %24 : vector<16x512xf32>
    %26 = vector.extract_strided_slice %25 {offsets = [0, 0], sizes = [16, 128], strides = [1, 1]} : vector<16x512xf32> to vector<16x128xf32>
    %27 = arith.negf %26 : vector<16x128xf32>
    %28 = math.exp %27 : vector<16x128xf32>
    %cst_20 = arith.constant 1.000000e+00 : f32
    %29 = vector.broadcast %cst_20 : f32 to vector<16x128xf32>
    %30 = arith.addf %29, %28 : vector<16x128xf32>
    %31 = arith.divf %29, %30 : vector<16x128xf32>
    %32 = vector.extract_strided_slice %25 {offsets = [0, 128], sizes = [16, 128], strides = [1, 1]} : vector<16x512xf32> to vector<16x128xf32>
    %33 = arith.negf %32 : vector<16x128xf32>
    %34 = math.exp %33 : vector<16x128xf32>
    %cst_21 = arith.constant 1.000000e+00 : f32
    %35 = vector.broadcast %cst_21 : f32 to vector<16x128xf32>
    %36 = arith.addf %35, %34 : vector<16x128xf32>
    %37 = arith.divf %35, %36 : vector<16x128xf32>
    %38 = vector.extract_strided_slice %25 {offsets = [0, 256], sizes = [16, 128], strides = [1, 1]} : vector<16x512xf32> to vector<16x128xf32>
    %39 = math.tanh %38 : vector<16x128xf32>
    %40 = vector.extract_strided_slice %25 {offsets = [0, 384], sizes = [16, 128], strides = [1, 1]} : vector<16x512xf32> to vector<16x128xf32>
    %41 = arith.negf %40 : vector<16x128xf32>
    %42 = math.exp %41 : vector<16x128xf32>
    %cst_22 = arith.constant 1.000000e+00 : f32
    %43 = vector.broadcast %cst_22 : f32 to vector<16x128xf32>
    %44 = arith.addf %43, %42 : vector<16x128xf32>
    %45 = arith.divf %43, %44 : vector<16x128xf32>
    %46 = arith.mulf %37, %17 : vector<16x128xf32>
    %47 = arith.mulf %31, %39 : vector<16x128xf32>
    %48 = arith.addf %46, %47 : vector<16x128xf32>
    %49 = math.tanh %48 : vector<16x128xf32>
    %50 = arith.mulf %45, %49 : vector<16x128xf32>
    %51 = arith.truncf %50 : vector<16x128xf32> to vector<16x128xbf16>
    %cst_23 = arith.constant dense<0.000000e+00> : vector<16x128xf32>
    %52 = tpu.matmul %51, %8, %cst_23 {dimension_numbers = #tpu.dot_dimension_numbers<[1], [0], [0], [1], [0, 0, 1, 1], [], []>} : vector<16x128xbf16>, vector<128x128xbf16>, vector<16x128xf32> -> vector<16x128xf32>
    %53 = vector.broadcast %9 : vector<1x128xf32> to vector<16x128xf32>
    %54 = arith.addf %52, %53 : vector<16x128xf32>
    %cst_24 = arith.constant dense<0xFF800000> : vector<16xf32>
    %55 = vector.multi_reduction <maximumf>, %54, %cst_24 [1] : vector<16x128xf32> to vector<16xf32>
    %56 = vector.shape_cast %55 : vector<16xf32> to vector<16x1xf32>
    %57 = vector.broadcast %56 : vector<16x1xf32> to vector<16x128xf32>
    %58 = arith.subf %54, %57 : vector<16x128xf32>
    %59 = math.exp %58 : vector<16x128xf32>
    %cst_25 = arith.constant dense<0.000000e+00> : vector<16xf32>
    %60 = vector.multi_reduction <add>, %59, %cst_25 [1] : vector<16x128xf32> to vector<16xf32>
    %61 = vector.shape_cast %60 : vector<16xf32> to vector<16x1xf32>
    %62 = math.log %61 : vector<16x1xf32>
    %63 = arith.addf %56, %62 : vector<16x1xf32>
    %64 = arith.index_cast %c0_i32 : i32 to index
    %c0_26 = arith.constant 0 : index
    %c0_27 = arith.constant 0 : index
    %65 = vector.load %arg8[%64, %c0_26, %c0_27] : memref<6x16x1xi32, #tpu.memory_space<vmem>>, vector<1x16x1xi32>
    %66 = vector.shape_cast %65 : vector<1x16x1xi32> to vector<16x1xi32>
    %67 = vector.broadcast %66 : vector<16x1xi32> to vector<16x128xi32>
    %68 = arith.cmpi eq, %15, %67 : vector<16x128xi32>
    %69 = arith.extui %68 : vector<16x128xi1> to vector<16x128xi32>
    %70 = arith.sitofp %69 : vector<16x128xi32> to vector<16x128xf32>
    %71 = arith.mulf %54, %70 : vector<16x128xf32>
    %cst_28 = arith.constant dense<0.000000e+00> : vector<16xf32>
    %72 = vector.multi_reduction <add>, %71, %cst_28 [1] : vector<16x128xf32> to vector<16xf32>
    %73 = vector.shape_cast %72 : vector<16xf32> to vector<16x1xf32>
    %74 = arith.subf %63, %73 : vector<16x1xf32>
    %75 = arith.mulf %74, %14 : vector<16x1xf32>
    %cst_29 = arith.constant dense<0.000000e+00> : vector<1xf32>
    %76 = vector.multi_reduction <add>, %75, %cst_29 [0] : vector<16x1xf32> to vector<1xf32>
    %77 = vector.shape_cast %76 : vector<1xf32> to vector<1x1xf32>
    %78 = arith.addf %18, %77 : vector<1x1xf32>
    %c1_i32 = arith.constant 1 : i32
    %c16_i32_30 = arith.constant 16 : i32
    %79 = arith.muli %c1_i32, %c16_i32_30 : i32
    %80 = tpu.assume_multiple %79, 16 : i32
    %81 = arith.index_cast %80 : i32 to index
    %c0_31 = arith.constant 0 : index
    %82 = vector.load %arg10[%81, %c0_31] : memref<96x512xf32, #tpu.memory_space<vmem>>, vector<16x512xf32>
    %83 = arith.truncf %50 : vector<16x128xf32> to vector<16x128xbf16>
    %cst_32 = arith.constant dense<0.000000e+00> : vector<16x512xf32>
    %84 = tpu.matmul %83, %7, %cst_32 {dimension_numbers = #tpu.dot_dimension_numbers<[1], [0], [0], [1], [0, 0, 1, 1], [], []>} : vector<16x128xbf16>, vector<128x512xbf16>, vector<16x512xf32> -> vector<16x512xf32>
    %85 = arith.addf %82, %84 : vector<16x512xf32>
    %86 = vector.extract_strided_slice %85 {offsets = [0, 0], sizes = [16, 128], strides = [1, 1]} : vector<16x512xf32> to vector<16x128xf32>
    %87 = arith.negf %86 : vector<16x128xf32>
    %88 = math.exp %87 : vector<16x128xf32>
    %cst_33 = arith.constant 1.000000e+00 : f32
    %89 = vector.broadcast %cst_33 : f32 to vector<16x128xf32>
    %90 = arith.addf %89, %88 : vector<16x128xf32>
    %91 = arith.divf %89, %90 : vector<16x128xf32>
    %92 = vector.extract_strided_slice %85 {offsets = [0, 128], sizes = [16, 128], strides = [1, 1]} : vector<16x512xf32> to vector<16x128xf32>
    %93 = arith.negf %92 : vector<16x128xf32>
    %94 = math.exp %93 : vector<16x128xf32>
    %cst_34 = arith.constant 1.000000e+00 : f32
    %95 = vector.broadcast %cst_34 : f32 to vector<16x128xf32>
    %96 = arith.addf %95, %94 : vector<16x128xf32>
    %97 = arith.divf %95, %96 : vector<16x128xf32>
    %98 = vector.extract_strided_slice %85 {offsets = [0, 256], sizes = [16, 128], strides = [1, 1]} : vector<16x512xf32> to vector<16x128xf32>
    %99 = math.tanh %98 : vector<16x128xf32>
    %100 = vector.extract_strided_slice %85 {offsets = [0, 384], sizes = [16, 128], strides = [1, 1]} : vector<16x512xf32> to vector<16x128xf32>
    %101 = arith.negf %100 : vector<16x128xf32>
    %102 = math.exp %101 : vector<16x128xf32>
    %cst_35 = arith.constant 1.000000e+00 : f32
    %103 = vector.broadcast %cst_35 : f32 to vector<16x128xf32>
    %104 = arith.addf %103, %102 : vector<16x128xf32>
    %105 = arith.divf %103, %104 : vector<16x128xf32>
    %106 = arith.mulf %97, %48 : vector<16x128xf32>
    %107 = arith.mulf %91, %99 : vector<16x128xf32>
    %108 = arith.addf %106, %107 : vector<16x128xf32>
    %109 = math.tanh %108 : vector<16x128xf32>
    %110 = arith.mulf %105, %109 : vector<16x128xf32>
    %111 = arith.truncf %110 : vector<16x128xf32> to vector<16x128xbf16>
    %cst_36 = arith.constant dense<0.000000e+00> : vector<16x128xf32>
    %112 = tpu.matmul %111, %8, %cst_36 {dimension_numbers = #tpu.dot_dimension_numbers<[1], [0], [0], [1], [0, 0, 1, 1], [], []>} : vector<16x128xbf16>, vector<128x128xbf16>, vector<16x128xf32> -> vector<16x128xf32>
    %113 = vector.broadcast %9 : vector<1x128xf32> to vector<16x128xf32>
    %114 = arith.addf %112, %113 : vector<16x128xf32>
    %cst_37 = arith.constant dense<0xFF800000> : vector<16xf32>
    %115 = vector.multi_reduction <maximumf>, %114, %cst_37 [1] : vector<16x128xf32> to vector<16xf32>
    %116 = vector.shape_cast %115 : vector<16xf32> to vector<16x1xf32>
    %117 = vector.broadcast %116 : vector<16x1xf32> to vector<16x128xf32>
    %118 = arith.subf %114, %117 : vector<16x128xf32>
    %119 = math.exp %118 : vector<16x128xf32>
    %cst_38 = arith.constant dense<0.000000e+00> : vector<16xf32>
    %120 = vector.multi_reduction <add>, %119, %cst_38 [1] : vector<16x128xf32> to vector<16xf32>
    %121 = vector.shape_cast %120 : vector<16xf32> to vector<16x1xf32>
    %122 = math.log %121 : vector<16x1xf32>
    %123 = arith.addf %116, %122 : vector<16x1xf32>
    %124 = arith.index_cast %c1_i32 : i32 to index
    %c0_39 = arith.constant 0 : index
    %c0_40 = arith.constant 0 : index
    %125 = vector.load %arg8[%124, %c0_39, %c0_40] : memref<6x16x1xi32, #tpu.memory_space<vmem>>, vector<1x16x1xi32>
    %126 = vector.shape_cast %125 : vector<1x16x1xi32> to vector<16x1xi32>
    %127 = vector.broadcast %126 : vector<16x1xi32> to vector<16x128xi32>
    %128 = arith.cmpi eq, %15, %127 : vector<16x128xi32>
    %129 = arith.extui %128 : vector<16x128xi1> to vector<16x128xi32>
    %130 = arith.sitofp %129 : vector<16x128xi32> to vector<16x128xf32>
    %131 = arith.mulf %114, %130 : vector<16x128xf32>
    %cst_41 = arith.constant dense<0.000000e+00> : vector<16xf32>
    %132 = vector.multi_reduction <add>, %131, %cst_41 [1] : vector<16x128xf32> to vector<16xf32>
    %133 = vector.shape_cast %132 : vector<16xf32> to vector<16x1xf32>
    %134 = arith.subf %123, %133 : vector<16x1xf32>
    %135 = arith.mulf %134, %14 : vector<16x1xf32>
    %cst_42 = arith.constant dense<0.000000e+00> : vector<1xf32>
    %136 = vector.multi_reduction <add>, %135, %cst_42 [0] : vector<16x1xf32> to vector<1xf32>
    %137 = vector.shape_cast %136 : vector<1xf32> to vector<1x1xf32>
    %138 = arith.addf %78, %137 : vector<1x1xf32>
    %c2_i32 = arith.constant 2 : i32
    %c16_i32_43 = arith.constant 16 : i32
    %139 = arith.muli %c2_i32, %c16_i32_43 : i32
    %140 = tpu.assume_multiple %139, 16 : i32
    %141 = arith.index_cast %140 : i32 to index
    %c0_44 = arith.constant 0 : index
    %142 = vector.load %arg10[%141, %c0_44] : memref<96x512xf32, #tpu.memory_space<vmem>>, vector<16x512xf32>
    %143 = arith.truncf %110 : vector<16x128xf32> to vector<16x128xbf16>
    %cst_45 = arith.constant dense<0.000000e+00> : vector<16x512xf32>
    %144 = tpu.matmul %143, %7, %cst_45 {dimension_numbers = #tpu.dot_dimension_numbers<[1], [0], [0], [1], [0, 0, 1, 1], [], []>} : vector<16x128xbf16>, vector<128x512xbf16>, vector<16x512xf32> -> vector<16x512xf32>
    %145 = arith.addf %142, %144 : vector<16x512xf32>
    %146 = vector.extract_strided_slice %145 {offsets = [0, 0], sizes = [16, 128], strides = [1, 1]} : vector<16x512xf32> to vector<16x128xf32>
    %147 = arith.negf %146 : vector<16x128xf32>
    %148 = math.exp %147 : vector<16x128xf32>
    %cst_46 = arith.constant 1.000000e+00 : f32
    %149 = vector.broadcast %cst_46 : f32 to vector<16x128xf32>
    %150 = arith.addf %149, %148 : vector<16x128xf32>
    %151 = arith.divf %149, %150 : vector<16x128xf32>
    %152 = vector.extract_strided_slice %145 {offsets = [0, 128], sizes = [16, 128], strides = [1, 1]} : vector<16x512xf32> to vector<16x128xf32>
    %153 = arith.negf %152 : vector<16x128xf32>
    %154 = math.exp %153 : vector<16x128xf32>
    %cst_47 = arith.constant 1.000000e+00 : f32
    %155 = vector.broadcast %cst_47 : f32 to vector<16x128xf32>
    %156 = arith.addf %155, %154 : vector<16x128xf32>
    %157 = arith.divf %155, %156 : vector<16x128xf32>
    %158 = vector.extract_strided_slice %145 {offsets = [0, 256], sizes = [16, 128], strides = [1, 1]} : vector<16x512xf32> to vector<16x128xf32>
    %159 = math.tanh %158 : vector<16x128xf32>
    %160 = vector.extract_strided_slice %145 {offsets = [0, 384], sizes = [16, 128], strides = [1, 1]} : vector<16x512xf32> to vector<16x128xf32>
    %161 = arith.negf %160 : vector<16x128xf32>
    %162 = math.exp %161 : vector<16x128xf32>
    %cst_48 = arith.constant 1.000000e+00 : f32
    %163 = vector.broadcast %cst_48 : f32 to vector<16x128xf32>
    %164 = arith.addf %163, %162 : vector<16x128xf32>
    %165 = arith.divf %163, %164 : vector<16x128xf32>
    %166 = arith.mulf %157, %108 : vector<16x128xf32>
    %167 = arith.mulf %151, %159 : vector<16x128xf32>
    %168 = arith.addf %166, %167 : vector<16x128xf32>
    %169 = math.tanh %168 : vector<16x128xf32>
    %170 = arith.mulf %165, %169 : vector<16x128xf32>
    %171 = arith.truncf %170 : vector<16x128xf32> to vector<16x128xbf16>
    %cst_49 = arith.constant dense<0.000000e+00> : vector<16x128xf32>
    %172 = tpu.matmul %171, %8, %cst_49 {dimension_numbers = #tpu.dot_dimension_numbers<[1], [0], [0], [1], [0, 0, 1, 1], [], []>} : vector<16x128xbf16>, vector<128x128xbf16>, vector<16x128xf32> -> vector<16x128xf32>
    %173 = vector.broadcast %9 : vector<1x128xf32> to vector<16x128xf32>
    %174 = arith.addf %172, %173 : vector<16x128xf32>
    %cst_50 = arith.constant dense<0xFF800000> : vector<16xf32>
    %175 = vector.multi_reduction <maximumf>, %174, %cst_50 [1] : vector<16x128xf32> to vector<16xf32>
    %176 = vector.shape_cast %175 : vector<16xf32> to vector<16x1xf32>
    %177 = vector.broadcast %176 : vector<16x1xf32> to vector<16x128xf32>
    %178 = arith.subf %174, %177 : vector<16x128xf32>
    %179 = math.exp %178 : vector<16x128xf32>
    %cst_51 = arith.constant dense<0.000000e+00> : vector<16xf32>
    %180 = vector.multi_reduction <add>, %179, %cst_51 [1] : vector<16x128xf32> to vector<16xf32>
    %181 = vector.shape_cast %180 : vector<16xf32> to vector<16x1xf32>
    %182 = math.log %181 : vector<16x1xf32>
    %183 = arith.addf %176, %182 : vector<16x1xf32>
    %184 = arith.index_cast %c2_i32 : i32 to index
    %c0_52 = arith.constant 0 : index
    %c0_53 = arith.constant 0 : index
    %185 = vector.load %arg8[%184, %c0_52, %c0_53] : memref<6x16x1xi32, #tpu.memory_space<vmem>>, vector<1x16x1xi32>
    %186 = vector.shape_cast %185 : vector<1x16x1xi32> to vector<16x1xi32>
    %187 = vector.broadcast %186 : vector<16x1xi32> to vector<16x128xi32>
    %188 = arith.cmpi eq, %15, %187 : vector<16x128xi32>
    %189 = arith.extui %188 : vector<16x128xi1> to vector<16x128xi32>
    %190 = arith.sitofp %189 : vector<16x128xi32> to vector<16x128xf32>
    %191 = arith.mulf %174, %190 : vector<16x128xf32>
    %cst_54 = arith.constant dense<0.000000e+00> : vector<16xf32>
    %192 = vector.multi_reduction <add>, %191, %cst_54 [1] : vector<16x128xf32> to vector<16xf32>
    %193 = vector.shape_cast %192 : vector<16xf32> to vector<16x1xf32>
    %194 = arith.subf %183, %193 : vector<16x1xf32>
    %195 = arith.mulf %194, %14 : vector<16x1xf32>
    %cst_55 = arith.constant dense<0.000000e+00> : vector<1xf32>
    %196 = vector.multi_reduction <add>, %195, %cst_55 [0] : vector<16x1xf32> to vector<1xf32>
    %197 = vector.shape_cast %196 : vector<1xf32> to vector<1x1xf32>
    %198 = arith.addf %138, %197 : vector<1x1xf32>
    %c3_i32 = arith.constant 3 : i32
    %c16_i32_56 = arith.constant 16 : i32
    %199 = arith.muli %c3_i32, %c16_i32_56 : i32
    %200 = tpu.assume_multiple %199, 16 : i32
    %201 = arith.index_cast %200 : i32 to index
    %c0_57 = arith.constant 0 : index
    %202 = vector.load %arg10[%201, %c0_57] : memref<96x512xf32, #tpu.memory_space<vmem>>, vector<16x512xf32>
    %203 = arith.truncf %170 : vector<16x128xf32> to vector<16x128xbf16>
    %cst_58 = arith.constant dense<0.000000e+00> : vector<16x512xf32>
    %204 = tpu.matmul %203, %7, %cst_58 {dimension_numbers = #tpu.dot_dimension_numbers<[1], [0], [0], [1], [0, 0, 1, 1], [], []>} : vector<16x128xbf16>, vector<128x512xbf16>, vector<16x512xf32> -> vector<16x512xf32>
    %205 = arith.addf %202, %204 : vector<16x512xf32>
    %206 = vector.extract_strided_slice %205 {offsets = [0, 0], sizes = [16, 128], strides = [1, 1]} : vector<16x512xf32> to vector<16x128xf32>
    %207 = arith.negf %206 : vector<16x128xf32>
    %208 = math.exp %207 : vector<16x128xf32>
    %cst_59 = arith.constant 1.000000e+00 : f32
    %209 = vector.broadcast %cst_59 : f32 to vector<16x128xf32>
    %210 = arith.addf %209, %208 : vector<16x128xf32>
    %211 = arith.divf %209, %210 : vector<16x128xf32>
    %212 = vector.extract_strided_slice %205 {offsets = [0, 128], sizes = [16, 128], strides = [1, 1]} : vector<16x512xf32> to vector<16x128xf32>
    %213 = arith.negf %212 : vector<16x128xf32>
    %214 = math.exp %213 : vector<16x128xf32>
    %cst_60 = arith.constant 1.000000e+00 : f32
    %215 = vector.broadcast %cst_60 : f32 to vector<16x128xf32>
    %216 = arith.addf %215, %214 : vector<16x128xf32>
    %217 = arith.divf %215, %216 : vector<16x128xf32>
    %218 = vector.extract_strided_slice %205 {offsets = [0, 256], sizes = [16, 128], strides = [1, 1]} : vector<16x512xf32> to vector<16x128xf32>
    %219 = math.tanh %218 : vector<16x128xf32>
    %220 = vector.extract_strided_slice %205 {offsets = [0, 384], sizes = [16, 128], strides = [1, 1]} : vector<16x512xf32> to vector<16x128xf32>
    %221 = arith.negf %220 : vector<16x128xf32>
    %222 = math.exp %221 : vector<16x128xf32>
    %cst_61 = arith.constant 1.000000e+00 : f32
    %223 = vector.broadcast %cst_61 : f32 to vector<16x128xf32>
    %224 = arith.addf %223, %222 : vector<16x128xf32>
    %225 = arith.divf %223, %224 : vector<16x128xf32>
    %226 = arith.mulf %217, %168 : vector<16x128xf32>
    %227 = arith.mulf %211, %219 : vector<16x128xf32>
    %228 = arith.addf %226, %227 : vector<16x128xf32>
    %229 = math.tanh %228 : vector<16x128xf32>
    %230 = arith.mulf %225, %229 : vector<16x128xf32>
    %231 = arith.truncf %230 : vector<16x128xf32> to vector<16x128xbf16>
    %cst_62 = arith.constant dense<0.000000e+00> : vector<16x128xf32>
    %232 = tpu.matmul %231, %8, %cst_62 {dimension_numbers = #tpu.dot_dimension_numbers<[1], [0], [0], [1], [0, 0, 1, 1], [], []>} : vector<16x128xbf16>, vector<128x128xbf16>, vector<16x128xf32> -> vector<16x128xf32>
    %233 = vector.broadcast %9 : vector<1x128xf32> to vector<16x128xf32>
    %234 = arith.addf %232, %233 : vector<16x128xf32>
    %cst_63 = arith.constant dense<0xFF800000> : vector<16xf32>
    %235 = vector.multi_reduction <maximumf>, %234, %cst_63 [1] : vector<16x128xf32> to vector<16xf32>
    %236 = vector.shape_cast %235 : vector<16xf32> to vector<16x1xf32>
    %237 = vector.broadcast %236 : vector<16x1xf32> to vector<16x128xf32>
    %238 = arith.subf %234, %237 : vector<16x128xf32>
    %239 = math.exp %238 : vector<16x128xf32>
    %cst_64 = arith.constant dense<0.000000e+00> : vector<16xf32>
    %240 = vector.multi_reduction <add>, %239, %cst_64 [1] : vector<16x128xf32> to vector<16xf32>
    %241 = vector.shape_cast %240 : vector<16xf32> to vector<16x1xf32>
    %242 = math.log %241 : vector<16x1xf32>
    %243 = arith.addf %236, %242 : vector<16x1xf32>
    %244 = arith.index_cast %c3_i32 : i32 to index
    %c0_65 = arith.constant 0 : index
    %c0_66 = arith.constant 0 : index
    %245 = vector.load %arg8[%244, %c0_65, %c0_66] : memref<6x16x1xi32, #tpu.memory_space<vmem>>, vector<1x16x1xi32>
    %246 = vector.shape_cast %245 : vector<1x16x1xi32> to vector<16x1xi32>
    %247 = vector.broadcast %246 : vector<16x1xi32> to vector<16x128xi32>
    %248 = arith.cmpi eq, %15, %247 : vector<16x128xi32>
    %249 = arith.extui %248 : vector<16x128xi1> to vector<16x128xi32>
    %250 = arith.sitofp %249 : vector<16x128xi32> to vector<16x128xf32>
    %251 = arith.mulf %234, %250 : vector<16x128xf32>
    %cst_67 = arith.constant dense<0.000000e+00> : vector<16xf32>
    %252 = vector.multi_reduction <add>, %251, %cst_67 [1] : vector<16x128xf32> to vector<16xf32>
    %253 = vector.shape_cast %252 : vector<16xf32> to vector<16x1xf32>
    %254 = arith.subf %243, %253 : vector<16x1xf32>
    %255 = arith.mulf %254, %14 : vector<16x1xf32>
    %cst_68 = arith.constant dense<0.000000e+00> : vector<1xf32>
    %256 = vector.multi_reduction <add>, %255, %cst_68 [0] : vector<16x1xf32> to vector<1xf32>
    %257 = vector.shape_cast %256 : vector<1xf32> to vector<1x1xf32>
    %258 = arith.addf %198, %257 : vector<1x1xf32>
    %c4_i32_69 = arith.constant 4 : i32
    %c16_i32_70 = arith.constant 16 : i32
    %259 = arith.muli %c4_i32_69, %c16_i32_70 : i32
    %260 = tpu.assume_multiple %259, 16 : i32
    %261 = arith.index_cast %260 : i32 to index
    %c0_71 = arith.constant 0 : index
    %262 = vector.load %arg10[%261, %c0_71] : memref<96x512xf32, #tpu.memory_space<vmem>>, vector<16x512xf32>
    %263 = arith.truncf %230 : vector<16x128xf32> to vector<16x128xbf16>
    %cst_72 = arith.constant dense<0.000000e+00> : vector<16x512xf32>
    %264 = tpu.matmul %263, %7, %cst_72 {dimension_numbers = #tpu.dot_dimension_numbers<[1], [0], [0], [1], [0, 0, 1, 1], [], []>} : vector<16x128xbf16>, vector<128x512xbf16>, vector<16x512xf32> -> vector<16x512xf32>
    %265 = arith.addf %262, %264 : vector<16x512xf32>
    %266 = vector.extract_strided_slice %265 {offsets = [0, 0], sizes = [16, 128], strides = [1, 1]} : vector<16x512xf32> to vector<16x128xf32>
    %267 = arith.negf %266 : vector<16x128xf32>
    %268 = math.exp %267 : vector<16x128xf32>
    %cst_73 = arith.constant 1.000000e+00 : f32
    %269 = vector.broadcast %cst_73 : f32 to vector<16x128xf32>
    %270 = arith.addf %269, %268 : vector<16x128xf32>
    %271 = arith.divf %269, %270 : vector<16x128xf32>
    %272 = vector.extract_strided_slice %265 {offsets = [0, 128], sizes = [16, 128], strides = [1, 1]} : vector<16x512xf32> to vector<16x128xf32>
    %273 = arith.negf %272 : vector<16x128xf32>
    %274 = math.exp %273 : vector<16x128xf32>
    %cst_74 = arith.constant 1.000000e+00 : f32
    %275 = vector.broadcast %cst_74 : f32 to vector<16x128xf32>
    %276 = arith.addf %275, %274 : vector<16x128xf32>
    %277 = arith.divf %275, %276 : vector<16x128xf32>
    %278 = vector.extract_strided_slice %265 {offsets = [0, 256], sizes = [16, 128], strides = [1, 1]} : vector<16x512xf32> to vector<16x128xf32>
    %279 = math.tanh %278 : vector<16x128xf32>
    %280 = vector.extract_strided_slice %265 {offsets = [0, 384], sizes = [16, 128], strides = [1, 1]} : vector<16x512xf32> to vector<16x128xf32>
    %281 = arith.negf %280 : vector<16x128xf32>
    %282 = math.exp %281 : vector<16x128xf32>
    %cst_75 = arith.constant 1.000000e+00 : f32
    %283 = vector.broadcast %cst_75 : f32 to vector<16x128xf32>
    %284 = arith.addf %283, %282 : vector<16x128xf32>
    %285 = arith.divf %283, %284 : vector<16x128xf32>
    %286 = arith.mulf %277, %228 : vector<16x128xf32>
    %287 = arith.mulf %271, %279 : vector<16x128xf32>
    %288 = arith.addf %286, %287 : vector<16x128xf32>
    %289 = math.tanh %288 : vector<16x128xf32>
    %290 = arith.mulf %285, %289 : vector<16x128xf32>
    %291 = arith.truncf %290 : vector<16x128xf32> to vector<16x128xbf16>
    %cst_76 = arith.constant dense<0.000000e+00> : vector<16x128xf32>
    %292 = tpu.matmul %291, %8, %cst_76 {dimension_numbers = #tpu.dot_dimension_numbers<[1], [0], [0], [1], [0, 0, 1, 1], [], []>} : vector<16x128xbf16>, vector<128x128xbf16>, vector<16x128xf32> -> vector<16x128xf32>
    %293 = vector.broadcast %9 : vector<1x128xf32> to vector<16x128xf32>
    %294 = arith.addf %292, %293 : vector<16x128xf32>
    %cst_77 = arith.constant dense<0xFF800000> : vector<16xf32>
    %295 = vector.multi_reduction <maximumf>, %294, %cst_77 [1] : vector<16x128xf32> to vector<16xf32>
    %296 = vector.shape_cast %295 : vector<16xf32> to vector<16x1xf32>
    %297 = vector.broadcast %296 : vector<16x1xf32> to vector<16x128xf32>
    %298 = arith.subf %294, %297 : vector<16x128xf32>
    %299 = math.exp %298 : vector<16x128xf32>
    %cst_78 = arith.constant dense<0.000000e+00> : vector<16xf32>
    %300 = vector.multi_reduction <add>, %299, %cst_78 [1] : vector<16x128xf32> to vector<16xf32>
    %301 = vector.shape_cast %300 : vector<16xf32> to vector<16x1xf32>
    %302 = math.log %301 : vector<16x1xf32>
    %303 = arith.addf %296, %302 : vector<16x1xf32>
    %304 = arith.index_cast %c4_i32_69 : i32 to index
    %c0_79 = arith.constant 0 : index
    %c0_80 = arith.constant 0 : index
    %305 = vector.load %arg8[%304, %c0_79, %c0_80] : memref<6x16x1xi32, #tpu.memory_space<vmem>>, vector<1x16x1xi32>
    %306 = vector.shape_cast %305 : vector<1x16x1xi32> to vector<16x1xi32>
    %307 = vector.broadcast %306 : vector<16x1xi32> to vector<16x128xi32>
    %308 = arith.cmpi eq, %15, %307 : vector<16x128xi32>
    %309 = arith.extui %308 : vector<16x128xi1> to vector<16x128xi32>
    %310 = arith.sitofp %309 : vector<16x128xi32> to vector<16x128xf32>
    %311 = arith.mulf %294, %310 : vector<16x128xf32>
    %cst_81 = arith.constant dense<0.000000e+00> : vector<16xf32>
    %312 = vector.multi_reduction <add>, %311, %cst_81 [1] : vector<16x128xf32> to vector<16xf32>
    %313 = vector.shape_cast %312 : vector<16xf32> to vector<16x1xf32>
    %314 = arith.subf %303, %313 : vector<16x1xf32>
    %315 = arith.mulf %314, %14 : vector<16x1xf32>
    %cst_82 = arith.constant dense<0.000000e+00> : vector<1xf32>
    %316 = vector.multi_reduction <add>, %315, %cst_82 [0] : vector<16x1xf32> to vector<1xf32>
    %317 = vector.shape_cast %316 : vector<1xf32> to vector<1x1xf32>
    %318 = arith.addf %258, %317 : vector<1x1xf32>
    %c5_i32 = arith.constant 5 : i32
    %c16_i32_83 = arith.constant 16 : i32
    %319 = arith.muli %c5_i32, %c16_i32_83 : i32
    %320 = tpu.assume_multiple %319, 16 : i32
    %321 = arith.index_cast %320 : i32 to index
    %c0_84 = arith.constant 0 : index
    %322 = vector.load %arg10[%321, %c0_84] : memref<96x512xf32, #tpu.memory_space<vmem>>, vector<16x512xf32>
    %323 = arith.truncf %290 : vector<16x128xf32> to vector<16x128xbf16>
    %cst_85 = arith.constant dense<0.000000e+00> : vector<16x512xf32>
    %324 = tpu.matmul %323, %7, %cst_85 {dimension_numbers = #tpu.dot_dimension_numbers<[1], [0], [0], [1], [0, 0, 1, 1], [], []>} : vector<16x128xbf16>, vector<128x512xbf16>, vector<16x512xf32> -> vector<16x512xf32>
    %325 = arith.addf %322, %324 : vector<16x512xf32>
    %326 = vector.extract_strided_slice %325 {offsets = [0, 0], sizes = [16, 128], strides = [1, 1]} : vector<16x512xf32> to vector<16x128xf32>
    %327 = arith.negf %326 : vector<16x128xf32>
    %328 = math.exp %327 : vector<16x128xf32>
    %cst_86 = arith.constant 1.000000e+00 : f32
    %329 = vector.broadcast %cst_86 : f32 to vector<16x128xf32>
    %330 = arith.addf %329, %328 : vector<16x128xf32>
    %331 = arith.divf %329, %330 : vector<16x128xf32>
    %332 = vector.extract_strided_slice %325 {offsets = [0, 128], sizes = [16, 128], strides = [1, 1]} : vector<16x512xf32> to vector<16x128xf32>
    %333 = arith.negf %332 : vector<16x128xf32>
    %334 = math.exp %333 : vector<16x128xf32>
    %cst_87 = arith.constant 1.000000e+00 : f32
    %335 = vector.broadcast %cst_87 : f32 to vector<16x128xf32>
    %336 = arith.addf %335, %334 : vector<16x128xf32>
    %337 = arith.divf %335, %336 : vector<16x128xf32>
    %338 = vector.extract_strided_slice %325 {offsets = [0, 256], sizes = [16, 128], strides = [1, 1]} : vector<16x512xf32> to vector<16x128xf32>
    %339 = math.tanh %338 : vector<16x128xf32>
    %340 = vector.extract_strided_slice %325 {offsets = [0, 384], sizes = [16, 128], strides = [1, 1]} : vector<16x512xf32> to vector<16x128xf32>
    %341 = arith.negf %340 : vector<16x128xf32>
    %342 = math.exp %341 : vector<16x128xf32>
    %cst_88 = arith.constant 1.000000e+00 : f32
    %343 = vector.broadcast %cst_88 : f32 to vector<16x128xf32>
    %344 = arith.addf %343, %342 : vector<16x128xf32>
    %345 = arith.divf %343, %344 : vector<16x128xf32>
    %346 = arith.mulf %337, %288 : vector<16x128xf32>
    %347 = arith.mulf %331, %339 : vector<16x128xf32>
    %348 = arith.addf %346, %347 : vector<16x128xf32>
    %349 = math.tanh %348 : vector<16x128xf32>
    %350 = arith.mulf %345, %349 : vector<16x128xf32>
    %351 = arith.truncf %350 : vector<16x128xf32> to vector<16x128xbf16>
    %cst_89 = arith.constant dense<0.000000e+00> : vector<16x128xf32>
    %352 = tpu.matmul %351, %8, %cst_89 {dimension_numbers = #tpu.dot_dimension_numbers<[1], [0], [0], [1], [0, 0, 1, 1], [], []>} : vector<16x128xbf16>, vector<128x128xbf16>, vector<16x128xf32> -> vector<16x128xf32>
    %353 = vector.broadcast %9 : vector<1x128xf32> to vector<16x128xf32>
    %354 = arith.addf %352, %353 : vector<16x128xf32>
    %cst_90 = arith.constant dense<0xFF800000> : vector<16xf32>
    %355 = vector.multi_reduction <maximumf>, %354, %cst_90 [1] : vector<16x128xf32> to vector<16xf32>
    %356 = vector.shape_cast %355 : vector<16xf32> to vector<16x1xf32>
    %357 = vector.broadcast %356 : vector<16x1xf32> to vector<16x128xf32>
    %358 = arith.subf %354, %357 : vector<16x128xf32>
    %359 = math.exp %358 : vector<16x128xf32>
    %cst_91 = arith.constant dense<0.000000e+00> : vector<16xf32>
    %360 = vector.multi_reduction <add>, %359, %cst_91 [1] : vector<16x128xf32> to vector<16xf32>
    %361 = vector.shape_cast %360 : vector<16xf32> to vector<16x1xf32>
    %362 = math.log %361 : vector<16x1xf32>
    %363 = arith.addf %356, %362 : vector<16x1xf32>
    %364 = arith.index_cast %c5_i32 : i32 to index
    %c0_92 = arith.constant 0 : index
    %c0_93 = arith.constant 0 : index
    %365 = vector.load %arg8[%364, %c0_92, %c0_93] : memref<6x16x1xi32, #tpu.memory_space<vmem>>, vector<1x16x1xi32>
    %366 = vector.shape_cast %365 : vector<1x16x1xi32> to vector<16x1xi32>
    %367 = vector.broadcast %366 : vector<16x1xi32> to vector<16x128xi32>
    %368 = arith.cmpi eq, %15, %367 : vector<16x128xi32>
    %369 = arith.extui %368 : vector<16x128xi1> to vector<16x128xi32>
    %370 = arith.sitofp %369 : vector<16x128xi32> to vector<16x128xf32>
    %371 = arith.mulf %354, %370 : vector<16x128xf32>
    %cst_94 = arith.constant dense<0.000000e+00> : vector<16xf32>
    %372 = vector.multi_reduction <add>, %371, %cst_94 [1] : vector<16x128xf32> to vector<16xf32>
    %373 = vector.shape_cast %372 : vector<16xf32> to vector<16x1xf32>
    %374 = arith.subf %363, %373 : vector<16x1xf32>
    %375 = arith.mulf %374, %14 : vector<16x1xf32>
    %cst_95 = arith.constant dense<0.000000e+00> : vector<1xf32>
    %376 = vector.multi_reduction <add>, %375, %cst_95 [0] : vector<16x1xf32> to vector<1xf32>
    %377 = vector.shape_cast %376 : vector<1xf32> to vector<1x1xf32>
    %378 = arith.addf %318, %377 : vector<1x1xf32>
    %c6_i32 = arith.constant 6 : i32
    %cst_96 = arith.constant 0.0416666679 : f32
    %379 = vector.broadcast %cst_96 : f32 to vector<1x1xf32>
    %380 = arith.mulf %378, %379 : vector<1x1xf32>
    %c0_97 = arith.constant 0 : index
    %c0_98 = arith.constant 0 : index
    %381 = vector.load %arg9[%c0_97, %c0_98] : memref<1x1xf32, #tpu.memory_space<vmem>>, vector<1x1xf32>
    tpu.vector_store %arg9[%c0_97, %c0_98], %380 {strides = array<i32>} : memref<1x1xf32, #tpu.memory_space<vmem>>, vector<1x1xf32>,
    return
  }
}

</mosaic_0001>

<bundles_post_ra>
// kernel: inductor_forward.7
= control target key start
LH: loop header
LB: loop body
LE: loop exit
PB: predicated region body
PF: predicated region fallthrough
CT: control target
= control target key end

     0   :  { %9 = vsyncpa [#allocation3], 0  ;;  %s1492_s0 = inlined_call_operand.vmem [shape: f32[1,64], index: 0, kind: input, shape index: {}]   ;;  %s1493_s1 = inlined_call_operand.hbm [shape: s8[64,14336], index: 1, kind: input, shape index: {}]   ;;  %s1494_s2 = inlined_call_operand.vmem [shape: f32[1,14336], index: 2, kind: input, shape index: {}]   ;;  %s1495_s3 = inlined_call_operand.vmem [shape: f32[1,14336], index: 3, kind: input, shape index: {}]   ;;  %s1496_s4 = inlined_call_operand.vmem [shape: f32[1,14336], index: 4, kind: output, shape index: {}]  }
   0x1   :  { %11 = vsyncpa [#allocation3 + $0x1], 0  ;;  %s1246_s15 = smov 0   ;;  %s1248_s16 = smov 0  }
   0x2   :  { %s1250_s17 = smov 0   ;;  %s1252_s18 = smov 0  }
   0x3 LB: > { %s1084_s19 = sadd.s32 4294967295, %s1213_s18   ;;  %s1266_s20 = sadd.s32 1, %s1213_s18   ;;  %s1213_s18 = sphi %s1252_s18, %s1504_s18   ;;  %s1209_s17 = sphi %s1250_s17, %s1503_s17   ;;  %s1205_s16 = sphi %s1248_s16, %s1502_s16   ;;  %s1201_s15 = sphi %s1246_s15, %s1501_s15  }
   0x4   : > { %s42_s21 = ssub.s32 %s1213_s18, %s1266_s20  ;;  %s45_s22 = sadd.s32 1, %s1209_s17 }
   0x5   : > { %p43_p0 = scmp.eq.s32.totalorder %s42_s21, 0  ;;  %p52_p1 = scmp.ne.s32.totalorder %s1209_s17, %s1205_s16 }
   0x6   : > { %p53_p2 = scmp.eq.s32.totalorder %s1213_s18, 0  ;;  %p58_p3 = scmp.ne.s32.totalorder %s1205_s16, %s1201_s15 }
   0x7   : > { %s1276_s23 = scalar_select %p43_p0, %s1209_s17, %s45_s22  }
   0x8   : > { %p54_p4 = por %p53_p2, %p52_p1  ;;  %p59_p5 = scmp.eq.s32.totalorder %s1084_s19, 0 }
   0x9   : > { %p1113_p6 = scmp.lt.s32.totalorder %s1213_s18, 7  ;;  %s163_s25 = sand.u32 1, %s1209_s17  }
   0xa   : > { %p1281_p7 = por %p59_p5, %p58_p3  ;;  %s1088_s26 = sshll.u32 %s163_s25, 8 }
   0xb   : > { %s1106_s27 = sshll.u32 %s1213_s18, 11  ;;  %s167_s5 = scalar_lea.vmem [#allocation2], %s1088_s26 }
   0xc   : > { %s1498_s24 = scalar_select %p1281_p7, 1, 0 }
   0xd   : > { %s1290_s30 = scalar_lea.hbm %s1493_s1, %s1106_s27  ;;  %s174_s6 = sshll.u32 %s167_s5, 4  ;;  %s1292_s6 = int_to_ptr.vmem [resolvable:$true] %s174_s6 }
   0xe   : > { %p1294_p8 = pnand %p1113_p6, %p54_p4  ;;  %s1298_s8 = scalar_lea.sflag [#allocation3], %s163_s25 }
   0xf   : > { %s1151_s9 = scalar_lea.hbm %s1290_s30, 4096  ;;  %s1156_s12 = scalar_lea.hbm %s1493_s1, 28672 }
  0x10   : > { %p1152_p9 = scmp.ne.s32.totalorder %s1290_s30, %s1151_s9  ;;  %p1153_p10 = pneg %p1294_p8 }
  0x11   : > { %p1157_p13 = scmp.lt.s32.totalorder %s1290_s30, %s1493_s1  ;;  %p1158_p0 = scmp.lt.s32.totalorder %s1156_s12, %s1151_s9 }
  0x12   : > { %p1154_p11 = pnand %p1153_p10, %p1152_p9 }
  0x13   : > { %p1159_p1 = por %p1158_p0, %p1157_p13 }
  0x14   : > { %p1155_p12 = pneg %p1154_p11 }
  0x16   : > { %p1160_p2 = pnand %p1159_p1, %p1155_p12 }
  0x18   : > { %1163 = shalt.err (!%p1160_p2)
}
  0x19   : > { %s1164_s15 = scalar_lea.vmem %s1292_s6, 4096  ;;  %s1215_s21 = smov [#allocation2]  }
  0x1a   : > { %p1165_p3 = scmp.ne.s32.totalorder %s1292_s6, %s1164_s15  ;;  %s1169_s22 = sshll.u32 %s1215_s21, 4  ;;  %s1170_s22 = int_to_ptr.vmem [resolvable:$false] %s1169_s22 }
  0x1b   : > { %s1171_s25 = scalar_lea.vmem %s1170_s22, 8192  ;;  %p1172_p6 = scmp.lt.s32.totalorder %s1292_s6, %s1170_s22 }
  0x1c   : > { %p1167_p4 = pnand %p1165_p3, %p1153_p10  ;;  %p1173_p9 = scmp.lt.s32.totalorder %s1171_s25, %s1164_s15 }
  0x1e   : > { %p1168_p5 = pneg %p1167_p4  ;;  %p1174_p11 = por %p1173_p9, %p1172_p6 }
  0x20   : > { %p1175_p7 = pnand %p1174_p11, %p1168_p5 }
  0x22   : > { %1178 = shalt.err (!%p1175_p7)
}
  0x23   : > { %s1216_s26 = smov 14336   ;;  %s1217_s27 = smov 2048  }
  0x24   : > { %s1218_s28 = smov 128   ;;  %p1091_p10 = scmp.ge.s32.totalorder %s1213_s18, 1 }
  0x25   : > { %1112 = dma.hbm_to_vmem [thread:$0]  (!%p1294_p8), %s1290_s30, 4096, %s1292_s6, %s1298_s8, %s1216_s26, %s1217_s27, %s1218_s28  }
  0x26   : > { %p198_p12 = scmp.lt.s32.totalorder %s1213_s18, 8 }
  0x28   : > { %p199_p13 = pnand %p1091_p10, %p198_p12 }
  0x29   : > { %s204_s29 = sand.u32 (!%p199_p13), 1, %s1205_s16   ;;  %p1500_p7 = scmp.ne.s32.totalorder (!%p199_p13), %s1498_s24, 0 }
  0x2a   : > { %202 = sbr.rel (%p199_p13) target bundleno = 325 (0x145), region = 36  ;;  %s1092_s5 = sshll.u32 (!%p199_p13), %s204_s29, 8 }
  0x2b   : > { %s205_s9 = scalar_lea.sflag (!%p199_p13), [#allocation3], %s204_s29  ;;  %s1322_s10 = scalar_lea.vmem (!%p199_p13), [#allocation2], %s1092_s5 }
  0x2f   : > { %1196 = dma.done.wait (%p1500_p7), %s205_s9, 4096  }
  0x30   : > { %1198 = vsyncadd (%p1500_p7), %s205_s9, 4294963200  ;;  %v1219_v0 = vmov 0   ;;  %v276_v1 = vld [vmem:[%s1322_s10 + $0x88] sm:$0xff]  ;;  %v278_v2 = vld [vmem:[%s1322_s10 + $0x98] sm:$0xff]  ;;  %vm355_vm0 = vcmask 523264   ;;  %s1093_s6 = sshll.u32 %s1084_s19, 4 }
  0x31   : > { %391 = vmatprep.mubr.bf16.mxu0 %v1219_v0  ;;  %432 = vmatprep.mubr.bf16.mxu1 %v1219_v0  ;;  %v275_v3 = vld [vmem:[%s1322_s10 + $0x80] sm:$0xff]  ;;  %v324_v4 = vunpack.c.l.s8.bf16 %v276_v1  ;;  %v340_v5 = vunpack.c.h.s8.bf16 %v276_v1  ;;  %v326_v6 = vunpack.c.l.s8.bf16 %v278_v2  ;;  %v342_v7 = vunpack.c.h.s8.bf16 %v278_v2  ;;  %v277_v8 = vld [vmem:[%s1322_s10 + $0x90] sm:$0xff]  ;;  %v260_v11 = vld [vmem:[%s1322_s10 + $0x8] sm:$0xff]  ;;  %p242_p8 = scmp.lt.s32.totalorder %s1093_s6, 111 }
  0x32   : > { %v339_v9 = vunpack.c.h.s8.bf16 %v275_v3  ;;  %v341_v10 = vunpack.c.h.s8.bf16 %v277_v8  ;;  %v262_v12 = vld [vmem:[%s1322_s10 + $0x18] sm:$0xff]  ;;  %v323_v13 = vunpack.c.l.s8.bf16 %v275_v3  ;;  %v325_v14 = vunpack.c.l.s8.bf16 %v277_v8  ;;  %v259_v17 = vld [vmem:[%s1322_s10] sm:$0xff]  ;;  %v261_v18 = vld [vmem:[%s1322_s10 + $0x10] sm:$0xff] }
  0x33   : > { %367 = vmatprep.subr.bf16.mxu0 %v340_v5  ;;  %408 = vmatprep.subr.bf16.mxu1 %v342_v7  ;;  %v308_v15 = vunpack.c.h.s8.bf16 %v260_v11  ;;  %v310_v16 = vunpack.c.h.s8.bf16 %v262_v12  ;;  %v307_v19 = vunpack.c.h.s8.bf16 %v259_v17  ;;  %v309_v20 = vunpack.c.h.s8.bf16 %v261_v18  ;;  %v280_v23 = vld [vmem:[%s1322_s10 + $0xa8] sm:$0xff]  ;;  %v282_v24 = vld [vmem:[%s1322_s10 + $0xb8] sm:$0xff]  ;;  %v257_v27 = vld [vmem:[%s1492_s0] sm:$0x1]  ;;  %s1506_s6 = smov (!%p242_p8, %s1093_s6), 111 }
  0x34   : > { %368 = vmatpush1.bf16.msra.mxu0 %v339_v9  ;;  %409 = vmatpush1.bf16.msra.mxu1 %v341_v10  ;;  %v292_v21 = vunpack.c.l.s8.bf16 %v260_v11  ;;  %v294_v22 = vunpack.c.l.s8.bf16 %v262_v12  ;;  %v291_v25 = vunpack.c.l.s8.bf16 %v259_v17  ;;  %v293_v26 = vunpack.c.l.s8.bf16 %v261_v18  ;;  %v279_v30 = vld [vmem:[%s1322_s10 + $0xa0] sm:$0xff]  ;;  %v281_v31 = vld [vmem:[%s1322_s10 + $0xb0] sm:$0xff]  ;;  %v264_v37 = vld [vmem:[%s1322_s10 + $0x28] sm:$0xff]  ;;  %s1397_s11 = scalar_lea.vmem %s1494_s2, %s1506_s6  ;;  %s1405_s19 = scalar_lea.vmem %s1495_s3, %s1506_s6 }
  0x35   : > { %369 = vmatprep.subr.bf16.mxu0 %v324_v4  ;;  %410 = vmatprep.subr.bf16.mxu1 %v326_v6  ;;  %v344_v28 = vunpack.c.h.s8.bf16 %v280_v23  ;;  %v346_v29 = vunpack.c.h.s8.bf16 %v282_v24  ;;  %v1345_v32 = vpack.c.bf16 %v257_v27, %v257_v27  ;;  %v343_v33 = vunpack.c.h.s8.bf16 %v279_v30  ;;  %v266_v38 = vld [vmem:[%s1322_s10 + $0x38] sm:$0xff]  ;;  %v263_v43 = vld [vmem:[%s1322_s10 + $0x20] sm:$0xff]  ;;  %v265_v44 = vld [vmem:[%s1322_s10 + $0x30] sm:$0xff]  ;;  %s1451_s15 = scalar_lea.vmem %s1496_s4, %s1506_s6 }
  0x36   : > { %v345_v34 = vunpack.c.h.s8.bf16 %v281_v31  ;;  %v328_v35 = vunpack.c.l.s8.bf16 %v280_v23  ;;  %v330_v36 = vunpack.c.l.s8.bf16 %v282_v24  ;;  %v327_v39 = vunpack.c.l.s8.bf16 %v279_v30  ;;  %v284_v49 = vld [vmem:[%s1322_s10 + $0xc8] sm:$0xff]  ;;  %v286_v50 = vld [vmem:[%s1322_s10 + $0xd8] sm:$0xff]  ;;  %v283_v55 = vld [vmem:[%s1322_s10 + $0xc0] sm:$0xff] }
  0x37   : > { %v329_v40 = vunpack.c.l.s8.bf16 %v281_v31  ;;  %v312_v41 = vunpack.c.h.s8.bf16 %v264_v37  ;;  %v314_v42 = vunpack.c.h.s8.bf16 %v266_v38  ;;  %v311_v45 = vunpack.c.h.s8.bf16 %v263_v43  ;;  %v285_v56 = vld [vmem:[%s1322_s10 + $0xd0] sm:$0xff]  ;;  %v268_v61 = vld [vmem:[%s1322_s10 + $0x48] sm:$0xff]  ;;  %v270_v62 = vld [vmem:[%s1322_s10 + $0x58] sm:$0xff] }
  0x38   : > { %370 = vmatpush1.bf16.msra.mxu0 %v323_v13  ;;  %411 = vmatpush1.bf16.msra.mxu1 %v325_v14  ;;  %v313_v46 = vunpack.c.h.s8.bf16 %v265_v44  ;;  %v296_v47 = vunpack.c.l.s8.bf16 %v264_v37  ;;  %v298_v48 = vunpack.c.l.s8.bf16 %v266_v38  ;;  %v295_v51 = vunpack.c.l.s8.bf16 %v263_v43  ;;  %v267_v4 = vld [vmem:[%s1322_s10 + $0x40] sm:$0xff]  ;;  %v269_v5 = vld [vmem:[%s1322_s10 + $0x50] sm:$0xff]  ;;  %v288_v10 = vld [vmem:[%s1322_s10 + $0xe8] sm:$0xff] }
  0x39   : > { %371 = vmatprep.subr.bf16.mxu0 %v308_v15  ;;  %412 = vmatprep.subr.bf16.mxu1 %v310_v16  ;;  %v297_v52 = vunpack.c.l.s8.bf16 %v265_v44  ;;  %v348_v53 = vunpack.c.h.s8.bf16 %v284_v49  ;;  %v350_v54 = vunpack.c.h.s8.bf16 %v286_v50  ;;  %v347_v57 = vunpack.c.h.s8.bf16 %v283_v55  ;;  %v290_v11 = vld [vmem:[%s1322_s10 + $0xf8] sm:$0xff]  ;;  %v287_v16 = vld [vmem:[%s1322_s10 + $0xe0] sm:$0xff]  ;;  %v289_v17 = vld [vmem:[%s1322_s10 + $0xf0] sm:$0xff] }
  0x3a   : > { %v349_v58 = vunpack.c.h.s8.bf16 %v285_v56  ;;  %v332_v59 = vunpack.c.l.s8.bf16 %v284_v49  ;;  %v334_v60 = vunpack.c.l.s8.bf16 %v286_v50  ;;  %v331_v63 = vunpack.c.l.s8.bf16 %v283_v55  ;;  %v274_v23 = vld [vmem:[%s1322_s10 + $0x78] sm:$0xff] }
  0x3b   : > { %v333_v1 = vunpack.c.l.s8.bf16 %v285_v56  ;;  %v316_v2 = vunpack.c.h.s8.bf16 %v268_v61  ;;  %v318_v3 = vunpack.c.h.s8.bf16 %v270_v62  ;;  %v315_v6 = vunpack.c.h.s8.bf16 %v267_v4 }
  0x3c   : > { %372 = vmatpush1.bf16.msra.mxu0 %v307_v19  ;;  %413 = vmatpush1.bf16.msra.mxu1 %v309_v20  ;;  %v317_v7 = vunpack.c.h.s8.bf16 %v269_v5  ;;  %v300_v8 = vunpack.c.l.s8.bf16 %v268_v61  ;;  %v302_v9 = vunpack.c.l.s8.bf16 %v270_v62  ;;  %v299_v12 = vunpack.c.l.s8.bf16 %v267_v4 }
  0x3d   : > { %373 = vmatprep.subr.bf16.mxu0 %v292_v21  ;;  %414 = vmatprep.subr.bf16.mxu1 %v294_v22  ;;  %v301_v13 = vunpack.c.l.s8.bf16 %v269_v5  ;;  %v352_v14 = vunpack.c.h.s8.bf16 %v288_v10  ;;  %v354_v15 = vunpack.c.h.s8.bf16 %v290_v11  ;;  %v351_v18 = vunpack.c.h.s8.bf16 %v287_v16  ;;  %v272_v22 = vld [vmem:[%s1322_s10 + $0x68] sm:$0xff] }
  0x3e   : > { %v353_v19 = vunpack.c.h.s8.bf16 %v289_v17  ;;  %v336_v20 = vunpack.c.l.s8.bf16 %v288_v10  ;;  %v338_v21 = vunpack.c.l.s8.bf16 %v290_v11  ;;  %v335_v24 = vunpack.c.l.s8.bf16 %v287_v16 }
  0x3f   : > { %v322_v27 = vunpack.c.h.s8.bf16 %v274_v23 }
  0x40   : > { %374 = vmatpush1.bf16.msra.mxu0 %v291_v25  ;;  %415 = vmatpush1.bf16.msra.mxu1 %v293_v26  ;;  %v337_v25 = vunpack.c.l.s8.bf16 %v289_v17  ;;  %v320_v26 = vunpack.c.h.s8.bf16 %v272_v22 }
  0x41   : > { %449 = vmatprep.subr.bf16.mxu0 %v344_v28  ;;  %490 = vmatprep.subr.bf16.mxu1 %v346_v29  ;;  %v271_v28 = vld [vmem:[%s1322_s10 + $0x60] sm:$0xff]  ;;  %v273_v29 = vld [vmem:[%s1322_s10 + $0x70] sm:$0xff] }
  0x42   : > { %v319_v30 = vunpack.c.h.s8.bf16 %v271_v28  ;;  %v321_v31 = vunpack.c.h.s8.bf16 %v273_v29 }
  0x43   : > { %1096 = vmatmul.mubr.msk.bf16.vlgmr.msra.gmra.mxu0 %vm355_vm0, %v1345_v32  ;;  %1097 = vmatmul.mubr.msk.bf16.vlgmr.msra.gmra.mxu1 %vm355_vm0, %v1345_v32 }
  0x44   : > { %450 = vmatpush1.bf16.msra.mxu0 %v343_v33  ;;  %491 = vmatpush1.bf16.msra.mxu1 %v345_v34  ;;  %v304_v33 = vunpack.c.l.s8.bf16 %v272_v22  ;;  %v306_v34 = vunpack.c.l.s8.bf16 %v274_v23 }
  0x45   : > { %451 = vmatprep.subr.bf16.mxu0 %v328_v35  ;;  %492 = vmatprep.subr.bf16.mxu1 %v330_v36  ;;  %v303_v35 = vunpack.c.l.s8.bf16 %v271_v28  ;;  %v305_v36 = vunpack.c.l.s8.bf16 %v273_v29 }
  0x46   : > { %473 = vmatprep.mubr.bf16.mxu0 %v1219_v0  ;;  %514 = vmatprep.mubr.bf16.mxu1 %v1219_v0 }
  0x48   : > { %452 = vmatpush1.bf16.msra.mxu0 %v327_v39  ;;  %493 = vmatpush1.bf16.msra.mxu1 %v329_v40 }
  0x49   : > { %453 = vmatprep.subr.bf16.mxu0 %v312_v41  ;;  %494 = vmatprep.subr.bf16.mxu1 %v314_v42 }
  0x4c   : > { %454 = vmatpush1.bf16.msra.mxu0 %v311_v45  ;;  %495 = vmatpush1.bf16.msra.mxu1 %v313_v46 }
  0x4d   : > { %455 = vmatprep.subr.bf16.mxu0 %v296_v47  ;;  %496 = vmatprep.subr.bf16.mxu1 %v298_v48  ;;  %v787_v47 = vld [vmem:[%s1405_s19] sm:$0xff] }
  0x50   : > { %456 = vmatpush1.bf16.msra.mxu0 %v295_v51  ;;  %497 = vmatpush1.bf16.msra.mxu1 %v297_v52 }
  0x51   : > { %531 = vmatprep.subr.bf16.mxu0 %v348_v53  ;;  %572 = vmatprep.subr.bf16.mxu1 %v350_v54 }
  0x53   : > { %1098 = vmatmul.mubr.msk.bf16.vlgmr.msra.gmra.mxu0 %vm355_vm0, %v1345_v32  ;;  %1099 = vmatmul.mubr.msk.bf16.vlgmr.msra.gmra.mxu1 %vm355_vm0, %v1345_v32 }
  0x54   : > { %532 = vmatpush1.bf16.msra.mxu0 %v347_v57  ;;  %573 = vmatpush1.bf16.msra.mxu1 %v349_v58  ;;  %v1220_v58 = vmov 1966171168  }
  0x55   : > { %533 = vmatprep.subr.bf16.mxu0 %v332_v59  ;;  %574 = vmatprep.subr.bf16.mxu1 %v334_v60  ;;  %v908_v59 = vunpack.c.l.s4 %v1220_v58  ;;  %v788_v58 = vld [vmem:[%s1405_s19 + $0x8] sm:$0xff] }
  0x56   : > { %555 = vmatprep.mubr.bf16.mxu0 %v1219_v0  ;;  %596 = vmatprep.mubr.bf16.mxu1 %v1219_v0 }
  0x58   : > { %534 = vmatpush1.bf16.msra.mxu0 %v331_v63  ;;  %575 = vmatpush1.bf16.msra.mxu1 %v333_v1 }
  0x59   : > { %535 = vmatprep.subr.bf16.mxu0 %v316_v2  ;;  %576 = vmatprep.subr.bf16.mxu1 %v318_v3 }
  0x5c   : > { %536 = vmatpush1.bf16.msra.mxu0 %v315_v6  ;;  %577 = vmatpush1.bf16.msra.mxu1 %v317_v7  ;;  %v909_v6 = vunpack.c.0.s8 %v908_v59 }
  0x5d   : > { %537 = vmatprep.subr.bf16.mxu0 %v300_v8  ;;  %578 = vmatprep.subr.bf16.mxu1 %v302_v9 }
  0x60   : > { %538 = vmatpush1.bf16.msra.mxu0 %v299_v12  ;;  %579 = vmatpush1.bf16.msra.mxu1 %v301_v13 }
  0x61   : > { %613 = vmatprep.subr.bf16.mxu0 %v352_v14  ;;  %654 = vmatprep.subr.bf16.mxu1 %v354_v15 }
  0x63   : > { %1100 = vmatmul.mubr.msk.bf16.vlgmr.msra.gmra.mxu0 %vm355_vm0, %v1345_v32  ;;  %1101 = vmatmul.mubr.msk.bf16.vlgmr.msra.gmra.mxu1 %vm355_vm0, %v1345_v32 }
  0x64   : > { %614 = vmatpush1.bf16.msra.mxu0 %v351_v18  ;;  %655 = vmatpush1.bf16.msra.mxu1 %v353_v19 }
  0x65   : > { %615 = vmatprep.subr.bf16.mxu0 %v336_v20  ;;  %656 = vmatprep.subr.bf16.mxu1 %v338_v21 }
  0x66   : > { %637 = vmatprep.mubr.bf16.mxu0 %v1219_v0  ;;  %678 = vmatprep.mubr.bf16.mxu1 %v1219_v0  ;;  %v691_v0 = vlaneseq }
  0x68   : > { %616 = vmatpush1.bf16.msra.mxu0 %v335_v24  ;;  %657 = vmatpush1.bf16.msra.mxu1 %v337_v25  ;;  %v692_v37 = vshrl.u32 %v691_v0, 7 }
  0x69   : > { %617 = vmatprep.subr.bf16.mxu0 %v320_v26  ;;  %658 = vmatprep.subr.bf16.mxu1 %v322_v27 }
  0x6a   : > { %v1399_v39 = vsub.s32 0, %v692_v37  ;;  %v1408_v41 = vsub.s32 2, %v692_v37  ;;  %v1410_v42 = vsub.s32 1, %v692_v37  ;;  %v1412_v43 = vsub.s32 3, %v692_v37 }
  0x6b   : > { %v1423_v61 = vsub.s32 4, %v692_v37  ;;  %v1425_v62 = vsub.s32 6, %v692_v37  ;;  %v1427_v4 = vsub.s32 5, %v692_v37  ;;  %v1429_v5 = vsub.s32 7, %v692_v37 }
  0x6c   : > { %618 = vmatpush1.bf16.msra.mxu0 %v319_v30  ;;  %659 = vmatpush1.bf16.msra.mxu1 %v321_v31  ;;  %v794_v55 = vrot.slane %v787_v47, %v1399_v39  ;;  %v802_v56 = vrot.slane %v787_v47, %v1408_v41  ;;  %v798_v57 = vrot.slane %v787_v47, %v1410_v42 }
  0x6d   : > { %619 = vmatprep.subr.bf16.mxu0 %v304_v33  ;;  %660 = vmatprep.subr.bf16.mxu1 %v306_v34  ;;  %v806_v60 = vrot.slane %v787_v47, %v1412_v43  ;;  %v810_v13 = vrot.slane %v787_v47, %v1423_v61  ;;  %v818_v14 = vrot.slane %v787_v47, %v1425_v62 }
  0x6e   : > { %v1437_v17 = vsub.s32 %v909_v6, %v692_v37  ;;  %v814_v20 = vrot.slane %v787_v47, %v1427_v4  ;;  %v822_v21 = vrot.slane %v787_v47, %v1429_v5 }
  0x70   : > { %620 = vmatpush1.bf16.msra.mxu0 %v303_v35  ;;  %661 = vmatpush1.bf16.msra.mxu1 %v305_v36 }
  0x73   : > { %1102 = vmatmul.mubr.msk.bf16.vlgmr.msra.gmra.mxu0 %vm355_vm0, %v1345_v32  ;;  %1103 = vmatmul.mubr.msk.bf16.vlgmr.msra.gmra.mxu1 %vm355_vm0, %v1345_v32  ;;  %v687_v32 = vld [vmem:[%s1397_s11] sm:$0xff] }
  0x74   : > { %v694_v46 = vrot.slane %v687_v32, %v1399_v39  ;;  %v702_v50 = vrot.slane %v687_v32, %v1408_v41  ;;  %v698_v51 = vrot.slane %v687_v32, %v1410_v42  ;;  %v706_v52 = vrot.slane %v687_v32, %v1412_v43 }
  0x75   : > { %v710_v7 = vrot.slane %v687_v32, %v1423_v61  ;;  %v718_v8 = vrot.slane %v687_v32, %v1425_v62  ;;  %v714_v15 = vrot.slane %v687_v32, %v1427_v4  ;;  %v722_v16 = vrot.slane %v687_v32, %v1429_v5 }
 0x103   : > { %v393_v38 = vpop.f32.mrf.mxu0  ;;  %v434_v40 = vpop.f32.mrf.mxu1 }
 0x104   : > { %v771_v63 = vmul.f32 %v694_v46, %v393_v38  ;;  %v773_v1 = vmul.f32 %v702_v50, %v434_v40 }
 0x105   : > { %v395_v44 = vpop.f32.mrf.mxu0  ;;  %v436_v45 = vpop.f32.mrf.mxu1 }
 0x106   : > { %v772_v2 = vmul.f32 %v698_v51, %v395_v44  ;;  %v774_v3 = vmul.f32 %v706_v52, %v436_v45  ;;  %v871_v9 = vadd.f32 %v794_v55, %v771_v63  ;;  %v873_v10 = vadd.f32 %v802_v56, %v773_v1 }
 0x107   : > { %v397_v48 = vpop.f32.mrf.mxu0  ;;  %v438_v49 = vpop.f32.mrf.mxu1 }
 0x108   : > { %v872_v11 = vadd.f32 %v798_v57, %v772_v2  ;;  %v874_v12 = vadd.f32 %v806_v60, %v774_v3 }
 0x109   : > { %v398_v53 = vpop.f32.mrf.mxu0  ;;  %v439_v54 = vpop.f32.mrf.mxu1 }
 0x10a   : > { %v903_v22 = vcombine.low %v871_v9, %v872_v11  ;;  %v904_v23 = vcombine.low %v873_v10, %v874_v12  ;;  %v688_v54 = vld [vmem:[%s1397_s11 + $0x8] sm:$0xff]  ;;  %v830_v9 = vrot.slane %v788_v58, %v1410_v42  ;;  %v838_v10 = vrot.slane %v788_v58, %v1412_v43 }
 0x10b   : > { %v726_v57 = vrot.slane %v688_v54, %v1399_v39  ;;  %v734_v59 = vrot.slane %v688_v54, %v1408_v41  ;;  %v730_v60 = vrot.slane %v688_v54, %v1410_v42  ;;  %v738_v63 = vrot.slane %v688_v54, %v1412_v43 }
 0x10c   : > { %v913_v35 = vrot.slane %v903_v22, %v1437_v17  ;;  %v920_v36 = vrot.slane %v904_v23, %v1437_v17  ;;  %v842_v43 = vrot.slane %v788_v58, %v1423_v61 }
 0x10e   : > { %v935_v45 = vcombine.low %v913_v35, %v920_v36 }
 0x110   : > { %v943_v49 = vrot.slane %v935_v45, %v1437_v17 }
 0x113   : > { %v475_v18 = vpop.f32.mrf.mxu0  ;;  %v516_v19 = vpop.f32.mrf.mxu1 }
 0x114   : > { %v775_v24 = vmul.f32 %v710_v7, %v475_v18  ;;  %v777_v25 = vmul.f32 %v718_v8, %v516_v19  ;;  %v826_v7 = vrot.slane %v788_v58, %v1399_v39  ;;  %v834_v8 = vrot.slane %v788_v58, %v1408_v41 }
 0x115   : > { %v477_v26 = vpop.f32.mrf.mxu0  ;;  %v518_v27 = vpop.f32.mrf.mxu1  ;;  %v746_v39 = vrot.slane %v688_v54, %v1427_v4  ;;  %v754_v41 = vrot.slane %v688_v54, %v1429_v5 }
 0x116   : > { %v875_v28 = vadd.f32 %v810_v13, %v775_v24  ;;  %v877_v29 = vadd.f32 %v818_v14, %v777_v25  ;;  %v776_v30 = vmul.f32 %v714_v15, %v477_v26  ;;  %v778_v31 = vmul.f32 %v722_v16, %v518_v27 }
 0x117   : > { %v479_v33 = vpop.f32.mrf.mxu0  ;;  %v520_v34 = vpop.f32.mrf.mxu1  ;;  %v850_v25 = vrot.slane %v788_v58, %v1425_v62 }
 0x118   : > { %v876_v0 = vadd.f32 %v814_v20, %v776_v30  ;;  %v878_v37 = vadd.f32 %v822_v21, %v778_v31  ;;  %v742_v20 = vrot.slane %v688_v54, %v1423_v61  ;;  %v750_v21 = vrot.slane %v688_v54, %v1425_v62 }
 0x119   : > { %v480_v38 = vpop.f32.mrf.mxu0  ;;  %v521_v40 = vpop.f32.mrf.mxu1 }
 0x11a   : > { %v905_v32 = vcombine.low %v875_v28, %v876_v0  ;;  %v906_v44 = vcombine.low %v877_v29, %v878_v37  ;;  %v846_v28 = vrot.slane %v788_v58, %v1427_v4  ;;  %v854_v29 = vrot.slane %v788_v58, %v1429_v5 }
 0x11c   : > { %v927_v46 = vrot.slane %v905_v32, %v1437_v17  ;;  %v934_v47 = vrot.slane %v906_v44, %v1437_v17 }
 0x11e   : > { %v936_v48 = vcombine.low %v927_v46, %v934_v47 }
 0x120   : > { %v950_v50 = vrot.slane %v936_v48, %v1437_v17 }
 0x122   : > { %v951_v51 = vcombine.low %v943_v49, %v950_v50 }
 0x123   : > { %v557_v52 = vpop.f32.mrf.mxu0  ;;  %v598_v53 = vpop.f32.mrf.mxu1 }
 0x124   : > { %1003 = vst [vmem:[%s1451_s15] sm:$0xff] %v951_v51  ;;  %v779_v11 = vmul.f32 %v726_v57, %v557_v52  ;;  %v781_v12 = vmul.f32 %v734_v59, %v598_v53 }
 0x125   : > { %v559_v55 = vpop.f32.mrf.mxu0  ;;  %v600_v56 = vpop.f32.mrf.mxu1 }
 0x126   : > { %v780_v13 = vmul.f32 %v730_v60, %v559_v55  ;;  %v782_v14 = vmul.f32 %v738_v63, %v600_v56  ;;  %v879_v15 = vadd.f32 %v826_v7, %v779_v11  ;;  %v881_v16 = vadd.f32 %v834_v8, %v781_v12 }
 0x127   : > { %v561_v1 = vpop.f32.mrf.mxu0  ;;  %v602_v2 = vpop.f32.mrf.mxu1 }
 0x128   : > { %v880_v18 = vadd.f32 %v830_v9, %v780_v13  ;;  %v882_v19 = vadd.f32 %v838_v10, %v782_v14 }
 0x129   : > { %v562_v3 = vpop.f32.mrf.mxu0  ;;  %v603_v6 = vpop.f32.mrf.mxu1 }
 0x12a   : > { %v952_v22 = vcombine.low %v879_v15, %v880_v18  ;;  %v953_v42 = vcombine.low %v881_v16, %v882_v19 }
 0x12c   : > { %v962_v35 = vrot.slane %v952_v22, %v1437_v17  ;;  %v969_v36 = vrot.slane %v953_v42, %v1437_v17 }
 0x12e   : > { %v984_v5 = vcombine.low %v962_v35, %v969_v36 }
 0x130   : > { %v992_v49 = vrot.slane %v984_v5, %v1437_v17 }
 0x133   : > { %v639_v23 = vpop.f32.mrf.mxu0  ;;  %v680_v24 = vpop.f32.mrf.mxu1 }
 0x134   : > { %v783_v26 = vmul.f32 %v742_v20, %v639_v23  ;;  %v785_v27 = vmul.f32 %v750_v21, %v680_v24 }
 0x135   : > { %v641_v30 = vpop.f32.mrf.mxu0  ;;  %v682_v31 = vpop.f32.mrf.mxu1 }
 0x136   : > { %v784_v33 = vmul.f32 %v746_v39, %v641_v30  ;;  %v786_v34 = vmul.f32 %v754_v41, %v682_v31  ;;  %v883_v61 = vadd.f32 %v842_v43, %v783_v26  ;;  %v885_v38 = vadd.f32 %v850_v25, %v785_v27 }
 0x137   : > { %v643_v0 = vpop.f32.mrf.mxu0  ;;  %v684_v37 = vpop.f32.mrf.mxu1 }
 0x138   : > { %v884_v62 = vadd.f32 %v846_v28, %v784_v33  ;;  %v886_v40 = vadd.f32 %v854_v29, %v786_v34 }
 0x139   : > { %v644_v32 = vpop.f32.mrf.mxu0  ;;  %v685_v44 = vpop.f32.mrf.mxu1 }
 0x13a   : > { %v954_v4 = vcombine.low %v883_v61, %v884_v62  ;;  %v955_v45 = vcombine.low %v885_v38, %v886_v40 }
 0x13c   : > { %v976_v46 = vrot.slane %v954_v4, %v1437_v17  ;;  %v983_v47 = vrot.slane %v955_v45, %v1437_v17 }
 0x13e   : > { %v985_v48 = vcombine.low %v976_v46, %v983_v47 }
 0x140   : > { %v999_v50 = vrot.slane %v985_v48, %v1437_v17 }
 0x142   : > { %v1000_v51 = vcombine.low %v992_v49, %v999_v50 }
 0x144   : > { %1004 = vst [vmem:[%s1451_s15 + $0x8] sm:$0xff] %v1000_v51 }
 0x145 PF: > { %p14_p0 = scmp.ge.s32.totalorder %s1266_s20, 9   ;;  %s1501_s15 = smov %s1205_s16 }
 0x146   : > { %s1502_s16 = smov %s1209_s17  ;;  %s1503_s17 = smov %s1276_s23 }
 0x147   : > { %s1504_s18 = smov %s1266_s20  ;;  %16 = sbr.rel (!%p14_p0) target bundleno = 3 (0x3), region = 82 }
 0x14c   :  { %1025 = vsyncpa [#allocation3], 1 }
 0x14d   :  { %1027 = vsyncpa [#allocation3 + $0x1], 1 }

// kernel: inductor_forward.6
= control target key start
LH: loop header
LB: loop body
LE: loop exit
PB: predicated region body
PF: predicated region fallthrough
CT: control target
= control target key end

     0   :  { %v542_v0 = vmov 0.0   ;;  %vm543_vm0 = vmmov 0   ;;  %vm139_vm1 = vcmask 523264   ;;  %v299_v32 = vlaneseq  ;;  %s681_s1 = inlined_call_operand.vmem [shape: bf16[128,64], index: 1, kind: input, shape index: {}]   ;;  %s682_s4 = inlined_call_operand.vmem [shape: bf16[64,64], index: 4, kind: input, shape index: {}]   ;;  %s683_s0 = inlined_call_operand.vmem [shape: f32[16,128], index: 0, kind: input, shape index: {}]   ;;  %s684_s3 = inlined_call_operand.vmem [shape: bf16[64,64], index: 3, kind: input, shape index: {}]   ;;  %s685_s2 = inlined_call_operand.vmem [shape: f32[1,64], index: 2, kind: input, shape index: {}]   ;;  %s686_s5 = inlined_call_operand.vmem [shape: f32[1,64], index: 5, kind: input, shape index: {}]   ;;  %s687_s6 = inlined_call_operand.vmem [shape: f32[1,64], index: 6, kind: output, shape index: {}]  }
   0x1   :  { %456 = vmatprep.subr.bf16.mxu0 %v542_v0  ;;  %v526_v1 = vld [vmem:[%s681_s1 + $0x38] sm:$0xff]   ;;  %472 = vmatprep.mubr.msk.bf16.mxu0 %vm543_vm0, %v542_v0  ;;  %v527_v2 = vld [vmem:[%s681_s1 + $0x30] sm:$0xff]   ;;  %v528_v3 = vld [vmem:[%s681_s1 + $0x28] sm:$0xff]   ;;  %vm305_vm2 = vcmask 517120   ;;  %vm398_vm3 = vcmask 516096  }
   0x2   :  { %476 = vmatprep.subr.bf16.mxu1 %v542_v0  ;;  %484 = vmatprep.mubr.msk.bf16.mxu1 %vm543_vm0, %v542_v0  ;;  %v529_v4 = vld [vmem:[%s681_s1 + $0x20] sm:$0xff]   ;;  %v534_v5 = vld [vmem:[%s682_s4 + $0x18] sm:$0xff]   ;;  %v531_v7 = vld [vmem:[%s681_s1 + $0x10] sm:$0xff]   ;;  %v300_v35 = vshrl.u32 %v299_v32, 7 }
   0x3   :  { %457 = vmatpush3.bf16.msra.mxu0 %v526_v1  ;;  %477 = vmatpush3.bf16.msra.mxu1 %v534_v5  ;;  %v530_v6 = vld [vmem:[%s681_s1 + $0x18] sm:$0xff]   ;;  %v532_v8 = vld [vmem:[%s681_s1 + $0x8] sm:$0xff]   ;;  %v533_v9 = vld [vmem:[%s681_s1] sm:$0xff]  }
   0x4   :  { %458 = vmatprep.subr.bf16.mxu0 %v542_v0  ;;  %478 = vmatprep.subr.bf16.mxu1 %v542_v0  ;;  %v24_v10 = vld [vmem:[%s683_s0] sm:$0xff]  ;;  %v25_v11 = vld [vmem:[%s683_s0 + $0x8] sm:$0xff]  ;;  %v535_v13 = vld [vmem:[%s682_s4 + $0x10] sm:$0xff]   ;;  %v301_v36 = vsub.s32 0, %v300_v35 }
   0x5   :  { %v26_v12 = vpack.c.bf16 %v25_v11, %v24_v10  ;;  %v536_v14 = vld [vmem:[%s682_s4 + $0x8] sm:$0xff]   ;;  %v537_v15 = vld [vmem:[%s682_s4] sm:$0xff]   ;;  %v538_v23 = vld [vmem:[%s684_s3 + $0x18] sm:$0xff]  }
   0x6   :  { %v406_v16 = vld [vmem:[%s685_s2] ss:$0 sm:$0xff]  ;;  %v539_v25 = vld [vmem:[%s684_s3 + $0x10] sm:$0xff]   ;;  %v540_v26 = vld [vmem:[%s684_s3 + $0x8] sm:$0xff]  }
   0x7   :  { %459 = vmatpush3.bf16.msra.mxu0 %v527_v2  ;;  %479 = vmatpush3.bf16.msra.mxu1 %v535_v13  ;;  %v541_v27 = vld [vmem:[%s684_s3] sm:$0xff]  }
   0x8   :  { %460 = vmatprep.subr.bf16.mxu0 %v542_v0  ;;  %480 = vmatprep.subr.bf16.mxu1 %v542_v0  ;;  %v158_v37 = vld [vmem:[%s686_s5] sm:$0x1] }
   0x9   :  { %v302_v38 = vrot.slane %v158_v37, %v301_v36 }
   0xb   :  { %461 = vmatpush3.bf16.msra.mxu0 %v528_v3  ;;  %481 = vmatpush3.bf16.msra.mxu1 %v536_v14 }
   0xc   :  { %462 = vmatprep.subr.bf16.mxu0 %v542_v0  ;;  %482 = vmatprep.subr.bf16.mxu1 %v542_v0 }
   0xf   :  { %463 = vmatpush3.bf16.msra.mxu0 %v529_v4  ;;  %483 = vmatpush3.bf16.msra.mxu1 %v537_v15 }
  0x10   :  { %464 = vmatprep.subr.bf16.mxu0 %v542_v0  ;;  %488 = vmatprep.subr.bf16.mxu1 %v542_v0 }
  0x13   :  { %465 = vmatpush3.bf16.msra.mxu0 %v530_v6 }
  0x14   :  { %466 = vmatprep.subr.bf16.mxu0 %v542_v0 }
  0x17   :  { %467 = vmatpush3.bf16.msra.mxu0 %v531_v7 }
  0x18   :  { %468 = vmatprep.subr.bf16.mxu0 %v542_v0 }
  0x1b   :  { %469 = vmatpush3.bf16.msra.mxu0 %v532_v8 }
  0x1c   :  { %470 = vmatprep.subr.bf16.mxu0 %v542_v0 }
  0x1f   :  { %471 = vmatpush3.bf16.msra.mxu0 %v533_v9 }
  0x20   :  { %500 = vmatprep.subr.bf16.mxu0 %v542_v0 }
  0x22   :  { %473 = vmatmul.mubr.bf16.vlgmr.msra.gmra.mxu0 %v26_v12 }
  0x23   :  { %501 = vmatpush3.bf16.msra.mxu0 %v534_v5  ;;  %508 = vmatprep.mubr.msk.bf16.mxu0 %vm543_vm0, %v542_v0 }
  0x24   :  { %502 = vmatprep.subr.bf16.mxu0 %v542_v0 }
  0x27   :  { %503 = vmatpush3.bf16.msra.mxu0 %v535_v13 }
  0x28   :  { %504 = vmatprep.subr.bf16.mxu0 %v542_v0 }
  0x2b   :  { %505 = vmatpush3.bf16.msra.mxu0 %v536_v14 }
  0x2c   :  { %506 = vmatprep.subr.bf16.mxu0 %v542_v0 }
  0x2f   :  { %507 = vmatpush3.bf16.msra.mxu0 %v537_v15 }
  0xe2   :  { %v132_v17 = vpop.f32.mrf.mxu0 }
  0xe3   :  { %v133_v18 = vadd.f32 %v406_v16, %v132_v17 }
  0xe4   :  { %v474_v19 = vpop.f32.mrf.mxu0 }
  0xe5   :  { %140 = vst.msk [vmem:[#allocation2] sm:$0xff] %vm139_vm1, %v133_v18 }
  0xe6   :  { %v135_v20 = vpop.f32.mrf.mxu0 }
  0xe8   :  { %v475_v21 = vpop.f32.mrf.mxu0 }
  0xec   :  { %v161_v22 = vld [vmem:[#allocation2 + $0x1] ss:$2 sm:$0x3]  ;;  %v159_v28 = vld [vmem:[#allocation2] ss:$2 sm:$0x3] }
  0xed   :  { %v163_v24 = vpack.c.bf16 %v161_v22, %v161_v22  ;;  %v162_v29 = vpack.c.bf16 %v159_v28, %v159_v28 }
  0xef   :  { %485 = vmatmul.mubr.msk.bf16.vlgmr.msra.gmra.mxu1 %vm139_vm1, %v163_v24 }
  0xf0   :  { %489 = vmatpush3.bf16.msra.mxu1 %v538_v23  ;;  %496 = vmatprep.mubr.msk.bf16.mxu1 %vm543_vm0, %v542_v0 }
  0xf1   :  { %490 = vmatprep.subr.bf16.mxu1 %v542_v0 }
  0xf4   :  { %491 = vmatpush3.bf16.msra.mxu1 %v539_v25 }
  0xf5   :  { %492 = vmatprep.subr.bf16.mxu1 %v542_v0 }
  0xf8   :  { %493 = vmatpush3.bf16.msra.mxu1 %v540_v26 }
  0xf9   :  { %494 = vmatprep.subr.bf16.mxu1 %v542_v0 }
  0xfc   :  { %495 = vmatpush3.bf16.msra.mxu1 %v541_v27 }
  0xfd   :  { %512 = vmatprep.subr.bf16.mxu1 %v542_v0 }
  0xff   :  { %497 = vmatmul.mubr.msk.bf16.vlgmr.msra.gmra.mxu1 %vm139_vm1, %v162_v29 }
 0x100   :  { %513 = vmatpush3.bf16.msra.mxu1 %v538_v23  ;;  %520 = vmatprep.mubr.msk.bf16.mxu1 %vm543_vm0, %v542_v0 }
 0x101   :  { %514 = vmatprep.subr.bf16.mxu1 %v542_v0 }
 0x104   :  { %515 = vmatpush3.bf16.msra.mxu1 %v539_v25 }
 0x105   :  { %516 = vmatprep.subr.bf16.mxu1 %v542_v0 }
 0x108   :  { %517 = vmatpush3.bf16.msra.mxu1 %v540_v26 }
 0x109   :  { %518 = vmatprep.subr.bf16.mxu1 %v542_v0 }
 0x10c   :  { %519 = vmatpush3.bf16.msra.mxu1 %v541_v27 }
 0x1af   :  { %v225_v30 = vpop.f32.mrf.mxu1 }
 0x1b1   :  { %v486_v31 = vpop.f32.mrf.mxu1 }
 0x1b3   :  { %v228_v33 = vpop.f32.mrf.mxu1 }
 0x1b5   :  { %v487_v34 = vpop.f32.mrf.mxu1 }
 0x1bf   :  { %v292_v39 = vpop.f32.mrf.mxu1 }
 0x1c0   :  { %v293_v40 = vadd.f32 %v292_v39, %v225_v30 }
 0x1c1   :  { %v498_v41 = vpop.f32.mrf.mxu1 }
 0x1c2   :  { %v304_v42 = vadd.f32 %v302_v38, %v293_v40 }
 0x1c3   :  { %v295_v43 = vpop.f32.mrf.mxu1 }
 0x1c4   :  { %306 = vst.msk [vmem:[#allocation2] sm:$0x3] %vm305_vm2, %v304_v42 }
 0x1c5   :  { %v499_v44 = vpop.f32.mrf.mxu1 }
 0x1cb   :  { %v308_v45 = vld [vmem:[#allocation2 + $0x1] ss:$2 sm:$0x1]  ;;  %v307_v46 = vld [vmem:[#allocation2] ss:$2 sm:$0x1] }
 0x1cc   :  { %v310_v47 = vpack.c.bf16 %v308_v45, %v308_v45  ;;  %v309_v48 = vpack.c.bf16 %v307_v46, %v307_v46 }
 0x1ce   :  { %509 = vmatmul.mubr.msk.bf16.vlgmr.msra.gmra.mxu0 %vm139_vm1, %v310_v47  ;;  %521 = vmatmul.mubr.msk.bf16.vlgmr.msra.gmra.mxu1 %vm139_vm1, %v309_v48 }
 0x28e   :  { %v348_v49 = vpop.f32.mrf.mxu0  ;;  %v391_v50 = vpop.f32.mrf.mxu1 }
 0x28f   :  { %v392_v51 = vadd.f32 %v391_v50, %v348_v49 }
 0x290   :  { %v510_v52 = vpop.f32.mrf.mxu0  ;;  %v522_v53 = vpop.f32.mrf.mxu1 }
 0x291   :  { %v397_v54 = vadd.f32 %v392_v51, %v158_v37 }
 0x292   :  { %v351_v55 = vpop.f32.mrf.mxu0  ;;  %v394_v56 = vpop.f32.mrf.mxu1 }
 0x293   :  { %399 = vst.msk [vmem:[#allocation2] sm:$0x1] %vm398_vm3, %v397_v54 }
 0x294   :  { %v511_v57 = vpop.f32.mrf.mxu0  ;;  %v523_v58 = vpop.f32.mrf.mxu1 }
 0x29a   :  { %v400_v59 = vld [vmem:[#allocation2] sm:$0x1] }
 0x29b   :  { %401 = vst.msk [vmem:[%s687_s6] sm:$0x1] %vm398_vm3, %v400_v59 }

// kernel: inductor_forward.5
= control target key start
LH: loop header
LB: loop body
LE: loop exit
PB: predicated region body
PF: predicated region fallthrough
CT: control target
= control target key end

     0   :  { %v2763_v2 = vmov 0   ;;  %vm115_vm0 = vcmask 130048   ;;  %s2755_s0 = inlined_call_operand.vmem [shape: bf16[96,16], index: 0, kind: input, shape index: {}]   ;;  %s2756_s1 = inlined_call_operand.vmem [shape: f32[16,128], index: 1, kind: input, shape index: {}, may-alias: {1,2}]   ;;  %s2757_s2 = inlined_call_operand.vmem [shape: f32[16,128], index: 2, kind: input, shape index: {}, may-alias: {1,2}]   ;;  %s2758_s3 = inlined_call_operand.vmem [shape: bf16[16,512], index: 3, kind: input, shape index: {}]   ;;  %s2759_s4 = inlined_call_operand.vmem [shape: bf16[128,512], index: 4, kind: input, shape index: {}]   ;;  %s2760_s5 = inlined_call_operand.vmem [shape: f32[1,512], index: 5, kind: input, shape index: {}]   ;;  %s2761_s6 = inlined_call_operand.vmem [shape: f32[16,128], index: 6, kind: output, shape index: {0}]   ;;  %s2762_s7 = inlined_call_operand.hbm [shape: f32[16,128], index: 7, kind: output, shape index: {1}]  }
   0x1   :  { %v1611_v0 = vld [vmem:[%s2758_s3 + $0x4] ss:$16 sps:$4 sm:$0xff]   ;;  %v1613_v1 = vld [vmem:[%s2758_s3 + $0xc] ss:$16 sps:$4 sm:$0xff]   ;;  %166 = vmatprep.mubr.bf16.mxu0 %v2763_v2  ;;  %259 = vmatprep.mubr.bf16.mxu1 %v2763_v2  ;;  %v1615_v3 = vld [vmem:[%s2758_s3] ss:$16 sps:$4 sm:$0xff]  }
   0x2   :  { %148 = vmatprep.subr.bf16.mxu0 %v1611_v0  ;;  %v1616_v4 = vld [vmem:[%s2758_s3 + $0x8] ss:$16 sps:$4 sm:$0xff]   ;;  %241 = vmatprep.subr.bf16.mxu1 %v1613_v1  ;;  %v1617_v5 = vld [vmem:[%s2755_s0] sm:$0xff]   ;;  %v2013_v11 = vld [vmem:[%s2759_s4 + $0xec] ss:$16 sps:$4 sm:$0xff]  }
   0x3   :  { %149 = vmatpush1.bf16.msra.mxu0 %v1615_v3  ;;  %242 = vmatpush1.bf16.msra.mxu1 %v1616_v4  ;;  %v1981_v6 = vld [vmem:[%s2759_s4 + $0xe4] ss:$16 sps:$4 sm:$0xff]   ;;  %v1986_v7 = vld [vmem:[%s2759_s4 + $0xe0] ss:$16 sps:$4 sm:$0xff]   ;;  %v2018_v12 = vld [vmem:[%s2759_s4 + $0xe8] ss:$16 sps:$4 sm:$0xff]  }
   0x4   :  { %v1991_v8 = vld [vmem:[%s2759_s4 + $0xc4] ss:$16 sps:$4 sm:$0xff]   ;;  %576 = vmatprep.subr.bf16.mxu0 %v1981_v6  ;;  %v2001_v9 = vld [vmem:[%s2759_s4 + $0xc0] ss:$16 sps:$4 sm:$0xff]   ;;  %v1624_v13 = vld [vmem:[%s2755_s0 + $0x8] sm:$0xff]   ;;  %619 = vmatprep.subr.bf16.mxu1 %v2013_v11 }
   0x5   :  { %v2008_v10 = vld [vmem:[%s2759_s4 + $0xa4] ss:$16 sps:$4 sm:$0xff]   ;;  %v2027_v14 = vld [vmem:[%s2759_s4 + $0xa0] ss:$16 sps:$4 sm:$0xff]   ;;  %v2040_v16 = vld [vmem:[%s2759_s4 + $0xcc] ss:$16 sps:$4 sm:$0xff]  }
   0x6   :  { %1527 = vmatmul.mubr.msk.bf16.vlgmr.msra.gmra.mxu0 %vm115_vm0, %v1617_v5  ;;  %1533 = vmatmul.mubr.msk.bf16.vlgmr.msra.gmra.mxu1 %vm115_vm0, %v1617_v5  ;;  %v2035_v15 = vld [vmem:[%s2759_s4 + $0x84] ss:$16 sps:$4 sm:$0xff]   ;;  %v2047_v17 = vld [vmem:[%s2759_s4 + $0xc8] ss:$16 sps:$4 sm:$0xff]   ;;  %v2054_v18 = vld [vmem:[%s2759_s4 + $0x80] ss:$16 sps:$4 sm:$0xff]  }
   0x7   :  { %577 = vmatpush1.bf16.msra.mxu0 %v1986_v7  ;;  %176 = vmatprep.mubr.bf16.mxu0 %v2763_v2  ;;  %v2059_v19 = vld [vmem:[%s2759_s4 + $0xac] ss:$16 sps:$4 sm:$0xff]   ;;  %v2066_v20 = vld [vmem:[%s2759_s4 + $0x64] ss:$16 sps:$4 sm:$0xff]   ;;  %v2076_v22 = vld [vmem:[%s2759_s4 + $0x60] ss:$16 sps:$4 sm:$0xff]  }
   0x8   :  { %578 = vmatprep.subr.bf16.mxu0 %v1991_v8  ;;  %269 = vmatprep.mubr.bf16.mxu1 %v2763_v2  ;;  %v1628_v21 = vld [vmem:[%s2755_s0 + $0x10] sm:$0xff]   ;;  %v2083_v23 = vld [vmem:[%s2759_s4 + $0xa8] ss:$16 sps:$4 sm:$0xff]   ;;  %v2089_v24 = vld [vmem:[%s2759_s4 + $0x8c] ss:$16 sps:$4 sm:$0xff]  }
   0x9   :  { %620 = vmatpush1.bf16.msra.mxu1 %v2018_v12  ;;  %v2094_v25 = vld [vmem:[%s2759_s4 + $0x44] ss:$16 sps:$4 sm:$0xff]   ;;  %v2103_v26 = vld [vmem:[%s2759_s4 + $0x88] ss:$16 sps:$4 sm:$0xff]   ;;  %v2108_v27 = vld [vmem:[%s2759_s4 + $0x40] ss:$16 sps:$4 sm:$0xff]  }
   0xa   :  { %621 = vmatprep.subr.bf16.mxu1 %v2040_v16  ;;  %v2115_v28 = vld [vmem:[%s2759_s4 + $0x6c] ss:$16 sps:$4 sm:$0xff]   ;;  %v2122_v29 = vld [vmem:[%s2759_s4 + $0x24] ss:$16 sps:$4 sm:$0xff]   ;;  %v2132_v31 = vld [vmem:[%s2759_s4 + $0x68] ss:$16 sps:$4 sm:$0xff]  }
   0xb   :  { %579 = vmatpush1.bf16.msra.mxu0 %v2001_v9  ;;  %v1638_v30 = vld [vmem:[%s2755_s0 + $0x18] sm:$0xff]   ;;  %v2137_v32 = vld [vmem:[%s2759_s4 + $0x20] ss:$16 sps:$4 sm:$0xff]   ;;  %v2149_v34 = vld [vmem:[%s2759_s4 + $0x4] ss:$16 sps:$4 sm:$0xff]  }
   0xc   :  { %580 = vmatprep.subr.bf16.mxu0 %v2008_v10  ;;  %v2144_v33 = vld [vmem:[%s2759_s4 + $0x4c] ss:$16 sps:$4 sm:$0xff]  }
   0xd   :  { %622 = vmatpush1.bf16.msra.mxu1 %v2047_v17 }
   0xe   :  { %1528 = vmatmul.mubr.msk.bf16.gmra.mxu0 %vm115_vm0, %v1624_v13  ;;  %1534 = vmatmul.mubr.msk.bf16.gmra.mxu1 %vm115_vm0, %v1624_v13 }
   0xf   :  { %581 = vmatpush1.bf16.msra.mxu0 %v2027_v14  ;;  %186 = vmatprep.mubr.bf16.mxu0 %v2763_v2 }
  0x10   :  { %279 = vmatprep.mubr.bf16.mxu1 %v2763_v2  ;;  %582 = vmatprep.subr.bf16.mxu0 %v2035_v15 }
  0x11   :  { %623 = vmatprep.subr.bf16.mxu1 %v2059_v19 }
  0x12   :  { %624 = vmatpush1.bf16.msra.mxu1 %v2083_v23 }
  0x13   :  { %583 = vmatpush1.bf16.msra.mxu0 %v2054_v18  ;;  %625 = vmatprep.subr.bf16.mxu1 %v2089_v24 }
  0x14   :  { %584 = vmatprep.subr.bf16.mxu0 %v2066_v20 }
  0x16   :  { %1529 = vmatmul.mubr.msk.bf16.gmra.mxu0 %vm115_vm0, %v1628_v21  ;;  %1535 = vmatmul.mubr.msk.bf16.gmra.mxu1 %vm115_vm0, %v1628_v21 }
  0x17   :  { %196 = vmatprep.mubr.bf16.mxu0 %v2763_v2  ;;  %289 = vmatprep.mubr.bf16.mxu1 %v2763_v2 }
  0x18   :  { %585 = vmatpush1.bf16.msra.mxu0 %v2076_v22  ;;  %626 = vmatpush1.bf16.msra.mxu1 %v2103_v26 }
  0x19   :  { %586 = vmatprep.subr.bf16.mxu0 %v2094_v25  ;;  %627 = vmatprep.subr.bf16.mxu1 %v2115_v28 }
  0x1c   :  { %587 = vmatpush1.bf16.msra.mxu0 %v2108_v27 }
  0x1d   :  { %588 = vmatprep.subr.bf16.mxu0 %v2122_v29 }
  0x1e   :  { %1530 = vmatmul.mubr.msk.bf16.gmra.mxu0 %vm115_vm0, %v1638_v30  ;;  %1536 = vmatmul.mubr.msk.bf16.gmra.mxu1 %vm115_vm0, %v1638_v30 }
  0x1f   :  { %13 = vsyncpa [#allocation4], 0  ;;  %206 = vmatprep.mubr.bf16.mxu0 %v2763_v2  ;;  %299 = vmatprep.mubr.bf16.mxu1 %v2763_v2  ;;  %v2160_v35 = vld [vmem:[%s2759_s4 + $0x48] ss:$16 sps:$4 sm:$0xff]   ;;  %v2165_v36 = vld [vmem:[%s2759_s4] ss:$16 sps:$4 sm:$0xff]   ;;  %v45_v46 = vlaneseq }
  0x20   :  { %628 = vmatpush1.bf16.msra.mxu1 %v2132_v31  ;;  %589 = vmatpush1.bf16.msra.mxu0 %v2137_v32  ;;  %v2171_v37 = vld [vmem:[%s2759_s4 + $0x2c] ss:$16 sps:$4 sm:$0xff]   ;;  %v1651_v38 = vld [vmem:[%s2755_s0 + $0x20] sm:$0xff]   ;;  %v2181_v39 = vld [vmem:[%s2759_s4 + $0x28] ss:$16 sps:$4 sm:$0xff]  }
  0x21   :  { %629 = vmatprep.subr.bf16.mxu1 %v2144_v33  ;;  %590 = vmatprep.subr.bf16.mxu0 %v2149_v34  ;;  %v2188_v40 = vld [vmem:[%s2759_s4 + $0xc] ss:$16 sps:$4 sm:$0xff]   ;;  %v2199_v41 = vld [vmem:[%s2759_s4 + $0x8] ss:$16 sps:$4 sm:$0xff]   ;;  %v400_v43 = vld [vmem:[%s2756_s1] sm:$0xff]  ;;  %v46_v47 = vshrl.u32 %v45_v46, 7 }
  0x22   :  { %v1661_v42 = vld [vmem:[%s2755_s0 + $0x28] sm:$0xff]   ;;  %v43_v54 = vld [vmem:[%s2760_s5] sm:$0xf] }
  0x23   :  { %v401_v44 = vld [vmem:[%s2756_s1 + $0x8] sm:$0xff]  ;;  %v47_v52 = vsub.s32 0, %v46_v47  ;;  %v55_v53 = vsub.s32 2, %v46_v47  ;;  %v51_v57 = vsub.s32 1, %v46_v47  ;;  %v59_v58 = vsub.s32 3, %v46_v47 }
  0x24   :  { %630 = vmatpush1.bf16.msra.mxu1 %v2160_v35  ;;  %591 = vmatpush1.bf16.msra.mxu0 %v2165_v36  ;;  %v415_v45 = vpack.c.bf16 %v401_v44, %v400_v43 }
  0x25   :  { %631 = vmatprep.subr.bf16.mxu1 %v2171_v37  ;;  %730 = vmatprep.subr.bf16.mxu0 %v1981_v6  ;;  %v2270_v61 = vrot.slane %v43_v54, %v47_v52  ;;  %v2272_v62 = vrot.slane %v43_v54, %v55_v53  ;;  %v2274_v1 = vrot.slane %v43_v54, %v51_v57 }
  0x26   :  { %1531 = vmatmul.mubr.msk.bf16.gmra.mxu0 %vm115_vm0, %v1651_v38  ;;  %1537 = vmatmul.mubr.msk.bf16.gmra.mxu1 %vm115_vm0, %v1651_v38  ;;  %v2276_v3 = vrot.slane %v43_v54, %v59_v58 }
  0x27   :  { %216 = vmatprep.mubr.bf16.mxu0 %v2763_v2  ;;  %309 = vmatprep.mubr.bf16.mxu1 %v2763_v2 }
  0x28   :  { %632 = vmatpush1.bf16.msra.mxu1 %v2181_v39 }
  0x29   :  { %633 = vmatprep.subr.bf16.mxu1 %v2188_v40 }
  0x2c   :  { %634 = vmatpush1.bf16.msra.mxu1 %v2199_v41 }
  0x2d   :  { %773 = vmatprep.subr.bf16.mxu1 %v2013_v11 }
  0x2e   :  { %1532 = vmatmul.mubr.msk.bf16.gmra.mxu0 %vm115_vm0, %v1661_v42  ;;  %1538 = vmatmul.mubr.msk.bf16.gmra.mxu1 %vm115_vm0, %v1661_v42 }
  0x2f   :  { %608 = vmatprep.mubr.bf16.mxu0 %v2763_v2  ;;  %651 = vmatprep.mubr.bf16.mxu1 %v2763_v2 }
  0x36   :  { %609 = vmatmul.mubr.bf16.vlgmr.msra.gmra.mxu0 %v415_v45  ;;  %652 = vmatmul.mubr.bf16.vlgmr.msra.gmra.mxu1 %v415_v45 }
  0x37   :  { %731 = vmatpush1.bf16.msra.mxu0 %v1986_v7  ;;  %774 = vmatpush1.bf16.msra.mxu1 %v2018_v12 }
  0x38   :  { %732 = vmatprep.subr.bf16.mxu0 %v1991_v8  ;;  %775 = vmatprep.subr.bf16.mxu1 %v2040_v16 }
  0x39   :  { %762 = vmatprep.mubr.bf16.mxu0 %v2763_v2  ;;  %805 = vmatprep.mubr.bf16.mxu1 %v2763_v2 }
  0x3b   :  { %733 = vmatpush1.bf16.msra.mxu0 %v2001_v9  ;;  %776 = vmatpush1.bf16.msra.mxu1 %v2047_v17 }
  0x3c   :  { %734 = vmatprep.subr.bf16.mxu0 %v2008_v10  ;;  %777 = vmatprep.subr.bf16.mxu1 %v2059_v19 }
  0x3f   :  { %735 = vmatpush1.bf16.msra.mxu0 %v2027_v14  ;;  %778 = vmatpush1.bf16.msra.mxu1 %v2083_v23 }
  0x40   :  { %736 = vmatprep.subr.bf16.mxu0 %v2035_v15  ;;  %779 = vmatprep.subr.bf16.mxu1 %v2089_v24 }
  0x43   :  { %737 = vmatpush1.bf16.msra.mxu0 %v2054_v18  ;;  %780 = vmatpush1.bf16.msra.mxu1 %v2103_v26 }
  0x44   :  { %738 = vmatprep.subr.bf16.mxu0 %v2066_v20  ;;  %781 = vmatprep.subr.bf16.mxu1 %v2115_v28 }
  0x47   :  { %739 = vmatpush1.bf16.msra.mxu0 %v2076_v22  ;;  %782 = vmatpush1.bf16.msra.mxu1 %v2132_v31 }
  0x48   :  { %740 = vmatprep.subr.bf16.mxu0 %v2094_v25  ;;  %783 = vmatprep.subr.bf16.mxu1 %v2144_v33 }
  0x4b   :  { %741 = vmatpush1.bf16.msra.mxu0 %v2108_v27  ;;  %784 = vmatpush1.bf16.msra.mxu1 %v2160_v35 }
  0x4c   :  { %742 = vmatprep.subr.bf16.mxu0 %v2122_v29  ;;  %785 = vmatprep.subr.bf16.mxu1 %v2171_v37 }
  0x4f   :  { %743 = vmatpush1.bf16.msra.mxu0 %v2137_v32  ;;  %786 = vmatpush1.bf16.msra.mxu1 %v2181_v39 }
  0x50   :  { %744 = vmatprep.subr.bf16.mxu0 %v2149_v34  ;;  %787 = vmatprep.subr.bf16.mxu1 %v2188_v40 }
  0x53   :  { %745 = vmatpush1.bf16.msra.mxu0 %v2165_v36  ;;  %788 = vmatpush1.bf16.msra.mxu1 %v2199_v41 }
  0x54   :  { %884 = vmatprep.subr.bf16.mxu0 %v1981_v6  ;;  %927 = vmatprep.subr.bf16.mxu1 %v2013_v11 }
  0xc6   :  { %v2251_v48 = vpop.f32.mrf.mxu0  ;;  %v2253_v49 = vpop.f32.mrf.mxu1 }
  0xc8   :  { %v2255_v50 = vpop.f32.mrf.mxu0  ;;  %v2257_v51 = vpop.f32.mrf.mxu1 }
  0xca   :  { %v2262_v55 = vpop.f32.mrf.mxu0  ;;  %v2264_v56 = vpop.f32.mrf.mxu1 }
  0xcc   :  { %v2266_v59 = vpop.f32.mrf.mxu0  ;;  %v2268_v60 = vpop.f32.mrf.mxu1 }
  0xce   :  { %v178_v63 = vpop.f32.mrf.mxu0  ;;  %v271_v0 = vpop.f32.mrf.mxu1 }
  0xcf   :  { %v2279_v4 = vadd.f32 %v178_v63, %v2270_v61  ;;  %v2282_v5 = vadd.f32 %v271_v0, %v2272_v62 }
  0xd0   :  { %v180_v13 = vpop.f32.mrf.mxu0  ;;  %v273_v21 = vpop.f32.mrf.mxu1 }
  0xd1   :  { %2765 = vst [vmem:[#allocation6_spill] sm:$0xff] %v2282_v5  ;;  %v2285_v30 = vadd.f32 %v180_v13, %v2274_v1  ;;  %v2288_v38 = vadd.f32 %v273_v21, %v2276_v3 }
  0xd2   :  { %v182_v42 = vpop.f32.mrf.mxu0  ;;  %v275_v43 = vpop.f32.mrf.mxu1 }
  0xd3   :  { %v2291_v44 = vadd.f32 %v182_v42, %v2270_v61  ;;  %v2294_v45 = vadd.f32 %v275_v43, %v2272_v62 }
  0xd4   :  { %v184_v46 = vpop.f32.mrf.mxu0  ;;  %v277_v47 = vpop.f32.mrf.mxu1 }
  0xd5   :  { %2766 = vst [vmem:[#allocation7_spill] sm:$0xff] %v2294_v45  ;;  %v2297_v52 = vadd.f32 %v184_v46, %v2274_v1  ;;  %v2300_v53 = vadd.f32 %v277_v47, %v2276_v3 }
  0xd6   :  { %v188_v54 = vpop.f32.mrf.mxu0  ;;  %v281_v57 = vpop.f32.mrf.mxu1 }
  0xd7   :  { %2767 = vst [vmem:[#allocation8_spill] sm:$0xff] %v2300_v53  ;;  %v2303_v58 = vadd.f32 %v188_v54, %v2270_v61  ;;  %v2306_v63 = vadd.f32 %v281_v57, %v2272_v62 }
  0xd8   :  { %v190_v0 = vpop.f32.mrf.mxu0  ;;  %v283_v13 = vpop.f32.mrf.mxu1 }
  0xd9   :  { %2768 = vst [vmem:[#allocation9_spill] sm:$0xff] %v2303_v58  ;;  %2769 = vst [vmem:[#allocation10_spill] sm:$0xff] %v2306_v63  ;;  %v2309_v21 = vadd.f32 %v190_v0, %v2274_v1  ;;  %v2312_v42 = vadd.f32 %v283_v13, %v2276_v3 }
  0xda   :  { %v192_v43 = vpop.f32.mrf.mxu0  ;;  %v285_v46 = vpop.f32.mrf.mxu1 }
  0xdb   :  { %2770 = vst [vmem:[#allocation11_spill] sm:$0xff] %v2309_v21  ;;  %2771 = vst [vmem:[#allocation12_spill] sm:$0xff] %v2312_v42  ;;  %v2315_v47 = vadd.f32 %v192_v43, %v2270_v61  ;;  %v2318_v2 = vadd.f32 %v285_v46, %v2272_v62 }
  0xdc   :  { %v194_v54 = vpop.f32.mrf.mxu0  ;;  %v287_v58 = vpop.f32.mrf.mxu1 }
  0xdd   :  { %2772 = vst [vmem:[#allocation13_spill] sm:$0xff] %v2315_v47  ;;  %2773 = vst [vmem:[#allocation14_spill] sm:$0xff] %v2318_v2  ;;  %v2321_v57 = vadd.f32 %v194_v54, %v2274_v1  ;;  %v2324_v63 = vadd.f32 %v287_v58, %v2276_v3 }
  0xde   :  { %v198_v0 = vpop.f32.mrf.mxu0  ;;  %v291_v21 = vpop.f32.mrf.mxu1 }
  0xdf   :  { %2774 = vst [vmem:[#allocation15_spill] sm:$0xff] %v2321_v57  ;;  %2775 = vst [vmem:[#allocation16_spill] sm:$0xff] %v2324_v63  ;;  %v2327_v13 = vadd.f32 %v198_v0, %v2270_v61  ;;  %v2330_v42 = vadd.f32 %v291_v21, %v2272_v62 }
  0xe0   :  { %v200_v43 = vpop.f32.mrf.mxu0  ;;  %v293_v47 = vpop.f32.mrf.mxu1 }
  0xe1   :  { %2776 = vst [vmem:[#allocation17_spill] sm:$0xff] %v2327_v13  ;;  %2777 = vst [vmem:[#allocation18_spill] sm:$0xff] %v2330_v42  ;;  %v2333_v46 = vadd.f32 %v200_v43, %v2274_v1  ;;  %v2336_v2 = vadd.f32 %v293_v47, %v2276_v3 }
  0xe2   :  { %v202_v54 = vpop.f32.mrf.mxu0  ;;  %v295_v57 = vpop.f32.mrf.mxu1 }
  0xe3   :  { %2778 = vst [vmem:[#allocation19_spill] sm:$0xff] %v2333_v46  ;;  %2779 = vst [vmem:[#allocation20_spill] sm:$0xff] %v2336_v2  ;;  %v2339_v58 = vadd.f32 %v202_v54, %v2270_v61  ;;  %v2342_v63 = vadd.f32 %v295_v57, %v2272_v62 }
  0xe4   :  { %v204_v0 = vpop.f32.mrf.mxu0  ;;  %v297_v13 = vpop.f32.mrf.mxu1 }
  0xe5   :  { %2780 = vst [vmem:[#allocation21_spill] sm:$0xff] %v2339_v58  ;;  %2781 = vst [vmem:[#allocation22_spill] sm:$0xff] %v2342_v63  ;;  %v2345_v21 = vadd.f32 %v204_v0, %v2274_v1  ;;  %v2348_v42 = vadd.f32 %v297_v13, %v2276_v3 }
  0xe6   :  { %v208_v43 = vpop.f32.mrf.mxu0  ;;  %v301_v46 = vpop.f32.mrf.mxu1 }
  0xe7   :  { %2782 = vst [vmem:[#allocation23_spill] sm:$0xff] %v2345_v21  ;;  %2783 = vst [vmem:[#allocation24_spill] sm:$0xff] %v2348_v42  ;;  %v2351_v47 = vadd.f32 %v208_v43, %v2270_v61  ;;  %v2354_v2 = vadd.f32 %v301_v46, %v2272_v62 }
  0xe8   :  { %v210_v54 = vpop.f32.mrf.mxu0  ;;  %v303_v58 = vpop.f32.mrf.mxu1 }
  0xe9   :  { %2784 = vst [vmem:[#allocation25_spill] sm:$0xff] %v2351_v47  ;;  %2785 = vst [vmem:[#allocation26_spill] sm:$0xff] %v2354_v2  ;;  %v2357_v57 = vadd.f32 %v210_v54, %v2274_v1  ;;  %v2360_v63 = vadd.f32 %v303_v58, %v2276_v3 }
  0xea   :  { %v212_v0 = vpop.f32.mrf.mxu0  ;;  %v305_v21 = vpop.f32.mrf.mxu1 }
  0xeb   :  { %2786 = vst [vmem:[#allocation27_spill] sm:$0xff] %v2357_v57  ;;  %2787 = vst [vmem:[#allocation28_spill] sm:$0xff] %v2360_v63  ;;  %v2363_v13 = vadd.f32 %v212_v0, %v2270_v61  ;;  %v2366_v42 = vadd.f32 %v305_v21, %v2272_v62 }
  0xec   :  { %v214_v43 = vpop.f32.mrf.mxu0  ;;  %v307_v47 = vpop.f32.mrf.mxu1 }
  0xed   :  { %2788 = vst [vmem:[#allocation29_spill] sm:$0xff] %v2363_v13  ;;  %2789 = vst [vmem:[#allocation30_spill] sm:$0xff] %v2366_v42  ;;  %v2369_v46 = vadd.f32 %v214_v43, %v2274_v1  ;;  %v2372_v2 = vadd.f32 %v307_v47, %v2276_v3 }
  0xee   :  { %v218_v54 = vpop.f32.mrf.mxu0  ;;  %v311_v57 = vpop.f32.mrf.mxu1 }
  0xef   :  { %2790 = vst [vmem:[#allocation31_spill] sm:$0xff] %v2369_v46  ;;  %2791 = vst [vmem:[#allocation32_spill] sm:$0xff] %v2372_v2  ;;  %v2375_v58 = vadd.f32 %v218_v54, %v2270_v61  ;;  %v2378_v63 = vadd.f32 %v311_v57, %v2272_v62  ;;  %v169_v57 = vadd.f32 %v2251_v48, %v2270_v61 }
  0xf0   :  { %v220_v0 = vpop.f32.mrf.mxu0  ;;  %v313_v13 = vpop.f32.mrf.mxu1  ;;  %v175_v48 = vadd.f32 %v2266_v59, %v2274_v1 }
  0xf1   :  { %2792 = vst [vmem:[#allocation33_spill] sm:$0xff] %v2375_v58  ;;  %2793 = vst [vmem:[#allocation34_spill] sm:$0xff] %v2378_v63  ;;  %v2381_v21 = vadd.f32 %v220_v0, %v2274_v1  ;;  %v2384_v42 = vadd.f32 %v313_v13, %v2276_v3 }
  0xf2   :  { %v222_v43 = vpop.f32.mrf.mxu0  ;;  %v315_v46 = vpop.f32.mrf.mxu1 }
  0xf3   :  { %2794 = vst [vmem:[#allocation35_spill] sm:$0xff] %v2381_v21  ;;  %2795 = vst [vmem:[#allocation36_spill] sm:$0xff] %v2384_v42  ;;  %v2387_v47 = vadd.f32 %v222_v43, %v2270_v61  ;;  %v2390_v2 = vadd.f32 %v315_v46, %v2272_v62  ;;  %v171_v42 = vadd.f32 %v2255_v50, %v2274_v1 }
  0xf4   :  { %v224_v54 = vpop.f32.mrf.mxu0  ;;  %v317_v58 = vpop.f32.mrf.mxu1  ;;  %v173_v46 = vadd.f32 %v2262_v55, %v2270_v61  ;;  %v264_v55 = vadd.f32 %v2257_v51, %v2276_v3 }
  0xf5   :  { %2796 = vst [vmem:[#allocation37_spill] sm:$0xff] %v2387_v47  ;;  %2797 = vst [vmem:[#allocation38_spill] sm:$0xff] %v2390_v2  ;;  %v2395_v63 = vadd.f32 %v224_v54, %v2274_v1  ;;  %v2398_v0 = vadd.f32 %v317_v58, %v2276_v3 }
  0xf6   :  { %v610_v13 = vpop.f32.mrf.mxu0  ;;  %v653_v47 = vpop.f32.mrf.mxu1 }
  0xf7   :  { %2798 = vst [vmem:[#allocation39_spill] sm:$0xff] %v2395_v63  ;;  %2799 = vst [vmem:[#allocation40_spill] sm:$0xff] %v2398_v0  ;;  %v662_v43 = vadd.f32 %v610_v13, %v169_v57 }
  0xf8   :  { %v612_v21 = vpop.f32.mrf.mxu0  ;;  %v655_v58 = vpop.f32.mrf.mxu1 }
  0xf9   :  { %v1571_v2 = vmul.f32 -1.442695, %v662_v43  ;;  %v663_v45 = vadd.f32 %v612_v21, %v171_v42  ;;  %v262_v42 = vadd.f32 %v2253_v49, %v2272_v62  ;;  %v665_v59 = vadd.f32 %v655_v58, %v264_v55 }
  0xfa   :  { %v614_v53 = vpop.f32.mrf.mxu0  ;;  %v657_v57 = vpop.f32.mrf.mxu1 }
  0xfb   :  { %1671 = vpow2.f32 %v1571_v2  ;;  %v1573_v54 = vmul.f32 -1.442695, %v663_v45  ;;  %v666_v0 = vadd.f32 %v614_v53, %v173_v46  ;;  %v268_v2 = vadd.f32 %v2268_v60, %v2276_v3 }
  0xfc   :  { %v616_v63 = vpop.f32.mrf.mxu0  ;;  %v659_v61 = vpop.f32.mrf.mxu1  ;;  %v664_v1 = vadd.f32 %v653_v47, %v262_v42  ;;  %v1575_v21 = vmul.f32 -1.442695, %v665_v59  ;;  %v403_v42 = vld [vmem:[%s2757_s2 + $0x8] sm:$0xff] }
  0xfd   :  { %1673 = vpow2.f32 %v1573_v54  ;;  %v1572_v5 = vmul.f32 -1.442695, %v666_v0  ;;  %v667_v50 = vadd.f32 %v616_v63, %v175_v48  ;;  %v669_v45 = vadd.f32 %v659_v61, %v268_v2 }
  0xfe   :  { %v266_v0 = vadd.f32 %v2264_v56, %v2272_v62  ;;  %v402_v56 = vld [vmem:[%s2757_s2] sm:$0xff] }
  0xff   :  { %1675 = vpow2.f32 %v1572_v5  ;;  %v1574_v13 = vmul.f32 -1.442695, %v667_v50  ;;  %v1576_v43 = vmul.f32 -1.442695, %v669_v45 }
 0x100   :  { %v668_v49 = vadd.f32 %v657_v57, %v266_v0 }
 0x101   :  { %1677 = vpow2.f32 %v1574_v13 }
 0x102   :  { %1679 = vtanh.f32 %v664_v1 }
 0x108   :  { %v1672_v53 = vpop.eup %1671 }
 0x109   :  { %v676_v63 = vadd.f32 1.0, %v1672_v53 }
 0x10a   :  { %v1674_v5 = vpop.eup %1673 }
 0x10b   :  { %1681 = vrcp.f32 %v676_v63  ;;  %v688_v51 = vadd.f32 1.0, %v1674_v5 }
 0x10c   :  { %v1676_v46 = vpop.eup %1675  ;;  %1683 = vpow2.f32 %v1575_v21 }
 0x10d   :  { %1685 = vrcp.f32 %v688_v51  ;;  %v677_v48 = vadd.f32 1.0, %v1676_v46 }
 0x10e   :  { %v1678_v60 = vpop.eup %1677  ;;  %1687 = vpow2.f32 %v1576_v43 }
 0x10f   :  { %1689 = vrcp.f32 %v677_v48  ;;  %v689_v3 = vadd.f32 1.0, %v1678_v60  ;;  %v1680_v47 = vpop.eup %1679  ;;  %v2800_v60 = vmov 0  }
 0x110   :  { %1691 = vtanh.f32 %v668_v49 }
 0x111   :  { %1693 = vrcp.f32 %v689_v3 }
 0x118   :  { %v1682_v54 = vpop.eup %1681 }
 0x119   :  { %v1684_v62 = vpop.eup %1683  ;;  %v710_v13 = vmul.f32 %v1682_v54, %v1680_v47 }
 0x11a   :  { %v1686_v58 = vpop.eup %1685  ;;  %v702_v61 = vadd.f32 1.0, %v1684_v62 }
 0x11b   :  { %v1688_v50 = vpop.eup %1687  ;;  %v708_v55 = vmul.f32 %v1686_v58, %v402_v56 }
 0x11c   :  { %v1690_v57 = vpop.eup %1689  ;;  %v703_v45 = vadd.f32 1.0, %v1688_v50  ;;  %1695 = vrcp.f32 %v702_v61 }
 0x11d   :  { %v1692_v2 = vpop.eup %1691  ;;  %v2420_v59 = vadd.f32 %v710_v13, %v708_v55 }
 0x11e   :  { %v1694_v1 = vpop.eup %1693  ;;  %v711_v53 = vmul.f32 %v1692_v2, %v1690_v57 }
 0x11f   :  { %v709_v21 = vmul.f32 %v1694_v1, %v403_v42  ;;  %1697 = vtanh.f32 %v2420_v59 }
 0x120   :  { %1699 = vrcp.f32 %v703_v45 }
 0x121   :  { %v2422_v63 = vadd.f32 %v711_v53, %v709_v21  ;;  %v2801_v21 = vld [vmem:[#allocation6_spill] sm:$0xff] }
 0x123   :  { %1701 = vtanh.f32 %v2422_v63 }
 0x129   :  { %v1696_v5 = vpop.eup %1695 }
 0x12c   :  { %v1698_v0 = vpop.eup %1697 }
 0x12d   :  { %v1700_v43 = vpop.eup %1699  ;;  %v716_v46 = vmul.f32 %v1698_v0, %v1696_v5  ;;  %v2802_v0 = vld [vmem:[#allocation8_spill] sm:$0xff] }
 0x130   :  { %v1702_v51 = vpop.eup %1701 }
 0x131   :  { %v717_v49 = vmul.f32 %v1702_v51, %v1700_v43 }
 0x133   :  { %v729_v48 = vpack.c.bf16 %v717_v49, %v716_v46  ;;  %v2803_v46 = vld [vmem:[#allocation7_spill] sm:$0xff] }
 0x135   :  { %763 = vmatmul.mubr.bf16.vlgmr.msra.gmra.mxu0 %v729_v48  ;;  %806 = vmatmul.mubr.bf16.vlgmr.msra.gmra.mxu1 %v729_v48 }
 0x136   :  { %885 = vmatpush1.bf16.msra.mxu0 %v1986_v7  ;;  %928 = vmatpush1.bf16.msra.mxu1 %v2018_v12 }
 0x137   :  { %886 = vmatprep.subr.bf16.mxu0 %v1991_v8  ;;  %929 = vmatprep.subr.bf16.mxu1 %v2040_v16 }
 0x138   :  { %916 = vmatprep.mubr.bf16.mxu0 %v2800_v60  ;;  %959 = vmatprep.mubr.bf16.mxu1 %v2800_v60 }
 0x13a   :  { %887 = vmatpush1.bf16.msra.mxu0 %v2001_v9  ;;  %930 = vmatpush1.bf16.msra.mxu1 %v2047_v17 }
 0x13b   :  { %888 = vmatprep.subr.bf16.mxu0 %v2008_v10  ;;  %931 = vmatprep.subr.bf16.mxu1 %v2059_v19 }
 0x13e   :  { %889 = vmatpush1.bf16.msra.mxu0 %v2027_v14  ;;  %932 = vmatpush1.bf16.msra.mxu1 %v2083_v23 }
 0x13f   :  { %890 = vmatprep.subr.bf16.mxu0 %v2035_v15  ;;  %933 = vmatprep.subr.bf16.mxu1 %v2089_v24 }
 0x142   :  { %891 = vmatpush1.bf16.msra.mxu0 %v2054_v18  ;;  %934 = vmatpush1.bf16.msra.mxu1 %v2103_v26 }
 0x143   :  { %892 = vmatprep.subr.bf16.mxu0 %v2066_v20  ;;  %935 = vmatprep.subr.bf16.mxu1 %v2115_v28 }
 0x146   :  { %893 = vmatpush1.bf16.msra.mxu0 %v2076_v22  ;;  %936 = vmatpush1.bf16.msra.mxu1 %v2132_v31 }
 0x147   :  { %894 = vmatprep.subr.bf16.mxu0 %v2094_v25  ;;  %937 = vmatprep.subr.bf16.mxu1 %v2144_v33 }
 0x14a   :  { %895 = vmatpush1.bf16.msra.mxu0 %v2108_v27  ;;  %938 = vmatpush1.bf16.msra.mxu1 %v2160_v35 }
 0x14b   :  { %896 = vmatprep.subr.bf16.mxu0 %v2122_v29  ;;  %939 = vmatprep.subr.bf16.mxu1 %v2171_v37 }
 0x14e   :  { %897 = vmatpush1.bf16.msra.mxu0 %v2137_v32  ;;  %940 = vmatpush1.bf16.msra.mxu1 %v2181_v39 }
 0x14f   :  { %898 = vmatprep.subr.bf16.mxu0 %v2149_v34  ;;  %941 = vmatprep.subr.bf16.mxu1 %v2188_v40 }
 0x152   :  { %899 = vmatpush1.bf16.msra.mxu0 %v2165_v36  ;;  %942 = vmatpush1.bf16.msra.mxu1 %v2199_v41 }
 0x153   :  { %1038 = vmatprep.subr.bf16.mxu0 %v1981_v6  ;;  %1081 = vmatprep.subr.bf16.mxu1 %v2013_v11 }
 0x1f5   :  { %v764_v3 = vpop.f32.mrf.mxu0  ;;  %v807_v54 = vpop.f32.mrf.mxu1 }
 0x1f6   :  { %v816_v47 = vadd.f32 %v764_v3, %v2279_v4 }
 0x1f7   :  { %v766_v56 = vpop.f32.mrf.mxu0  ;;  %v809_v55 = vpop.f32.mrf.mxu1 }
 0x1f8   :  { %v1577_v62 = vmul.f32 -1.442695, %v816_v47  ;;  %v817_v58 = vadd.f32 %v766_v56, %v2285_v30  ;;  %v819_v4 = vadd.f32 %v809_v55, %v2288_v38  ;;  %v818_v30 = vadd.f32 %v807_v54, %v2801_v21 }
 0x1f9   :  { %v768_v50 = vpop.f32.mrf.mxu0  ;;  %v811_v1 = vpop.f32.mrf.mxu1 }
 0x1fa   :  { %1703 = vpow2.f32 %v1577_v62  ;;  %v1579_v13 = vmul.f32 -1.442695, %v817_v58  ;;  %v820_v57 = vadd.f32 %v768_v50, %v2291_v44  ;;  %v1581_v5 = vmul.f32 -1.442695, %v819_v4 }
 0x1fb   :  { %v770_v61 = vpop.f32.mrf.mxu0  ;;  %v813_v53 = vpop.f32.mrf.mxu1  ;;  %v822_v44 = vadd.f32 %v811_v1, %v2803_v46 }
 0x1fc   :  { %1705 = vpow2.f32 %v1579_v13  ;;  %v1578_v42 = vmul.f32 -1.442695, %v820_v57  ;;  %v821_v2 = vadd.f32 %v770_v61, %v2297_v52  ;;  %v823_v43 = vadd.f32 %v813_v53, %v2802_v0 }
 0x1fe   :  { %1707 = vpow2.f32 %v1578_v42  ;;  %v1580_v45 = vmul.f32 -1.442695, %v821_v2  ;;  %v1582_v52 = vmul.f32 -1.442695, %v823_v43 }
 0x200   :  { %1709 = vpow2.f32 %v1580_v45 }
 0x201   :  { %1711 = vtanh.f32 %v818_v30 }
 0x202   :  { %1713 = vpow2.f32 %v1581_v5 }
 0x207   :  { %v1704_v51 = vpop.eup %1703 }
 0x208   :  { %v830_v49 = vadd.f32 1.0, %v1704_v51 }
 0x209   :  { %v1706_v48 = vpop.eup %1705 }
 0x20a   :  { %1715 = vrcp.f32 %v830_v49  ;;  %v842_v3 = vadd.f32 1.0, %v1706_v48  ;;  %v2808_v48 = vld [vmem:[#allocation12_spill] sm:$0xff] }
 0x20b   :  { %v1708_v47 = vpop.eup %1707  ;;  %1717 = vtanh.f32 %v822_v44 }
 0x20c   :  { %1719 = vrcp.f32 %v842_v3  ;;  %v831_v38 = vadd.f32 1.0, %v1708_v47  ;;  %v2809_v47 = vld [vmem:[#allocation10_spill] sm:$0xff] }
 0x20d   :  { %v1710_v56 = vpop.eup %1709  ;;  %1721 = vpow2.f32 %v1582_v52 }
 0x20e   :  { %1723 = vrcp.f32 %v831_v38  ;;  %v843_v54 = vadd.f32 1.0, %v1710_v56  ;;  %v1712_v62 = vpop.eup %1711 }
 0x20f   :  { %v1714_v58 = vpop.eup %1713 }
 0x210   :  { %1725 = vrcp.f32 %v843_v54  ;;  %v856_v1 = vadd.f32 1.0, %v1714_v58  ;;  %v2810_v54 = vld [vmem:[#allocation16_spill] sm:$0xff] }
 0x212   :  { %1727 = vrcp.f32 %v856_v1 }
 0x217   :  { %v1716_v50 = vpop.eup %1715 }
 0x218   :  { %v1718_v13 = vpop.eup %1717  ;;  %v864_v55 = vmul.f32 %v1716_v50, %v1712_v62  ;;  %v2811_v50 = vld [vmem:[#allocation14_spill] sm:$0xff] }
 0x219   :  { %v1720_v57 = vpop.eup %1719 }
 0x21a   :  { %v1722_v61 = vpop.eup %1721  ;;  %v862_v42 = vmul.f32 %v1720_v57, %v2420_v59 }
 0x21b   :  { %v1724_v2 = vpop.eup %1723  ;;  %v857_v21 = vadd.f32 1.0, %v1722_v61 }
 0x21c   :  { %v2469_v45 = vadd.f32 %v864_v55, %v862_v42  ;;  %v865_v4 = vmul.f32 %v1724_v2, %v1718_v13 }
 0x21d   :  { %v1726_v53 = vpop.eup %1725 }
 0x21e   :  { %v863_v30 = vmul.f32 %v1726_v53, %v2422_v63  ;;  %1729 = vtanh.f32 %v2469_v45 }
 0x21f   :  { %1731 = vrcp.f32 %v857_v21  ;;  %v1728_v0 = vpop.eup %1727 }
 0x220   :  { %v2472_v5 = vadd.f32 %v865_v4, %v863_v30 }
 0x222   :  { %1733 = vtanh.f32 %v2472_v5 }
 0x22b   :  { %v1730_v43 = vpop.eup %1729 }
 0x22c   :  { %v1732_v59 = vpop.eup %1731  ;;  %v870_v46 = vmul.f32 %v1730_v43, %v1728_v0 }
 0x22f   :  { %v1734_v51 = vpop.eup %1733 }
 0x230   :  { %v871_v44 = vmul.f32 %v1734_v51, %v1732_v59 }
 0x232   :  { %v883_v49 = vpack.c.bf16 %v871_v44, %v870_v46 }
 0x234   :  { %917 = vmatmul.mubr.bf16.vlgmr.msra.gmra.mxu0 %v883_v49  ;;  %960 = vmatmul.mubr.bf16.vlgmr.msra.gmra.mxu1 %v883_v49 }
 0x235   :  { %1039 = vmatpush1.bf16.msra.mxu0 %v1986_v7  ;;  %1082 = vmatpush1.bf16.msra.mxu1 %v2018_v12 }
 0x236   :  { %1040 = vmatprep.subr.bf16.mxu0 %v1991_v8  ;;  %1083 = vmatprep.subr.bf16.mxu1 %v2040_v16  ;;  %v2804_v8 = vld [vmem:[#allocation9_spill] sm:$0xff] }
 0x237   :  { %1070 = vmatprep.mubr.bf16.mxu0 %v2800_v60  ;;  %1113 = vmatprep.mubr.bf16.mxu1 %v2800_v60 }
 0x239   :  { %1041 = vmatpush1.bf16.msra.mxu0 %v2001_v9  ;;  %1084 = vmatpush1.bf16.msra.mxu1 %v2047_v17 }
 0x23a   :  { %1042 = vmatprep.subr.bf16.mxu0 %v2008_v10  ;;  %1085 = vmatprep.subr.bf16.mxu1 %v2059_v19 }
 0x23d   :  { %1043 = vmatpush1.bf16.msra.mxu0 %v2027_v14  ;;  %1086 = vmatpush1.bf16.msra.mxu1 %v2083_v23 }
 0x23e   :  { %1044 = vmatprep.subr.bf16.mxu0 %v2035_v15  ;;  %1087 = vmatprep.subr.bf16.mxu1 %v2089_v24  ;;  %v2805_v15 = vld [vmem:[#allocation11_spill] sm:$0xff] }
 0x241   :  { %1045 = vmatpush1.bf16.msra.mxu0 %v2054_v18  ;;  %1088 = vmatpush1.bf16.msra.mxu1 %v2103_v26 }
 0x242   :  { %1046 = vmatprep.subr.bf16.mxu0 %v2066_v20  ;;  %1089 = vmatprep.subr.bf16.mxu1 %v2115_v28  ;;  %v2806_v20 = vld [vmem:[#allocation13_spill] sm:$0xff] }
 0x245   :  { %1047 = vmatpush1.bf16.msra.mxu0 %v2076_v22  ;;  %1090 = vmatpush1.bf16.msra.mxu1 %v2132_v31 }
 0x246   :  { %1048 = vmatprep.subr.bf16.mxu0 %v2094_v25  ;;  %1091 = vmatprep.subr.bf16.mxu1 %v2144_v33 }
 0x249   :  { %1049 = vmatpush1.bf16.msra.mxu0 %v2108_v27  ;;  %1092 = vmatpush1.bf16.msra.mxu1 %v2160_v35 }
 0x24a   :  { %1050 = vmatprep.subr.bf16.mxu0 %v2122_v29  ;;  %1093 = vmatprep.subr.bf16.mxu1 %v2171_v37 }
 0x24d   :  { %1051 = vmatpush1.bf16.msra.mxu0 %v2137_v32  ;;  %1094 = vmatpush1.bf16.msra.mxu1 %v2181_v39 }
 0x24e   :  { %1052 = vmatprep.subr.bf16.mxu0 %v2149_v34  ;;  %1095 = vmatprep.subr.bf16.mxu1 %v2188_v40 }
 0x251   :  { %1053 = vmatpush1.bf16.msra.mxu0 %v2165_v36  ;;  %1096 = vmatpush1.bf16.msra.mxu1 %v2199_v41 }
 0x252   :  { %1192 = vmatprep.subr.bf16.mxu0 %v1981_v6  ;;  %1235 = vmatprep.subr.bf16.mxu1 %v2013_v11  ;;  %v2807_v6 = vld [vmem:[#allocation15_spill] sm:$0xff] }
 0x2f4   :  { %v918_v7 = vpop.f32.mrf.mxu0  ;;  %v961_v10 = vpop.f32.mrf.mxu1 }
 0x2f5   :  { %v970_v9 = vadd.f32 %v918_v7, %v2804_v8  ;;  %v972_v38 = vadd.f32 %v961_v10, %v2809_v47  ;;  %v2591_v47 = vld [vmem:[%s2759_s4 + $0x84] ss:$16 sps:$4 sm:$0xff]  }
 0x2f6   :  { %v920_v12 = vpop.f32.mrf.mxu0  ;;  %v963_v19 = vpop.f32.mrf.mxu1 }
 0x2f7   :  { %v1583_v14 = vmul.f32 -1.442695, %v970_v9  ;;  %v971_v16 = vadd.f32 %v920_v12, %v2805_v15  ;;  %v973_v52 = vadd.f32 %v963_v19, %v2808_v48  ;;  %v2573_v48 = vld [vmem:[%s2759_s4 + $0xac] ss:$16 sps:$4 sm:$0xff]  }
 0x2f8   :  { %v922_v17 = vpop.f32.mrf.mxu0  ;;  %v965_v11 = vpop.f32.mrf.mxu1 }
 0x2f9   :  { %1735 = vpow2.f32 %v1583_v14  ;;  %v1585_v18 = vmul.f32 -1.442695, %v971_v16  ;;  %v974_v22 = vadd.f32 %v922_v17, %v2806_v20  ;;  %v1587_v56 = vmul.f32 -1.442695, %v973_v52  ;;  %v2579_v52 = vld [vmem:[%s2759_s4 + $0xa0] ss:$16 sps:$4 sm:$0xff]  }
 0x2fa   :  { %v924_v23 = vpop.f32.mrf.mxu0  ;;  %v967_v3 = vpop.f32.mrf.mxu1  ;;  %v976_v13 = vadd.f32 %v965_v11, %v2811_v50  ;;  %v2561_v11 = vld [vmem:[%s2759_s4 + $0xc8] ss:$16 sps:$4 sm:$0xff]  }
 0x2fb   :  { %1737 = vpow2.f32 %v1585_v18  ;;  %v1584_v24 = vmul.f32 -1.442695, %v974_v22  ;;  %v975_v25 = vadd.f32 %v924_v23, %v2807_v6  ;;  %v977_v62 = vadd.f32 %v967_v3, %v2810_v54  ;;  %v2535_v23 = vld [vmem:[%s2759_s4 + $0xe8] ss:$16 sps:$4 sm:$0xff]   ;;  %v2547_v6 = vld [vmem:[%s2759_s4 + $0xcc] ss:$16 sps:$4 sm:$0xff]  }
 0x2fc   :  { %v2585_v3 = vld [vmem:[%s2759_s4 + $0xa8] ss:$16 sps:$4 sm:$0xff]   ;;  %v2610_v54 = vld [vmem:[%s2759_s4 + $0x64] ss:$16 sps:$4 sm:$0xff]  }
 0x2fd   :  { %1739 = vpow2.f32 %v1584_v24  ;;  %v1586_v63 = vmul.f32 -1.442695, %v975_v25  ;;  %v1588_v61 = vmul.f32 -1.442695, %v977_v62  ;;  %v2541_v24 = vld [vmem:[%s2759_s4 + $0xc4] ss:$16 sps:$4 sm:$0xff]  }
 0x2fe   :  { %v2555_v25 = vld [vmem:[%s2759_s4 + $0xc0] ss:$16 sps:$4 sm:$0xff]  }
 0x2ff   :  { %1741 = vpow2.f32 %v1586_v63  ;;  %v2567_v63 = vld [vmem:[%s2759_s4 + $0xa4] ss:$16 sps:$4 sm:$0xff]   ;;  %v2617_v62 = vld [vmem:[%s2759_s4 + $0x60] ss:$16 sps:$4 sm:$0xff]  }
 0x300   :  { %1743 = vtanh.f32 %v972_v38  ;;  %v2597_v38 = vld [vmem:[%s2759_s4 + $0x8c] ss:$16 sps:$4 sm:$0xff]  }
 0x301   :  { %1745 = vpow2.f32 %v1587_v56  ;;  %v2603_v56 = vld [vmem:[%s2759_s4 + $0x80] ss:$16 sps:$4 sm:$0xff]  }
 0x306   :  { %v1736_v58 = vpop.eup %1735 }
 0x307   :  { %v984_v55 = vadd.f32 1.0, %v1736_v58  ;;  %v2814_v58 = vld [vmem:[#allocation21_spill] sm:$0xff] }
 0x308   :  { %v1738_v57 = vpop.eup %1737 }
 0x309   :  { %1747 = vrcp.f32 %v984_v55  ;;  %v996_v42 = vadd.f32 1.0, %v1738_v57  ;;  %v2815_v57 = vld [vmem:[#allocation23_spill] sm:$0xff] }
 0x30a   :  { %v1740_v2 = vpop.eup %1739  ;;  %1749 = vtanh.f32 %v976_v13 }
 0x30b   :  { %1751 = vrcp.f32 %v996_v42  ;;  %v985_v1 = vadd.f32 1.0, %v1740_v2 }
 0x30c   :  { %v1742_v4 = vpop.eup %1741  ;;  %1753 = vpow2.f32 %v1588_v61 }
 0x30d   :  { %1755 = vrcp.f32 %v985_v1  ;;  %v997_v53 = vadd.f32 1.0, %v1742_v4  ;;  %v1744_v21 = vpop.eup %1743  ;;  %v2816_v1 = vld [vmem:[#allocation20_spill] sm:$0xff] }
 0x30e   :  { %v1746_v30 = vpop.eup %1745 }
 0x30f   :  { %1757 = vrcp.f32 %v997_v53  ;;  %v1010_v7 = vadd.f32 1.0, %v1746_v30 }
 0x311   :  { %1759 = vrcp.f32 %v1010_v7 }
 0x316   :  { %v1748_v0 = vpop.eup %1747 }
 0x317   :  { %v1750_v43 = vpop.eup %1749  ;;  %v1018_v59 = vmul.f32 %v1748_v0, %v1744_v21  ;;  %v2817_v21 = vld [vmem:[#allocation18_spill] sm:$0xff] }
 0x318   :  { %v1752_v51 = vpop.eup %1751 }
 0x319   :  { %v1754_v46 = vpop.eup %1753  ;;  %v1016_v44 = vmul.f32 %v1752_v51, %v2469_v45 }
 0x31a   :  { %v1756_v49 = vpop.eup %1755  ;;  %v1011_v12 = vadd.f32 1.0, %v1754_v46  ;;  %v2819_v46 = vld [vmem:[#allocation22_spill] sm:$0xff] }
 0x31b   :  { %v2519_v8 = vadd.f32 %v1018_v59, %v1016_v44  ;;  %v1019_v9 = vmul.f32 %v1756_v49, %v1750_v43  ;;  %v2818_v43 = vld [vmem:[#allocation24_spill] sm:$0xff] }
 0x31c   :  { %v1758_v10 = vpop.eup %1757 }
 0x31d   :  { %v1017_v14 = vmul.f32 %v1758_v10, %v2472_v5  ;;  %1761 = vtanh.f32 %v2519_v8  ;;  %v2529_v5 = vld [vmem:[%s2759_s4 + $0xe0] ss:$16 sps:$4 sm:$0xff]  }
 0x31e   :  { %1763 = vrcp.f32 %v1011_v12  ;;  %v1760_v16 = vpop.eup %1759 }
 0x31f   :  { %v2522_v15 = vadd.f32 %v1019_v9, %v1017_v14 }
 0x321   :  { %1765 = vtanh.f32 %v2522_v15 }
 0x32a   :  { %v1762_v17 = vpop.eup %1761 }
 0x32b   :  { %v1764_v45 = vpop.eup %1763  ;;  %v1024_v19 = vmul.f32 %v1762_v17, %v1760_v16 }
 0x32e   :  { %v1766_v18 = vpop.eup %1765 }
 0x32f   :  { %v1025_v20 = vmul.f32 %v1766_v18, %v1764_v45 }
 0x331   :  { %v1037_v22 = vpack.c.bf16 %v1025_v20, %v1024_v19 }
 0x333   :  { %1071 = vmatmul.mubr.bf16.vlgmr.msra.gmra.mxu0 %v1037_v22  ;;  %1114 = vmatmul.mubr.bf16.vlgmr.msra.gmra.mxu1 %v1037_v22 }
 0x334   :  { %1193 = vmatpush1.bf16.msra.mxu0 %v2529_v5  ;;  %1236 = vmatpush1.bf16.msra.mxu1 %v2535_v23 }
 0x335   :  { %1194 = vmatprep.subr.bf16.mxu0 %v2541_v24  ;;  %1237 = vmatprep.subr.bf16.mxu1 %v2547_v6 }
 0x336   :  { %1224 = vmatprep.mubr.bf16.mxu0 %v2800_v60  ;;  %1267 = vmatprep.mubr.bf16.mxu1 %v2800_v60 }
 0x338   :  { %1195 = vmatpush1.bf16.msra.mxu0 %v2555_v25  ;;  %1238 = vmatpush1.bf16.msra.mxu1 %v2561_v11 }
 0x339   :  { %1196 = vmatprep.subr.bf16.mxu0 %v2567_v63  ;;  %1239 = vmatprep.subr.bf16.mxu1 %v2573_v48 }
 0x33c   :  { %1197 = vmatpush1.bf16.msra.mxu0 %v2579_v52  ;;  %1240 = vmatpush1.bf16.msra.mxu1 %v2585_v3 }
 0x33d   :  { %1198 = vmatprep.subr.bf16.mxu0 %v2591_v47  ;;  %1241 = vmatprep.subr.bf16.mxu1 %v2597_v38 }
 0x340   :  { %1199 = vmatpush1.bf16.msra.mxu0 %v2603_v56  ;;  %1242 = vmatpush1.bf16.msra.mxu1 %v2103_v26  ;;  %v2624_v26 = vld [vmem:[%s2759_s4 + $0x44] ss:$16 sps:$4 sm:$0xff]  }
 0x341   :  { %1200 = vmatprep.subr.bf16.mxu0 %v2610_v54  ;;  %1243 = vmatprep.subr.bf16.mxu1 %v2115_v28  ;;  %v1880_v28 = vld [vmem:[%s2759_s4 + $0xec] ss:$16 sps:$4 sm:$0xff]  }
 0x344   :  { %1201 = vmatpush1.bf16.msra.mxu0 %v2617_v62  ;;  %1244 = vmatpush1.bf16.msra.mxu1 %v2132_v31  ;;  %v2812_v31 = vld [vmem:[#allocation17_spill] sm:$0xff] }
 0x345   :  { %1202 = vmatprep.subr.bf16.mxu0 %v2624_v26  ;;  %1245 = vmatprep.subr.bf16.mxu1 %v2144_v33 }
 0x348   :  { %1203 = vmatpush1.bf16.msra.mxu0 %v2108_v27  ;;  %1246 = vmatpush1.bf16.msra.mxu1 %v2160_v35  ;;  %v1879_v27 = vld [vmem:[%s2759_s4 + $0xe4] ss:$16 sps:$4 sm:$0xff]  }
 0x349   :  { %1204 = vmatprep.subr.bf16.mxu0 %v2122_v29  ;;  %1247 = vmatprep.subr.bf16.mxu1 %v2171_v37  ;;  %v2813_v37 = vld [vmem:[#allocation19_spill] sm:$0xff] }
 0x34c   :  { %1205 = vmatpush1.bf16.msra.mxu0 %v2137_v32  ;;  %1248 = vmatpush1.bf16.msra.mxu1 %v2181_v39 }
 0x34d   :  { %1206 = vmatprep.subr.bf16.mxu0 %v2149_v34  ;;  %1249 = vmatprep.subr.bf16.mxu1 %v2188_v40 }
 0x350   :  { %1207 = vmatpush1.bf16.msra.mxu0 %v2165_v36  ;;  %1250 = vmatpush1.bf16.msra.mxu1 %v2199_v41 }
 0x351   :  { %1346 = vmatprep.subr.bf16.mxu0 %v1879_v27  ;;  %1389 = vmatprep.subr.bf16.mxu1 %v1880_v28 }
 0x3f3   :  { %v1072_v29 = vpop.f32.mrf.mxu0  ;;  %v1115_v33 = vpop.f32.mrf.mxu1 }
 0x3f4   :  { %v1124_v32 = vadd.f32 %v1072_v29, %v2812_v31  ;;  %v1126_v30 = vadd.f32 %v1115_v33, %v2817_v21  ;;  %v2822_v21 = vld [vmem:[#allocation29_spill] sm:$0xff] }
 0x3f5   :  { %v1074_v34 = vpop.f32.mrf.mxu0  ;;  %v1117_v41 = vpop.f32.mrf.mxu1 }
 0x3f6   :  { %v1589_v35 = vmul.f32 -1.442695, %v1124_v32  ;;  %v1125_v36 = vadd.f32 %v1074_v34, %v2813_v37  ;;  %v1127_v4 = vadd.f32 %v1117_v41, %v2816_v1 }
 0x3f7   :  { %v1076_v39 = vpop.f32.mrf.mxu0  ;;  %v1119_v42 = vpop.f32.mrf.mxu1 }
 0x3f8   :  { %1767 = vpow2.f32 %v1589_v35  ;;  %v1591_v40 = vmul.f32 -1.442695, %v1125_v36  ;;  %v1128_v50 = vadd.f32 %v1076_v39, %v2814_v58  ;;  %v1593_v0 = vmul.f32 -1.442695, %v1127_v4 }
 0x3f9   :  { %v1078_v13 = vpop.f32.mrf.mxu0  ;;  %v1121_v53 = vpop.f32.mrf.mxu1  ;;  %v1130_v44 = vadd.f32 %v1119_v42, %v2819_v46  ;;  %v2821_v42 = vld [vmem:[#allocation27_spill] sm:$0xff] }
 0x3fa   :  { %1769 = vpow2.f32 %v1591_v40  ;;  %v1590_v55 = vmul.f32 -1.442695, %v1128_v50  ;;  %v1129_v61 = vadd.f32 %v1078_v13, %v2815_v57  ;;  %v1131_v59 = vadd.f32 %v1121_v53, %v2818_v43 }
 0x3fc   :  { %1771 = vpow2.f32 %v1590_v55  ;;  %v1592_v2 = vmul.f32 -1.442695, %v1129_v61  ;;  %v1594_v9 = vmul.f32 -1.442695, %v1131_v59  ;;  %v2823_v59 = vld [vmem:[#allocation31_spill] sm:$0xff] }
 0x3fe   :  { %1773 = vpow2.f32 %v1592_v2 }
 0x3ff   :  { %1775 = vtanh.f32 %v1126_v30 }
 0x400   :  { %1777 = vpow2.f32 %v1593_v0 }
 0x405   :  { %v1768_v51 = vpop.eup %1767 }
 0x406   :  { %v1138_v49 = vadd.f32 1.0, %v1768_v51 }
 0x407   :  { %v1770_v7 = vpop.eup %1769 }
 0x408   :  { %1779 = vrcp.f32 %v1138_v49  ;;  %v1150_v10 = vadd.f32 1.0, %v1770_v7  ;;  %v2824_v49 = vld [vmem:[#allocation28_spill] sm:$0xff] }
 0x409   :  { %v1772_v12 = vpop.eup %1771  ;;  %1781 = vtanh.f32 %v1130_v44 }
 0x40a   :  { %1783 = vrcp.f32 %v1150_v10  ;;  %v1139_v14 = vadd.f32 1.0, %v1772_v12  ;;  %v2825_v10 = vld [vmem:[#allocation26_spill] sm:$0xff] }
 0x40b   :  { %v1774_v16 = vpop.eup %1773  ;;  %1785 = vpow2.f32 %v1594_v9 }
 0x40c   :  { %1787 = vrcp.f32 %v1139_v14  ;;  %v1151_v17 = vadd.f32 1.0, %v1774_v16  ;;  %v1776_v45 = vpop.eup %1775  ;;  %v2826_v16 = vld [vmem:[#allocation32_spill] sm:$0xff] }
 0x40d   :  { %v1778_v18 = vpop.eup %1777 }
 0x40e   :  { %1789 = vrcp.f32 %v1151_v17  ;;  %v1164_v32 = vadd.f32 1.0, %v1778_v18  ;;  %v2827_v18 = vld [vmem:[#allocation30_spill] sm:$0xff] }
 0x410   :  { %1791 = vrcp.f32 %v1164_v32 }
 0x415   :  { %v1780_v19 = vpop.eup %1779 }
 0x416   :  { %v1782_v20 = vpop.eup %1781  ;;  %v1172_v22 = vmul.f32 %v1780_v19, %v1776_v45 }
 0x417   :  { %v1784_v27 = vpop.eup %1783 }
 0x418   :  { %v1786_v28 = vpop.eup %1785  ;;  %v1170_v29 = vmul.f32 %v1784_v27, %v2519_v8 }
 0x419   :  { %v1788_v31 = vpop.eup %1787  ;;  %v1165_v37 = vadd.f32 1.0, %v1786_v28 }
 0x41a   :  { %v2653_v33 = vadd.f32 %v1172_v22, %v1170_v29  ;;  %v1173_v34 = vmul.f32 %v1788_v31, %v1782_v20 }
 0x41b   :  { %v1790_v35 = vpop.eup %1789 }
 0x41c   :  { %v1171_v36 = vmul.f32 %v1790_v35, %v2522_v15  ;;  %1793 = vtanh.f32 %v2653_v33  ;;  %v1882_v15 = vld [vmem:[%s2759_s4 + $0x6c] ss:$16 sps:$4 sm:$0xff]  }
 0x41d   :  { %1795 = vrcp.f32 %v1165_v37  ;;  %v1792_v40 = vpop.eup %1791 }
 0x41e   :  { %v2656_v39 = vadd.f32 %v1173_v34, %v1171_v36 }
 0x420   :  { %1797 = vtanh.f32 %v2656_v39 }
 0x429   :  { %v1794_v41 = vpop.eup %1793 }
 0x42a   :  { %v1796_v8 = vpop.eup %1795  ;;  %v1178_v50 = vmul.f32 %v1794_v41, %v1792_v40 }
 0x42d   :  { %v1798_v58 = vpop.eup %1797 }
 0x42e   :  { %v1179_v13 = vmul.f32 %v1798_v58, %v1796_v8 }
 0x430   :  { %v1191_v55 = vpack.c.bf16 %v1179_v13, %v1178_v50 }
 0x432   :  { %1225 = vmatmul.mubr.bf16.vlgmr.msra.gmra.mxu0 %v1191_v55  ;;  %1268 = vmatmul.mubr.bf16.vlgmr.msra.gmra.mxu1 %v1191_v55 }
 0x433   :  { %1347 = vmatpush1.bf16.msra.mxu0 %v2529_v5  ;;  %1390 = vmatpush1.bf16.msra.mxu1 %v2535_v23  ;;  %v1883_v5 = vld [vmem:[%s2759_s4 + $0x68] ss:$16 sps:$4 sm:$0xff]   ;;  %v1884_v23 = vld [vmem:[%s2759_s4 + $0x4c] ss:$16 sps:$4 sm:$0xff]  }
 0x434   :  { %1348 = vmatprep.subr.bf16.mxu0 %v2541_v24  ;;  %1391 = vmatprep.subr.bf16.mxu1 %v2547_v6  ;;  %v1885_v24 = vld [vmem:[%s2759_s4 + $0x40] ss:$16 sps:$4 sm:$0xff]   ;;  %v1886_v6 = vld [vmem:[%s2759_s4 + $0x48] ss:$16 sps:$4 sm:$0xff]  }
 0x435   :  { %1378 = vmatprep.mubr.bf16.mxu0 %v2800_v60  ;;  %1421 = vmatprep.mubr.bf16.mxu1 %v2800_v60  ;;  %v1881_v60 = vld [vmem:[%s2759_s4 + $0x88] ss:$16 sps:$4 sm:$0xff]  }
 0x437   :  { %1349 = vmatpush1.bf16.msra.mxu0 %v2555_v25  ;;  %1392 = vmatpush1.bf16.msra.mxu1 %v2561_v11  ;;  %v1887_v25 = vld [vmem:[%s2759_s4 + $0x24] ss:$16 sps:$4 sm:$0xff]   ;;  %v1888_v11 = vld [vmem:[%s2759_s4 + $0x2c] ss:$16 sps:$4 sm:$0xff]  }
 0x438   :  { %1350 = vmatprep.subr.bf16.mxu0 %v2567_v63  ;;  %1393 = vmatprep.subr.bf16.mxu1 %v2573_v48  ;;  %v1889_v63 = vld [vmem:[%s2759_s4 + $0x20] ss:$16 sps:$4 sm:$0xff]   ;;  %v1890_v48 = vld [vmem:[%s2759_s4 + $0x28] ss:$16 sps:$4 sm:$0xff]  }
 0x43b   :  { %1351 = vmatpush1.bf16.msra.mxu0 %v2579_v52  ;;  %1394 = vmatpush1.bf16.msra.mxu1 %v2585_v3  ;;  %v1891_v52 = vld [vmem:[%s2759_s4 + $0x4] ss:$16 sps:$4 sm:$0xff]   ;;  %v1892_v3 = vld [vmem:[%s2759_s4 + $0xc] ss:$16 sps:$4 sm:$0xff]  }
 0x43c   :  { %1352 = vmatprep.subr.bf16.mxu0 %v2591_v47  ;;  %1395 = vmatprep.subr.bf16.mxu1 %v2597_v38  ;;  %v1893_v47 = vld [vmem:[%s2759_s4] ss:$16 sps:$4 sm:$0xff]   ;;  %v1894_v38 = vld [vmem:[%s2759_s4 + $0x8] ss:$16 sps:$4 sm:$0xff]   ;;  %s1918_s4 = smov [#allocation3]  }
 0x43d   :  { %s1499_s26 = sshll.u32 %s1918_s4, 4  ;;  %s1500_s26 = int_to_ptr.vmem [resolvable:$true] %s1499_s26 }
 0x43e   :  { %s1895_s27 = scalar_lea.vmem %s1500_s26, 256  ;;  %p1900_p1 = scmp.lt.s32.totalorder %s1500_s26, %s1500_s26 }
 0x43f   :  { %1353 = vmatpush1.bf16.msra.mxu0 %v2603_v56  ;;  %1396 = vmatpush1.bf16.msra.mxu1 %v1881_v60  ;;  %p1896_p0 = scmp.ne.s32.totalorder %s1500_s26, %s1895_s27  ;;  %p1901_p2 = scmp.lt.s32.totalorder %s1895_s27, %s1895_s27 }
 0x440   :  { %1354 = vmatprep.subr.bf16.mxu0 %v2610_v54  ;;  %1397 = vmatprep.subr.bf16.mxu1 %v1882_v15  ;;  %v2820_v54 = vld [vmem:[#allocation25_spill] sm:$0xff] }
 0x441   :  { %p1902_p3 = por %p1901_p2, %p1900_p1 }
 0x443   :  { %1355 = vmatpush1.bf16.msra.mxu0 %v2617_v62  ;;  %1398 = vmatpush1.bf16.msra.mxu1 %v1883_v5  ;;  %p1903_p4 = pnand %p1902_p3, %p1896_p0 }
 0x444   :  { %1356 = vmatprep.subr.bf16.mxu0 %v2624_v26  ;;  %1399 = vmatprep.subr.bf16.mxu1 %v1884_v23 }
 0x447   :  { %1357 = vmatpush1.bf16.msra.mxu0 %v1885_v24  ;;  %1400 = vmatpush1.bf16.msra.mxu1 %v1886_v6 }
 0x448   :  { %1358 = vmatprep.subr.bf16.mxu0 %v1887_v25  ;;  %1401 = vmatprep.subr.bf16.mxu1 %v1888_v11 }
 0x44b   :  { %1359 = vmatpush1.bf16.msra.mxu0 %v1889_v63  ;;  %1402 = vmatpush1.bf16.msra.mxu1 %v1890_v48 }
 0x44c   :  { %1360 = vmatprep.subr.bf16.mxu0 %v1891_v52  ;;  %1403 = vmatprep.subr.bf16.mxu1 %v1892_v3 }
 0x44f   :  { %1361 = vmatpush1.bf16.msra.mxu0 %v1893_v47  ;;  %1404 = vmatpush1.bf16.msra.mxu1 %v1894_v38  ;;  %v2828_v38 = vld [vmem:[#allocation33_spill] sm:$0xff] }
 0x4f2   :  { %v1226_v56 = vpop.f32.mrf.mxu0  ;;  %v1269_v26 = vpop.f32.mrf.mxu1 }
 0x4f3   :  { %v1278_v62 = vadd.f32 %v1226_v56, %v2820_v54  ;;  %v1280_v12 = vadd.f32 %v1269_v26, %v2825_v10  ;;  %v2829_v26 = vld [vmem:[#allocation35_spill] sm:$0xff]  ;;  %v2834_v10 = vld [vmem:[#allocation40_spill] sm:$0xff] }
 0x4f4   :  { %v1228_v57 = vpop.f32.mrf.mxu0  ;;  %v1271_v53 = vpop.f32.mrf.mxu1 }
 0x4f5   :  { %v1595_v61 = vmul.f32 -1.442695, %v1278_v62  ;;  %v1279_v2 = vadd.f32 %v1228_v57, %v2821_v42  ;;  %v1281_v7 = vadd.f32 %v1271_v53, %v2824_v49  ;;  %v2833_v49 = vld [vmem:[#allocation34_spill] sm:$0xff] }
 0x4f6   :  { %v1230_v1 = vpop.f32.mrf.mxu0  ;;  %v1273_v46 = vpop.f32.mrf.mxu1 }
 0x4f7   :  { %1799 = vpow2.f32 %v1595_v61  ;;  %v1597_v4 = vmul.f32 -1.442695, %v1279_v2  ;;  %v1282_v30 = vadd.f32 %v1230_v1, %v2822_v21  ;;  %v1599_v14 = vmul.f32 -1.442695, %v1281_v7  ;;  %v2830_v1 = vld [vmem:[#allocation37_spill] sm:$0xff] }
 0x4f8   :  { %v1232_v0 = vpop.f32.mrf.mxu0  ;;  %v1275_v9 = vpop.f32.mrf.mxu1  ;;  %v1284_v19 = vadd.f32 %v1273_v46, %v2827_v18 }
 0x4f9   :  { %1801 = vpow2.f32 %v1597_v4  ;;  %v1596_v43 = vmul.f32 -1.442695, %v1282_v30  ;;  %v1283_v51 = vadd.f32 %v1232_v0, %v2823_v59  ;;  %v1285_v17 = vadd.f32 %v1275_v9, %v2826_v16  ;;  %v2831_v30 = vld [vmem:[#allocation39_spill] sm:$0xff]  ;;  %v2835_v16 = vld [vmem:[#allocation38_spill] sm:$0xff] }
 0x4fb   :  { %1803 = vpow2.f32 %v1596_v43  ;;  %v1598_v44 = vmul.f32 -1.442695, %v1283_v51  ;;  %v1600_v27 = vmul.f32 -1.442695, %v1285_v17  ;;  %v2832_v51 = vld [vmem:[#allocation36_spill] sm:$0xff] }
 0x4fd   :  { %1805 = vpow2.f32 %v1598_v44 }
 0x4fe   :  { %1807 = vtanh.f32 %v1280_v12 }
 0x4ff   :  { %1809 = vpow2.f32 %v1599_v14 }
 0x504   :  { %v1800_v45 = vpop.eup %1799 }
 0x505   :  { %v1292_v20 = vadd.f32 1.0, %v1800_v45 }
 0x506   :  { %v1802_v22 = vpop.eup %1801 }
 0x507   :  { %1811 = vrcp.f32 %v1292_v20  ;;  %v1304_v28 = vadd.f32 1.0, %v1802_v22 }
 0x508   :  { %v1804_v29 = vpop.eup %1803  ;;  %1813 = vtanh.f32 %v1284_v19 }
 0x509   :  { %1815 = vrcp.f32 %v1304_v28  ;;  %v1293_v31 = vadd.f32 1.0, %v1804_v29 }
 0x50a   :  { %v1806_v32 = vpop.eup %1805  ;;  %1817 = vpow2.f32 %v1600_v27 }
 0x50b   :  { %1819 = vrcp.f32 %v1293_v31  ;;  %v1305_v34 = vadd.f32 1.0, %v1806_v32  ;;  %v1808_v35 = vpop.eup %1807 }
 0x50c   :  { %v1810_v37 = vpop.eup %1809 }
 0x50d   :  { %1821 = vrcp.f32 %v1305_v34  ;;  %v1318_v55 = vadd.f32 1.0, %v1810_v37 }
 0x50f   :  { %1823 = vrcp.f32 %v1318_v55 }
 0x514   :  { %v1812_v36 = vpop.eup %1811 }
 0x515   :  { %v1814_v40 = vpop.eup %1813  ;;  %v1326_v41 = vmul.f32 %v1812_v36, %v1808_v35 }
 0x516   :  { %v1816_v8 = vpop.eup %1815 }
 0x517   :  { %v1818_v58 = vpop.eup %1817  ;;  %v1324_v50 = vmul.f32 %v1816_v8, %v2653_v33 }
 0x518   :  { %v1820_v13 = vpop.eup %1819  ;;  %v1319_v23 = vadd.f32 1.0, %v1818_v58 }
 0x519   :  { %v2729_v60 = vadd.f32 %v1326_v41, %v1324_v50  ;;  %v1327_v15 = vmul.f32 %v1820_v13, %v1814_v40 }
 0x51a   :  { %v1822_v5 = vpop.eup %1821 }
 0x51b   :  { %v1325_v24 = vmul.f32 %v1822_v5, %v2656_v39  ;;  %1825 = vtanh.f32 %v2729_v60 }
 0x51c   :  { %1827 = vrcp.f32 %v1319_v23  ;;  %v1824_v25 = vpop.eup %1823 }
 0x51d   :  { %v2732_v6 = vadd.f32 %v1327_v15, %v1325_v24 }
 0x51f   :  { %1829 = vtanh.f32 %v2732_v6 }
 0x528   :  { %v1826_v11 = vpop.eup %1825 }
 0x529   :  { %v1828_v33 = vpop.eup %1827  ;;  %v1332_v48 = vmul.f32 %v1826_v11, %v1824_v25 }
 0x52c   :  { %v1830_v63 = vpop.eup %1829 }
 0x52d   :  { %v1333_v52 = vmul.f32 %v1830_v63, %v1828_v33 }
 0x52f   :  { %v1345_v3 = vpack.c.bf16 %v1333_v52, %v1332_v48 }
 0x531   :  { %1379 = vmatmul.mubr.bf16.vlgmr.msra.gmra.mxu0 %v1345_v3  ;;  %1422 = vmatmul.mubr.bf16.vlgmr.msra.gmra.mxu1 %v1345_v3 }
 0x5f1   :  { %v1380_v47 = vpop.f32.mrf.mxu0  ;;  %v1423_v56 = vpop.f32.mrf.mxu1 }
 0x5f2   :  { %v1432_v39 = vadd.f32 %v1380_v47, %v2828_v38  ;;  %v1434_v7 = vadd.f32 %v1423_v56, %v2833_v49 }
 0x5f3   :  { %v1382_v54 = vpop.f32.mrf.mxu0  ;;  %v1425_v2 = vpop.f32.mrf.mxu1 }
 0x5f4   :  { %v1601_v62 = vmul.f32 -1.442695, %v1432_v39  ;;  %v1433_v57 = vadd.f32 %v1382_v54, %v2829_v26  ;;  %v1435_v46 = vadd.f32 %v1425_v2, %v2832_v51 }
 0x5f5   :  { %v1384_v61 = vpop.f32.mrf.mxu0  ;;  %v1427_v43 = vpop.f32.mrf.mxu1 }
 0x5f6   :  { %1831 = vpow2.f32 %v1601_v62  ;;  %v1603_v42 = vmul.f32 -1.442695, %v1433_v57  ;;  %v1436_v4 = vadd.f32 %v1384_v61, %v2830_v1  ;;  %v1605_v9 = vmul.f32 -1.442695, %v1435_v46 }
 0x5f7   :  { %v1386_v53 = vpop.f32.mrf.mxu0  ;;  %v1429_v44 = vpop.f32.mrf.mxu1  ;;  %v1438_v17 = vadd.f32 %v1427_v43, %v2835_v16 }
 0x5f8   :  { %1833 = vpow2.f32 %v1603_v42  ;;  %v1602_v21 = vmul.f32 -1.442695, %v1436_v4  ;;  %v1437_v0 = vadd.f32 %v1386_v53, %v2831_v30  ;;  %v1439_v12 = vadd.f32 %v1429_v44, %v2834_v10 }
 0x5fa   :  { %1835 = vpow2.f32 %v1602_v21  ;;  %v1604_v59 = vmul.f32 -1.442695, %v1437_v0  ;;  %v1606_v19 = vmul.f32 -1.442695, %v1439_v12 }
 0x5fc   :  { %1837 = vpow2.f32 %v1604_v59 }
 0x5fd   :  { %1839 = vtanh.f32 %v1434_v7 }
 0x5fe   :  { %1841 = vpow2.f32 %v1605_v9 }
 0x603   :  { %v1832_v14 = vpop.eup %1831 }
 0x604   :  { %v1446_v45 = vadd.f32 1.0, %v1832_v14 }
 0x605   :  { %v1834_v18 = vpop.eup %1833 }
 0x606   :  { %1843 = vrcp.f32 %v1446_v45  ;;  %v1458_v20 = vadd.f32 1.0, %v1834_v18 }
 0x607   :  { %v1836_v22 = vpop.eup %1835  ;;  %1845 = vtanh.f32 %v1438_v17 }
 0x608   :  { %1847 = vrcp.f32 %v1458_v20  ;;  %v1447_v27 = vadd.f32 1.0, %v1836_v22 }
 0x609   :  { %v1838_v28 = vpop.eup %1837  ;;  %1849 = vpow2.f32 %v1606_v19 }
 0x60a   :  { %1851 = vrcp.f32 %v1447_v27  ;;  %v1459_v29 = vadd.f32 1.0, %v1838_v28  ;;  %v1840_v31 = vpop.eup %1839 }
 0x60b   :  { %v1842_v32 = vpop.eup %1841 }
 0x60c   :  { %1853 = vrcp.f32 %v1459_v29  ;;  %v1472_v40 = vadd.f32 1.0, %v1842_v32 }
 0x60e   :  { %1855 = vrcp.f32 %v1472_v40 }
 0x613   :  { %v1844_v34 = vpop.eup %1843 }
 0x614   :  { %v1846_v35 = vpop.eup %1845  ;;  %v1480_v37 = vmul.f32 %v1844_v34, %v1840_v31 }
 0x615   :  { %v1848_v36 = vpop.eup %1847 }
 0x616   :  { %v1850_v41 = vpop.eup %1849  ;;  %v1478_v8 = vmul.f32 %v1848_v36, %v2729_v60 }
 0x617   :  { %v1852_v58 = vpop.eup %1851  ;;  %v1473_v15 = vadd.f32 1.0, %v1850_v41 }
 0x618   :  { %v1481_v50 = vmul.f32 %v1852_v58, %v1846_v35  ;;  %v1482_v13 = vadd.f32 %v1480_v37, %v1478_v8 }
 0x619   :  { %v1854_v55 = vpop.eup %1853 }
 0x61a   :  { %v1479_v5 = vmul.f32 %v1854_v55, %v2732_v6  ;;  %1857 = vtanh.f32 %v1482_v13  ;;  %1490 = vst [vmem:[#allocation3] sm:$0xff] %v1482_v13 }
 0x61b   :  { %1859 = vrcp.f32 %v1473_v15 }
 0x61c   :  { %v1483_v23 = vadd.f32 %v1481_v50, %v1479_v5 }
 0x61e   :  { %1861 = vtanh.f32 %v1483_v23  ;;  %1491 = vst [vmem:[#allocation3 + $0x8] sm:$0xff] %v1483_v23 }
 0x61f   :  { %1906 = shalt.err (!%p1903_p4)
}
 0x620   :  { %s1919_s28 = smov 128   ;;  %s1920_s29 = smov 8   ;;  %v1856_v60 = vpop.eup %1855 }
 0x621   :  { %1505 = dma.vmem_to_hbm [thread:$0]  %s1500_s26, 256, %s2762_s7, [#allocation4], %s1919_s28, %s1919_s28, %s1920_s29  }
 0x627   :  { %v1858_v24 = vpop.eup %1857 }
 0x628   :  { %v1486_v6 = vmul.f32 %v1858_v24, %v1856_v60  ;;  %v1860_v25 = vpop.eup %1859 }
 0x62a   :  { %1488 = vst [vmem:[%s2761_s6] sm:$0xff] %v1486_v6 }
 0x62b   :  { %v1862_v11 = vpop.eup %1861 }
 0x62c   :  { %v1487_v33 = vmul.f32 %v1862_v11, %v1860_v25 }
 0x62e   :  { %1489 = vst [vmem:[%s2761_s6 + $0x8] sm:$0xff] %v1487_v33 }
 0x62f   :  { %1915 = dma.done.wait [#allocation4], 256  }
 0x630   :  { %1916 = vsyncadd [#allocation4], 4294967040 }
 0x631   :  { %1511 = vsyncpa [#allocation4], 1 }

// kernel: inductor_forward.8
= control target key start
LH: loop header
LB: loop body
LE: loop exit
PB: predicated region body
PF: predicated region fallthrough
CT: control target
= control target key end

     0   :  { %v3405_v1 = vmov 0   ;;  %vm128_vm0 = vcmask 130048   ;;  %v48_v48 = vlaneseq  ;;  %s3397_s3 = inlined_call_operand.vmem [shape: bf16[16,512], index: 3, kind: input, shape index: {}]   ;;  %s3398_s0 = inlined_call_operand.vmem [shape: bf16[128,16], index: 0, kind: input, shape index: {}]   ;;  %s3399_s4 = inlined_call_operand.vmem [shape: bf16[128,512], index: 4, kind: input, shape index: {}]   ;;  %s3400_s1 = inlined_call_operand.vmem [shape: f32[16,128], index: 1, kind: input, shape index: {}, may-alias: {1,2}]   ;;  %s3401_s5 = inlined_call_operand.vmem [shape: f32[1,512], index: 5, kind: input, shape index: {}]   ;;  %s3402_s2 = inlined_call_operand.vmem [shape: f32[16,128], index: 2, kind: input, shape index: {}, may-alias: {1,2}]   ;;  %s3403_s7 = inlined_call_operand.vmem [shape: f32[16,128], index: 7, kind: output, shape index: {1}]   ;;  %s3404_s6 = inlined_call_operand.vmem [shape: f32[16,128], index: 6, kind: output, shape index: {0}]  }
   0x1   :  { %v1999_v0 = vld [vmem:[%s3397_s3 + $0x4] ss:$16 sps:$4 sm:$0xff]   ;;  %185 = vmatprep.mubr.bf16.mxu0 %v3405_v1  ;;  %298 = vmatprep.mubr.bf16.mxu1 %v3405_v1  ;;  %v2001_v2 = vld [vmem:[%s3397_s3 + $0xc] ss:$16 sps:$4 sm:$0xff]   ;;  %v2003_v3 = vld [vmem:[%s3397_s3] ss:$16 sps:$4 sm:$0xff]  }
   0x2   :  { %167 = vmatprep.subr.bf16.mxu0 %v1999_v0  ;;  %v2004_v4 = vld [vmem:[%s3397_s3 + $0x8] ss:$16 sps:$4 sm:$0xff]   ;;  %280 = vmatprep.subr.bf16.mxu1 %v2001_v2  ;;  %v2005_v5 = vld [vmem:[%s3398_s0] sm:$0xff]   ;;  %v2442_v11 = vld [vmem:[%s3399_s4 + $0xec] ss:$16 sps:$4 sm:$0xff]   ;;  %v49_v49 = vshrl.u32 %v48_v48, 7 }
   0x3   :  { %168 = vmatpush1.bf16.msra.mxu0 %v2003_v3  ;;  %281 = vmatpush1.bf16.msra.mxu1 %v2004_v4  ;;  %v2410_v6 = vld [vmem:[%s3399_s4 + $0xe4] ss:$16 sps:$4 sm:$0xff]   ;;  %v2415_v7 = vld [vmem:[%s3399_s4 + $0xe0] ss:$16 sps:$4 sm:$0xff]   ;;  %v2447_v12 = vld [vmem:[%s3399_s4 + $0xe8] ss:$16 sps:$4 sm:$0xff]  }
   0x4   :  { %651 = vmatprep.subr.bf16.mxu0 %v2410_v6  ;;  %v2421_v8 = vld [vmem:[%s3399_s4 + $0xc4] ss:$16 sps:$4 sm:$0xff]   ;;  %v2430_v9 = vld [vmem:[%s3399_s4 + $0xc0] ss:$16 sps:$4 sm:$0xff]   ;;  %v2009_v13 = vld [vmem:[%s3398_s0 + $0x8] sm:$0xff]   ;;  %694 = vmatprep.subr.bf16.mxu1 %v2442_v11  ;;  %v50_v54 = vsub.s32 0, %v49_v49 }
   0x5   :  { %v2437_v10 = vld [vmem:[%s3399_s4 + $0xa4] ss:$16 sps:$4 sm:$0xff]   ;;  %v2456_v14 = vld [vmem:[%s3399_s4 + $0xa0] ss:$16 sps:$4 sm:$0xff]   ;;  %v2469_v16 = vld [vmem:[%s3399_s4 + $0xcc] ss:$16 sps:$4 sm:$0xff]  }
   0x6   :  { %1902 = vmatmul.mubr.msk.bf16.vlgmr.msra.gmra.mxu0 %vm128_vm0, %v2005_v5  ;;  %1910 = vmatmul.mubr.msk.bf16.vlgmr.msra.gmra.mxu1 %vm128_vm0, %v2005_v5  ;;  %v2464_v15 = vld [vmem:[%s3399_s4 + $0x84] ss:$16 sps:$4 sm:$0xff]   ;;  %v2474_v17 = vld [vmem:[%s3399_s4 + $0xc8] ss:$16 sps:$4 sm:$0xff]   ;;  %v2483_v18 = vld [vmem:[%s3399_s4 + $0x80] ss:$16 sps:$4 sm:$0xff]  }
   0x7   :  { %652 = vmatpush1.bf16.msra.mxu0 %v2415_v7  ;;  %195 = vmatprep.mubr.bf16.mxu0 %v3405_v1  ;;  %v2488_v19 = vld [vmem:[%s3399_s4 + $0x64] ss:$16 sps:$4 sm:$0xff]   ;;  %v2495_v20 = vld [vmem:[%s3399_s4 + $0xac] ss:$16 sps:$4 sm:$0xff]   ;;  %v2502_v21 = vld [vmem:[%s3399_s4 + $0xa8] ss:$16 sps:$4 sm:$0xff]  }
   0x8   :  { %308 = vmatprep.mubr.bf16.mxu1 %v3405_v1  ;;  %653 = vmatprep.subr.bf16.mxu0 %v2421_v8  ;;  %v2013_v22 = vld [vmem:[%s3398_s0 + $0x10] sm:$0xff]   ;;  %v2522_v25 = vld [vmem:[%s3399_s4 + $0x8c] ss:$16 sps:$4 sm:$0xff]   ;;  %v2529_v26 = vld [vmem:[%s3399_s4 + $0x88] ss:$16 sps:$4 sm:$0xff]   ;;  %v58_v55 = vsub.s32 2, %v49_v49 }
   0x9   :  { %695 = vmatpush1.bf16.msra.mxu1 %v2447_v12  ;;  %v2511_v23 = vld [vmem:[%s3399_s4 + $0x60] ss:$16 sps:$4 sm:$0xff]   ;;  %v2517_v24 = vld [vmem:[%s3399_s4 + $0x44] ss:$16 sps:$4 sm:$0xff]   ;;  %v2538_v27 = vld [vmem:[%s3399_s4 + $0x6c] ss:$16 sps:$4 sm:$0xff]  }
   0xa   :  { %696 = vmatprep.subr.bf16.mxu1 %v2469_v16  ;;  %v2544_v28 = vld [vmem:[%s3399_s4 + $0x40] ss:$16 sps:$4 sm:$0xff]   ;;  %v2552_v29 = vld [vmem:[%s3399_s4 + $0x24] ss:$16 sps:$4 sm:$0xff]   ;;  %v2557_v30 = vld [vmem:[%s3399_s4 + $0x68] ss:$16 sps:$4 sm:$0xff]  }
   0xb   :  { %654 = vmatpush1.bf16.msra.mxu0 %v2430_v9  ;;  %v2020_v31 = vld [vmem:[%s3398_s0 + $0x18] sm:$0xff]   ;;  %v2566_v32 = vld [vmem:[%s3399_s4 + $0x20] ss:$16 sps:$4 sm:$0xff]   ;;  %v2584_v35 = vld [vmem:[%s3399_s4 + $0x4] ss:$16 sps:$4 sm:$0xff]   ;;  %v54_v59 = vsub.s32 1, %v49_v49 }
   0xc   :  { %655 = vmatprep.subr.bf16.mxu0 %v2437_v10  ;;  %v2572_v33 = vld [vmem:[%s3399_s4 + $0x4c] ss:$16 sps:$4 sm:$0xff]   ;;  %v2579_v34 = vld [vmem:[%s3399_s4 + $0x48] ss:$16 sps:$4 sm:$0xff]   ;;  %v2600_v37 = vld [vmem:[%s3399_s4] ss:$16 sps:$4 sm:$0xff]  }
   0xd   :  { %697 = vmatpush1.bf16.msra.mxu1 %v2474_v17  ;;  %v2591_v36 = vld [vmem:[%s3399_s4 + $0x2c] ss:$16 sps:$4 sm:$0xff]   ;;  %v2607_v38 = vld [vmem:[%s3399_s4 + $0x28] ss:$16 sps:$4 sm:$0xff]   ;;  %v2027_v39 = vld [vmem:[%s3398_s0 + $0x20] sm:$0xff]   ;;  %v62_v60 = vsub.s32 3, %v49_v49 }
   0xe   :  { %1903 = vmatmul.mubr.msk.bf16.gmra.mxu0 %vm128_vm0, %v2009_v13  ;;  %1911 = vmatmul.mubr.msk.bf16.gmra.mxu1 %vm128_vm0, %v2009_v13  ;;  %v2617_v40 = vld [vmem:[%s3399_s4 + $0xc] ss:$16 sps:$4 sm:$0xff]   ;;  %v2623_v41 = vld [vmem:[%s3399_s4 + $0x8] ss:$16 sps:$4 sm:$0xff]   ;;  %v2041_v43 = vld [vmem:[%s3398_s0 + $0x30] sm:$0xff]  }
   0xf   :  { %205 = vmatprep.mubr.bf16.mxu0 %v3405_v1  ;;  %318 = vmatprep.mubr.bf16.mxu1 %v3405_v1  ;;  %v2034_v42 = vld [vmem:[%s3398_s0 + $0x28] sm:$0xff]   ;;  %v2051_v44 = vld [vmem:[%s3398_s0 + $0x38] sm:$0xff]   ;;  %v475_v45 = vld [vmem:[%s3400_s1] sm:$0xff] }
  0x10   :  { %656 = vmatpush1.bf16.msra.mxu0 %v2456_v14  ;;  %698 = vmatprep.subr.bf16.mxu1 %v2495_v20  ;;  %v476_v46 = vld [vmem:[%s3400_s1 + $0x8] sm:$0xff]  ;;  %v46_v56 = vld [vmem:[%s3401_s5] sm:$0xf] }
  0x11   :  { %657 = vmatprep.subr.bf16.mxu0 %v2464_v15  ;;  %699 = vmatpush1.bf16.msra.mxu1 %v2502_v21  ;;  %v490_v47 = vpack.c.bf16 %v476_v46, %v475_v45  ;;  %v2713_v63 = vrot.slane %v46_v56, %v50_v54  ;;  %v2715_v0 = vrot.slane %v46_v56, %v58_v55 }
  0x12   :  { %700 = vmatprep.subr.bf16.mxu1 %v2522_v25  ;;  %v2717_v4 = vrot.slane %v46_v56, %v54_v59  ;;  %v2719_v5 = vrot.slane %v46_v56, %v62_v60 }
  0x14   :  { %658 = vmatpush1.bf16.msra.mxu0 %v2483_v18 }
  0x15   :  { %659 = vmatprep.subr.bf16.mxu0 %v2488_v19  ;;  %701 = vmatpush1.bf16.msra.mxu1 %v2529_v26 }
  0x16   :  { %1904 = vmatmul.mubr.msk.bf16.gmra.mxu0 %vm128_vm0, %v2013_v22  ;;  %1912 = vmatmul.mubr.msk.bf16.gmra.mxu1 %vm128_vm0, %v2013_v22 }
  0x17   :  { %215 = vmatprep.mubr.bf16.mxu0 %v3405_v1  ;;  %328 = vmatprep.mubr.bf16.mxu1 %v3405_v1 }
  0x18   :  { %660 = vmatpush1.bf16.msra.mxu0 %v2511_v23  ;;  %702 = vmatprep.subr.bf16.mxu1 %v2538_v27 }
  0x19   :  { %661 = vmatprep.subr.bf16.mxu0 %v2517_v24  ;;  %703 = vmatpush1.bf16.msra.mxu1 %v2557_v30 }
  0x1a   :  { %704 = vmatprep.subr.bf16.mxu1 %v2572_v33 }
  0x1c   :  { %662 = vmatpush1.bf16.msra.mxu0 %v2544_v28 }
  0x1d   :  { %663 = vmatprep.subr.bf16.mxu0 %v2552_v29  ;;  %705 = vmatpush1.bf16.msra.mxu1 %v2579_v34 }
  0x1e   :  { %1905 = vmatmul.mubr.msk.bf16.gmra.mxu0 %vm128_vm0, %v2020_v31  ;;  %1913 = vmatmul.mubr.msk.bf16.gmra.mxu1 %vm128_vm0, %v2020_v31 }
  0x1f   :  { %225 = vmatprep.mubr.bf16.mxu0 %v3405_v1  ;;  %338 = vmatprep.mubr.bf16.mxu1 %v3405_v1 }
  0x20   :  { %664 = vmatpush1.bf16.msra.mxu0 %v2566_v32  ;;  %706 = vmatprep.subr.bf16.mxu1 %v2591_v36 }
  0x21   :  { %665 = vmatprep.subr.bf16.mxu0 %v2584_v35  ;;  %707 = vmatpush1.bf16.msra.mxu1 %v2607_v38 }
  0x22   :  { %708 = vmatprep.subr.bf16.mxu1 %v2617_v40 }
  0x24   :  { %666 = vmatpush1.bf16.msra.mxu0 %v2600_v37 }
  0x25   :  { %805 = vmatprep.subr.bf16.mxu0 %v2410_v6  ;;  %709 = vmatpush1.bf16.msra.mxu1 %v2623_v41 }
  0x26   :  { %1906 = vmatmul.mubr.msk.bf16.gmra.mxu0 %vm128_vm0, %v2027_v39  ;;  %1914 = vmatmul.mubr.msk.bf16.gmra.mxu1 %vm128_vm0, %v2027_v39 }
  0x27   :  { %235 = vmatprep.mubr.bf16.mxu0 %v3405_v1  ;;  %348 = vmatprep.mubr.bf16.mxu1 %v3405_v1 }
  0x28   :  { %848 = vmatprep.subr.bf16.mxu1 %v2442_v11 }
  0x2e   :  { %1907 = vmatmul.mubr.msk.bf16.gmra.mxu0 %vm128_vm0, %v2034_v42  ;;  %1915 = vmatmul.mubr.msk.bf16.gmra.mxu1 %vm128_vm0, %v2034_v42 }
  0x2f   :  { %245 = vmatprep.mubr.bf16.mxu0 %v3405_v1  ;;  %358 = vmatprep.mubr.bf16.mxu1 %v3405_v1 }
  0x36   :  { %1908 = vmatmul.mubr.msk.bf16.gmra.mxu0 %vm128_vm0, %v2041_v43  ;;  %1916 = vmatmul.mubr.msk.bf16.gmra.mxu1 %vm128_vm0, %v2041_v43 }
  0x37   :  { %255 = vmatprep.mubr.bf16.mxu0 %v3405_v1  ;;  %368 = vmatprep.mubr.bf16.mxu1 %v3405_v1 }
  0x3e   :  { %1909 = vmatmul.mubr.msk.bf16.gmra.mxu0 %vm128_vm0, %v2051_v44  ;;  %1917 = vmatmul.mubr.msk.bf16.gmra.mxu1 %vm128_vm0, %v2051_v44 }
  0x3f   :  { %683 = vmatprep.mubr.bf16.mxu0 %v3405_v1  ;;  %726 = vmatprep.mubr.bf16.mxu1 %v3405_v1 }
  0x46   :  { %684 = vmatmul.mubr.bf16.vlgmr.msra.gmra.mxu0 %v490_v47  ;;  %727 = vmatmul.mubr.bf16.vlgmr.msra.gmra.mxu1 %v490_v47 }
  0x47   :  { %806 = vmatpush1.bf16.msra.mxu0 %v2415_v7  ;;  %849 = vmatpush1.bf16.msra.mxu1 %v2447_v12 }
  0x48   :  { %807 = vmatprep.subr.bf16.mxu0 %v2421_v8  ;;  %850 = vmatprep.subr.bf16.mxu1 %v2469_v16 }
  0x49   :  { %837 = vmatprep.mubr.bf16.mxu0 %v3405_v1  ;;  %880 = vmatprep.mubr.bf16.mxu1 %v3405_v1 }
  0x4b   :  { %808 = vmatpush1.bf16.msra.mxu0 %v2430_v9  ;;  %851 = vmatpush1.bf16.msra.mxu1 %v2474_v17 }
  0x4c   :  { %809 = vmatprep.subr.bf16.mxu0 %v2437_v10  ;;  %852 = vmatprep.subr.bf16.mxu1 %v2495_v20 }
  0x4f   :  { %810 = vmatpush1.bf16.msra.mxu0 %v2456_v14  ;;  %853 = vmatpush1.bf16.msra.mxu1 %v2502_v21 }
  0x50   :  { %811 = vmatprep.subr.bf16.mxu0 %v2464_v15  ;;  %854 = vmatprep.subr.bf16.mxu1 %v2522_v25 }
  0x53   :  { %812 = vmatpush1.bf16.msra.mxu0 %v2483_v18  ;;  %855 = vmatpush1.bf16.msra.mxu1 %v2529_v26 }
  0x54   :  { %813 = vmatprep.subr.bf16.mxu0 %v2488_v19  ;;  %856 = vmatprep.subr.bf16.mxu1 %v2538_v27 }
  0x57   :  { %814 = vmatpush1.bf16.msra.mxu0 %v2511_v23  ;;  %857 = vmatpush1.bf16.msra.mxu1 %v2557_v30 }
  0x58   :  { %815 = vmatprep.subr.bf16.mxu0 %v2517_v24  ;;  %858 = vmatprep.subr.bf16.mxu1 %v2572_v33 }
  0x5b   :  { %816 = vmatpush1.bf16.msra.mxu0 %v2544_v28  ;;  %859 = vmatpush1.bf16.msra.mxu1 %v2579_v34 }
  0x5c   :  { %817 = vmatprep.subr.bf16.mxu0 %v2552_v29  ;;  %860 = vmatprep.subr.bf16.mxu1 %v2591_v36 }
  0x5f   :  { %818 = vmatpush1.bf16.msra.mxu0 %v2566_v32  ;;  %861 = vmatpush1.bf16.msra.mxu1 %v2607_v38 }
  0x60   :  { %819 = vmatprep.subr.bf16.mxu0 %v2584_v35  ;;  %862 = vmatprep.subr.bf16.mxu1 %v2617_v40 }
  0x63   :  { %820 = vmatpush1.bf16.msra.mxu0 %v2600_v37  ;;  %863 = vmatpush1.bf16.msra.mxu1 %v2623_v41 }
  0x64   :  { %959 = vmatprep.subr.bf16.mxu0 %v2410_v6  ;;  %1002 = vmatprep.subr.bf16.mxu1 %v2442_v11 }
  0xc6   :  { %v2694_v50 = vpop.f32.mrf.mxu0  ;;  %v2696_v51 = vpop.f32.mrf.mxu1 }
  0xc8   :  { %v2698_v52 = vpop.f32.mrf.mxu0  ;;  %v2700_v53 = vpop.f32.mrf.mxu1 }
  0xca   :  { %v2705_v57 = vpop.f32.mrf.mxu0  ;;  %v2707_v58 = vpop.f32.mrf.mxu1 }
  0xcc   :  { %v2709_v61 = vpop.f32.mrf.mxu0  ;;  %v2711_v62 = vpop.f32.mrf.mxu1 }
  0xce   :  { %v197_v2 = vpop.f32.mrf.mxu0  ;;  %v310_v3 = vpop.f32.mrf.mxu1 }
  0xcf   :  { %v2722_v13 = vadd.f32 %v197_v2, %v2713_v63  ;;  %v2725_v22 = vadd.f32 %v310_v3, %v2715_v0 }
  0xd0   :  { %v199_v31 = vpop.f32.mrf.mxu0  ;;  %v312_v39 = vpop.f32.mrf.mxu1 }
  0xd1   :  { %3407 = vst [vmem:[#allocation3_spill] sm:$0xff] %v2725_v22  ;;  %v2728_v42 = vadd.f32 %v199_v31, %v2717_v4  ;;  %v2731_v43 = vadd.f32 %v312_v39, %v2719_v5 }
  0xd2   :  { %v201_v44 = vpop.f32.mrf.mxu0  ;;  %v314_v45 = vpop.f32.mrf.mxu1 }
  0xd3   :  { %v2734_v46 = vadd.f32 %v201_v44, %v2713_v63  ;;  %v2737_v47 = vadd.f32 %v314_v45, %v2715_v0 }
  0xd4   :  { %v203_v48 = vpop.f32.mrf.mxu0  ;;  %v316_v49 = vpop.f32.mrf.mxu1 }
  0xd5   :  { %3408 = vst [vmem:[#allocation4_spill] sm:$0xff] %v2737_v47  ;;  %v2740_v54 = vadd.f32 %v203_v48, %v2717_v4  ;;  %v2743_v55 = vadd.f32 %v316_v49, %v2719_v5 }
  0xd6   :  { %v207_v56 = vpop.f32.mrf.mxu0  ;;  %v320_v59 = vpop.f32.mrf.mxu1 }
  0xd7   :  { %3409 = vst [vmem:[#allocation5_spill] sm:$0xff] %v2743_v55  ;;  %v2746_v60 = vadd.f32 %v207_v56, %v2713_v63  ;;  %v2749_v2 = vadd.f32 %v320_v59, %v2715_v0 }
  0xd8   :  { %v209_v3 = vpop.f32.mrf.mxu0  ;;  %v322_v31 = vpop.f32.mrf.mxu1 }
  0xd9   :  { %3410 = vst [vmem:[#allocation6_spill] sm:$0xff] %v2746_v60  ;;  %3411 = vst [vmem:[#allocation7_spill] sm:$0xff] %v2749_v2  ;;  %v2752_v39 = vadd.f32 %v209_v3, %v2717_v4  ;;  %v2755_v44 = vadd.f32 %v322_v31, %v2719_v5 }
  0xda   :  { %v211_v45 = vpop.f32.mrf.mxu0  ;;  %v324_v48 = vpop.f32.mrf.mxu1 }
  0xdb   :  { %3412 = vst [vmem:[#allocation8_spill] sm:$0xff] %v2752_v39  ;;  %3413 = vst [vmem:[#allocation9_spill] sm:$0xff] %v2755_v44  ;;  %v2758_v49 = vadd.f32 %v211_v45, %v2713_v63  ;;  %v2761_v1 = vadd.f32 %v324_v48, %v2715_v0 }
  0xdc   :  { %v213_v56 = vpop.f32.mrf.mxu0  ;;  %v326_v60 = vpop.f32.mrf.mxu1 }
  0xdd   :  { %3414 = vst [vmem:[#allocation10_spill] sm:$0xff] %v2758_v49  ;;  %3415 = vst [vmem:[#allocation11_spill] sm:$0xff] %v2761_v1  ;;  %v2764_v59 = vadd.f32 %v213_v56, %v2717_v4  ;;  %v2767_v2 = vadd.f32 %v326_v60, %v2719_v5 }
  0xde   :  { %v217_v3 = vpop.f32.mrf.mxu0  ;;  %v330_v39 = vpop.f32.mrf.mxu1 }
  0xdf   :  { %3416 = vst [vmem:[#allocation12_spill] sm:$0xff] %v2764_v59  ;;  %3417 = vst [vmem:[#allocation13_spill] sm:$0xff] %v2767_v2  ;;  %v2770_v31 = vadd.f32 %v217_v3, %v2713_v63  ;;  %v2773_v44 = vadd.f32 %v330_v39, %v2715_v0 }
  0xe0   :  { %v219_v45 = vpop.f32.mrf.mxu0  ;;  %v332_v49 = vpop.f32.mrf.mxu1 }
  0xe1   :  { %3418 = vst [vmem:[#allocation14_spill] sm:$0xff] %v2770_v31  ;;  %3419 = vst [vmem:[#allocation15_spill] sm:$0xff] %v2773_v44  ;;  %v2776_v48 = vadd.f32 %v219_v45, %v2717_v4  ;;  %v2779_v1 = vadd.f32 %v332_v49, %v2719_v5 }
  0xe2   :  { %v221_v56 = vpop.f32.mrf.mxu0  ;;  %v334_v59 = vpop.f32.mrf.mxu1 }
  0xe3   :  { %3420 = vst [vmem:[#allocation16_spill] sm:$0xff] %v2776_v48  ;;  %3421 = vst [vmem:[#allocation17_spill] sm:$0xff] %v2779_v1  ;;  %v2782_v60 = vadd.f32 %v221_v56, %v2713_v63  ;;  %v2785_v2 = vadd.f32 %v334_v59, %v2715_v0 }
  0xe4   :  { %v223_v3 = vpop.f32.mrf.mxu0  ;;  %v336_v31 = vpop.f32.mrf.mxu1 }
  0xe5   :  { %3422 = vst [vmem:[#allocation18_spill] sm:$0xff] %v2782_v60  ;;  %3423 = vst [vmem:[#allocation19_spill] sm:$0xff] %v2785_v2  ;;  %v2788_v39 = vadd.f32 %v223_v3, %v2717_v4  ;;  %v2791_v44 = vadd.f32 %v336_v31, %v2719_v5 }
  0xe6   :  { %v227_v45 = vpop.f32.mrf.mxu0  ;;  %v340_v48 = vpop.f32.mrf.mxu1 }
  0xe7   :  { %3424 = vst [vmem:[#allocation20_spill] sm:$0xff] %v2788_v39  ;;  %3425 = vst [vmem:[#allocation21_spill] sm:$0xff] %v2791_v44  ;;  %v2794_v49 = vadd.f32 %v227_v45, %v2713_v63  ;;  %v2797_v1 = vadd.f32 %v340_v48, %v2715_v0 }
  0xe8   :  { %v229_v56 = vpop.f32.mrf.mxu0  ;;  %v342_v60 = vpop.f32.mrf.mxu1 }
  0xe9   :  { %3426 = vst [vmem:[#allocation22_spill] sm:$0xff] %v2794_v49  ;;  %3427 = vst [vmem:[#allocation23_spill] sm:$0xff] %v2797_v1  ;;  %v2800_v59 = vadd.f32 %v229_v56, %v2717_v4  ;;  %v2803_v2 = vadd.f32 %v342_v60, %v2719_v5 }
  0xea   :  { %v231_v3 = vpop.f32.mrf.mxu0  ;;  %v344_v39 = vpop.f32.mrf.mxu1 }
  0xeb   :  { %3428 = vst [vmem:[#allocation24_spill] sm:$0xff] %v2800_v59  ;;  %3429 = vst [vmem:[#allocation25_spill] sm:$0xff] %v2803_v2  ;;  %v2806_v31 = vadd.f32 %v231_v3, %v2713_v63  ;;  %v2809_v44 = vadd.f32 %v344_v39, %v2715_v0 }
  0xec   :  { %v233_v45 = vpop.f32.mrf.mxu0  ;;  %v346_v49 = vpop.f32.mrf.mxu1 }
  0xed   :  { %3430 = vst [vmem:[#allocation26_spill] sm:$0xff] %v2806_v31  ;;  %3431 = vst [vmem:[#allocation27_spill] sm:$0xff] %v2809_v44  ;;  %v2812_v48 = vadd.f32 %v233_v45, %v2717_v4  ;;  %v2815_v1 = vadd.f32 %v346_v49, %v2719_v5 }
  0xee   :  { %v237_v56 = vpop.f32.mrf.mxu0  ;;  %v350_v59 = vpop.f32.mrf.mxu1 }
  0xef   :  { %3432 = vst [vmem:[#allocation28_spill] sm:$0xff] %v2812_v48  ;;  %3433 = vst [vmem:[#allocation29_spill] sm:$0xff] %v2815_v1  ;;  %v2818_v60 = vadd.f32 %v237_v56, %v2713_v63  ;;  %v2821_v2 = vadd.f32 %v350_v59, %v2715_v0 }
  0xf0   :  { %v239_v3 = vpop.f32.mrf.mxu0  ;;  %v352_v31 = vpop.f32.mrf.mxu1 }
  0xf1   :  { %3434 = vst [vmem:[#allocation30_spill] sm:$0xff] %v2818_v60  ;;  %3435 = vst [vmem:[#allocation31_spill] sm:$0xff] %v2821_v2  ;;  %v2824_v39 = vadd.f32 %v239_v3, %v2717_v4  ;;  %v2827_v44 = vadd.f32 %v352_v31, %v2719_v5 }
  0xf2   :  { %v241_v45 = vpop.f32.mrf.mxu0  ;;  %v354_v48 = vpop.f32.mrf.mxu1 }
  0xf3   :  { %3436 = vst [vmem:[#allocation32_spill] sm:$0xff] %v2824_v39  ;;  %3437 = vst [vmem:[#allocation33_spill] sm:$0xff] %v2827_v44  ;;  %v2830_v49 = vadd.f32 %v241_v45, %v2713_v63  ;;  %v2833_v1 = vadd.f32 %v354_v48, %v2715_v0 }
  0xf4   :  { %v243_v56 = vpop.f32.mrf.mxu0  ;;  %v356_v60 = vpop.f32.mrf.mxu1 }
  0xf5   :  { %3438 = vst [vmem:[#allocation34_spill] sm:$0xff] %v2830_v49  ;;  %3439 = vst [vmem:[#allocation35_spill] sm:$0xff] %v2833_v1  ;;  %v2836_v59 = vadd.f32 %v243_v56, %v2717_v4  ;;  %v2839_v2 = vadd.f32 %v356_v60, %v2719_v5 }
  0xf6   :  { %v247_v3 = vpop.f32.mrf.mxu0  ;;  %v360_v39 = vpop.f32.mrf.mxu1 }
  0xf7   :  { %3440 = vst [vmem:[#allocation36_spill] sm:$0xff] %v2836_v59  ;;  %3441 = vst [vmem:[#allocation37_spill] sm:$0xff] %v2839_v2  ;;  %v2842_v31 = vadd.f32 %v247_v3, %v2713_v63  ;;  %v2845_v44 = vadd.f32 %v360_v39, %v2715_v0 }
  0xf8   :  { %v249_v45 = vpop.f32.mrf.mxu0  ;;  %v362_v49 = vpop.f32.mrf.mxu1 }
  0xf9   :  { %3442 = vst [vmem:[#allocation38_spill] sm:$0xff] %v2842_v31  ;;  %3443 = vst [vmem:[#allocation39_spill] sm:$0xff] %v2845_v44  ;;  %v2848_v48 = vadd.f32 %v249_v45, %v2717_v4  ;;  %v2851_v1 = vadd.f32 %v362_v49, %v2719_v5 }
  0xfa   :  { %v251_v56 = vpop.f32.mrf.mxu0  ;;  %v364_v59 = vpop.f32.mrf.mxu1 }
  0xfb   :  { %3444 = vst [vmem:[#allocation40_spill] sm:$0xff] %v2848_v48  ;;  %3445 = vst [vmem:[#allocation41_spill] sm:$0xff] %v2851_v1  ;;  %v2854_v60 = vadd.f32 %v251_v56, %v2713_v63  ;;  %v2857_v2 = vadd.f32 %v364_v59, %v2715_v0 }
  0xfc   :  { %v253_v3 = vpop.f32.mrf.mxu0  ;;  %v366_v31 = vpop.f32.mrf.mxu1 }
  0xfd   :  { %3446 = vst [vmem:[#allocation42_spill] sm:$0xff] %v2854_v60  ;;  %3447 = vst [vmem:[#allocation43_spill] sm:$0xff] %v2857_v2  ;;  %v2860_v39 = vadd.f32 %v253_v3, %v2717_v4  ;;  %v2863_v44 = vadd.f32 %v366_v31, %v2719_v5 }
  0xfe   :  { %v257_v45 = vpop.f32.mrf.mxu0  ;;  %v370_v48 = vpop.f32.mrf.mxu1 }
  0xff   :  { %3448 = vst [vmem:[#allocation44_spill] sm:$0xff] %v2860_v39  ;;  %3449 = vst [vmem:[#allocation45_spill] sm:$0xff] %v2863_v44  ;;  %v2866_v49 = vadd.f32 %v257_v45, %v2713_v63  ;;  %v2869_v1 = vadd.f32 %v370_v48, %v2715_v0  ;;  %v188_v48 = vadd.f32 %v2694_v50, %v2713_v63 }
 0x100   :  { %v259_v56 = vpop.f32.mrf.mxu0  ;;  %v372_v60 = vpop.f32.mrf.mxu1  ;;  %v194_v50 = vadd.f32 %v2709_v61, %v2717_v4 }
 0x101   :  { %3450 = vst [vmem:[#allocation46_spill] sm:$0xff] %v2866_v49  ;;  %3451 = vst [vmem:[#allocation47_spill] sm:$0xff] %v2869_v1  ;;  %v2872_v59 = vadd.f32 %v259_v56, %v2717_v4  ;;  %v2875_v2 = vadd.f32 %v372_v60, %v2719_v5 }
 0x102   :  { %v261_v3 = vpop.f32.mrf.mxu0  ;;  %v374_v39 = vpop.f32.mrf.mxu1 }
 0x103   :  { %3452 = vst [vmem:[#allocation48_spill] sm:$0xff] %v2872_v59  ;;  %3453 = vst [vmem:[#allocation49_spill] sm:$0xff] %v2875_v2  ;;  %v2878_v31 = vadd.f32 %v261_v3, %v2713_v63  ;;  %v2881_v44 = vadd.f32 %v374_v39, %v2715_v0  ;;  %v190_v2 = vadd.f32 %v2698_v52, %v2717_v4 }
 0x104   :  { %v263_v45 = vpop.f32.mrf.mxu0  ;;  %v376_v49 = vpop.f32.mrf.mxu1  ;;  %v192_v39 = vadd.f32 %v2705_v57, %v2713_v63  ;;  %v303_v57 = vadd.f32 %v2700_v53, %v2719_v5 }
 0x105   :  { %3454 = vst [vmem:[#allocation50_spill] sm:$0xff] %v2878_v31  ;;  %3455 = vst [vmem:[#allocation51_spill] sm:$0xff] %v2881_v44  ;;  %v2886_v1 = vadd.f32 %v263_v45, %v2717_v4  ;;  %v2889_v56 = vadd.f32 %v376_v49, %v2719_v5  ;;  %v307_v4 = vadd.f32 %v2711_v62, %v2719_v5 }
 0x106   :  { %v685_v60 = vpop.f32.mrf.mxu0  ;;  %v728_v31 = vpop.f32.mrf.mxu1 }
 0x107   :  { %3456 = vst [vmem:[#allocation52_spill] sm:$0xff] %v2886_v1  ;;  %3457 = vst [vmem:[#allocation53_spill] sm:$0xff] %v2889_v56  ;;  %v737_v3 = vadd.f32 %v685_v60, %v188_v48 }
 0x108   :  { %v687_v59 = vpop.f32.mrf.mxu0  ;;  %v730_v49 = vpop.f32.mrf.mxu1 }
 0x109   :  { %v1950_v44 = vmul.f32 -1.442695, %v737_v3  ;;  %v738_v47 = vadd.f32 %v687_v59, %v190_v2  ;;  %v740_v63 = vadd.f32 %v730_v49, %v303_v57  ;;  %v301_v2 = vadd.f32 %v2696_v51, %v2715_v0 }
 0x10a   :  { %v689_v55 = vpop.f32.mrf.mxu0  ;;  %v732_v48 = vpop.f32.mrf.mxu1 }
 0x10b   :  { %2061 = vpow2.f32 %v1950_v44  ;;  %v1952_v45 = vmul.f32 -1.442695, %v738_v47  ;;  %v741_v56 = vadd.f32 %v689_v55, %v192_v39  ;;  %v739_v47 = vadd.f32 %v728_v31, %v301_v2 }
 0x10c   :  { %v691_v1 = vpop.f32.mrf.mxu0  ;;  %v734_v61 = vpop.f32.mrf.mxu1  ;;  %v305_v55 = vadd.f32 %v2707_v58, %v2715_v0 }
 0x10d   :  { %2063 = vpow2.f32 %v1952_v45  ;;  %v1951_v22 = vmul.f32 -1.442695, %v741_v56  ;;  %v742_v52 = vadd.f32 %v691_v1, %v194_v50  ;;  %v1954_v1 = vmul.f32 -1.442695, %v740_v63  ;;  %v477_v45 = vld [vmem:[%s3402_s2] sm:$0xff] }
 0x10e   :  { %v743_v59 = vadd.f32 %v732_v48, %v305_v55 }
 0x10f   :  { %2065 = vpow2.f32 %v1951_v22  ;;  %v1953_v60 = vmul.f32 -1.442695, %v742_v52  ;;  %v744_v22 = vadd.f32 %v734_v61, %v307_v4  ;;  %v478_v61 = vld [vmem:[%s3402_s2 + $0x8] sm:$0xff] }
 0x111   :  { %2067 = vpow2.f32 %v1953_v60  ;;  %v1955_v3 = vmul.f32 -1.442695, %v744_v22 }
 0x112   :  { %2069 = vtanh.f32 %v739_v47 }
 0x113   :  { %2071 = vpow2.f32 %v1954_v1 }
 0x118   :  { %v2062_v44 = vpop.eup %2061 }
 0x119   :  { %v751_v56 = vadd.f32 1.0, %v2062_v44 }
 0x11a   :  { %v2064_v53 = vpop.eup %2063 }
 0x11b   :  { %2073 = vrcp.f32 %v751_v56  ;;  %v763_v39 = vadd.f32 1.0, %v2064_v53 }
 0x11c   :  { %v2066_v51 = vpop.eup %2065  ;;  %2075 = vtanh.f32 %v743_v59 }
 0x11d   :  { %2077 = vrcp.f32 %v763_v39  ;;  %v752_v50 = vadd.f32 1.0, %v2066_v51 }
 0x11e   :  { %v2068_v62 = vpop.eup %2067  ;;  %2079 = vpow2.f32 %v1955_v3 }
 0x11f   :  { %2081 = vrcp.f32 %v752_v50  ;;  %v764_v5 = vadd.f32 1.0, %v2068_v62  ;;  %v2070_v58 = vpop.eup %2069  ;;  %v3458_v62 = vmov 0  }
 0x120   :  { %v2072_v0 = vpop.eup %2071 }
 0x121   :  { %2083 = vrcp.f32 %v764_v5  ;;  %v777_v2 = vadd.f32 1.0, %v2072_v0 }
 0x123   :  { %2085 = vrcp.f32 %v777_v2 }
 0x128   :  { %v2074_v31 = vpop.eup %2073 }
 0x129   :  { %v2076_v49 = vpop.eup %2075  ;;  %v785_v52 = vmul.f32 %v2074_v31, %v2070_v58 }
 0x12a   :  { %v2078_v48 = vpop.eup %2077 }
 0x12b   :  { %v2080_v60 = vpop.eup %2079  ;;  %v783_v57 = vmul.f32 %v2078_v48, %v477_v45 }
 0x12c   :  { %v2082_v63 = vpop.eup %2081  ;;  %v778_v1 = vadd.f32 1.0, %v2080_v60 }
 0x12d   :  { %v2911_v4 = vadd.f32 %v785_v52, %v783_v57  ;;  %v786_v47 = vmul.f32 %v2082_v63, %v2076_v49 }
 0x12e   :  { %v2084_v55 = vpop.eup %2083 }
 0x12f   :  { %v784_v22 = vmul.f32 %v2084_v55, %v478_v61  ;;  %2087 = vtanh.f32 %v2911_v4  ;;  %v3459_v55 = vld [vmem:[#allocation3_spill] sm:$0xff] }
 0x130   :  { %2089 = vrcp.f32 %v778_v1  ;;  %v2086_v59 = vpop.eup %2085 }
 0x131   :  { %v2913_v44 = vadd.f32 %v786_v47, %v784_v22  ;;  %v3460_v22 = vld [vmem:[#allocation5_spill] sm:$0xff] }
 0x133   :  { %2091 = vtanh.f32 %v2913_v44 }
 0x13c   :  { %v2088_v56 = vpop.eup %2087 }
 0x13d   :  { %v2090_v53 = vpop.eup %2089  ;;  %v791_v39 = vmul.f32 %v2088_v56, %v2086_v59 }
 0x140   :  { %v2092_v3 = vpop.eup %2091 }
 0x141   :  { %v792_v51 = vmul.f32 %v2092_v3, %v2090_v53  ;;  %v3461_v53 = vld [vmem:[#allocation4_spill] sm:$0xff] }
 0x143   :  { %v804_v50 = vpack.c.bf16 %v792_v51, %v791_v39 }
 0x145   :  { %838 = vmatmul.mubr.bf16.vlgmr.msra.gmra.mxu0 %v804_v50  ;;  %881 = vmatmul.mubr.bf16.vlgmr.msra.gmra.mxu1 %v804_v50 }
 0x146   :  { %960 = vmatpush1.bf16.msra.mxu0 %v2415_v7  ;;  %1003 = vmatpush1.bf16.msra.mxu1 %v2447_v12 }
 0x147   :  { %961 = vmatprep.subr.bf16.mxu0 %v2421_v8  ;;  %1004 = vmatprep.subr.bf16.mxu1 %v2469_v16 }
 0x148   :  { %991 = vmatprep.mubr.bf16.mxu0 %v3458_v62  ;;  %1034 = vmatprep.mubr.bf16.mxu1 %v3458_v62 }
 0x14a   :  { %962 = vmatpush1.bf16.msra.mxu0 %v2430_v9  ;;  %1005 = vmatpush1.bf16.msra.mxu1 %v2474_v17 }
 0x14b   :  { %963 = vmatprep.subr.bf16.mxu0 %v2437_v10  ;;  %1006 = vmatprep.subr.bf16.mxu1 %v2495_v20 }
 0x14e   :  { %964 = vmatpush1.bf16.msra.mxu0 %v2456_v14  ;;  %1007 = vmatpush1.bf16.msra.mxu1 %v2502_v21 }
 0x14f   :  { %965 = vmatprep.subr.bf16.mxu0 %v2464_v15  ;;  %1008 = vmatprep.subr.bf16.mxu1 %v2522_v25 }
 0x152   :  { %966 = vmatpush1.bf16.msra.mxu0 %v2483_v18  ;;  %1009 = vmatpush1.bf16.msra.mxu1 %v2529_v26 }
 0x153   :  { %967 = vmatprep.subr.bf16.mxu0 %v2488_v19  ;;  %1010 = vmatprep.subr.bf16.mxu1 %v2538_v27 }
 0x156   :  { %968 = vmatpush1.bf16.msra.mxu0 %v2511_v23  ;;  %1011 = vmatpush1.bf16.msra.mxu1 %v2557_v30 }
 0x157   :  { %969 = vmatprep.subr.bf16.mxu0 %v2517_v24  ;;  %1012 = vmatprep.subr.bf16.mxu1 %v2572_v33 }
 0x15a   :  { %970 = vmatpush1.bf16.msra.mxu0 %v2544_v28  ;;  %1013 = vmatpush1.bf16.msra.mxu1 %v2579_v34 }
 0x15b   :  { %971 = vmatprep.subr.bf16.mxu0 %v2552_v29  ;;  %1014 = vmatprep.subr.bf16.mxu1 %v2591_v36 }
 0x15e   :  { %972 = vmatpush1.bf16.msra.mxu0 %v2566_v32  ;;  %1015 = vmatpush1.bf16.msra.mxu1 %v2607_v38 }
 0x15f   :  { %973 = vmatprep.subr.bf16.mxu0 %v2584_v35  ;;  %1016 = vmatprep.subr.bf16.mxu1 %v2617_v40 }
 0x162   :  { %974 = vmatpush1.bf16.msra.mxu0 %v2600_v37  ;;  %1017 = vmatpush1.bf16.msra.mxu1 %v2623_v41 }
 0x163   :  { %1113 = vmatprep.subr.bf16.mxu0 %v2410_v6  ;;  %1156 = vmatprep.subr.bf16.mxu1 %v2442_v11 }
 0x205   :  { %v839_v5 = vpop.f32.mrf.mxu0  ;;  %v882_v0 = vpop.f32.mrf.mxu1 }
 0x206   :  { %v891_v58 = vadd.f32 %v839_v5, %v2722_v13 }
 0x207   :  { %v841_v31 = vpop.f32.mrf.mxu0  ;;  %v884_v60 = vpop.f32.mrf.mxu1 }
 0x208   :  { %v1956_v45 = vmul.f32 -1.442695, %v891_v58  ;;  %v892_v49 = vadd.f32 %v841_v31, %v2728_v42  ;;  %v894_v13 = vadd.f32 %v884_v60, %v2731_v43  ;;  %v893_v42 = vadd.f32 %v882_v0, %v3459_v55 }
 0x209   :  { %v843_v52 = vpop.f32.mrf.mxu0  ;;  %v886_v11 = vpop.f32.mrf.mxu1 }
 0x20a   :  { %2093 = vpow2.f32 %v1956_v45  ;;  %v1958_v48 = vmul.f32 -1.442695, %v892_v49  ;;  %v895_v57 = vadd.f32 %v843_v52, %v2734_v46  ;;  %v1960_v1 = vmul.f32 -1.442695, %v894_v13 }
 0x20b   :  { %v845_v63 = vpop.f32.mrf.mxu0  ;;  %v888_v47 = vpop.f32.mrf.mxu1  ;;  %v897_v46 = vadd.f32 %v886_v11, %v3461_v53 }
 0x20c   :  { %2095 = vpow2.f32 %v1958_v48  ;;  %v1957_v2 = vmul.f32 -1.442695, %v895_v57  ;;  %v896_v6 = vadd.f32 %v845_v63, %v2740_v54  ;;  %v898_v59 = vadd.f32 %v888_v47, %v3460_v22 }
 0x20e   :  { %2097 = vpow2.f32 %v1957_v2  ;;  %v1959_v61 = vmul.f32 -1.442695, %v896_v6  ;;  %v1961_v54 = vmul.f32 -1.442695, %v898_v59 }
 0x210   :  { %2099 = vpow2.f32 %v1959_v61 }
 0x211   :  { %2101 = vtanh.f32 %v893_v42 }
 0x212   :  { %2103 = vpow2.f32 %v1960_v1 }
 0x217   :  { %v2094_v56 = vpop.eup %2093 }
 0x218   :  { %v905_v3 = vadd.f32 1.0, %v2094_v56 }
 0x219   :  { %v2096_v39 = vpop.eup %2095 }
 0x21a   :  { %2105 = vrcp.f32 %v905_v3  ;;  %v917_v51 = vadd.f32 1.0, %v2096_v39 }
 0x21b   :  { %v2098_v50 = vpop.eup %2097  ;;  %2107 = vtanh.f32 %v897_v46 }
 0x21c   :  { %2109 = vrcp.f32 %v917_v51  ;;  %v906_v43 = vadd.f32 1.0, %v2098_v50 }
 0x21d   :  { %v2100_v5 = vpop.eup %2099  ;;  %2111 = vpow2.f32 %v1961_v54 }
 0x21e   :  { %2113 = vrcp.f32 %v906_v43  ;;  %v918_v58 = vadd.f32 1.0, %v2100_v5  ;;  %v2102_v0 = vpop.eup %2101 }
 0x21f   :  { %v2104_v31 = vpop.eup %2103 }
 0x220   :  { %2115 = vrcp.f32 %v918_v58  ;;  %v931_v2 = vadd.f32 1.0, %v2104_v31 }
 0x222   :  { %2117 = vrcp.f32 %v931_v2 }
 0x227   :  { %v2106_v45 = vpop.eup %2105 }
 0x228   :  { %v2108_v49 = vpop.eup %2107  ;;  %v939_v52 = vmul.f32 %v2106_v45, %v2102_v0 }
 0x229   :  { %v2110_v48 = vpop.eup %2109 }
 0x22a   :  { %v2112_v60 = vpop.eup %2111  ;;  %v937_v57 = vmul.f32 %v2110_v48, %v2911_v4 }
 0x22b   :  { %v2114_v63 = vpop.eup %2113  ;;  %v932_v13 = vadd.f32 1.0, %v2112_v60 }
 0x22c   :  { %v2960_v6 = vadd.f32 %v939_v52, %v937_v57  ;;  %v940_v11 = vmul.f32 %v2114_v63, %v2108_v49 }
 0x22d   :  { %v2116_v61 = vpop.eup %2115 }
 0x22e   :  { %v938_v47 = vmul.f32 %v2116_v61, %v2913_v44  ;;  %2119 = vtanh.f32 %v2960_v6  ;;  %v3469_v44 = vld [vmem:[#allocation11_spill] sm:$0xff] }
 0x22f   :  { %2121 = vrcp.f32 %v932_v13  ;;  %v2118_v42 = vpop.eup %2117 }
 0x230   :  { %v2963_v55 = vadd.f32 %v940_v11, %v938_v47 }
 0x232   :  { %2123 = vtanh.f32 %v2963_v55 }
 0x23b   :  { %v2120_v1 = vpop.eup %2119 }
 0x23c   :  { %v2122_v4 = vpop.eup %2121  ;;  %v945_v59 = vmul.f32 %v2120_v1, %v2118_v42 }
 0x23f   :  { %v2124_v22 = vpop.eup %2123 }
 0x240   :  { %v946_v56 = vmul.f32 %v2124_v22, %v2122_v4 }
 0x242   :  { %v958_v53 = vpack.c.bf16 %v946_v56, %v945_v59 }
 0x244   :  { %992 = vmatmul.mubr.bf16.vlgmr.msra.gmra.mxu0 %v958_v53  ;;  %1035 = vmatmul.mubr.bf16.vlgmr.msra.gmra.mxu1 %v958_v53 }
 0x245   :  { %1114 = vmatpush1.bf16.msra.mxu0 %v2415_v7  ;;  %1157 = vmatpush1.bf16.msra.mxu1 %v2447_v12  ;;  %v3002_v7 = vld [vmem:[%s3399_s4 + $0xe4] ss:$16 sps:$4 sm:$0xff]  }
 0x246   :  { %1115 = vmatprep.subr.bf16.mxu0 %v2421_v8  ;;  %1158 = vmatprep.subr.bf16.mxu1 %v2469_v16  ;;  %v3008_v8 = vld [vmem:[%s3399_s4 + $0xec] ss:$16 sps:$4 sm:$0xff]  }
 0x247   :  { %1145 = vmatprep.mubr.bf16.mxu0 %v3458_v62  ;;  %1188 = vmatprep.mubr.bf16.mxu1 %v3458_v62 }
 0x249   :  { %1116 = vmatpush1.bf16.msra.mxu0 %v2430_v9  ;;  %1159 = vmatpush1.bf16.msra.mxu1 %v2474_v17  ;;  %v3463_v17 = vld [vmem:[#allocation8_spill] sm:$0xff] }
 0x24a   :  { %1117 = vmatprep.subr.bf16.mxu0 %v2437_v10  ;;  %1160 = vmatprep.subr.bf16.mxu1 %v2495_v20  ;;  %v3462_v10 = vld [vmem:[#allocation6_spill] sm:$0xff] }
 0x24d   :  { %1118 = vmatpush1.bf16.msra.mxu0 %v2456_v14  ;;  %1161 = vmatpush1.bf16.msra.mxu1 %v2502_v21 }
 0x24e   :  { %1119 = vmatprep.subr.bf16.mxu0 %v2464_v15  ;;  %1162 = vmatprep.subr.bf16.mxu1 %v2522_v25 }
 0x251   :  { %1120 = vmatpush1.bf16.msra.mxu0 %v2483_v18  ;;  %1163 = vmatpush1.bf16.msra.mxu1 %v2529_v26 }
 0x252   :  { %1121 = vmatprep.subr.bf16.mxu0 %v2488_v19  ;;  %1164 = vmatprep.subr.bf16.mxu1 %v2538_v27  ;;  %v3465_v27 = vld [vmem:[#allocation12_spill] sm:$0xff] }
 0x255   :  { %1122 = vmatpush1.bf16.msra.mxu0 %v2511_v23  ;;  %1165 = vmatpush1.bf16.msra.mxu1 %v2557_v30  ;;  %v3464_v23 = vld [vmem:[#allocation10_spill] sm:$0xff] }
 0x256   :  { %1123 = vmatprep.subr.bf16.mxu0 %v2517_v24  ;;  %1166 = vmatprep.subr.bf16.mxu1 %v2572_v33 }
 0x259   :  { %1124 = vmatpush1.bf16.msra.mxu0 %v2544_v28  ;;  %1167 = vmatpush1.bf16.msra.mxu1 %v2579_v34 }
 0x25a   :  { %1125 = vmatprep.subr.bf16.mxu0 %v2552_v29  ;;  %1168 = vmatprep.subr.bf16.mxu1 %v2591_v36 }
 0x25d   :  { %1126 = vmatpush1.bf16.msra.mxu0 %v2566_v32  ;;  %1169 = vmatpush1.bf16.msra.mxu1 %v2607_v38  ;;  %v3466_v32 = vld [vmem:[#allocation9_spill] sm:$0xff] }
 0x25e   :  { %1127 = vmatprep.subr.bf16.mxu0 %v2584_v35  ;;  %1170 = vmatprep.subr.bf16.mxu1 %v2617_v40  ;;  %v3467_v35 = vld [vmem:[#allocation7_spill] sm:$0xff]  ;;  %v3468_v38 = vld [vmem:[#allocation13_spill] sm:$0xff] }
 0x261   :  { %1128 = vmatpush1.bf16.msra.mxu0 %v2600_v37  ;;  %1171 = vmatpush1.bf16.msra.mxu1 %v2623_v41 }
 0x262   :  { %1267 = vmatprep.subr.bf16.mxu0 %v3002_v7  ;;  %1310 = vmatprep.subr.bf16.mxu1 %v3008_v8 }
 0x304   :  { %v993_v9 = vpop.f32.mrf.mxu0  ;;  %v1036_v14 = vpop.f32.mrf.mxu1 }
 0x305   :  { %v1045_v12 = vadd.f32 %v993_v9, %v3462_v10  ;;  %v1047_v36 = vadd.f32 %v1036_v14, %v3467_v35  ;;  %v3036_v10 = vld [vmem:[%s3399_s4 + $0xe8] ss:$16 sps:$4 sm:$0xff]   ;;  %v3048_v14 = vld [vmem:[%s3399_s4 + $0xcc] ss:$16 sps:$4 sm:$0xff]   ;;  %v3164_v35 = vld [vmem:[%s3399_s4 + $0x24] ss:$16 sps:$4 sm:$0xff]  }
 0x306   :  { %v995_v15 = vpop.f32.mrf.mxu0  ;;  %v1038_v21 = vpop.f32.mrf.mxu1 }
 0x307   :  { %v1962_v16 = vmul.f32 -1.442695, %v1045_v12  ;;  %v1046_v18 = vadd.f32 %v995_v15, %v3463_v17  ;;  %v1048_v33 = vadd.f32 %v1038_v21, %v3466_v32  ;;  %v3042_v12 = vld [vmem:[%s3399_s4 + $0xc4] ss:$16 sps:$4 sm:$0xff]   ;;  %v3056_v15 = vld [vmem:[%s3399_s4 + $0xc0] ss:$16 sps:$4 sm:$0xff]  }
 0x308   :  { %v997_v19 = vpop.f32.mrf.mxu0  ;;  %v1040_v29 = vpop.f32.mrf.mxu1  ;;  %v3068_v17 = vld [vmem:[%s3399_s4 + $0xa4] ss:$16 sps:$4 sm:$0xff]   ;;  %v3146_v32 = vld [vmem:[%s3399_s4 + $0x4c] ss:$16 sps:$4 sm:$0xff]  }
 0x309   :  { %2125 = vpow2.f32 %v1962_v16  ;;  %v1964_v20 = vmul.f32 -1.442695, %v1046_v18  ;;  %v1049_v24 = vadd.f32 %v997_v19, %v3464_v23  ;;  %v1966_v37 = vmul.f32 -1.442695, %v1048_v33  ;;  %v3062_v16 = vld [vmem:[%s3399_s4 + $0xc8] ss:$16 sps:$4 sm:$0xff]  }
 0x30a   :  { %v999_v25 = vpop.f32.mrf.mxu0  ;;  %v1042_v34 = vpop.f32.mrf.mxu1  ;;  %v1051_v46 = vadd.f32 %v1040_v29, %v3469_v44  ;;  %v3074_v18 = vld [vmem:[%s3399_s4 + $0xac] ss:$16 sps:$4 sm:$0xff]   ;;  %v3080_v19 = vld [vmem:[%s3399_s4 + $0xa0] ss:$16 sps:$4 sm:$0xff]   ;;  %v3092_v21 = vld [vmem:[%s3399_s4 + $0x84] ss:$16 sps:$4 sm:$0xff]  }
 0x30b   :  { %2127 = vpow2.f32 %v1964_v20  ;;  %v1963_v26 = vmul.f32 -1.442695, %v1049_v24  ;;  %v1050_v28 = vadd.f32 %v999_v25, %v3465_v27  ;;  %v1052_v40 = vadd.f32 %v1042_v34, %v3468_v38  ;;  %v3086_v20 = vld [vmem:[%s3399_s4 + $0xa8] ss:$16 sps:$4 sm:$0xff]   ;;  %v3098_v23 = vld [vmem:[%s3399_s4 + $0x8c] ss:$16 sps:$4 sm:$0xff]  }
 0x30c   :  { %v3104_v24 = vld [vmem:[%s3399_s4 + $0x80] ss:$16 sps:$4 sm:$0xff]   ;;  %v3110_v25 = vld [vmem:[%s3399_s4 + $0x88] ss:$16 sps:$4 sm:$0xff]   ;;  %v3122_v27 = vld [vmem:[%s3399_s4 + $0x6c] ss:$16 sps:$4 sm:$0xff]  }
 0x30d   :  { %2129 = vpow2.f32 %v1963_v26  ;;  %v1965_v30 = vmul.f32 -1.442695, %v1050_v28  ;;  %v1967_v54 = vmul.f32 -1.442695, %v1052_v40  ;;  %v3116_v26 = vld [vmem:[%s3399_s4 + $0x64] ss:$16 sps:$4 sm:$0xff]  }
 0x30e   :  { %v3128_v28 = vld [vmem:[%s3399_s4 + $0x60] ss:$16 sps:$4 sm:$0xff]   ;;  %v3134_v29 = vld [vmem:[%s3399_s4 + $0x68] ss:$16 sps:$4 sm:$0xff]   ;;  %v3188_v40 = vld [vmem:[%s3399_s4 + $0x4] ss:$16 sps:$4 sm:$0xff]  }
 0x30f   :  { %2131 = vpow2.f32 %v1965_v30  ;;  %v3140_v30 = vld [vmem:[%s3399_s4 + $0x44] ss:$16 sps:$4 sm:$0xff]   ;;  %v3152_v33 = vld [vmem:[%s3399_s4 + $0x40] ss:$16 sps:$4 sm:$0xff]   ;;  %v3158_v34 = vld [vmem:[%s3399_s4 + $0x48] ss:$16 sps:$4 sm:$0xff]  }
 0x310   :  { %2133 = vtanh.f32 %v1047_v36  ;;  %v3170_v36 = vld [vmem:[%s3399_s4 + $0x2c] ss:$16 sps:$4 sm:$0xff]   ;;  %v3182_v38 = vld [vmem:[%s3399_s4 + $0x28] ss:$16 sps:$4 sm:$0xff]   ;;  %v3200_v44 = vld [vmem:[%s3399_s4] ss:$16 sps:$4 sm:$0xff]  }
 0x311   :  { %2135 = vpow2.f32 %v1966_v37  ;;  %v3176_v37 = vld [vmem:[%s3399_s4 + $0x20] ss:$16 sps:$4 sm:$0xff]  }
 0x316   :  { %v2126_v41 = vpop.eup %2125 }
 0x317   :  { %v1059_v3 = vadd.f32 1.0, %v2126_v41  ;;  %v3194_v41 = vld [vmem:[%s3399_s4 + $0xc] ss:$16 sps:$4 sm:$0xff]  }
 0x318   :  { %v2128_v39 = vpop.eup %2127 }
 0x319   :  { %2137 = vrcp.f32 %v1059_v3  ;;  %v1071_v51 = vadd.f32 1.0, %v2128_v39  ;;  %v3470_v39 = vld [vmem:[#allocation14_spill] sm:$0xff] }
 0x31a   :  { %v2130_v50 = vpop.eup %2129  ;;  %2139 = vtanh.f32 %v1051_v46  ;;  %v3206_v46 = vld [vmem:[%s3399_s4 + $0x8] ss:$16 sps:$4 sm:$0xff]  }
 0x31b   :  { %2141 = vrcp.f32 %v1071_v51  ;;  %v1060_v43 = vadd.f32 1.0, %v2130_v50 }
 0x31c   :  { %v2132_v5 = vpop.eup %2131  ;;  %2143 = vpow2.f32 %v1967_v54 }
 0x31d   :  { %2145 = vrcp.f32 %v1060_v43  ;;  %v1072_v58 = vadd.f32 1.0, %v2132_v5  ;;  %v2134_v0 = vpop.eup %2133  ;;  %v3471_v5 = vld [vmem:[#allocation16_spill] sm:$0xff] }
 0x31e   :  { %v2136_v31 = vpop.eup %2135 }
 0x31f   :  { %2147 = vrcp.f32 %v1072_v58  ;;  %v1085_v2 = vadd.f32 1.0, %v2136_v31 }
 0x321   :  { %2149 = vrcp.f32 %v1085_v2 }
 0x326   :  { %v2138_v45 = vpop.eup %2137 }
 0x327   :  { %v2140_v49 = vpop.eup %2139  ;;  %v1093_v52 = vmul.f32 %v2138_v45, %v2134_v0 }
 0x328   :  { %v2142_v48 = vpop.eup %2141 }
 0x329   :  { %v2144_v60 = vpop.eup %2143  ;;  %v1091_v57 = vmul.f32 %v2142_v48, %v2960_v6 }
 0x32a   :  { %v2146_v63 = vpop.eup %2145  ;;  %v1086_v47 = vadd.f32 1.0, %v2144_v60 }
 0x32b   :  { %v3020_v11 = vadd.f32 %v1093_v52, %v1091_v57  ;;  %v1094_v61 = vmul.f32 %v2146_v63, %v2140_v49  ;;  %v3472_v49 = vld [vmem:[#allocation18_spill] sm:$0xff]  ;;  %v3473_v57 = vld [vmem:[#allocation20_spill] sm:$0xff] }
 0x32c   :  { %v2148_v13 = vpop.eup %2147 }
 0x32d   :  { %v1092_v42 = vmul.f32 %v2148_v13, %v2963_v55  ;;  %2151 = vtanh.f32 %v3020_v11  ;;  %v3030_v55 = vld [vmem:[%s3399_s4 + $0xe0] ss:$16 sps:$4 sm:$0xff]  }
 0x32e   :  { %2153 = vrcp.f32 %v1086_v47  ;;  %v2150_v4 = vpop.eup %2149  ;;  %v3474_v13 = vld [vmem:[#allocation17_spill] sm:$0xff] }
 0x32f   :  { %v3023_v1 = vadd.f32 %v1094_v61, %v1092_v42 }
 0x331   :  { %2155 = vtanh.f32 %v3023_v1 }
 0x33a   :  { %v2152_v22 = vpop.eup %2151 }
 0x33b   :  { %v2154_v6 = vpop.eup %2153  ;;  %v1099_v56 = vmul.f32 %v2152_v22, %v2150_v4  ;;  %v3475_v4 = vld [vmem:[#allocation15_spill] sm:$0xff] }
 0x33e   :  { %v2156_v59 = vpop.eup %2155 }
 0x33f   :  { %v1100_v53 = vmul.f32 %v2156_v59, %v2154_v6  ;;  %v3476_v59 = vld [vmem:[#allocation21_spill] sm:$0xff] }
 0x341   :  { %v1112_v9 = vpack.c.bf16 %v1100_v53, %v1099_v56 }
 0x343   :  { %1146 = vmatmul.mubr.bf16.vlgmr.msra.gmra.mxu0 %v1112_v9  ;;  %1189 = vmatmul.mubr.bf16.vlgmr.msra.gmra.mxu1 %v1112_v9  ;;  %v3477_v9 = vld [vmem:[#allocation19_spill] sm:$0xff] }
 0x344   :  { %1268 = vmatpush1.bf16.msra.mxu0 %v3030_v55  ;;  %1311 = vmatpush1.bf16.msra.mxu1 %v3036_v10 }
 0x345   :  { %1269 = vmatprep.subr.bf16.mxu0 %v3042_v12  ;;  %1312 = vmatprep.subr.bf16.mxu1 %v3048_v14 }
 0x346   :  { %1299 = vmatprep.mubr.bf16.mxu0 %v3458_v62  ;;  %1342 = vmatprep.mubr.bf16.mxu1 %v3458_v62 }
 0x348   :  { %1270 = vmatpush1.bf16.msra.mxu0 %v3056_v15  ;;  %1313 = vmatpush1.bf16.msra.mxu1 %v3062_v16 }
 0x349   :  { %1271 = vmatprep.subr.bf16.mxu0 %v3068_v17  ;;  %1314 = vmatprep.subr.bf16.mxu1 %v3074_v18 }
 0x34c   :  { %1272 = vmatpush1.bf16.msra.mxu0 %v3080_v19  ;;  %1315 = vmatpush1.bf16.msra.mxu1 %v3086_v20 }
 0x34d   :  { %1273 = vmatprep.subr.bf16.mxu0 %v3092_v21  ;;  %1316 = vmatprep.subr.bf16.mxu1 %v3098_v23 }
 0x350   :  { %1274 = vmatpush1.bf16.msra.mxu0 %v3104_v24  ;;  %1317 = vmatpush1.bf16.msra.mxu1 %v3110_v25 }
 0x351   :  { %1275 = vmatprep.subr.bf16.mxu0 %v3116_v26  ;;  %1318 = vmatprep.subr.bf16.mxu1 %v3122_v27 }
 0x354   :  { %1276 = vmatpush1.bf16.msra.mxu0 %v3128_v28  ;;  %1319 = vmatpush1.bf16.msra.mxu1 %v3134_v29 }
 0x355   :  { %1277 = vmatprep.subr.bf16.mxu0 %v3140_v30  ;;  %1320 = vmatprep.subr.bf16.mxu1 %v3146_v32 }
 0x358   :  { %1278 = vmatpush1.bf16.msra.mxu0 %v3152_v33  ;;  %1321 = vmatpush1.bf16.msra.mxu1 %v3158_v34 }
 0x359   :  { %1279 = vmatprep.subr.bf16.mxu0 %v3164_v35  ;;  %1322 = vmatprep.subr.bf16.mxu1 %v3170_v36 }
 0x35c   :  { %1280 = vmatpush1.bf16.msra.mxu0 %v3176_v37  ;;  %1323 = vmatpush1.bf16.msra.mxu1 %v3182_v38 }
 0x35d   :  { %1281 = vmatprep.subr.bf16.mxu0 %v3188_v40  ;;  %1324 = vmatprep.subr.bf16.mxu1 %v3194_v41 }
 0x360   :  { %1282 = vmatpush1.bf16.msra.mxu0 %v3200_v44  ;;  %1325 = vmatpush1.bf16.msra.mxu1 %v3206_v46 }
 0x361   :  { %1421 = vmatprep.subr.bf16.mxu0 %v3002_v7  ;;  %1464 = vmatprep.subr.bf16.mxu1 %v3008_v8 }
 0x403   :  { %v1147_v3 = vpop.f32.mrf.mxu0  ;;  %v1190_v51 = vpop.f32.mrf.mxu1 }
 0x404   :  { %v1199_v54 = vadd.f32 %v1147_v3, %v3470_v39  ;;  %v1201_v22 = vadd.f32 %v1190_v51, %v3475_v4 }
 0x405   :  { %v1149_v50 = vpop.f32.mrf.mxu0  ;;  %v1192_v45 = vpop.f32.mrf.mxu1 }
 0x406   :  { %v1968_v43 = vmul.f32 -1.442695, %v1199_v54  ;;  %v1200_v58 = vadd.f32 %v1149_v50, %v3471_v5  ;;  %v1202_v47 = vadd.f32 %v1192_v45, %v3474_v13 }
 0x407   :  { %v1151_v0 = vpop.f32.mrf.mxu0  ;;  %v1194_v2 = vpop.f32.mrf.mxu1 }
 0x408   :  { %2157 = vpow2.f32 %v1968_v43  ;;  %v1970_v31 = vmul.f32 -1.442695, %v1200_v58  ;;  %v1203_v52 = vadd.f32 %v1151_v0, %v3472_v49  ;;  %v1972_v6 = vmul.f32 -1.442695, %v1202_v47 }
 0x409   :  { %v1153_v48 = vpop.f32.mrf.mxu0  ;;  %v1196_v42 = vpop.f32.mrf.mxu1  ;;  %v1205_v3 = vadd.f32 %v1194_v2, %v3477_v9 }
 0x40a   :  { %2159 = vpow2.f32 %v1970_v31  ;;  %v1969_v60 = vmul.f32 -1.442695, %v1203_v52  ;;  %v1204_v63 = vadd.f32 %v1153_v48, %v3473_v57  ;;  %v1206_v56 = vadd.f32 %v1196_v42, %v3476_v59 }
 0x40c   :  { %2161 = vpow2.f32 %v1969_v60  ;;  %v1971_v61 = vmul.f32 -1.442695, %v1204_v63  ;;  %v1973_v50 = vmul.f32 -1.442695, %v1206_v56 }
 0x40e   :  { %2163 = vpow2.f32 %v1971_v61 }
 0x40f   :  { %2165 = vtanh.f32 %v1201_v22 }
 0x410   :  { %2167 = vpow2.f32 %v1972_v6 }
 0x415   :  { %v2158_v53 = vpop.eup %2157 }
 0x416   :  { %v1213_v39 = vadd.f32 1.0, %v2158_v53 }
 0x417   :  { %v2160_v54 = vpop.eup %2159 }
 0x418   :  { %2169 = vrcp.f32 %v1213_v39  ;;  %v1225_v43 = vadd.f32 1.0, %v2160_v54  ;;  %v3478_v54 = vld [vmem:[#allocation22_spill] sm:$0xff] }
 0x419   :  { %v2162_v5 = vpop.eup %2161  ;;  %2171 = vtanh.f32 %v1205_v3 }
 0x41a   :  { %2173 = vrcp.f32 %v1225_v43  ;;  %v1214_v58 = vadd.f32 1.0, %v2162_v5 }
 0x41b   :  { %v2164_v0 = vpop.eup %2163  ;;  %2175 = vpow2.f32 %v1973_v50 }
 0x41c   :  { %2177 = vrcp.f32 %v1214_v58  ;;  %v1226_v51 = vadd.f32 1.0, %v2164_v0  ;;  %v2166_v31 = vpop.eup %2165  ;;  %v3479_v0 = vld [vmem:[#allocation24_spill] sm:$0xff] }
 0x41d   :  { %v2168_v45 = vpop.eup %2167 }
 0x41e   :  { %2179 = vrcp.f32 %v1226_v51  ;;  %v1239_v61 = vadd.f32 1.0, %v2168_v45 }
 0x420   :  { %2181 = vrcp.f32 %v1239_v61 }
 0x425   :  { %v2170_v49 = vpop.eup %2169 }
 0x426   :  { %v2172_v52 = vpop.eup %2171  ;;  %v1247_v48 = vmul.f32 %v2170_v49, %v2166_v31 }
 0x427   :  { %v2174_v60 = vpop.eup %2173 }
 0x428   :  { %v2176_v57 = vpop.eup %2175  ;;  %v1245_v63 = vmul.f32 %v2174_v60, %v3020_v11 }
 0x429   :  { %v2178_v2 = vpop.eup %2177  ;;  %v1240_v4 = vadd.f32 1.0, %v2176_v57 }
 0x42a   :  { %v3220_v13 = vadd.f32 %v1247_v48, %v1245_v63  ;;  %v1248_v47 = vmul.f32 %v2178_v2, %v2172_v52  ;;  %v3480_v52 = vld [vmem:[#allocation26_spill] sm:$0xff]  ;;  %v3481_v63 = vld [vmem:[#allocation28_spill] sm:$0xff] }
 0x42b   :  { %v2180_v42 = vpop.eup %2179 }
 0x42c   :  { %v1246_v22 = vmul.f32 %v2180_v42, %v3023_v1  ;;  %2183 = vtanh.f32 %v3220_v13  ;;  %v3482_v42 = vld [vmem:[#allocation25_spill] sm:$0xff] }
 0x42d   :  { %2185 = vrcp.f32 %v1240_v4  ;;  %v2182_v59 = vpop.eup %2181 }
 0x42e   :  { %v3223_v6 = vadd.f32 %v1248_v47, %v1246_v22 }
 0x430   :  { %2187 = vtanh.f32 %v3223_v6 }
 0x439   :  { %v2184_v56 = vpop.eup %2183 }
 0x43a   :  { %v2186_v11 = vpop.eup %2185  ;;  %v1253_v9 = vmul.f32 %v2184_v56, %v2182_v59  ;;  %v3483_v59 = vld [vmem:[#allocation23_spill] sm:$0xff] }
 0x43d   :  { %v2188_v53 = vpop.eup %2187 }
 0x43e   :  { %v1254_v3 = vmul.f32 %v2188_v53, %v2186_v11  ;;  %v3484_v53 = vld [vmem:[#allocation29_spill] sm:$0xff] }
 0x440   :  { %v1266_v39 = vpack.c.bf16 %v1254_v3, %v1253_v9 }
 0x442   :  { %1300 = vmatmul.mubr.bf16.vlgmr.msra.gmra.mxu0 %v1266_v39  ;;  %1343 = vmatmul.mubr.bf16.vlgmr.msra.gmra.mxu1 %v1266_v39  ;;  %v3485_v39 = vld [vmem:[#allocation27_spill] sm:$0xff] }
 0x443   :  { %1422 = vmatpush1.bf16.msra.mxu0 %v3030_v55  ;;  %1465 = vmatpush1.bf16.msra.mxu1 %v3036_v10 }
 0x444   :  { %1423 = vmatprep.subr.bf16.mxu0 %v3042_v12  ;;  %1466 = vmatprep.subr.bf16.mxu1 %v3048_v14 }
 0x445   :  { %1453 = vmatprep.mubr.bf16.mxu0 %v3458_v62  ;;  %1496 = vmatprep.mubr.bf16.mxu1 %v3458_v62 }
 0x447   :  { %1424 = vmatpush1.bf16.msra.mxu0 %v3056_v15  ;;  %1467 = vmatpush1.bf16.msra.mxu1 %v3062_v16 }
 0x448   :  { %1425 = vmatprep.subr.bf16.mxu0 %v3068_v17  ;;  %1468 = vmatprep.subr.bf16.mxu1 %v3074_v18 }
 0x44b   :  { %1426 = vmatpush1.bf16.msra.mxu0 %v3080_v19  ;;  %1469 = vmatpush1.bf16.msra.mxu1 %v3086_v20 }
 0x44c   :  { %1427 = vmatprep.subr.bf16.mxu0 %v3092_v21  ;;  %1470 = vmatprep.subr.bf16.mxu1 %v3098_v23 }
 0x44f   :  { %1428 = vmatpush1.bf16.msra.mxu0 %v3104_v24  ;;  %1471 = vmatpush1.bf16.msra.mxu1 %v3110_v25 }
 0x450   :  { %1429 = vmatprep.subr.bf16.mxu0 %v3116_v26  ;;  %1472 = vmatprep.subr.bf16.mxu1 %v3122_v27 }
 0x453   :  { %1430 = vmatpush1.bf16.msra.mxu0 %v3128_v28  ;;  %1473 = vmatpush1.bf16.msra.mxu1 %v3134_v29 }
 0x454   :  { %1431 = vmatprep.subr.bf16.mxu0 %v3140_v30  ;;  %1474 = vmatprep.subr.bf16.mxu1 %v3146_v32 }
 0x457   :  { %1432 = vmatpush1.bf16.msra.mxu0 %v3152_v33  ;;  %1475 = vmatpush1.bf16.msra.mxu1 %v3158_v34 }
 0x458   :  { %1433 = vmatprep.subr.bf16.mxu0 %v3164_v35  ;;  %1476 = vmatprep.subr.bf16.mxu1 %v3170_v36 }
 0x45b   :  { %1434 = vmatpush1.bf16.msra.mxu0 %v3176_v37  ;;  %1477 = vmatpush1.bf16.msra.mxu1 %v3182_v38 }
 0x45c   :  { %1435 = vmatprep.subr.bf16.mxu0 %v3188_v40  ;;  %1478 = vmatprep.subr.bf16.mxu1 %v3194_v41 }
 0x45f   :  { %1436 = vmatpush1.bf16.msra.mxu0 %v3200_v44  ;;  %1479 = vmatpush1.bf16.msra.mxu1 %v3206_v46 }
 0x460   :  { %1575 = vmatprep.subr.bf16.mxu0 %v3002_v7  ;;  %1618 = vmatprep.subr.bf16.mxu1 %v3008_v8 }
 0x502   :  { %v1301_v1 = vpop.f32.mrf.mxu0  ;;  %v1344_v43 = vpop.f32.mrf.mxu1 }
 0x503   :  { %v1353_v50 = vadd.f32 %v1301_v1, %v3478_v54  ;;  %v1355_v56 = vadd.f32 %v1344_v43, %v3483_v59 }
 0x504   :  { %v1303_v5 = vpop.f32.mrf.mxu0  ;;  %v1346_v49 = vpop.f32.mrf.mxu1 }
 0x505   :  { %v1974_v58 = vmul.f32 -1.442695, %v1353_v50  ;;  %v1354_v51 = vadd.f32 %v1303_v5, %v3479_v0  ;;  %v1356_v4 = vadd.f32 %v1346_v49, %v3482_v42 }
 0x506   :  { %v1305_v31 = vpop.f32.mrf.mxu0  ;;  %v1348_v61 = vpop.f32.mrf.mxu1 }
 0x507   :  { %2189 = vpow2.f32 %v1974_v58  ;;  %v1976_v45 = vmul.f32 -1.442695, %v1354_v51  ;;  %v1357_v48 = vadd.f32 %v1305_v31, %v3480_v52  ;;  %v1978_v11 = vmul.f32 -1.442695, %v1356_v4 }
 0x508   :  { %v1307_v60 = vpop.f32.mrf.mxu0  ;;  %v1350_v22 = vpop.f32.mrf.mxu1  ;;  %v1359_v1 = vadd.f32 %v1348_v61, %v3485_v39 }
 0x509   :  { %2191 = vpow2.f32 %v1976_v45  ;;  %v1975_v57 = vmul.f32 -1.442695, %v1357_v48  ;;  %v1358_v2 = vadd.f32 %v1307_v60, %v3481_v63  ;;  %v1360_v9 = vadd.f32 %v1350_v22, %v3484_v53 }
 0x50b   :  { %2193 = vpow2.f32 %v1975_v57  ;;  %v1977_v47 = vmul.f32 -1.442695, %v1358_v2  ;;  %v1979_v5 = vmul.f32 -1.442695, %v1360_v9 }
 0x50d   :  { %2195 = vpow2.f32 %v1977_v47 }
 0x50e   :  { %2197 = vtanh.f32 %v1355_v56 }
 0x50f   :  { %2199 = vpow2.f32 %v1978_v11 }
 0x514   :  { %v2190_v3 = vpop.eup %2189 }
 0x515   :  { %v1367_v54 = vadd.f32 1.0, %v2190_v3 }
 0x516   :  { %v2192_v50 = vpop.eup %2191 }
 0x517   :  { %2201 = vrcp.f32 %v1367_v54  ;;  %v1379_v58 = vadd.f32 1.0, %v2192_v50  ;;  %v3486_v50 = vld [vmem:[#allocation30_spill] sm:$0xff] }
 0x518   :  { %v2194_v0 = vpop.eup %2193  ;;  %2203 = vtanh.f32 %v1359_v1 }
 0x519   :  { %2205 = vrcp.f32 %v1379_v58  ;;  %v1368_v51 = vadd.f32 1.0, %v2194_v0 }
 0x51a   :  { %v2196_v31 = vpop.eup %2195  ;;  %2207 = vpow2.f32 %v1979_v5 }
 0x51b   :  { %2209 = vrcp.f32 %v1368_v51  ;;  %v1380_v43 = vadd.f32 1.0, %v2196_v31  ;;  %v2198_v45 = vpop.eup %2197  ;;  %v3487_v31 = vld [vmem:[#allocation32_spill] sm:$0xff] }
 0x51c   :  { %v2200_v49 = vpop.eup %2199 }
 0x51d   :  { %2211 = vrcp.f32 %v1380_v43  ;;  %v1393_v47 = vadd.f32 1.0, %v2200_v49 }
 0x51f   :  { %2213 = vrcp.f32 %v1393_v47  ;;  %v3490_v47 = vld [vmem:[#allocation33_spill] sm:$0xff] }
 0x524   :  { %v2202_v52 = vpop.eup %2201 }
 0x525   :  { %v2204_v48 = vpop.eup %2203  ;;  %v1401_v60 = vmul.f32 %v2202_v52, %v2198_v45 }
 0x526   :  { %v2206_v57 = vpop.eup %2205 }
 0x527   :  { %v2208_v63 = vpop.eup %2207  ;;  %v1399_v2 = vmul.f32 %v2206_v57, %v3220_v13 }
 0x528   :  { %v2210_v61 = vpop.eup %2209  ;;  %v1394_v59 = vadd.f32 1.0, %v2208_v63 }
 0x529   :  { %v3270_v42 = vadd.f32 %v1401_v60, %v1399_v2  ;;  %v1402_v4 = vmul.f32 %v2210_v61, %v2204_v48  ;;  %v3488_v48 = vld [vmem:[#allocation34_spill] sm:$0xff] }
 0x52a   :  { %v2212_v22 = vpop.eup %2211 }
 0x52b   :  { %v1400_v56 = vmul.f32 %v2212_v22, %v3223_v6  ;;  %2215 = vtanh.f32 %v3270_v42 }
 0x52c   :  { %2217 = vrcp.f32 %v1394_v59  ;;  %v2214_v53 = vpop.eup %2213  ;;  %v3491_v59 = vld [vmem:[#allocation31_spill] sm:$0xff] }
 0x52d   :  { %v3273_v11 = vadd.f32 %v1402_v4, %v1400_v56 }
 0x52f   :  { %2219 = vtanh.f32 %v3273_v11 }
 0x538   :  { %v2216_v9 = vpop.eup %2215 }
 0x539   :  { %v2218_v13 = vpop.eup %2217  ;;  %v1407_v39 = vmul.f32 %v2216_v9, %v2214_v53  ;;  %v3492_v9 = vld [vmem:[#allocation37_spill] sm:$0xff] }
 0x53c   :  { %v2220_v3 = vpop.eup %2219 }
 0x53d   :  { %v1408_v1 = vmul.f32 %v2220_v3, %v2218_v13 }
 0x53f   :  { %v1420_v54 = vpack.c.bf16 %v1408_v1, %v1407_v39  ;;  %v3493_v39 = vld [vmem:[#allocation35_spill] sm:$0xff] }
 0x541   :  { %1454 = vmatmul.mubr.bf16.vlgmr.msra.gmra.mxu0 %v1420_v54  ;;  %1497 = vmatmul.mubr.bf16.vlgmr.msra.gmra.mxu1 %v1420_v54 }
 0x542   :  { %1576 = vmatpush1.bf16.msra.mxu0 %v3030_v55  ;;  %1619 = vmatpush1.bf16.msra.mxu1 %v3036_v10 }
 0x543   :  { %1577 = vmatprep.subr.bf16.mxu0 %v3042_v12  ;;  %1620 = vmatprep.subr.bf16.mxu1 %v3048_v14 }
 0x544   :  { %1607 = vmatprep.mubr.bf16.mxu0 %v3458_v62  ;;  %1650 = vmatprep.mubr.bf16.mxu1 %v3458_v62 }
 0x546   :  { %1578 = vmatpush1.bf16.msra.mxu0 %v3056_v15  ;;  %1621 = vmatpush1.bf16.msra.mxu1 %v3062_v16 }
 0x547   :  { %1579 = vmatprep.subr.bf16.mxu0 %v3068_v17  ;;  %1622 = vmatprep.subr.bf16.mxu1 %v3074_v18 }
 0x54a   :  { %1580 = vmatpush1.bf16.msra.mxu0 %v3080_v19  ;;  %1623 = vmatpush1.bf16.msra.mxu1 %v3086_v20 }
 0x54b   :  { %1581 = vmatprep.subr.bf16.mxu0 %v3092_v21  ;;  %1624 = vmatprep.subr.bf16.mxu1 %v3098_v23 }
 0x54e   :  { %1582 = vmatpush1.bf16.msra.mxu0 %v3104_v24  ;;  %1625 = vmatpush1.bf16.msra.mxu1 %v3110_v25 }
 0x54f   :  { %1583 = vmatprep.subr.bf16.mxu0 %v3116_v26  ;;  %1626 = vmatprep.subr.bf16.mxu1 %v3122_v27 }
 0x552   :  { %1584 = vmatpush1.bf16.msra.mxu0 %v3128_v28  ;;  %1627 = vmatpush1.bf16.msra.mxu1 %v3134_v29 }
 0x553   :  { %1585 = vmatprep.subr.bf16.mxu0 %v3140_v30  ;;  %1628 = vmatprep.subr.bf16.mxu1 %v3146_v32 }
 0x556   :  { %1586 = vmatpush1.bf16.msra.mxu0 %v3152_v33  ;;  %1629 = vmatpush1.bf16.msra.mxu1 %v3158_v34 }
 0x557   :  { %1587 = vmatprep.subr.bf16.mxu0 %v3164_v35  ;;  %1630 = vmatprep.subr.bf16.mxu1 %v3170_v36 }
 0x55a   :  { %1588 = vmatpush1.bf16.msra.mxu0 %v3176_v37  ;;  %1631 = vmatpush1.bf16.msra.mxu1 %v3182_v38 }
 0x55b   :  { %1589 = vmatprep.subr.bf16.mxu0 %v3188_v40  ;;  %1632 = vmatprep.subr.bf16.mxu1 %v3194_v41 }
 0x55e   :  { %1590 = vmatpush1.bf16.msra.mxu0 %v3200_v44  ;;  %1633 = vmatpush1.bf16.msra.mxu1 %v3206_v46 }
 0x55f   :  { %1729 = vmatprep.subr.bf16.mxu0 %v3002_v7  ;;  %1772 = vmatprep.subr.bf16.mxu1 %v3008_v8  ;;  %v3489_v7 = vld [vmem:[#allocation36_spill] sm:$0xff] }
 0x601   :  { %v1455_v6 = vpop.f32.mrf.mxu0  ;;  %v1498_v58 = vpop.f32.mrf.mxu1 }
 0x602   :  { %v1507_v5 = vadd.f32 %v1455_v6, %v3486_v50  ;;  %v1509_v56 = vadd.f32 %v1498_v58, %v3491_v59 }
 0x603   :  { %v1457_v0 = vpop.f32.mrf.mxu0  ;;  %v1500_v52 = vpop.f32.mrf.mxu1 }
 0x604   :  { %v1980_v51 = vmul.f32 -1.442695, %v1507_v5  ;;  %v1508_v43 = vadd.f32 %v1457_v0, %v3487_v31  ;;  %v1510_v4 = vadd.f32 %v1500_v52, %v3490_v47 }
 0x605   :  { %v1459_v45 = vpop.f32.mrf.mxu0  ;;  %v1502_v8 = vpop.f32.mrf.mxu1 }
 0x606   :  { %2221 = vpow2.f32 %v1980_v51  ;;  %v1982_v49 = vmul.f32 -1.442695, %v1508_v43  ;;  %v1511_v60 = vadd.f32 %v1459_v45, %v3488_v48  ;;  %v1984_v53 = vmul.f32 -1.442695, %v1510_v4 }
 0x607   :  { %v1461_v57 = vpop.f32.mrf.mxu0  ;;  %v1504_v22 = vpop.f32.mrf.mxu1  ;;  %v1513_v1 = vadd.f32 %v1502_v8, %v3493_v39 }
 0x608   :  { %2223 = vpow2.f32 %v1982_v49  ;;  %v1981_v63 = vmul.f32 -1.442695, %v1511_v60  ;;  %v1512_v2 = vadd.f32 %v1461_v57, %v3489_v7  ;;  %v1514_v13 = vadd.f32 %v1504_v22, %v3492_v9 }
 0x60a   :  { %2225 = vpow2.f32 %v1981_v63  ;;  %v1983_v61 = vmul.f32 -1.442695, %v1512_v2  ;;  %v1985_v50 = vmul.f32 -1.442695, %v1514_v13 }
 0x60c   :  { %2227 = vpow2.f32 %v1983_v61 }
 0x60d   :  { %2229 = vtanh.f32 %v1509_v56 }
 0x60e   :  { %2231 = vpow2.f32 %v1984_v53 }
 0x613   :  { %v2222_v3 = vpop.eup %2221 }
 0x614   :  { %v1521_v54 = vadd.f32 1.0, %v2222_v3 }
 0x615   :  { %v2224_v6 = vpop.eup %2223 }
 0x616   :  { %2233 = vrcp.f32 %v1521_v54  ;;  %v1533_v5 = vadd.f32 1.0, %v2224_v6 }
 0x617   :  { %v2226_v0 = vpop.eup %2225  ;;  %2235 = vtanh.f32 %v1513_v1 }
 0x618   :  { %2237 = vrcp.f32 %v1533_v5  ;;  %v1522_v51 = vadd.f32 1.0, %v2226_v0 }
 0x619   :  { %v2228_v31 = vpop.eup %2227  ;;  %2239 = vpow2.f32 %v1985_v50 }
 0x61a   :  { %2241 = vrcp.f32 %v1522_v51  ;;  %v1534_v58 = vadd.f32 1.0, %v2228_v31  ;;  %v2230_v43 = vpop.eup %2229 }
 0x61b   :  { %v2232_v45 = vpop.eup %2231 }
 0x61c   :  { %2243 = vrcp.f32 %v1534_v58  ;;  %v1547_v2 = vadd.f32 1.0, %v2232_v45 }
 0x61e   :  { %2245 = vrcp.f32 %v1547_v2 }
 0x623   :  { %v2234_v49 = vpop.eup %2233 }
 0x624   :  { %v2236_v52 = vpop.eup %2235  ;;  %v1555_v48 = vmul.f32 %v2234_v49, %v2230_v43 }
 0x625   :  { %v2238_v60 = vpop.eup %2237 }
 0x626   :  { %v2240_v57 = vpop.eup %2239  ;;  %v1553_v63 = vmul.f32 %v2238_v60, %v3270_v42 }
 0x627   :  { %v2242_v7 = vpop.eup %2241  ;;  %v1548_v4 = vadd.f32 1.0, %v2240_v57 }
 0x628   :  { %v3320_v8 = vadd.f32 %v1555_v48, %v1553_v63  ;;  %v1556_v61 = vmul.f32 %v2242_v7, %v2236_v52 }
 0x629   :  { %v2244_v47 = vpop.eup %2243 }
 0x62a   :  { %v1554_v22 = vmul.f32 %v2244_v47, %v3273_v11  ;;  %2247 = vtanh.f32 %v3320_v8 }
 0x62b   :  { %2249 = vrcp.f32 %v1548_v4  ;;  %v2246_v56 = vpop.eup %2245 }
 0x62c   :  { %v3323_v59 = vadd.f32 %v1556_v61, %v1554_v22 }
 0x62e   :  { %2251 = vtanh.f32 %v3323_v59 }
 0x637   :  { %v2248_v53 = vpop.eup %2247 }
 0x638   :  { %v2250_v42 = vpop.eup %2249  ;;  %v1561_v13 = vmul.f32 %v2248_v53, %v2246_v56 }
 0x63b   :  { %v2252_v9 = vpop.eup %2251 }
 0x63c   :  { %v1562_v3 = vmul.f32 %v2252_v9, %v2250_v42 }
 0x63e   :  { %v1574_v39 = vpack.c.bf16 %v1562_v3, %v1561_v13 }
 0x640   :  { %1608 = vmatmul.mubr.bf16.vlgmr.msra.gmra.mxu0 %v1574_v39  ;;  %1651 = vmatmul.mubr.bf16.vlgmr.msra.gmra.mxu1 %v1574_v39  ;;  %v3502_v39 = vld [vmem:[#allocation46_spill] sm:$0xff] }
 0x641   :  { %1730 = vmatpush1.bf16.msra.mxu0 %v3030_v55  ;;  %1773 = vmatpush1.bf16.msra.mxu1 %v3036_v10  ;;  %v3494_v55 = vld [vmem:[#allocation38_spill] sm:$0xff] }
 0x642   :  { %1731 = vmatprep.subr.bf16.mxu0 %v3042_v12  ;;  %1774 = vmatprep.subr.bf16.mxu1 %v3048_v14 }
 0x643   :  { %1761 = vmatprep.mubr.bf16.mxu0 %v3458_v62  ;;  %1804 = vmatprep.mubr.bf16.mxu1 %v3458_v62 }
 0x645   :  { %1732 = vmatpush1.bf16.msra.mxu0 %v3056_v15  ;;  %1775 = vmatpush1.bf16.msra.mxu1 %v3062_v16  ;;  %v3495_v16 = vld [vmem:[#allocation40_spill] sm:$0xff] }
 0x646   :  { %1733 = vmatprep.subr.bf16.mxu0 %v3068_v17  ;;  %1776 = vmatprep.subr.bf16.mxu1 %v3074_v18 }
 0x649   :  { %1734 = vmatpush1.bf16.msra.mxu0 %v3080_v19  ;;  %1777 = vmatpush1.bf16.msra.mxu1 %v3086_v20 }
 0x64a   :  { %1735 = vmatprep.subr.bf16.mxu0 %v3092_v21  ;;  %1778 = vmatprep.subr.bf16.mxu1 %v3098_v23  ;;  %v3496_v21 = vld [vmem:[#allocation42_spill] sm:$0xff] }
 0x64d   :  { %1736 = vmatpush1.bf16.msra.mxu0 %v3104_v24  ;;  %1779 = vmatpush1.bf16.msra.mxu1 %v3110_v25 }
 0x64e   :  { %1737 = vmatprep.subr.bf16.mxu0 %v3116_v26  ;;  %1780 = vmatprep.subr.bf16.mxu1 %v3122_v27  ;;  %v3497_v26 = vld [vmem:[#allocation44_spill] sm:$0xff] }
 0x651   :  { %1738 = vmatpush1.bf16.msra.mxu0 %v3128_v28  ;;  %1781 = vmatpush1.bf16.msra.mxu1 %v3134_v29 }
 0x652   :  { %1739 = vmatprep.subr.bf16.mxu0 %v3140_v30  ;;  %1782 = vmatprep.subr.bf16.mxu1 %v3146_v32  ;;  %v3498_v30 = vld [vmem:[#allocation41_spill] sm:$0xff] }
 0x655   :  { %1740 = vmatpush1.bf16.msra.mxu0 %v3152_v33  ;;  %1783 = vmatpush1.bf16.msra.mxu1 %v3158_v34  ;;  %v3499_v34 = vld [vmem:[#allocation39_spill] sm:$0xff] }
 0x656   :  { %1741 = vmatprep.subr.bf16.mxu0 %v3164_v35  ;;  %1784 = vmatprep.subr.bf16.mxu1 %v3170_v36 }
 0x659   :  { %1742 = vmatpush1.bf16.msra.mxu0 %v3176_v37  ;;  %1785 = vmatpush1.bf16.msra.mxu1 %v3182_v38  ;;  %v3500_v37 = vld [vmem:[#allocation45_spill] sm:$0xff] }
 0x65a   :  { %1743 = vmatprep.subr.bf16.mxu0 %v3188_v40  ;;  %1786 = vmatprep.subr.bf16.mxu1 %v3194_v41  ;;  %v3501_v41 = vld [vmem:[#allocation43_spill] sm:$0xff] }
 0x65d   :  { %1744 = vmatpush1.bf16.msra.mxu0 %v3200_v44  ;;  %1787 = vmatpush1.bf16.msra.mxu1 %v3206_v46 }
 0x700   :  { %v1609_v62 = vpop.f32.mrf.mxu0  ;;  %v1652_v12 = vpop.f32.mrf.mxu1 }
 0x701   :  { %v1661_v10 = vadd.f32 %v1609_v62, %v3494_v55  ;;  %v1663_v35 = vadd.f32 %v1652_v12, %v3499_v34  ;;  %v3503_v12 = vld [vmem:[#allocation48_spill] sm:$0xff]  ;;  %v3508_v34 = vld [vmem:[#allocation53_spill] sm:$0xff] }
 0x702   :  { %v1611_v14 = vpop.f32.mrf.mxu0  ;;  %v1654_v20 = vpop.f32.mrf.mxu1 }
 0x703   :  { %v1986_v15 = vmul.f32 -1.442695, %v1661_v10  ;;  %v1662_v17 = vadd.f32 %v1611_v14, %v3495_v16  ;;  %v1664_v32 = vadd.f32 %v1654_v20, %v3498_v30  ;;  %v3507_v30 = vld [vmem:[#allocation47_spill] sm:$0xff] }
 0x704   :  { %v1613_v18 = vpop.f32.mrf.mxu0  ;;  %v1656_v28 = vpop.f32.mrf.mxu1 }
 0x705   :  { %2253 = vpow2.f32 %v1986_v15  ;;  %v1988_v19 = vmul.f32 -1.442695, %v1662_v17  ;;  %v1665_v23 = vadd.f32 %v1613_v18, %v3496_v21  ;;  %v1990_v36 = vmul.f32 -1.442695, %v1664_v32  ;;  %v3504_v18 = vld [vmem:[#allocation50_spill] sm:$0xff] }
 0x706   :  { %v1615_v24 = vpop.f32.mrf.mxu0  ;;  %v1658_v33 = vpop.f32.mrf.mxu1  ;;  %v1667_v44 = vadd.f32 %v1656_v28, %v3501_v41 }
 0x707   :  { %2255 = vpow2.f32 %v1988_v19  ;;  %v1987_v25 = vmul.f32 -1.442695, %v1665_v23  ;;  %v1666_v27 = vadd.f32 %v1615_v24, %v3497_v26  ;;  %v1668_v38 = vadd.f32 %v1658_v33, %v3500_v37  ;;  %v3505_v23 = vld [vmem:[#allocation52_spill] sm:$0xff]  ;;  %v3509_v37 = vld [vmem:[#allocation51_spill] sm:$0xff] }
 0x709   :  { %2257 = vpow2.f32 %v1987_v25  ;;  %v1989_v29 = vmul.f32 -1.442695, %v1666_v27  ;;  %v1991_v1 = vmul.f32 -1.442695, %v1668_v38  ;;  %v3506_v27 = vld [vmem:[#allocation49_spill] sm:$0xff] }
 0x70b   :  { %2259 = vpow2.f32 %v1989_v29 }
 0x70c   :  { %2261 = vtanh.f32 %v1663_v35 }
 0x70d   :  { %2263 = vpow2.f32 %v1990_v36 }
 0x712   :  { %v2254_v40 = vpop.eup %2253 }
 0x713   :  { %v1675_v46 = vadd.f32 1.0, %v2254_v40 }
 0x714   :  { %v2256_v11 = vpop.eup %2255 }
 0x715   :  { %2265 = vrcp.f32 %v1675_v46  ;;  %v1687_v54 = vadd.f32 1.0, %v2256_v11 }
 0x716   :  { %v2258_v6 = vpop.eup %2257  ;;  %2267 = vtanh.f32 %v1667_v44 }
 0x717   :  { %2269 = vrcp.f32 %v1687_v54  ;;  %v1676_v50 = vadd.f32 1.0, %v2258_v6 }
 0x718   :  { %v2260_v5 = vpop.eup %2259  ;;  %2271 = vpow2.f32 %v1991_v1 }
 0x719   :  { %2273 = vrcp.f32 %v1676_v50  ;;  %v1688_v0 = vadd.f32 1.0, %v2260_v5  ;;  %v2262_v51 = vpop.eup %2261 }
 0x71a   :  { %v2264_v31 = vpop.eup %2263 }
 0x71b   :  { %2275 = vrcp.f32 %v1688_v0  ;;  %v1701_v57 = vadd.f32 1.0, %v2264_v31 }
 0x71d   :  { %2277 = vrcp.f32 %v1701_v57 }
 0x722   :  { %v2266_v58 = vpop.eup %2265 }
 0x723   :  { %v2268_v43 = vpop.eup %2267  ;;  %v1709_v45 = vmul.f32 %v2266_v58, %v2262_v51 }
 0x724   :  { %v2270_v49 = vpop.eup %2269 }
 0x725   :  { %v2272_v52 = vpop.eup %2271  ;;  %v1707_v48 = vmul.f32 %v2270_v49, %v3320_v8 }
 0x726   :  { %v2274_v60 = vpop.eup %2273  ;;  %v1702_v61 = vadd.f32 1.0, %v2272_v52 }
 0x727   :  { %v3368_v63 = vadd.f32 %v1709_v45, %v1707_v48  ;;  %v1710_v7 = vmul.f32 %v2274_v60, %v2268_v43 }
 0x728   :  { %v2276_v2 = vpop.eup %2275 }
 0x729   :  { %v1708_v47 = vmul.f32 %v2276_v2, %v3323_v59  ;;  %2279 = vtanh.f32 %v3368_v63 }
 0x72a   :  { %2281 = vrcp.f32 %v1702_v61  ;;  %v2278_v22 = vpop.eup %2277 }
 0x72b   :  { %v3371_v4 = vadd.f32 %v1710_v7, %v1708_v47 }
 0x72d   :  { %2283 = vtanh.f32 %v3371_v4 }
 0x736   :  { %v2280_v56 = vpop.eup %2279 }
 0x737   :  { %v2282_v8 = vpop.eup %2281  ;;  %v1715_v42 = vmul.f32 %v2280_v56, %v2278_v22 }
 0x73a   :  { %v2284_v53 = vpop.eup %2283 }
 0x73b   :  { %v1716_v9 = vmul.f32 %v2284_v53, %v2282_v8 }
 0x73d   :  { %v1728_v13 = vpack.c.bf16 %v1716_v9, %v1715_v42 }
 0x73f   :  { %1762 = vmatmul.mubr.bf16.vlgmr.msra.gmra.mxu0 %v1728_v13  ;;  %1805 = vmatmul.mubr.bf16.vlgmr.msra.gmra.mxu1 %v1728_v13 }
 0x7ff   :  { %v1763_v3 = vpop.f32.mrf.mxu0  ;;  %v1806_v62 = vpop.f32.mrf.mxu1 }
 0x800   :  { %v1815_v59 = vadd.f32 %v1763_v3, %v3502_v39  ;;  %v1817_v32 = vadd.f32 %v1806_v62, %v3507_v30 }
 0x801   :  { %v1765_v55 = vpop.f32.mrf.mxu0  ;;  %v1808_v17 = vpop.f32.mrf.mxu1 }
 0x802   :  { %v1992_v10 = vmul.f32 -1.442695, %v1815_v59  ;;  %v1816_v14 = vadd.f32 %v1765_v55, %v3503_v12  ;;  %v1818_v28 = vadd.f32 %v1808_v17, %v3506_v27 }
 0x803   :  { %v1767_v15 = vpop.f32.mrf.mxu0  ;;  %v1810_v25 = vpop.f32.mrf.mxu1 }
 0x804   :  { %2285 = vpow2.f32 %v1992_v10  ;;  %v1994_v16 = vmul.f32 -1.442695, %v1816_v14  ;;  %v1819_v19 = vadd.f32 %v1767_v15, %v3504_v18  ;;  %v1996_v33 = vmul.f32 -1.442695, %v1818_v28 }
 0x805   :  { %v1769_v20 = vpop.f32.mrf.mxu0  ;;  %v1812_v29 = vpop.f32.mrf.mxu1  ;;  %v1821_v38 = vadd.f32 %v1810_v25, %v3509_v37 }
 0x806   :  { %2287 = vpow2.f32 %v1994_v16  ;;  %v1993_v21 = vmul.f32 -1.442695, %v1819_v19  ;;  %v1820_v24 = vadd.f32 %v1769_v20, %v3505_v23  ;;  %v1822_v35 = vadd.f32 %v1812_v29, %v3508_v34 }
 0x808   :  { %2289 = vpow2.f32 %v1993_v21  ;;  %v1995_v26 = vmul.f32 -1.442695, %v1820_v24  ;;  %v1997_v44 = vmul.f32 -1.442695, %v1822_v35 }
 0x80a   :  { %2291 = vpow2.f32 %v1995_v26 }
 0x80b   :  { %2293 = vtanh.f32 %v1817_v32 }
 0x80c   :  { %2295 = vpow2.f32 %v1996_v33 }
 0x811   :  { %v2286_v36 = vpop.eup %2285 }
 0x812   :  { %v1829_v40 = vadd.f32 1.0, %v2286_v36 }
 0x813   :  { %v2288_v41 = vpop.eup %2287 }
 0x814   :  { %2297 = vrcp.f32 %v1829_v40  ;;  %v1841_v46 = vadd.f32 1.0, %v2288_v41 }
 0x815   :  { %v2290_v11 = vpop.eup %2289  ;;  %2299 = vtanh.f32 %v1821_v38 }
 0x816   :  { %2301 = vrcp.f32 %v1841_v46  ;;  %v1830_v1 = vadd.f32 1.0, %v2290_v11 }
 0x817   :  { %v2292_v54 = vpop.eup %2291  ;;  %2303 = vpow2.f32 %v1997_v44 }
 0x818   :  { %2305 = vrcp.f32 %v1830_v1  ;;  %v1842_v6 = vadd.f32 1.0, %v2292_v54  ;;  %v2294_v50 = vpop.eup %2293 }
 0x819   :  { %v2296_v5 = vpop.eup %2295 }
 0x81a   :  { %2307 = vrcp.f32 %v1842_v6  ;;  %v1855_v43 = vadd.f32 1.0, %v2296_v5 }
 0x81c   :  { %2309 = vrcp.f32 %v1855_v43 }
 0x821   :  { %v2298_v0 = vpop.eup %2297 }
 0x822   :  { %v2300_v51 = vpop.eup %2299  ;;  %v1863_v31 = vmul.f32 %v2298_v0, %v2294_v50 }
 0x823   :  { %v2302_v58 = vpop.eup %2301 }
 0x824   :  { %v2304_v45 = vpop.eup %2303  ;;  %v1861_v49 = vmul.f32 %v2302_v58, %v3368_v63 }
 0x825   :  { %v2306_v52 = vpop.eup %2305  ;;  %v1856_v7 = vadd.f32 1.0, %v2304_v45 }
 0x826   :  { %v1865_v48 = vadd.f32 %v1863_v31, %v1861_v49  ;;  %v1864_v60 = vmul.f32 %v2306_v52, %v2300_v51 }
 0x827   :  { %v2308_v57 = vpop.eup %2307 }
 0x828   :  { %2311 = vtanh.f32 %v1865_v48  ;;  %1873 = vst [vmem:[%s3403_s7] sm:$0xff] %v1865_v48  ;;  %v1862_v2 = vmul.f32 %v2308_v57, %v3371_v4 }
 0x829   :  { %2313 = vrcp.f32 %v1856_v7  ;;  %v2310_v63 = vpop.eup %2309 }
 0x82a   :  { %v1866_v61 = vadd.f32 %v1864_v60, %v1862_v2 }
 0x82c   :  { %2315 = vtanh.f32 %v1866_v61  ;;  %1874 = vst [vmem:[%s3403_s7 + $0x8] sm:$0xff] %v1866_v61 }
 0x835   :  { %v2312_v47 = vpop.eup %2311 }
 0x836   :  { %v1869_v22 = vmul.f32 %v2312_v47, %v2310_v63  ;;  %v2314_v56 = vpop.eup %2313 }
 0x838   :  { %1871 = vst [vmem:[%s3404_s6] sm:$0xff] %v1869_v22 }
 0x839   :  { %v2316_v8 = vpop.eup %2315 }
 0x83a   :  { %v1870_v53 = vmul.f32 %v2316_v8, %v2314_v56 }
 0x83c   :  { %1872 = vst [vmem:[%s3404_s6 + $0x8] sm:$0xff] %v1870_v53 }

// kernel: inductor_forward.9
= control target key start
LH: loop header
LB: loop body
LE: loop exit
PB: predicated region body
PF: predicated region fallthrough
CT: control target
= control target key end

     0   :  { %v4172_v2 = vmov 0   ;;  %vm122_vm0 = vcmask 130048   ;;  %s4159_s0 = inlined_call_operand.vmem [shape: bf16[96,16], index: 0, kind: input, shape index: {}]   ;;  %s4160_s1 = inlined_call_operand.vmem [shape: f32[16,128], index: 1, kind: input, shape index: {}]   ;;  %s4161_s2 = inlined_call_operand.vmem [shape: f32[16,128], index: 2, kind: input, shape index: {}]   ;;  %s4162_s3 = inlined_call_operand.vmem [shape: bf16[16,512], index: 3, kind: input, shape index: {}]   ;;  %s4163_s4 = inlined_call_operand.vmem [shape: bf16[128,512], index: 4, kind: input, shape index: {}]   ;;  %s4164_s5 = inlined_call_operand.vmem [shape: f32[1,512], index: 5, kind: input, shape index: {}]   ;;  %s4165_s6 = inlined_call_operand.vmem [shape: bf16[128,128], index: 6, kind: input, shape index: {}]   ;;  %s4166_s7 = inlined_call_operand.vmem [shape: f32[1,128], index: 7, kind: input, shape index: {}]   ;;  %s4167_s8 = inlined_call_operand.vmem [shape: s32[6,16,1], index: 8, kind: input, shape index: {}]   ;;  %s4168_s9 = inlined_call_operand.hbm [shape: f32[1,1], index: 9, kind: output, shape index: {}]  }
   0x1   :  { %v2465_v0 = vld [vmem:[%s4162_s3 + $0x4] ss:$16 sps:$4 sm:$0xff]   ;;  %v2467_v1 = vld [vmem:[%s4162_s3 + $0xc] ss:$16 sps:$4 sm:$0xff]   ;;  %173 = vmatprep.mubr.bf16.mxu0 %v4172_v2  ;;  %266 = vmatprep.mubr.bf16.mxu1 %v4172_v2  ;;  %v2469_v3 = vld [vmem:[%s4162_s3] ss:$16 sps:$4 sm:$0xff]  }
   0x2   :  { %155 = vmatprep.subr.bf16.mxu0 %v2465_v0  ;;  %v2470_v4 = vld [vmem:[%s4162_s3 + $0x8] ss:$16 sps:$4 sm:$0xff]   ;;  %2463 = vset.pattern.permute.xlu0 %v4172_v2  ;;  %v2471_v5 = vld [vmem:[%s4159_s0] sm:$0xff]   ;;  %v2944_v11 = vld [vmem:[%s4163_s4 + $0xec] ss:$16 sps:$4 sm:$0xff]  }
   0x3   :  { %248 = vmatprep.subr.bf16.mxu1 %v2467_v1  ;;  %2464 = vset.pattern.permute.xlu1 %v4172_v2  ;;  %v2912_v6 = vld [vmem:[%s4163_s4 + $0xe4] ss:$16 sps:$4 sm:$0xff]   ;;  %v2917_v7 = vld [vmem:[%s4163_s4 + $0xe0] ss:$16 sps:$4 sm:$0xff]   ;;  %v2949_v12 = vld [vmem:[%s4163_s4 + $0xe8] ss:$16 sps:$4 sm:$0xff]  }
   0x4   :  { %156 = vmatpush1.bf16.msra.mxu0 %v2469_v3  ;;  %249 = vmatpush1.bf16.msra.mxu1 %v2470_v4  ;;  %v2922_v8 = vld [vmem:[%s4163_s4 + $0xc4] ss:$16 sps:$4 sm:$0xff]   ;;  %v2932_v9 = vld [vmem:[%s4163_s4 + $0xc0] ss:$16 sps:$4 sm:$0xff]   ;;  %v2478_v13 = vld [vmem:[%s4159_s0 + $0x8] sm:$0xff]  }
   0x5   :  { %611 = vmatprep.subr.bf16.mxu0 %v2912_v6  ;;  %v2939_v10 = vld [vmem:[%s4163_s4 + $0xa4] ss:$16 sps:$4 sm:$0xff]   ;;  %v2958_v14 = vld [vmem:[%s4163_s4 + $0xa0] ss:$16 sps:$4 sm:$0xff]   ;;  %654 = vmatprep.subr.bf16.mxu1 %v2944_v11  ;;  %v2971_v16 = vld [vmem:[%s4163_s4 + $0xcc] ss:$16 sps:$4 sm:$0xff]  }
   0x6   :  { %v2966_v15 = vld [vmem:[%s4163_s4 + $0x84] ss:$16 sps:$4 sm:$0xff]   ;;  %v2978_v17 = vld [vmem:[%s4163_s4 + $0xc8] ss:$16 sps:$4 sm:$0xff]   ;;  %v2985_v18 = vld [vmem:[%s4163_s4 + $0x80] ss:$16 sps:$4 sm:$0xff]  }
   0x7   :  { %2173 = vmatmul.mubr.msk.bf16.vlgmr.msra.gmra.mxu0 %vm122_vm0, %v2471_v5  ;;  %2179 = vmatmul.mubr.msk.bf16.vlgmr.msra.gmra.mxu1 %vm122_vm0, %v2471_v5  ;;  %v2990_v19 = vld [vmem:[%s4163_s4 + $0xac] ss:$16 sps:$4 sm:$0xff]   ;;  %v2997_v20 = vld [vmem:[%s4163_s4 + $0x64] ss:$16 sps:$4 sm:$0xff]   ;;  %v3007_v22 = vld [vmem:[%s4163_s4 + $0x60] ss:$16 sps:$4 sm:$0xff]  }
   0x8   :  { %612 = vmatpush1.bf16.msra.mxu0 %v2917_v7  ;;  %183 = vmatprep.mubr.bf16.mxu0 %v4172_v2  ;;  %v2482_v21 = vld [vmem:[%s4159_s0 + $0x10] sm:$0xff]   ;;  %v3014_v23 = vld [vmem:[%s4163_s4 + $0xa8] ss:$16 sps:$4 sm:$0xff]   ;;  %v3020_v24 = vld [vmem:[%s4163_s4 + $0x8c] ss:$16 sps:$4 sm:$0xff]  }
   0x9   :  { %613 = vmatprep.subr.bf16.mxu0 %v2922_v8  ;;  %276 = vmatprep.mubr.bf16.mxu1 %v4172_v2  ;;  %v3025_v25 = vld [vmem:[%s4163_s4 + $0x44] ss:$16 sps:$4 sm:$0xff]   ;;  %v3034_v26 = vld [vmem:[%s4163_s4 + $0x88] ss:$16 sps:$4 sm:$0xff]   ;;  %v3039_v27 = vld [vmem:[%s4163_s4 + $0x40] ss:$16 sps:$4 sm:$0xff]  }
   0xa   :  { %655 = vmatpush1.bf16.msra.mxu1 %v2949_v12  ;;  %v3046_v28 = vld [vmem:[%s4163_s4 + $0x6c] ss:$16 sps:$4 sm:$0xff]   ;;  %v3053_v29 = vld [vmem:[%s4163_s4 + $0x24] ss:$16 sps:$4 sm:$0xff]   ;;  %v3063_v31 = vld [vmem:[%s4163_s4 + $0x68] ss:$16 sps:$4 sm:$0xff]  }
   0xb   :  { %656 = vmatprep.subr.bf16.mxu1 %v2971_v16  ;;  %v2492_v30 = vld [vmem:[%s4159_s0 + $0x18] sm:$0xff]   ;;  %v3068_v32 = vld [vmem:[%s4163_s4 + $0x20] ss:$16 sps:$4 sm:$0xff]   ;;  %v3080_v34 = vld [vmem:[%s4163_s4 + $0x4] ss:$16 sps:$4 sm:$0xff]  }
   0xc   :  { %614 = vmatpush1.bf16.msra.mxu0 %v2932_v9  ;;  %4195 = vst [vmem:[#allocation6_spill] sm:$0xff] %v3068_v32  ;;  %v3075_v33 = vld [vmem:[%s4163_s4 + $0x4c] ss:$16 sps:$4 sm:$0xff]   ;;  %4196 = vst [vmem:[#allocation7_spill] sm:$0xff] %v3080_v34  ;;  %v3087_v35 = vld [vmem:[%s4163_s4 + $0x48] ss:$16 sps:$4 sm:$0xff]  }
   0xd   :  { %615 = vmatprep.subr.bf16.mxu0 %v2939_v10  ;;  %v3092_v36 = vld [vmem:[%s4163_s4] ss:$16 sps:$4 sm:$0xff]   ;;  %v3099_v37 = vld [vmem:[%s4163_s4 + $0x2c] ss:$16 sps:$4 sm:$0xff]  }
   0xe   :  { %657 = vmatpush1.bf16.msra.mxu1 %v2978_v17  ;;  %4197 = vst [vmem:[#allocation8_spill] sm:$0xff] %v3092_v36  ;;  %v2505_v38 = vld [vmem:[%s4159_s0 + $0x20] sm:$0xff]  }
   0xf   :  { %2174 = vmatmul.mubr.msk.bf16.gmra.mxu0 %vm122_vm0, %v2478_v13  ;;  %2180 = vmatmul.mubr.msk.bf16.gmra.mxu1 %vm122_vm0, %v2478_v13 }
  0x10   :  { %616 = vmatpush1.bf16.msra.mxu0 %v2958_v14  ;;  %193 = vmatprep.mubr.bf16.mxu0 %v4172_v2 }
  0x11   :  { %286 = vmatprep.mubr.bf16.mxu1 %v4172_v2  ;;  %617 = vmatprep.subr.bf16.mxu0 %v2966_v15 }
  0x12   :  { %658 = vmatprep.subr.bf16.mxu1 %v2990_v19 }
  0x13   :  { %659 = vmatpush1.bf16.msra.mxu1 %v3014_v23 }
  0x14   :  { %618 = vmatpush1.bf16.msra.mxu0 %v2985_v18  ;;  %660 = vmatprep.subr.bf16.mxu1 %v3020_v24 }
  0x15   :  { %619 = vmatprep.subr.bf16.mxu0 %v2997_v20 }
  0x17   :  { %2175 = vmatmul.mubr.msk.bf16.gmra.mxu0 %vm122_vm0, %v2482_v21  ;;  %2181 = vmatmul.mubr.msk.bf16.gmra.mxu1 %vm122_vm0, %v2482_v21 }
  0x18   :  { %203 = vmatprep.mubr.bf16.mxu0 %v4172_v2  ;;  %296 = vmatprep.mubr.bf16.mxu1 %v4172_v2 }
  0x19   :  { %620 = vmatpush1.bf16.msra.mxu0 %v3007_v22  ;;  %661 = vmatpush1.bf16.msra.mxu1 %v3034_v26 }
  0x1a   :  { %621 = vmatprep.subr.bf16.mxu0 %v3025_v25  ;;  %662 = vmatprep.subr.bf16.mxu1 %v3046_v28 }
  0x1d   :  { %622 = vmatpush1.bf16.msra.mxu0 %v3039_v27  ;;  %663 = vmatpush1.bf16.msra.mxu1 %v3063_v31 }
  0x1e   :  { %623 = vmatprep.subr.bf16.mxu0 %v3053_v29  ;;  %664 = vmatprep.subr.bf16.mxu1 %v3075_v33 }
  0x1f   :  { %2176 = vmatmul.mubr.msk.bf16.gmra.mxu0 %vm122_vm0, %v2492_v30  ;;  %2182 = vmatmul.mubr.msk.bf16.gmra.mxu1 %vm122_vm0, %v2492_v30 }
  0x20   :  { %213 = vmatprep.mubr.bf16.mxu0 %v4172_v2  ;;  %306 = vmatprep.mubr.bf16.mxu1 %v4172_v2 }
  0x21   :  { %624 = vmatpush1.bf16.msra.mxu0 %v3068_v32 }
  0x22   :  { %625 = vmatprep.subr.bf16.mxu0 %v3080_v34 }
  0x23   :  { %14 = vsyncpa [#allocation4], 0  ;;  %665 = vmatpush1.bf16.msra.mxu1 %v3087_v35  ;;  %v3112_v39 = vld [vmem:[%s4163_s4 + $0x28] ss:$16 sps:$4 sm:$0xff]   ;;  %v3119_v40 = vld [vmem:[%s4163_s4 + $0xc] ss:$16 sps:$4 sm:$0xff]   ;;  %v4169_v55 = vlaneseq }
  0x24   :  { %666 = vmatprep.subr.bf16.mxu1 %v3099_v37  ;;  %v3129_v41 = vld [vmem:[%s4163_s4 + $0x8] ss:$16 sps:$4 sm:$0xff]   ;;  %v435_v43 = vld [vmem:[%s4160_s1] sm:$0xff]  ;;  %v4170_v47 = vmov 0.0   ;;  %v3175_v48 = vld [vmem:[%s4165_s6 + $0x30] sm:$0xff]   ;;  %vm2838_vm1 = vmmov 0  }
  0x25   :  { %626 = vmatpush1.bf16.msra.mxu0 %v3092_v36  ;;  %v2515_v42 = vld [vmem:[%s4159_s0 + $0x28] sm:$0xff]   ;;  %v3166_v46 = vld [vmem:[%s4165_s6 + $0x38] sm:$0xff]   ;;  %v3189_v50 = vld [vmem:[%s4165_s6 + $0x20] sm:$0xff]   ;;  %v3224_v56 = vshrl.u32 %v4169_v55, 7  ;;  %vm2142_vm15 = vcmask 0  }
  0x26   :  { %v436_v44 = vld [vmem:[%s4160_s1 + $0x8] sm:$0xff]  ;;  %2339 = vmatprep.subr.bf16.mxu0 %v4170_v47  ;;  %v3197_v51 = vld [vmem:[%s4165_s6 + $0x18] sm:$0xff]   ;;  %v3204_v52 = vld [vmem:[%s4165_s6 + $0x10] sm:$0xff]  }
  0x27   :  { %2177 = vmatmul.mubr.msk.bf16.gmra.mxu0 %vm122_vm0, %v2505_v38  ;;  %2183 = vmatmul.mubr.msk.bf16.gmra.mxu1 %vm122_vm0, %v2505_v38  ;;  %v450_v45 = vpack.c.bf16 %v436_v44, %v435_v43  ;;  %v3182_v49 = vld [vmem:[%s4165_s6 + $0x28] sm:$0xff]   ;;  %v3218_v54 = vld [vmem:[%s4165_s6] sm:$0xff]   ;;  %4198 = vst [vmem:[#allocation9_spill] sm:$0xff] %v3224_v56  ;;  %v54_v61 = vsub.s32 0, %v3224_v56  ;;  %v62_v62 = vsub.s32 2, %v3224_v56  ;;  %v58_v3 = vsub.s32 1, %v3224_v56 }
  0x28   :  { %223 = vmatprep.mubr.bf16.mxu0 %v4172_v2  ;;  %316 = vmatprep.mubr.bf16.mxu1 %v4172_v2  ;;  %v3211_v53 = vld [vmem:[%s4165_s6 + $0x8] sm:$0xff]   ;;  %v50_v63 = vld [vmem:[%s4164_s5] sm:$0xf]  ;;  %v66_v4 = vsub.s32 3, %v3224_v56 }
  0x29   :  { %667 = vmatpush1.bf16.msra.mxu1 %v3112_v39  ;;  %v3249_v21 = vrot.slane %v50_v63, %v54_v61  ;;  %v3251_v30 = vrot.slane %v50_v63, %v62_v62  ;;  %v3253_v43 = vrot.slane %v50_v63, %v58_v3 }
  0x2a   :  { %668 = vmatprep.subr.bf16.mxu1 %v3119_v40  ;;  %v3255_v44 = vrot.slane %v50_v63, %v66_v4 }
  0x2d   :  { %669 = vmatpush1.bf16.msra.mxu1 %v3129_v41 }
  0x2e   :  { %912 = vmatprep.subr.bf16.mxu1 %v2912_v6 }
  0x2f   :  { %2178 = vmatmul.mubr.msk.bf16.gmra.mxu0 %vm122_vm0, %v2515_v42  ;;  %2184 = vmatmul.mubr.msk.bf16.gmra.mxu1 %vm122_vm0, %v2515_v42 }
  0x30   :  { %643 = vmatprep.mubr.bf16.mxu0 %v4172_v2  ;;  %686 = vmatprep.mubr.bf16.mxu1 %v4172_v2 }
  0x37   :  { %644 = vmatmul.mubr.bf16.vlgmr.msra.gmra.mxu0 %v450_v45  ;;  %687 = vmatmul.mubr.bf16.vlgmr.msra.gmra.mxu1 %v450_v45 }
  0x38   :  { %913 = vmatpush1.bf16.msra.mxu1 %v2917_v7  ;;  %944 = vmatprep.mubr.bf16.mxu1 %v4172_v2 }
  0x39   :  { %914 = vmatprep.subr.bf16.mxu1 %v2922_v8  ;;  %2340 = vmatpush3.bf16.msra.mxu0 %v3166_v46 }
  0x3a   :  { %2341 = vmatprep.subr.bf16.mxu0 %v4170_v47  ;;  %2355 = vmatprep.mubr.msk.bf16.mxu0 %vm2838_vm1, %v4170_v47 }
  0x3c   :  { %915 = vmatpush1.bf16.msra.mxu1 %v2932_v9 }
  0x3d   :  { %916 = vmatprep.subr.bf16.mxu1 %v2939_v10  ;;  %2342 = vmatpush3.bf16.msra.mxu0 %v3175_v48 }
  0x3e   :  { %2343 = vmatprep.subr.bf16.mxu0 %v4170_v47 }
  0x40   :  { %917 = vmatpush1.bf16.msra.mxu1 %v2958_v14 }
  0x41   :  { %918 = vmatprep.subr.bf16.mxu1 %v2966_v15  ;;  %2344 = vmatpush3.bf16.msra.mxu0 %v3182_v49 }
  0x42   :  { %2345 = vmatprep.subr.bf16.mxu0 %v4170_v47 }
  0x44   :  { %919 = vmatpush1.bf16.msra.mxu1 %v2985_v18 }
  0x45   :  { %920 = vmatprep.subr.bf16.mxu1 %v2997_v20  ;;  %2346 = vmatpush3.bf16.msra.mxu0 %v3189_v50 }
  0x46   :  { %2347 = vmatprep.subr.bf16.mxu0 %v4170_v47 }
  0x48   :  { %921 = vmatpush1.bf16.msra.mxu1 %v3007_v22 }
  0x49   :  { %922 = vmatprep.subr.bf16.mxu1 %v3025_v25  ;;  %2348 = vmatpush3.bf16.msra.mxu0 %v3197_v51 }
  0x4a   :  { %2349 = vmatprep.subr.bf16.mxu0 %v4170_v47 }
  0x4c   :  { %923 = vmatpush1.bf16.msra.mxu1 %v3039_v27 }
  0x4d   :  { %924 = vmatprep.subr.bf16.mxu1 %v3053_v29  ;;  %2350 = vmatpush3.bf16.msra.mxu0 %v3204_v52 }
  0x4e   :  { %2351 = vmatprep.subr.bf16.mxu0 %v4170_v47 }
  0x50   :  { %925 = vmatpush1.bf16.msra.mxu1 %v3068_v32 }
  0x51   :  { %926 = vmatprep.subr.bf16.mxu1 %v3080_v34  ;;  %2352 = vmatpush3.bf16.msra.mxu0 %v3211_v53 }
  0x52   :  { %2353 = vmatprep.subr.bf16.mxu0 %v4170_v47 }
  0x54   :  { %927 = vmatpush1.bf16.msra.mxu1 %v3092_v36 }
  0x55   :  { %2359 = vmatprep.subr.bf16.mxu1 %v4170_v47  ;;  %2354 = vmatpush3.bf16.msra.mxu0 %v3218_v54 }
  0x56   :  { %955 = vmatprep.subr.bf16.mxu0 %v2944_v11 }
  0xc7   :  { %v3226_v57 = vpop.f32.mrf.mxu0  ;;  %v3228_v58 = vpop.f32.mrf.mxu1 }
  0xc9   :  { %v3230_v59 = vpop.f32.mrf.mxu0  ;;  %v3232_v60 = vpop.f32.mrf.mxu1 }
  0xcb   :  { %v3239_v0 = vpop.f32.mrf.mxu0  ;;  %v3241_v1 = vpop.f32.mrf.mxu1 }
  0xcd   :  { %v3245_v5 = vpop.f32.mrf.mxu0  ;;  %v3247_v13 = vpop.f32.mrf.mxu1 }
  0xcf   :  { %v185_v38 = vpop.f32.mrf.mxu0  ;;  %v278_v42 = vpop.f32.mrf.mxu1 }
  0xd0   :  { %v3258_v45 = vadd.f32 %v185_v38, %v3249_v21  ;;  %v3261_v55 = vadd.f32 %v278_v42, %v3251_v30 }
  0xd1   :  { %v187_v47 = vpop.f32.mrf.mxu0  ;;  %v280_v2 = vpop.f32.mrf.mxu1 }
  0xd2   :  { %4199 = vst [vmem:[#allocation10_spill] sm:$0xff] %v3258_v45  ;;  %4200 = vst [vmem:[#allocation11_spill] sm:$0xff] %v3261_v55  ;;  %v3264_v56 = vadd.f32 %v187_v47, %v3253_v43  ;;  %v3267_v61 = vadd.f32 %v280_v2, %v3255_v44  ;;  %v869_v2 = vld [vmem:[%s4167_s8] sm:$0xff]  ;;  %v870_v47 = vld [vmem:[%s4167_s8 + $0x8] sm:$0xff] }
  0xd3   :  { %v189_v62 = vpop.f32.mrf.mxu0  ;;  %v282_v36 = vpop.f32.mrf.mxu1  ;;  %872 = vperm.xlu0 %2463, %v869_v2   ;;  %875 = vperm.xlu1 %2464, %v870_v47  }
  0xd4   :  { %4201 = vst [vmem:[#allocation12_spill] sm:$0xff] %v3264_v56  ;;  %4202 = vst [vmem:[#allocation13_spill] sm:$0xff] %v3267_v61  ;;  %v3270_v3 = vadd.f32 %v189_v62, %v3249_v21  ;;  %v3273_v63 = vadd.f32 %v282_v36, %v3251_v30 }
  0xd5   :  { %v191_v4 = vpop.f32.mrf.mxu0  ;;  %v284_v38 = vpop.f32.mrf.mxu1 }
  0xd6   :  { %4203 = vst [vmem:[#allocation14_spill] sm:$0xff] %v3270_v3  ;;  %4204 = vst [vmem:[#allocation15_spill] sm:$0xff] %v3273_v63  ;;  %v3276_v42 = vadd.f32 %v191_v4, %v3253_v43  ;;  %v3279_v55 = vadd.f32 %v284_v38, %v3255_v44  ;;  %v2241_v38 = vld [vmem:[%s4167_s8 + $0x10] sm:$0xff] }
  0xd7   :  { %v195_v62 = vpop.f32.mrf.mxu0  ;;  %v288_v61 = vpop.f32.mrf.mxu1  ;;  %1120 = vperm.xlu1 %2464, %v2241_v38  }
  0xd8   :  { %4205 = vst [vmem:[#allocation16_spill] sm:$0xff] %v3276_v42  ;;  %4206 = vst [vmem:[#allocation17_spill] sm:$0xff] %v3279_v55  ;;  %v3288_v36 = vadd.f32 %v195_v62, %v3249_v21  ;;  %v3291_v4 = vadd.f32 %v288_v61, %v3251_v30  ;;  %v2242_v55 = vld [vmem:[%s4167_s8 + $0x18] sm:$0xff] }
  0xd9   :  { %v197_v63 = vpop.f32.mrf.mxu0  ;;  %v290_v42 = vpop.f32.mrf.mxu1  ;;  %1123 = vperm.xlu0 %2463, %v2242_v55  }
  0xda   :  { %4207 = vst [vmem:[#allocation18_spill] sm:$0xff] %v3288_v36  ;;  %4208 = vst [vmem:[#allocation19_spill] sm:$0xff] %v3291_v4  ;;  %v3300_v3 = vadd.f32 %v197_v63, %v3253_v43  ;;  %v3303_v2 = vadd.f32 %v290_v42, %v3255_v44  ;;  %v2252_v36 = vld [vmem:[%s4167_s8 + $0x28] sm:$0xff]  ;;  %v2251_v63 = vld [vmem:[%s4167_s8 + $0x20] sm:$0xff] }
  0xdb   :  { %v199_v47 = vpop.f32.mrf.mxu0  ;;  %v292_v62 = vpop.f32.mrf.mxu1  ;;  %1371 = vperm.xlu1 %2464, %v2252_v36  }
  0xdc   :  { %4209 = vst [vmem:[#allocation20_spill] sm:$0xff] %v3300_v3  ;;  %4210 = vst [vmem:[#allocation21_spill] sm:$0xff] %v3303_v2  ;;  %v3306_v61 = vadd.f32 %v199_v47, %v3249_v21  ;;  %v3309_v4 = vadd.f32 %v292_v62, %v3251_v30 }
  0xdd   :  { %v201_v42 = vpop.f32.mrf.mxu0  ;;  %v294_v2 = vpop.f32.mrf.mxu1  ;;  %1368 = vperm.xlu0 %2463, %v2251_v63  }
  0xde   :  { %4211 = vst [vmem:[#allocation22_spill] sm:$0xff] %v3306_v61  ;;  %4212 = vst [vmem:[#allocation23_spill] sm:$0xff] %v3309_v4  ;;  %v3318_v3 = vadd.f32 %v201_v42, %v3253_v43  ;;  %v3321_v55 = vadd.f32 %v294_v2, %v3255_v44  ;;  %v2261_v61 = vld [vmem:[%s4167_s8 + $0x30] sm:$0xff]  ;;  %v2262_v42 = vld [vmem:[%s4167_s8 + $0x38] sm:$0xff] }
  0xdf   :  { %v205_v38 = vpop.f32.mrf.mxu0  ;;  %v298_v47 = vpop.f32.mrf.mxu1  ;;  %1616 = vperm.xlu1 %2464, %v2261_v61  }
  0xe0   :  { %4213 = vst [vmem:[#allocation24_spill] sm:$0xff] %v3318_v3  ;;  %4214 = vst [vmem:[#allocation25_spill] sm:$0xff] %v3321_v55  ;;  %v3324_v62 = vadd.f32 %v205_v38, %v3249_v21  ;;  %v3327_v4 = vadd.f32 %v298_v47, %v3251_v30 }
  0xe1   :  { %v207_v2 = vpop.f32.mrf.mxu0  ;;  %v300_v55 = vpop.f32.mrf.mxu1  ;;  %1619 = vperm.xlu0 %2463, %v2262_v42  }
  0xe2   :  { %4215 = vst [vmem:[#allocation26_spill] sm:$0xff] %v3324_v62  ;;  %4216 = vst [vmem:[#allocation27_spill] sm:$0xff] %v3327_v4  ;;  %v3336_v3 = vadd.f32 %v207_v2, %v3253_v43  ;;  %v3339_v36 = vadd.f32 %v300_v55, %v3255_v44 }
  0xe3   :  { %v209_v63 = vpop.f32.mrf.mxu0  ;;  %v302_v38 = vpop.f32.mrf.mxu1 }
  0xe4   :  { %4217 = vst [vmem:[#allocation28_spill] sm:$0xff] %v3336_v3  ;;  %4218 = vst [vmem:[#allocation29_spill] sm:$0xff] %v3339_v36  ;;  %v3342_v47 = vadd.f32 %v209_v63, %v3249_v21  ;;  %v3345_v4 = vadd.f32 %v302_v38, %v3251_v30 }
  0xe5   :  { %v211_v62 = vpop.f32.mrf.mxu0  ;;  %v304_v45 = vpop.f32.mrf.mxu1 }
  0xe6   :  { %4219 = vst [vmem:[#allocation30_spill] sm:$0xff] %v3342_v47  ;;  %4220 = vst [vmem:[#allocation31_spill] sm:$0xff] %v3345_v4  ;;  %v3348_v56 = vadd.f32 %v211_v62, %v3253_v43  ;;  %v3351_v2 = vadd.f32 %v304_v45, %v3255_v44 }
  0xe7   :  { %v215_v55 = vpop.f32.mrf.mxu0  ;;  %v308_v36 = vpop.f32.mrf.mxu1 }
  0xe8   :  { %4221 = vst [vmem:[#allocation32_spill] sm:$0xff] %v3348_v56  ;;  %4222 = vst [vmem:[#allocation33_spill] sm:$0xff] %v3351_v2  ;;  %v3354_v3 = vadd.f32 %v215_v55, %v3249_v21  ;;  %v3357_v61 = vadd.f32 %v308_v36, %v3251_v30 }
  0xe9   :  { %v217_v42 = vpop.f32.mrf.mxu0  ;;  %v310_v63 = vpop.f32.mrf.mxu1 }
  0xea   :  { %4223 = vst [vmem:[#allocation34_spill] sm:$0xff] %v3354_v3  ;;  %4224 = vst [vmem:[#allocation35_spill] sm:$0xff] %v3357_v61  ;;  %v3360_v38 = vadd.f32 %v217_v42, %v3253_v43  ;;  %v3363_v4 = vadd.f32 %v310_v63, %v3255_v44 }
  0xeb   :  { %v219_v62 = vpop.f32.mrf.mxu0  ;;  %v312_v56 = vpop.f32.mrf.mxu1 }
  0xec   :  { %4225 = vst [vmem:[#allocation36_spill] sm:$0xff] %v3360_v38  ;;  %4226 = vst [vmem:[#allocation37_spill] sm:$0xff] %v3363_v4  ;;  %v3366_v45 = vadd.f32 %v219_v62, %v3249_v21  ;;  %v3369_v2 = vadd.f32 %v312_v56, %v3251_v30 }
  0xed   :  { %v221_v55 = vpop.f32.mrf.mxu0  ;;  %v314_v3 = vpop.f32.mrf.mxu1 }
  0xee   :  { %4227 = vst [vmem:[#allocation38_spill] sm:$0xff] %v3366_v45  ;;  %4228 = vst [vmem:[#allocation39_spill] sm:$0xff] %v3369_v2  ;;  %v3372_v36 = vadd.f32 %v221_v55, %v3253_v43  ;;  %v3375_v61 = vadd.f32 %v314_v3, %v3255_v44 }
  0xef   :  { %v225_v42 = vpop.f32.mrf.mxu0  ;;  %v318_v38 = vpop.f32.mrf.mxu1 }
  0xf0   :  { %4229 = vst [vmem:[#allocation40_spill] sm:$0xff] %v3372_v36  ;;  %4230 = vst [vmem:[#allocation41_spill] sm:$0xff] %v3375_v61  ;;  %v3378_v63 = vadd.f32 %v225_v42, %v3249_v21  ;;  %v3381_v4 = vadd.f32 %v318_v38, %v3251_v30  ;;  %v176_v38 = vadd.f32 %v3226_v57, %v3249_v21 }
  0xf1   :  { %v227_v62 = vpop.f32.mrf.mxu0  ;;  %v320_v45 = vpop.f32.mrf.mxu1  ;;  %v182_v57 = vadd.f32 %v3245_v5, %v3253_v43  ;;  %v275_v5 = vadd.f32 %v3247_v13, %v3255_v44 }
  0xf2   :  { %4231 = vst [vmem:[#allocation42_spill] sm:$0xff] %v3378_v63  ;;  %4232 = vst [vmem:[#allocation43_spill] sm:$0xff] %v3381_v4  ;;  %v3384_v56 = vadd.f32 %v227_v62, %v3253_v43  ;;  %v3387_v2 = vadd.f32 %v320_v45, %v3255_v44 }
  0xf3   :  { %v229_v55 = vpop.f32.mrf.mxu0  ;;  %v322_v36 = vpop.f32.mrf.mxu1 }
  0xf4   :  { %4233 = vst [vmem:[#allocation44_spill] sm:$0xff] %v3384_v56  ;;  %4234 = vst [vmem:[#allocation45_spill] sm:$0xff] %v3387_v2  ;;  %v3390_v3 = vadd.f32 %v229_v55, %v3249_v21  ;;  %v3393_v61 = vadd.f32 %v322_v36, %v3251_v30  ;;  %v178_v2 = vadd.f32 %v3230_v59, %v3253_v43 }
  0xf5   :  { %v231_v42 = vpop.f32.mrf.mxu0  ;;  %v324_v63 = vpop.f32.mrf.mxu1  ;;  %v180_v36 = vadd.f32 %v3239_v0, %v3249_v21  ;;  %v271_v0 = vadd.f32 %v3232_v60, %v3255_v44 }
  0xf6   :  { %4235 = vst [vmem:[#allocation46_spill] sm:$0xff] %v3390_v3  ;;  %4236 = vst [vmem:[#allocation47_spill] sm:$0xff] %v3393_v61  ;;  %v3398_v4 = vadd.f32 %v231_v42, %v3253_v43  ;;  %v3401_v62 = vadd.f32 %v324_v63, %v3255_v44 }
  0xf7   :  { %v645_v45 = vpop.f32.mrf.mxu0  ;;  %v688_v3 = vpop.f32.mrf.mxu1 }
  0xf8   :  { %4237 = vst [vmem:[#allocation48_spill] sm:$0xff] %v3398_v4  ;;  %4238 = vst [vmem:[#allocation49_spill] sm:$0xff] %v3401_v62  ;;  %v697_v55 = vadd.f32 %v645_v45, %v176_v38 }
  0xf9   :  { %v647_v56 = vpop.f32.mrf.mxu0  ;;  %v690_v63 = vpop.f32.mrf.mxu1 }
  0xfa   :  { %v2218_v61 = vmul.f32 -1.442695, %v697_v55  ;;  %v698_v47 = vadd.f32 %v647_v56, %v178_v2  ;;  %v269_v2 = vadd.f32 %v3228_v58, %v3251_v30  ;;  %v700_v43 = vadd.f32 %v690_v63, %v271_v0 }
  0xfb   :  { %v649_v34 = vpop.f32.mrf.mxu0  ;;  %v692_v38 = vpop.f32.mrf.mxu1 }
  0xfc   :  { %2533 = vpow2.f32 %v2218_v61  ;;  %v2220_v42 = vmul.f32 -1.442695, %v698_v47  ;;  %v701_v62 = vadd.f32 %v649_v34, %v180_v36  ;;  %v699_v34 = vadd.f32 %v688_v3, %v269_v2  ;;  %v438_v2 = vld [vmem:[%s4161_s2 + $0x8] sm:$0xff] }
  0xfd   :  { %v651_v4 = vpop.f32.mrf.mxu0  ;;  %v694_v21 = vpop.f32.mrf.mxu1  ;;  %v2222_v56 = vmul.f32 -1.442695, %v700_v43 }
  0xfe   :  { %2535 = vpow2.f32 %v2220_v42  ;;  %v2219_v32 = vmul.f32 -1.442695, %v701_v62  ;;  %v702_v59 = vadd.f32 %v651_v4, %v182_v57  ;;  %v704_v47 = vadd.f32 %v694_v21, %v275_v5 }
  0xff   :  { %v273_v62 = vadd.f32 %v3241_v1, %v3251_v30  ;;  %v437_v1 = vld [vmem:[%s4161_s2] sm:$0xff] }
 0x100   :  { %2537 = vpow2.f32 %v2219_v32  ;;  %v2221_v45 = vmul.f32 -1.442695, %v702_v59  ;;  %v2223_v55 = vmul.f32 -1.442695, %v704_v47 }
 0x101   :  { %v703_v58 = vadd.f32 %v692_v38, %v273_v62 }
 0x102   :  { %2539 = vpow2.f32 %v2221_v45 }
 0x103   :  { %2541 = vtanh.f32 %v699_v34 }
 0x109   :  { %v2534_v61 = vpop.eup %2533 }
 0x10a   :  { %v711_v4 = vadd.f32 1.0, %v2534_v61 }
 0x10b   :  { %v2536_v32 = vpop.eup %2535 }
 0x10c   :  { %2543 = vrcp.f32 %v711_v4  ;;  %v723_v60 = vadd.f32 1.0, %v2536_v32 }
 0x10d   :  { %v2538_v36 = vpop.eup %2537  ;;  %2545 = vpow2.f32 %v2222_v56 }
 0x10e   :  { %2547 = vrcp.f32 %v723_v60  ;;  %v712_v57 = vadd.f32 1.0, %v2538_v36 }
 0x10f   :  { %v2540_v13 = vpop.eup %2539  ;;  %2549 = vpow2.f32 %v2223_v55 }
 0x110   :  { %2551 = vrcp.f32 %v712_v57  ;;  %v724_v44 = vadd.f32 1.0, %v2540_v13  ;;  %v2542_v3 = vpop.eup %2541  ;;  %v4239_v13 = vmov 0  }
 0x111   :  { %2553 = vtanh.f32 %v703_v58 }
 0x112   :  { %2555 = vrcp.f32 %v724_v44  ;;  %v4240_v44 = vmov 0.0  }
 0x119   :  { %v2544_v42 = vpop.eup %2543 }
 0x11a   :  { %v2546_v30 = vpop.eup %2545  ;;  %v745_v45 = vmul.f32 %v2544_v42, %v2542_v3 }
 0x11b   :  { %v2548_v63 = vpop.eup %2547  ;;  %v737_v21 = vadd.f32 1.0, %v2546_v30 }
 0x11c   :  { %v2550_v59 = vpop.eup %2549  ;;  %v743_v0 = vmul.f32 %v2548_v63, %v437_v1  ;;  %v4247_v63 = vld [vmem:[#allocation12_spill] sm:$0xff] }
 0x11d   :  { %v2552_v38 = vpop.eup %2551  ;;  %v738_v47 = vadd.f32 1.0, %v2550_v59  ;;  %2557 = vrcp.f32 %v737_v21 }
 0x11e   :  { %v2554_v5 = vpop.eup %2553  ;;  %v3423_v43 = vadd.f32 %v745_v45, %v743_v0  ;;  %v4248_v0 = vld [vmem:[#allocation10_spill] sm:$0xff] }
 0x11f   :  { %v2556_v34 = vpop.eup %2555  ;;  %v746_v61 = vmul.f32 %v2554_v5, %v2552_v38 }
 0x120   :  { %v744_v56 = vmul.f32 %v2556_v34, %v438_v2  ;;  %2559 = vtanh.f32 %v3423_v43 }
 0x121   :  { %2561 = vrcp.f32 %v738_v47  ;;  %v4249_v47 = vld [vmem:[#allocation14_spill] sm:$0xff] }
 0x122   :  { %v3425_v4 = vadd.f32 %v746_v61, %v744_v56 }
 0x124   :  { %2563 = vtanh.f32 %v3425_v4 }
 0x12a   :  { %v2558_v32 = vpop.eup %2557 }
 0x12d   :  { %v2560_v62 = vpop.eup %2559 }
 0x12e   :  { %v2562_v55 = vpop.eup %2561  ;;  %v751_v36 = vmul.f32 %v2560_v62, %v2558_v32  ;;  %v4250_v62 = vld [vmem:[#allocation16_spill] sm:$0xff] }
 0x131   :  { %v2564_v60 = vpop.eup %2563 }
 0x132   :  { %v752_v58 = vmul.f32 %v2564_v60, %v2562_v55 }
 0x134   :  { %v753_v57 = vpack.c.bf16 %v752_v58, %v751_v36 }
 0x136   :  { %2356 = vmatmul.mubr.bf16.vlgmr.msra.gmra.mxu0 %v753_v57  ;;  %945 = vmatmul.mubr.bf16.vlgmr.msra.gmra.mxu1 %v753_v57 }
 0x137   :  { %956 = vmatpush1.bf16.msra.mxu0 %v2949_v12  ;;  %987 = vmatprep.mubr.bf16.mxu0 %v4239_v13  ;;  %v3488_v12 = vld [vmem:[%s4166_s7] ss:$0 sm:$0xff] }
 0x138   :  { %957 = vmatprep.subr.bf16.mxu0 %v2971_v16  ;;  %2360 = vmatpush3.bf16.msra.mxu1 %v3166_v46 }
 0x139   :  { %2361 = vmatprep.subr.bf16.mxu1 %v4240_v44  ;;  %2375 = vmatprep.mubr.msk.bf16.mxu1 %vm2838_vm1, %v4240_v44 }
 0x13b   :  { %958 = vmatpush1.bf16.msra.mxu0 %v2978_v17 }
 0x13c   :  { %959 = vmatprep.subr.bf16.mxu0 %v2990_v19  ;;  %2362 = vmatpush3.bf16.msra.mxu1 %v3175_v48 }
 0x13d   :  { %2363 = vmatprep.subr.bf16.mxu1 %v4240_v44 }
 0x13f   :  { %960 = vmatpush1.bf16.msra.mxu0 %v3014_v23 }
 0x140   :  { %961 = vmatprep.subr.bf16.mxu0 %v3020_v24  ;;  %2364 = vmatpush3.bf16.msra.mxu1 %v3182_v49 }
 0x141   :  { %2365 = vmatprep.subr.bf16.mxu1 %v4240_v44 }
 0x143   :  { %962 = vmatpush1.bf16.msra.mxu0 %v3034_v26 }
 0x144   :  { %963 = vmatprep.subr.bf16.mxu0 %v3046_v28  ;;  %2366 = vmatpush3.bf16.msra.mxu1 %v3189_v50 }
 0x145   :  { %2367 = vmatprep.subr.bf16.mxu1 %v4240_v44 }
 0x147   :  { %964 = vmatpush1.bf16.msra.mxu0 %v3063_v31 }
 0x148   :  { %965 = vmatprep.subr.bf16.mxu0 %v3075_v33  ;;  %2368 = vmatpush3.bf16.msra.mxu1 %v3197_v51 }
 0x149   :  { %2369 = vmatprep.subr.bf16.mxu1 %v4240_v44 }
 0x14b   :  { %966 = vmatpush1.bf16.msra.mxu0 %v3087_v35 }
 0x14c   :  { %967 = vmatprep.subr.bf16.mxu0 %v3099_v37  ;;  %2370 = vmatpush3.bf16.msra.mxu1 %v3204_v52 }
 0x14d   :  { %2371 = vmatprep.subr.bf16.mxu1 %v4240_v44 }
 0x14f   :  { %968 = vmatpush1.bf16.msra.mxu0 %v3112_v39 }
 0x150   :  { %969 = vmatprep.subr.bf16.mxu0 %v3119_v40  ;;  %2372 = vmatpush3.bf16.msra.mxu1 %v3211_v53 }
 0x151   :  { %2373 = vmatprep.subr.bf16.mxu1 %v4240_v44 }
 0x153   :  { %970 = vmatpush1.bf16.msra.mxu0 %v3129_v41 }
 0x154   :  { %1160 = vmatprep.subr.bf16.mxu0 %v2912_v6  ;;  %2374 = vmatpush3.bf16.msra.mxu1 %v3218_v54  ;;  %v4241_v6 = vld [vmem:[#allocation6_spill] sm:$0xff] }
 0x155   :  { %1203 = vmatprep.subr.bf16.mxu1 %v2944_v11  ;;  %v873_v11 = vpop.permute.xlu0 %872 }
 0x156   :  { %988 = vmatmul.mubr.bf16.vlgmr.msra.gmra.mxu0 %v753_v57 }
 0x157   :  { %1161 = vmatpush1.bf16.msra.mxu0 %v2917_v7  ;;  %1192 = vmatprep.mubr.bf16.mxu0 %v4239_v13  ;;  %v4242_v7 = vld [vmem:[#allocation7_spill] sm:$0xff] }
 0x158   :  { %1162 = vmatprep.subr.bf16.mxu0 %v2922_v8  ;;  %v4243_v8 = vld [vmem:[#allocation8_spill] sm:$0xff]  ;;  %4246 = vst [vmem:[#allocation7_spill] sm:$0xff] %v3488_v12 }
 0x15b   :  { %1163 = vmatpush1.bf16.msra.mxu0 %v2932_v9  ;;  %v4244_v9 = vlaneseq }
 0x15c   :  { %1164 = vmatprep.subr.bf16.mxu0 %v2939_v10 }
 0x15d   :  { %v3482_v10 = vand.u32 127, %v4244_v9 }
 0x15f   :  { %1165 = vmatpush1.bf16.msra.mxu0 %v2958_v14  ;;  %4245 = vst [vmem:[#allocation6_spill] sm:$0xff] %v3482_v10  ;;  %vm877_vm2 = vcmp.eq.s32.totalorder %v3482_v10, %v873_v11  ;;  %v876_v14 = vpop.permute.xlu1 %875 }
 0x160   :  { %1166 = vmatprep.subr.bf16.mxu0 %v2966_v15  ;;  %v2233_v15 = vsel %vm877_vm2, 1.0, %v4240_v44  ;;  %vm878_vm3 = vcmp.eq.s32.totalorder %v3482_v10, %v876_v14 }
 0x161   :  { %v2234_v21 = vsel %vm878_vm3, 1.0, %v4240_v44 }
 0x163   :  { %1167 = vmatpush1.bf16.msra.mxu0 %v2985_v18 }
 0x164   :  { %1168 = vmatprep.subr.bf16.mxu0 %v2997_v20 }
 0x167   :  { %1169 = vmatpush1.bf16.msra.mxu0 %v3007_v22 }
 0x168   :  { %1170 = vmatprep.subr.bf16.mxu0 %v3025_v25 }
 0x16b   :  { %1171 = vmatpush1.bf16.msra.mxu0 %v3039_v27 }
 0x16c   :  { %1172 = vmatprep.subr.bf16.mxu0 %v3053_v29 }
 0x16f   :  { %1173 = vmatpush1.bf16.msra.mxu0 %v4241_v6 }
 0x170   :  { %1174 = vmatprep.subr.bf16.mxu0 %v4242_v7 }
 0x173   :  { %1175 = vmatpush1.bf16.msra.mxu0 %v4243_v8 }
 0x174   :  { %2379 = vmatprep.subr.bf16.mxu0 %v4240_v44 }
 0x1f6   :  { %v842_v18 = vpop.f32.mrf.mxu0  ;;  %v946_v20 = vpop.f32.mrf.mxu1 }
 0x1f7   :  { %v3492_v22 = vadd.f32 %v3488_v12, %v842_v18  ;;  %v998_v38 = vadd.f32 %v946_v20, %v4248_v0 }
 0x1f8   :  { %v2357_v25 = vpop.f32.mrf.mxu0  ;;  %v948_v3 = vpop.f32.mrf.mxu1 }
 0x1f9   :  { %849 = vmax.xlane.f32.xlu0 %v3492_v22  ;;  %v883_v42 = vmul.f32 %v2233_v15, %v3492_v22  ;;  %v999_v59 = vadd.f32 %v948_v3, %v4247_v63  ;;  %v2235_v32 = vmul.f32 -1.442695, %v998_v38  ;;  %v4251_v25 = vld [vmem:[#allocation11_spill] sm:$0xff] }
 0x1fa   :  { %v845_v1 = vpop.f32.mrf.mxu0  ;;  %v950_v30 = vpop.f32.mrf.mxu1  ;;  %v4253_v38 = vld [vmem:[#allocation15_spill] sm:$0xff] }
 0x1fb   :  { %v3499_v45 = vadd.f32 %v3488_v12, %v845_v1  ;;  %885 = vadd.xlane.f32.xlu1 %v883_v42  ;;  %v2237_v34 = vmul.f32 -1.442695, %v999_v59  ;;  %v1002_v61 = vadd.f32 %v950_v30, %v4249_v47  ;;  %v4252_v30 = vld [vmem:[#allocation13_spill] sm:$0xff] }
 0x1fc   :  { %v2358_v2 = vpop.f32.mrf.mxu0  ;;  %v952_v5 = vpop.f32.mrf.mxu1 }
 0x1fd   :  { %851 = vmax.xlane.f32.xlu0 %v3499_v45  ;;  %v884_v56 = vmul.f32 %v2234_v21, %v3499_v45  ;;  %v1003_v55 = vadd.f32 %v952_v5, %v4250_v62  ;;  %2565 = vpow2.f32 %v2237_v34  ;;  %v2236_v60 = vmul.f32 -1.442695, %v1002_v61  ;;  %v4254_v5 = vld [vmem:[#allocation17_spill] sm:$0xff] }
 0x1fe   :  { %2567 = vpow2.f32 %v2235_v32 }
 0x1ff   :  { %v2238_v36 = vmul.f32 -1.442695, %v1003_v55  ;;  %2569 = vpow2.f32 %v2236_v60 }
 0x201   :  { %887 = vadd.xlane.f32.xlu0 %v884_v56  ;;  %2571 = vpow2.f32 %v2238_v36 }
 0x20a   :  { %v2566_v58 = vpop.eup %2565 }
 0x20b   :  { %v2568_v57 = vpop.eup %2567  ;;  %v1024_v9 = vadd.f32 1.0, %v2566_v58 }
 0x20c   :  { %v2570_v11 = vpop.eup %2569  ;;  %v1012_v14 = vadd.f32 1.0, %v2568_v57 }
 0x20d   :  { %2573 = vrcp.f32 %v1024_v9  ;;  %v1013_v20 = vadd.f32 1.0, %v2570_v11 }
 0x20e   :  { %v2572_v15 = vpop.eup %2571  ;;  %2575 = vrcp.f32 %v1012_v14 }
 0x20f   :  { %v1025_v42 = vadd.f32 1.0, %v2572_v15 }
 0x216   :  { %v989_v18 = vpop.f32.mrf.mxu0 }
 0x217   :  { %v1000_v3 = vadd.f32 %v989_v18, %v4251_v25 }
 0x218   :  { %v991_v1 = vpop.f32.mrf.mxu0 }
 0x219   :  { %2577 = vtanh.f32 %v1000_v3  ;;  %v1001_v63 = vadd.f32 %v991_v1, %v4252_v30 }
 0x21a   :  { %v993_v59 = vpop.f32.mrf.mxu0  ;;  %2579 = vrcp.f32 %v1013_v20  ;;  %v2574_v61 = vpop.eup %2573 }
 0x21b   :  { %v2239_v0 = vmul.f32 -1.442695, %v1001_v63  ;;  %v1004_v21 = vadd.f32 %v993_v59, %v4253_v38  ;;  %2581 = vrcp.f32 %v1025_v42  ;;  %v2576_v56 = vpop.eup %2575  ;;  %v1044_v62 = vmul.f32 %v2574_v61, %v3423_v43 }
 0x21c   :  { %v995_v2 = vpop.f32.mrf.mxu0 }
 0x21d   :  { %2583 = vpow2.f32 %v2239_v0  ;;  %v1005_v34 = vadd.f32 %v995_v2, %v4254_v5  ;;  %v4258_v5 = vld [vmem:[#allocation20_spill] sm:$0xff] }
 0x21e   :  { %2585 = vtanh.f32 %v1004_v21 }
 0x21f   :  { %v2240_v47 = vmul.f32 -1.442695, %v1005_v34 }
 0x221   :  { %2587 = vpow2.f32 %v2240_v47 }
 0x226   :  { %v2578_v32 = vpop.eup %2577 }
 0x227   :  { %v1046_v55 = vmul.f32 %v2578_v32, %v2576_v56  ;;  %v2580_v60 = vpop.eup %2579  ;;  %v4259_v56 = vld [vmem:[#allocation18_spill] sm:$0xff] }
 0x228   :  { %v2582_v36 = vpop.eup %2581 }
 0x229   :  { %v3512_v58 = vadd.f32 %v1046_v55, %v1044_v62  ;;  %v1045_v14 = vmul.f32 %v2582_v36, %v3425_v4  ;;  %v3522_v4 = vld [vmem:[%s4163_s4 + $0xe8] ss:$16 sps:$4 sm:$0xff]  }
 0x22a   :  { %v2584_v57 = vpop.eup %2583 }
 0x22b   :  { %v2586_v9 = vpop.eup %2585  ;;  %v1038_v11 = vadd.f32 1.0, %v2584_v57  ;;  %2589 = vtanh.f32 %v3512_v58  ;;  %v4260_v57 = vld [vmem:[#allocation22_spill] sm:$0xff] }
 0x22c   :  { %v1047_v15 = vmul.f32 %v2586_v9, %v2580_v60 }
 0x22d   :  { %2591 = vrcp.f32 %v1038_v11 }
 0x22e   :  { %v2588_v18 = vpop.eup %2587  ;;  %v3516_v20 = vadd.f32 %v1047_v15, %v1045_v14  ;;  %v4261_v14 = vld [vmem:[#allocation24_spill] sm:$0xff] }
 0x22f   :  { %v1039_v25 = vadd.f32 1.0, %v2588_v18 }
 0x230   :  { %2593 = vtanh.f32 %v3516_v20 }
 0x231   :  { %2595 = vrcp.f32 %v1039_v25 }
 0x238   :  { %v2590_v43 = vpop.eup %2589 }
 0x23a   :  { %v2592_v3 = vpop.eup %2591 }
 0x23b   :  { %v1052_v30 = vmul.f32 %v2592_v3, %v2590_v43 }
 0x23d   :  { %v2594_v42 = vpop.eup %2593 }
 0x23e   :  { %v2596_v1 = vpop.eup %2595 }
 0x23f   :  { %v1053_v63 = vmul.f32 %v2596_v1, %v2594_v42 }
 0x241   :  { %v1054_v59 = vpack.c.bf16 %v1053_v63, %v1052_v30 }
 0x243   :  { %2376 = vmatmul.mubr.bf16.vlgmr.msra.gmra.mxu1 %v1054_v59  ;;  %1193 = vmatmul.mubr.bf16.vlgmr.msra.gmra.mxu0 %v1054_v59 }
 0x244   :  { %1204 = vmatpush1.bf16.msra.mxu1 %v3522_v4  ;;  %1235 = vmatprep.mubr.bf16.mxu1 %v4239_v13 }
 0x245   :  { %1205 = vmatprep.subr.bf16.mxu1 %v2971_v16  ;;  %2380 = vmatpush3.bf16.msra.mxu0 %v3166_v46  ;;  %v3559_v16 = vld [vmem:[%s4163_s4 + $0xe4] ss:$16 sps:$4 sm:$0xff]  }
 0x246   :  { %2381 = vmatprep.subr.bf16.mxu0 %v4240_v44  ;;  %2395 = vmatprep.mubr.msk.bf16.mxu0 %vm2838_vm1, %v4240_v44 }
 0x248   :  { %1206 = vmatpush1.bf16.msra.mxu1 %v2978_v17  ;;  %v3566_v17 = vld [vmem:[%s4163_s4 + $0xec] ss:$16 sps:$4 sm:$0xff]  }
 0x249   :  { %1207 = vmatprep.subr.bf16.mxu1 %v2990_v19  ;;  %2382 = vmatpush3.bf16.msra.mxu0 %v3175_v48  ;;  %v3572_v19 = vld [vmem:[%s4163_s4 + $0xe0] ss:$16 sps:$4 sm:$0xff]  }
 0x24a   :  { %2383 = vmatprep.subr.bf16.mxu0 %v4240_v44 }
 0x24c   :  { %1208 = vmatpush1.bf16.msra.mxu1 %v3014_v23  ;;  %v3579_v23 = vld [vmem:[%s4163_s4 + $0xc4] ss:$16 sps:$4 sm:$0xff]  }
 0x24d   :  { %1209 = vmatprep.subr.bf16.mxu1 %v3020_v24  ;;  %2384 = vmatpush3.bf16.msra.mxu0 %v3182_v49  ;;  %v3585_v24 = vld [vmem:[%s4163_s4 + $0xc0] ss:$16 sps:$4 sm:$0xff]  }
 0x24e   :  { %2385 = vmatprep.subr.bf16.mxu0 %v4240_v44 }
 0x250   :  { %1210 = vmatpush1.bf16.msra.mxu1 %v3034_v26  ;;  %v3591_v26 = vld [vmem:[%s4163_s4 + $0xa4] ss:$16 sps:$4 sm:$0xff]  }
 0x251   :  { %1211 = vmatprep.subr.bf16.mxu1 %v3046_v28  ;;  %2386 = vmatpush3.bf16.msra.mxu0 %v3189_v50  ;;  %v3597_v28 = vld [vmem:[%s4163_s4 + $0xa0] ss:$16 sps:$4 sm:$0xff]  }
 0x252   :  { %2387 = vmatprep.subr.bf16.mxu0 %v4240_v44 }
 0x254   :  { %1212 = vmatpush1.bf16.msra.mxu1 %v3063_v31  ;;  %v3603_v31 = vld [vmem:[%s4163_s4 + $0x84] ss:$16 sps:$4 sm:$0xff]  }
 0x255   :  { %1213 = vmatprep.subr.bf16.mxu1 %v3075_v33  ;;  %2388 = vmatpush3.bf16.msra.mxu0 %v3197_v51  ;;  %v1124_v33 = vpop.permute.xlu0 %1123 }
 0x256   :  { %2389 = vmatprep.subr.bf16.mxu0 %v4240_v44  ;;  %vm1126_vm5 = vcmp.eq.s32.totalorder %v3482_v10, %v1124_v33 }
 0x257   :  { %v2244_v38 = vsel %vm1126_vm5, 1.0, %v4240_v44 }
 0x258   :  { %1214 = vmatpush1.bf16.msra.mxu1 %v3087_v35  ;;  %v3609_v35 = vld [vmem:[%s4163_s4 + $0x80] ss:$16 sps:$4 sm:$0xff]  }
 0x259   :  { %1215 = vmatprep.subr.bf16.mxu1 %v3099_v37  ;;  %2390 = vmatpush3.bf16.msra.mxu0 %v3204_v52  ;;  %v3615_v37 = vld [vmem:[%s4163_s4 + $0x64] ss:$16 sps:$4 sm:$0xff]  }
 0x25a   :  { %2391 = vmatprep.subr.bf16.mxu0 %v4240_v44 }
 0x25c   :  { %1216 = vmatpush1.bf16.msra.mxu1 %v3112_v39  ;;  %v3621_v39 = vld [vmem:[%s4163_s4 + $0x60] ss:$16 sps:$4 sm:$0xff]  }
 0x25d   :  { %1217 = vmatprep.subr.bf16.mxu1 %v3119_v40  ;;  %2392 = vmatpush3.bf16.msra.mxu0 %v3211_v53  ;;  %v3627_v40 = vld [vmem:[%s4163_s4 + $0x44] ss:$16 sps:$4 sm:$0xff]  }
 0x25e   :  { %2393 = vmatprep.subr.bf16.mxu0 %v4240_v44  ;;  %4255 = vst [vmem:[#allocation8_spill] sm:$0xff] %v3627_v40 }
 0x260   :  { %1218 = vmatpush1.bf16.msra.mxu1 %v3129_v41  ;;  %v3630_v41 = vpop.permute.xlu0 %1368 }
 0x261   :  { %1408 = vmatprep.subr.bf16.mxu1 %v3559_v16  ;;  %2394 = vmatpush3.bf16.msra.mxu0 %v3218_v54  ;;  %4256 = vst [vmem:[#allocation12_spill] sm:$0xff] %v3630_v41  ;;  %v1121_v54 = vpop.permute.xlu1 %1120 }
 0x262   :  { %1451 = vmatprep.subr.bf16.mxu0 %v3566_v17  ;;  %vm1125_vm4 = vcmp.eq.s32.totalorder %v3482_v10, %v1121_v54 }
 0x263   :  { %1236 = vmatmul.mubr.bf16.vlgmr.msra.gmra.mxu1 %v1054_v59 }
 0x264   :  { %1409 = vmatpush1.bf16.msra.mxu1 %v3572_v19  ;;  %1440 = vmatprep.mubr.bf16.mxu1 %v4239_v13  ;;  %v3634_v46 = vpop.permute.xlu0 %1619 }
 0x265   :  { %1410 = vmatprep.subr.bf16.mxu1 %v3579_v23  ;;  %4257 = vst [vmem:[#allocation10_spill] sm:$0xff] %v3634_v46  ;;  %v3665_v18 = vpop.permute.xlu1 %1371 }
 0x266   :  { %4262 = vst [vmem:[#allocation14_spill] sm:$0xff] %v3665_v18 }
 0x268   :  { %1411 = vmatpush1.bf16.msra.mxu1 %v3585_v24 }
 0x269   :  { %1412 = vmatprep.subr.bf16.mxu1 %v3591_v26  ;;  %v3668_v3 = vpop.permute.xlu1 %1616 }
 0x26a   :  { %4263 = vst [vmem:[#allocation16_spill] sm:$0xff] %v3668_v3 }
 0x26c   :  { %1413 = vmatpush1.bf16.msra.mxu1 %v3597_v28 }
 0x26d   :  { %1414 = vmatprep.subr.bf16.mxu1 %v3603_v31 }
 0x270   :  { %1415 = vmatpush1.bf16.msra.mxu1 %v3609_v35 }
 0x271   :  { %1416 = vmatprep.subr.bf16.mxu1 %v3615_v37 }
 0x274   :  { %1417 = vmatpush1.bf16.msra.mxu1 %v3621_v39 }
 0x275   :  { %1418 = vmatprep.subr.bf16.mxu1 %v3627_v40 }
 0x278   :  { %1419 = vmatpush1.bf16.msra.mxu1 %v3039_v27 }
 0x279   :  { %1420 = vmatprep.subr.bf16.mxu1 %v3053_v29 }
 0x27c   :  { %1421 = vmatpush1.bf16.msra.mxu1 %v4241_v6 }
 0x27d   :  { %1422 = vmatprep.subr.bf16.mxu1 %v4242_v7 }
 0x280   :  { %1423 = vmatpush1.bf16.msra.mxu1 %v4243_v8 }
 0x281   :  { %2399 = vmatprep.subr.bf16.mxu1 %v4240_v44 }
 0x282   :  { %v3640_v48 = vpop.xlane.xlu0 %849 }
 0x283   :  { %v853_v49 = vsub.f32 %v3492_v22, %v3640_v48  ;;  %v2243_v22 = vsel %vm1125_vm4, 1.0, %v4240_v44 }
 0x284   :  { %v3670_v42 = vpop.xlane.xlu1 %885 }
 0x285   :  { %v855_v50 = vmul.f32 1.442695, %v853_v49 }
 0x286   :  { %v3644_v51 = vpop.xlane.xlu0 %851 }
 0x287   :  { %2597 = vpow2.f32 %v855_v50  ;;  %v854_v27 = vsub.f32 %v3499_v45, %v3644_v51 }
 0x289   :  { %v857_v29 = vmul.f32 1.442695, %v854_v27 }
 0x28b   :  { %2599 = vpow2.f32 %v857_v29 }
 0x294   :  { %v2598_v52 = vpop.eup %2597 }
 0x295   :  { %859 = vadd.xlane.f32.xlu1 %v2598_v52  ;;  %v4264_v52 = vld [vmem:[#allocation19_spill] sm:$0xff] }
 0x298   :  { %v2600_v53 = vpop.eup %2599 }
 0x299   :  { %861 = vadd.xlane.f32.xlu1 %v2600_v53 }
 0x303   :  { %v1089_v6 = vpop.f32.mrf.mxu1  ;;  %v1194_v7 = vpop.f32.mrf.mxu0 }
 0x304   :  { %v3651_v8 = vadd.f32 %v3488_v12, %v1089_v6  ;;  %v1246_v32 = vadd.f32 %v1194_v7, %v4259_v56  ;;  %v4265_v7 = vld [vmem:[#allocation21_spill] sm:$0xff] }
 0x305   :  { %v2377_v0 = vpop.f32.mrf.mxu1  ;;  %v1196_v45 = vpop.f32.mrf.mxu0 }
 0x306   :  { %1096 = vmax.xlane.f32.xlu1 %v3651_v8  ;;  %v1247_v34 = vadd.f32 %v1196_v45, %v4258_v5  ;;  %v1131_v61 = vmul.f32 %v2243_v22, %v3651_v8  ;;  %v2245_v11 = vmul.f32 -1.442695, %v1246_v32  ;;  %v4267_v5 = vld [vmem:[#allocation25_spill] sm:$0xff] }
 0x307   :  { %v1092_v21 = vpop.f32.mrf.mxu1  ;;  %v1198_v2 = vpop.f32.mrf.mxu0 }
 0x308   :  { %v3658_v47 = vadd.f32 %v3488_v12, %v1092_v21  ;;  %v2247_v36 = vmul.f32 -1.442695, %v1247_v34  ;;  %v1250_v9 = vadd.f32 %v1198_v2, %v4260_v57 }
 0x309   :  { %v2378_v62 = vpop.f32.mrf.mxu1  ;;  %v1200_v55 = vpop.f32.mrf.mxu0 }
 0x30a   :  { %1133 = vadd.xlane.f32.xlu1 %v1131_v61  ;;  %v1132_v60 = vmul.f32 %v2244_v38, %v3658_v47  ;;  %v1251_v15 = vadd.f32 %v1200_v55, %v4261_v14  ;;  %2601 = vpow2.f32 %v2247_v36  ;;  %v2246_v25 = vmul.f32 -1.442695, %v1250_v9  ;;  %v4266_v38 = vld [vmem:[#allocation23_spill] sm:$0xff] }
 0x30b   :  { %2603 = vpow2.f32 %v2245_v11 }
 0x30c   :  { %1135 = vadd.xlane.f32.xlu0 %v1132_v60  ;;  %v2248_v43 = vmul.f32 -1.442695, %v1251_v15  ;;  %2605 = vpow2.f32 %v2246_v25 }
 0x30e   :  { %1098 = vmax.xlane.f32.xlu1 %v3658_v47  ;;  %2607 = vpow2.f32 %v2248_v43 }
 0x317   :  { %v2602_v1 = vpop.eup %2601 }
 0x318   :  { %v2604_v30 = vpop.eup %2603  ;;  %v1272_v59 = vadd.f32 1.0, %v2602_v1 }
 0x319   :  { %v2606_v33 = vpop.eup %2605  ;;  %v1260_v49 = vadd.f32 1.0, %v2604_v30 }
 0x31a   :  { %v1261_v29 = vadd.f32 1.0, %v2606_v33 }
 0x31b   :  { %v2608_v50 = vpop.eup %2607 }
 0x31c   :  { %v1273_v54 = vadd.f32 1.0, %v2608_v50 }
 0x31e   :  { %v860_v63 = vpop.xlane.xlu1 %859 }
 0x31f   :  { %2609 = vlog2.f32 %v860_v63 }
 0x320   :  { %2611 = vrcp.f32 %v1272_v59 }
 0x321   :  { %2613 = vrcp.f32 %v1260_v49 }
 0x323   :  { %v1237_v27 = vpop.f32.mrf.mxu1 }
 0x324   :  { %v1248_v53 = vadd.f32 %v1237_v27, %v4264_v52 }
 0x325   :  { %v1239_v6 = vpop.f32.mrf.mxu1 }
 0x326   :  { %2615 = vtanh.f32 %v1248_v53  ;;  %v1249_v22 = vadd.f32 %v1239_v6, %v4265_v7  ;;  %v3700_v6 = vld [vmem:[%s4165_s6 + $0x38] sm:$0xff]  }
 0x327   :  { %v1241_v0 = vpop.f32.mrf.mxu1  ;;  %2617 = vrcp.f32 %v1261_v29  ;;  %v3709_v7 = vld [vmem:[%s4163_s4 + $0xc8] ss:$16 sps:$4 sm:$0xff]  }
 0x328   :  { %v2249_v45 = vmul.f32 -1.442695, %v1249_v22  ;;  %v1252_v21 = vadd.f32 %v1241_v0, %v4266_v38  ;;  %2619 = vrcp.f32 %v1273_v54  ;;  %v3715_v22 = vld [vmem:[%s4163_s4 + $0xac] ss:$16 sps:$4 sm:$0xff]   ;;  %v3721_v0 = vld [vmem:[%s4165_s6 + $0x30] sm:$0xff]  }
 0x329   :  { %v1243_v2 = vpop.f32.mrf.mxu1  ;;  %v3734_v38 = vld [vmem:[%s4163_s4 + $0x8c] ss:$16 sps:$4 sm:$0xff]  }
 0x32a   :  { %2621 = vpow2.f32 %v2249_v45  ;;  %v1253_v34 = vadd.f32 %v1243_v2, %v4267_v5  ;;  %v3728_v45 = vld [vmem:[%s4163_s4 + $0xa8] ss:$16 sps:$4 sm:$0xff]   ;;  %v3753_v5 = vld [vmem:[%s4163_s4 + $0x6c] ss:$16 sps:$4 sm:$0xff]  }
 0x32b   :  { %2623 = vtanh.f32 %v1252_v21  ;;  %v3740_v21 = vld [vmem:[%s4165_s6 + $0x28] sm:$0xff]  }
 0x32c   :  { %v2610_v61 = vpop.eup %2609  ;;  %v2250_v56 = vmul.f32 -1.442695, %v1253_v34  ;;  %v3747_v2 = vld [vmem:[%s4163_s4 + $0x88] ss:$16 sps:$4 sm:$0xff]   ;;  %v3759_v34 = vld [vmem:[%s4165_s6 + $0x20] sm:$0xff]  }
 0x32d   :  { %v864_v32 = vmul.f32 0.6931472, %v2610_v61  ;;  %v2612_v55 = vpop.eup %2611  ;;  %v3766_v61 = vld [vmem:[%s4163_s4 + $0x68] ss:$16 sps:$4 sm:$0xff]  }
 0x32e   :  { %2625 = vpow2.f32 %v2250_v56  ;;  %v2614_v36 = vpop.eup %2613  ;;  %v1292_v9 = vmul.f32 %v2612_v55, %v3512_v58  ;;  %v3772_v56 = vld [vmem:[%s4163_s4 + $0x4c] ss:$16 sps:$4 sm:$0xff]   ;;  %v3785_v55 = vld [vmem:[%s4163_s4 + $0x48] ss:$16 sps:$4 sm:$0xff]  }
 0x32f   :  { %v3677_v62 = vadd.f32 %v864_v32, %v3640_v48  ;;  %v3778_v32 = vld [vmem:[%s4165_s6 + $0x18] sm:$0xff]  }
 0x333   :  { %v2616_v57 = vpop.eup %2615 }
 0x334   :  { %v1294_v11 = vmul.f32 %v2616_v57, %v2614_v36  ;;  %v2618_v14 = vpop.eup %2617  ;;  %v3791_v36 = vld [vmem:[%s4163_s4 + $0x2c] ss:$16 sps:$4 sm:$0xff]   ;;  %v3797_v57 = vld [vmem:[%s4165_s6 + $0x10] sm:$0xff]  }
 0x335   :  { %v2620_v15 = vpop.eup %2619 }
 0x336   :  { %v3682_v25 = vadd.f32 %v1294_v11, %v1292_v9  ;;  %v1293_v63 = vmul.f32 %v2620_v15, %v3516_v20  ;;  %v3694_v20 = vld [vmem:[%s4163_s4 + $0xcc] ss:$16 sps:$4 sm:$0xff]   ;;  %v3804_v9 = vld [vmem:[%s4163_s4 + $0x28] ss:$16 sps:$4 sm:$0xff]  }
 0x337   :  { %v2622_v43 = vpop.eup %2621  ;;  %v3810_v11 = vld [vmem:[%s4163_s4 + $0xc] ss:$16 sps:$4 sm:$0xff]   ;;  %v3823_v15 = vld [vmem:[%s4163_s4 + $0x8] ss:$16 sps:$4 sm:$0xff]  }
 0x338   :  { %v2624_v1 = vpop.eup %2623  ;;  %v1286_v30 = vadd.f32 1.0, %v2622_v43  ;;  %2627 = vtanh.f32 %v3682_v25  ;;  %v3830_v43 = vld [vmem:[%s4165_s6] sm:$0xff]  }
 0x339   :  { %v1295_v48 = vmul.f32 %v2624_v1, %v2618_v14  ;;  %v3816_v14 = vld [vmem:[%s4165_s6 + $0x8] sm:$0xff]   ;;  %v3848_v1 = vld [vmem:[%s4163_s4 + $0x40] ss:$16 sps:$4 sm:$0xff]  }
 0x33a   :  { %2629 = vrcp.f32 %v1286_v30  ;;  %4268 = vst [vmem:[#allocation11_spill] sm:$0xff] %v3848_v1  ;;  %v3854_v30 = vld [vmem:[%s4163_s4 + $0x24] ss:$16 sps:$4 sm:$0xff]  }
 0x33b   :  { %v2626_v59 = vpop.eup %2625  ;;  %v3686_v33 = vadd.f32 %v1295_v48, %v1293_v63  ;;  %4269 = vst [vmem:[#allocation13_spill] sm:$0xff] %v3854_v30  ;;  %v3860_v63 = vld [vmem:[%s4163_s4 + $0x20] ss:$16 sps:$4 sm:$0xff]   ;;  %v3866_v48 = vld [vmem:[%s4163_s4 + $0x4] ss:$16 sps:$4 sm:$0xff]  }
 0x33c   :  { %v1287_v49 = vadd.f32 1.0, %v2626_v59  ;;  %4270 = vst [vmem:[#allocation15_spill] sm:$0xff] %v3860_v63  ;;  %4271 = vst [vmem:[#allocation17_spill] sm:$0xff] %v3866_v48  ;;  %v862_v59 = vpop.xlane.xlu1 %861 }
 0x33d   :  { %2631 = vtanh.f32 %v3686_v33 }
 0x33e   :  { %2633 = vrcp.f32 %v1287_v49  ;;  %v3872_v49 = vld [vmem:[%s4163_s4] ss:$16 sps:$4 sm:$0xff]  }
 0x33f   :  { %4272 = vst [vmem:[#allocation20_spill] sm:$0xff] %v3872_v49 }
 0x345   :  { %v2628_v58 = vpop.eup %2627 }
 0x347   :  { %v2630_v50 = vpop.eup %2629 }
 0x348   :  { %v1300_v52 = vmul.f32 %v2630_v50, %v2628_v58 }
 0x34a   :  { %v2632_v27 = vpop.eup %2631 }
 0x34b   :  { %v2634_v29 = vpop.eup %2633 }
 0x34c   :  { %v1301_v53 = vmul.f32 %v2634_v29, %v2632_v27 }
 0x34e   :  { %v1302_v54 = vpack.c.bf16 %v1301_v53, %v1300_v52 }
 0x350   :  { %2396 = vmatmul.mubr.bf16.vlgmr.msra.gmra.mxu0 %v1302_v54  ;;  %1441 = vmatmul.mubr.bf16.vlgmr.msra.gmra.mxu1 %v1302_v54 }
 0x351   :  { %1452 = vmatpush1.bf16.msra.mxu0 %v3522_v4  ;;  %1483 = vmatprep.mubr.bf16.mxu0 %v4239_v13 }
 0x352   :  { %1453 = vmatprep.subr.bf16.mxu0 %v3694_v20  ;;  %2400 = vmatpush3.bf16.msra.mxu1 %v3700_v6 }
 0x353   :  { %2401 = vmatprep.subr.bf16.mxu1 %v4240_v44  ;;  %2415 = vmatprep.mubr.msk.bf16.mxu1 %vm2838_vm1, %v4240_v44 }
 0x355   :  { %1454 = vmatpush1.bf16.msra.mxu0 %v3709_v7 }
 0x356   :  { %1455 = vmatprep.subr.bf16.mxu0 %v3715_v22  ;;  %2402 = vmatpush3.bf16.msra.mxu1 %v3721_v0 }
 0x357   :  { %2403 = vmatprep.subr.bf16.mxu1 %v4240_v44 }
 0x359   :  { %1456 = vmatpush1.bf16.msra.mxu0 %v3728_v45 }
 0x35a   :  { %1457 = vmatprep.subr.bf16.mxu0 %v3734_v38  ;;  %2404 = vmatpush3.bf16.msra.mxu1 %v3740_v21 }
 0x35b   :  { %2405 = vmatprep.subr.bf16.mxu1 %v4240_v44 }
 0x35d   :  { %1458 = vmatpush1.bf16.msra.mxu0 %v3747_v2 }
 0x35e   :  { %1459 = vmatprep.subr.bf16.mxu0 %v3753_v5  ;;  %2406 = vmatpush3.bf16.msra.mxu1 %v3759_v34 }
 0x35f   :  { %2407 = vmatprep.subr.bf16.mxu1 %v4240_v44 }
 0x361   :  { %1460 = vmatpush1.bf16.msra.mxu0 %v3766_v61 }
 0x362   :  { %1461 = vmatprep.subr.bf16.mxu0 %v3772_v56  ;;  %2408 = vmatpush3.bf16.msra.mxu1 %v3778_v32 }
 0x363   :  { %2409 = vmatprep.subr.bf16.mxu1 %v4240_v44 }
 0x365   :  { %1462 = vmatpush1.bf16.msra.mxu0 %v3785_v55 }
 0x366   :  { %1463 = vmatprep.subr.bf16.mxu0 %v3791_v36  ;;  %2410 = vmatpush3.bf16.msra.mxu1 %v3797_v57 }
 0x367   :  { %2411 = vmatprep.subr.bf16.mxu1 %v4240_v44 }
 0x369   :  { %1464 = vmatpush1.bf16.msra.mxu0 %v3804_v9 }
 0x36a   :  { %1465 = vmatprep.subr.bf16.mxu0 %v3810_v11  ;;  %2412 = vmatpush3.bf16.msra.mxu1 %v3816_v14 }
 0x36b   :  { %2413 = vmatprep.subr.bf16.mxu1 %v4240_v44 }
 0x36d   :  { %1466 = vmatpush1.bf16.msra.mxu0 %v3823_v15 }
 0x36e   :  { %1656 = vmatprep.subr.bf16.mxu0 %v3559_v16  ;;  %2414 = vmatpush3.bf16.msra.mxu1 %v3830_v43 }
 0x36f   :  { %1699 = vmatprep.subr.bf16.mxu1 %v3566_v17 }
 0x370   :  { %1484 = vmatmul.mubr.bf16.vlgmr.msra.gmra.mxu0 %v1302_v54 }
 0x371   :  { %1657 = vmatpush1.bf16.msra.mxu0 %v3572_v19  ;;  %1688 = vmatprep.mubr.bf16.mxu0 %v4239_v13 }
 0x372   :  { %1658 = vmatprep.subr.bf16.mxu0 %v3579_v23 }
 0x375   :  { %1659 = vmatpush1.bf16.msra.mxu0 %v3585_v24 }
 0x376   :  { %1660 = vmatprep.subr.bf16.mxu0 %v3591_v26 }
 0x379   :  { %1661 = vmatpush1.bf16.msra.mxu0 %v3597_v28 }
 0x37a   :  { %1662 = vmatprep.subr.bf16.mxu0 %v3603_v31 }
 0x37d   :  { %1663 = vmatpush1.bf16.msra.mxu0 %v3609_v35 }
 0x37e   :  { %1664 = vmatprep.subr.bf16.mxu0 %v3615_v37 }
 0x381   :  { %1665 = vmatpush1.bf16.msra.mxu0 %v3621_v39 }
 0x382   :  { %1666 = vmatprep.subr.bf16.mxu0 %v3627_v40 }
 0x385   :  { %1667 = vmatpush1.bf16.msra.mxu0 %v3848_v1  ;;  %v4278_v1 = vld [vmem:[#allocation32_spill] sm:$0xff] }
 0x386   :  { %1668 = vmatprep.subr.bf16.mxu0 %v3854_v30 }
 0x389   :  { %1669 = vmatpush1.bf16.msra.mxu0 %v3860_v63 }
 0x38a   :  { %1670 = vmatprep.subr.bf16.mxu0 %v3866_v48 }
 0x38d   :  { %1671 = vmatpush1.bf16.msra.mxu0 %v3872_v49  ;;  %v4274_v49 = vld [vmem:[#allocation28_spill] sm:$0xff] }
 0x38e   :  { %2419 = vmatprep.subr.bf16.mxu0 %v4240_v44 }
 0x38f   :  { %v3876_v58 = vpop.xlane.xlu1 %1096 }
 0x390   :  { %v1100_v50 = vsub.f32 %v3651_v8, %v3876_v58 }
 0x392   :  { %v1102_v27 = vmul.f32 1.442695, %v1100_v50 }
 0x393   :  { %v3880_v29 = vpop.xlane.xlu1 %1133 }
 0x394   :  { %2635 = vpow2.f32 %v1102_v27 }
 0x397   :  { %v3882_v52 = vpop.xlane.xlu1 %1098 }
 0x398   :  { %v1101_v53 = vsub.f32 %v3658_v47, %v3882_v52 }
 0x39a   :  { %v1104_v54 = vmul.f32 1.442695, %v1101_v53  ;;  %v4276_v53 = vld [vmem:[#allocation26_spill] sm:$0xff] }
 0x39c   :  { %2637 = vpow2.f32 %v1104_v54 }
 0x39d   :  { %2639 = vlog2.f32 %v862_v59  ;;  %v4279_v59 = vld [vmem:[#allocation27_spill] sm:$0xff] }
 0x3a1   :  { %v2636_v60 = vpop.eup %2635 }
 0x3a2   :  { %1106 = vadd.xlane.f32.xlu1 %v2636_v60 }
 0x3a9   :  { %v2638_v3 = vpop.eup %2637 }
 0x3aa   :  { %1108 = vadd.xlane.f32.xlu1 %v2638_v3 }
 0x410   :  { %v1337_v46 = vpop.f32.mrf.mxu0  ;;  %v1442_v18 = vpop.f32.mrf.mxu1 }
 0x411   :  { %v3887_v10 = vadd.f32 %v3488_v12, %v1337_v46  ;;  %v1494_v60 = vadd.f32 %v1442_v18, %v4276_v53  ;;  %v4277_v46 = vld [vmem:[#allocation30_spill] sm:$0xff] }
 0x412   :  { %v2397_v8 = vpop.f32.mrf.mxu0  ;;  %v1444_v50 = vpop.f32.mrf.mxu1 }
 0x413   :  { %4273 = vst [vmem:[#allocation18_spill] sm:$0xff] %v3887_v10  ;;  %1344 = vmax.xlane.f32.xlu1 %v3887_v10  ;;  %v1495_v48 = vadd.f32 %v1444_v50, %v4274_v49  ;;  %v2255_v8 = vmul.f32 -1.442695, %v1494_v60  ;;  %v2640_v50 = vpop.eup %2639 }
 0x414   :  { %v1340_v27 = vpop.f32.mrf.mxu0  ;;  %v1446_v41 = vpop.f32.mrf.mxu1 }
 0x415   :  { %v3892_v47 = vadd.f32 %v3488_v12, %v1340_v27  ;;  %v2257_v63 = vmul.f32 -1.442695, %v1495_v48  ;;  %v1498_v30 = vadd.f32 %v1446_v41, %v4277_v46  ;;  %v866_v48 = vmul.f32 0.6931472, %v2640_v50 }
 0x416   :  { %v2398_v54 = vpop.f32.mrf.mxu0  ;;  %v1448_v3 = vpop.f32.mrf.mxu1 }
 0x417   :  { %4275 = vst [vmem:[#allocation22_spill] sm:$0xff] %v3892_v47  ;;  %1346 = vmax.xlane.f32.xlu1 %v3892_v47  ;;  %v1499_v40 = vadd.f32 %v1448_v3, %v4278_v1  ;;  %2641 = vpow2.f32 %v2257_v63  ;;  %v2256_v10 = vmul.f32 -1.442695, %v1498_v30  ;;  %v868_v30 = vadd.f32 %v866_v48, %v3644_v51  ;;  %v4280_v3 = vld [vmem:[#allocation29_spill] sm:$0xff] }
 0x418   :  { %2643 = vpow2.f32 %v2255_v8  ;;  %v4283_v51 = vld [vmem:[#allocation33_spill] sm:$0xff] }
 0x419   :  { %v2258_v49 = vmul.f32 -1.442695, %v1499_v40  ;;  %2645 = vpow2.f32 %v2256_v10 }
 0x41b   :  { %2647 = vpow2.f32 %v2258_v49 }
 0x424   :  { %v2642_v27 = vpop.eup %2641 }
 0x425   :  { %v2644_v18 = vpop.eup %2643  ;;  %v1520_v54 = vadd.f32 1.0, %v2642_v27  ;;  %v888_v27 = vpop.xlane.xlu0 %887 }
 0x426   :  { %v2646_v12 = vpop.eup %2645  ;;  %v1508_v47 = vadd.f32 1.0, %v2644_v18  ;;  %v4281_v18 = vld [vmem:[#allocation31_spill] sm:$0xff] }
 0x427   :  { %v1509_v1 = vadd.f32 1.0, %v2646_v12  ;;  %v890_v12 = vsub.f32 %v868_v30, %v888_v27 }
 0x428   :  { %v2648_v41 = vpop.eup %2647 }
 0x429   :  { %v1521_v10 = vadd.f32 1.0, %v2648_v41 }
 0x42b   :  { %v1107_v53 = vpop.xlane.xlu1 %1106 }
 0x42c   :  { %2649 = vlog2.f32 %v1107_v53 }
 0x42d   :  { %2651 = vrcp.f32 %v1520_v54  ;;  %v4282_v54 = vld [vmem:[#allocation9_spill] sm:$0xff] }
 0x42e   :  { %2653 = vrcp.f32 %v1508_v47  ;;  %vm427_vm6 = vcmp.lt.s32.totalorder %v4282_v54, 4 }
 0x42f   :  { %v3905_v41 = vsel %vm427_vm6, 1.0, %v4240_v44 }
 0x430   :  { %v1485_v60 = vpop.f32.mrf.mxu0 }
 0x431   :  { %v1496_v63 = vadd.f32 %v1485_v60, %v4279_v59 }
 0x432   :  { %v1487_v40 = vpop.f32.mrf.mxu0 }
 0x433   :  { %2655 = vtanh.f32 %v1496_v63  ;;  %v1497_v46 = vadd.f32 %v1487_v40, %v4280_v3  ;;  %v1109_v8 = vpop.xlane.xlu1 %1108  ;;  %v892_v63 = vmul.f32 0.0, %v890_v12 }
 0x434   :  { %v1489_v49 = vpop.f32.mrf.mxu0  ;;  %2657 = vlog2.f32 %v1109_v8 }
 0x435   :  { %2659 = vrcp.f32 %v1509_v1  ;;  %v2259_v50 = vmul.f32 -1.442695, %v1497_v46  ;;  %v1500_v53 = vadd.f32 %v1489_v49, %v4281_v18  ;;  %v4284_v1 = vsub.f32 %v3677_v62, %v3670_v42 }
 0x436   :  { %2661 = vrcp.f32 %v1521_v10  ;;  %v1491_v60 = vpop.f32.mrf.mxu0 }
 0x437   :  { %2663 = vpow2.f32 %v2259_v50  ;;  %v1501_v47 = vadd.f32 %v1491_v60, %v4283_v51  ;;  %v891_v40 = vmul.f32 %v3905_v41, %v4284_v1 }
 0x438   :  { %2665 = vtanh.f32 %v1500_v53 }
 0x439   :  { %v2650_v48 = vpop.eup %2649  ;;  %v2260_v59 = vmul.f32 -1.442695, %v1501_v47  ;;  %v893_v10 = vadd.f32 %v892_v63, %v891_v40 }
 0x43a   :  { %v1111_v3 = vmul.f32 0.6931472, %v2650_v48  ;;  %v2652_v30 = vpop.eup %2651 }
 0x43b   :  { %2667 = vpow2.f32 %v2260_v59  ;;  %v2654_v46 = vpop.eup %2653  ;;  %v1540_v50 = vmul.f32 %v2652_v30, %v3682_v25  ;;  %v894_v54 = vrot.slane %v893_v10, 4  ;;  %v1136_v59 = vpop.xlane.xlu0 %1135 }
 0x43c   :  { %v1114_v49 = vadd.f32 %v1111_v3, %v3876_v58 }
 0x43d   :  { %v895_v1 = vadd.f32 %v894_v54, %v893_v10 }
 0x43e   :  { %v1137_v62 = vsub.f32 %v1114_v49, %v3880_v29 }
 0x43f   :  { %v896_v49 = vrot.slane %v895_v1, 2 }
 0x440   :  { %v2656_v8 = vpop.eup %2655  ;;  %v1139_v30 = vmul.f32 %v3905_v41, %v1137_v62 }
 0x441   :  { %v2658_v27 = vpop.eup %2657  ;;  %v1542_v18 = vmul.f32 %v2656_v8, %v2654_v46 }
 0x442   :  { %v2660_v53 = vpop.eup %2659  ;;  %v1113_v12 = vmul.f32 0.6931472, %v2658_v27  ;;  %v897_v27 = vadd.f32 %v896_v49, %v895_v1  ;;  %v4292_v1 = vld [vmem:[#allocation22_spill] sm:$0xff] }
 0x443   :  { %v2662_v60 = vpop.eup %2661  ;;  %v3913_v51 = vadd.f32 %v1542_v18, %v1540_v50 }
 0x444   :  { %v2664_v42 = vpop.eup %2663  ;;  %v1115_v47 = vadd.f32 %v1113_v12, %v3882_v52  ;;  %v1541_v58 = vmul.f32 %v2662_v60, %v3686_v33 }
 0x445   :  { %v2666_v48 = vpop.eup %2665  ;;  %v1534_v63 = vadd.f32 1.0, %v2664_v42  ;;  %2669 = vtanh.f32 %v3913_v51 }
 0x446   :  { %v1543_v40 = vmul.f32 %v2666_v48, %v2660_v53  ;;  %v1138_v25 = vsub.f32 %v1115_v47, %v1136_v59  ;;  %v898_v53 = vrot.slane %v897_v27, 1 }
 0x447   :  { %2671 = vrcp.f32 %v1534_v63 }
 0x448   :  { %v2668_v3 = vpop.eup %2667  ;;  %v3920_v46 = vadd.f32 %v1543_v40, %v1541_v58  ;;  %v1140_v8 = vmul.f32 0.0, %v1138_v25  ;;  %v899_v42 = vadd.f32 %v898_v53, %v897_v27  ;;  %v4294_v53 = vld [vmem:[#allocation36_spill] sm:$0xff] }
 0x449   :  { %v1535_v29 = vadd.f32 1.0, %v2668_v3 }
 0x44a   :  { %2673 = vtanh.f32 %v3920_v46  ;;  %v1141_v52 = vadd.f32 %v1140_v8, %v1139_v30 }
 0x44b   :  { %2675 = vrcp.f32 %v1535_v29 }
 0x44c   :  { %v1142_v10 = vrot.slane %v1141_v52, 4 }
 0x44e   :  { %v1143_v33 = vadd.f32 %v1142_v10, %v1141_v52  ;;  %v4293_v52 = vld [vmem:[#allocation7_spill] sm:$0xff] }
 0x450   :  { %v1144_v50 = vrot.slane %v1143_v33, 2 }
 0x452   :  { %v1145_v18 = vadd.f32 %v1144_v50, %v1143_v33  ;;  %v2670_v12 = vpop.eup %2669 }
 0x454   :  { %v1146_v54 = vrot.slane %v1145_v18, 1  ;;  %v2672_v60 = vpop.eup %2671 }
 0x455   :  { %v1548_v63 = vmul.f32 %v2672_v60, %v2670_v12  ;;  %v4295_v60 = vld [vmem:[#allocation34_spill] sm:$0xff] }
 0x456   :  { %v1147_v62 = vadd.f32 %v1146_v54, %v1145_v18 }
 0x457   :  { %v2674_v47 = vpop.eup %2673 }
 0x458   :  { %v2676_v48 = vpop.eup %2675  ;;  %v3923_v59 = vadd.f32 %v1147_v62, %v899_v42 }
 0x459   :  { %v1549_v58 = vmul.f32 %v2676_v48, %v2674_v47 }
 0x45b   :  { %v1550_v40 = vpack.c.bf16 %v1549_v58, %v1548_v63  ;;  %v4296_v63 = vld [vmem:[#allocation38_spill] sm:$0xff] }
 0x45d   :  { %2416 = vmatmul.mubr.bf16.vlgmr.msra.gmra.mxu1 %v1550_v40  ;;  %1689 = vmatmul.mubr.bf16.vlgmr.msra.gmra.mxu0 %v1550_v40 }
 0x45e   :  { %1700 = vmatpush1.bf16.msra.mxu1 %v3522_v4  ;;  %1731 = vmatprep.mubr.bf16.mxu1 %v4239_v13 }
 0x45f   :  { %1701 = vmatprep.subr.bf16.mxu1 %v3694_v20  ;;  %2420 = vmatpush3.bf16.msra.mxu0 %v3700_v6 }
 0x460   :  { %2421 = vmatprep.subr.bf16.mxu0 %v4240_v44  ;;  %2435 = vmatprep.mubr.msk.bf16.mxu0 %vm2838_vm1, %v4240_v44 }
 0x462   :  { %1702 = vmatpush1.bf16.msra.mxu1 %v3709_v7 }
 0x463   :  { %1703 = vmatprep.subr.bf16.mxu1 %v3715_v22  ;;  %2422 = vmatpush3.bf16.msra.mxu0 %v3721_v0 }
 0x464   :  { %2423 = vmatprep.subr.bf16.mxu0 %v4240_v44 }
 0x466   :  { %1704 = vmatpush1.bf16.msra.mxu1 %v3728_v45 }
 0x467   :  { %1705 = vmatprep.subr.bf16.mxu1 %v3734_v38  ;;  %2424 = vmatpush3.bf16.msra.mxu0 %v3740_v21 }
 0x468   :  { %2425 = vmatprep.subr.bf16.mxu0 %v4240_v44 }
 0x46a   :  { %1706 = vmatpush1.bf16.msra.mxu1 %v3747_v2 }
 0x46b   :  { %1707 = vmatprep.subr.bf16.mxu1 %v3753_v5  ;;  %2426 = vmatpush3.bf16.msra.mxu0 %v3759_v34 }
 0x46c   :  { %2427 = vmatprep.subr.bf16.mxu0 %v4240_v44 }
 0x46e   :  { %1708 = vmatpush1.bf16.msra.mxu1 %v3766_v61 }
 0x46f   :  { %1709 = vmatprep.subr.bf16.mxu1 %v3772_v56  ;;  %2428 = vmatpush3.bf16.msra.mxu0 %v3778_v32 }
 0x470   :  { %2429 = vmatprep.subr.bf16.mxu0 %v4240_v44 }
 0x472   :  { %1710 = vmatpush1.bf16.msra.mxu1 %v3785_v55 }
 0x473   :  { %1711 = vmatprep.subr.bf16.mxu1 %v3791_v36  ;;  %2430 = vmatpush3.bf16.msra.mxu0 %v3797_v57 }
 0x474   :  { %2431 = vmatprep.subr.bf16.mxu0 %v4240_v44 }
 0x476   :  { %1712 = vmatpush1.bf16.msra.mxu1 %v3804_v9 }
 0x477   :  { %1713 = vmatprep.subr.bf16.mxu1 %v3810_v11  ;;  %2432 = vmatpush3.bf16.msra.mxu0 %v3816_v14 }
 0x478   :  { %2433 = vmatprep.subr.bf16.mxu0 %v4240_v44 }
 0x47a   :  { %1714 = vmatpush1.bf16.msra.mxu1 %v3823_v15 }
 0x47b   :  { %1904 = vmatprep.subr.bf16.mxu1 %v3559_v16  ;;  %2434 = vmatpush3.bf16.msra.mxu0 %v3830_v43  ;;  %v4285_v16 = vld [vmem:[#allocation8_spill] sm:$0xff] }
 0x47c   :  { %1947 = vmatprep.subr.bf16.mxu0 %v3566_v17  ;;  %v4286_v17 = vld [vmem:[#allocation11_spill] sm:$0xff] }
 0x47d   :  { %1732 = vmatmul.mubr.bf16.vlgmr.msra.gmra.mxu1 %v1550_v40 }
 0x47e   :  { %1905 = vmatpush1.bf16.msra.mxu1 %v3572_v19  ;;  %1936 = vmatprep.mubr.bf16.mxu1 %v4239_v13  ;;  %v4287_v19 = vld [vmem:[#allocation13_spill] sm:$0xff] }
 0x47f   :  { %1906 = vmatprep.subr.bf16.mxu1 %v3579_v23  ;;  %v4288_v23 = vld [vmem:[#allocation15_spill] sm:$0xff] }
 0x482   :  { %1907 = vmatpush1.bf16.msra.mxu1 %v3585_v24  ;;  %v4289_v24 = vld [vmem:[#allocation17_spill] sm:$0xff] }
 0x483   :  { %1908 = vmatprep.subr.bf16.mxu1 %v3591_v26  ;;  %v4290_v26 = vld [vmem:[#allocation20_spill] sm:$0xff] }
 0x486   :  { %1909 = vmatpush1.bf16.msra.mxu1 %v3597_v28 }
 0x487   :  { %1910 = vmatprep.subr.bf16.mxu1 %v3603_v31  ;;  %v4291_v31 = vld [vmem:[#allocation18_spill] sm:$0xff] }
 0x48a   :  { %1911 = vmatpush1.bf16.msra.mxu1 %v3609_v35 }
 0x48b   :  { %1912 = vmatprep.subr.bf16.mxu1 %v3615_v37 }
 0x48e   :  { %1913 = vmatpush1.bf16.msra.mxu1 %v3621_v39 }
 0x48f   :  { %1914 = vmatprep.subr.bf16.mxu1 %v4285_v16  ;;  %v4297_v16 = vld [vmem:[#allocation40_spill] sm:$0xff] }
 0x492   :  { %1915 = vmatpush1.bf16.msra.mxu1 %v4286_v17 }
 0x493   :  { %1916 = vmatprep.subr.bf16.mxu1 %v4287_v19 }
 0x496   :  { %1917 = vmatpush1.bf16.msra.mxu1 %v4288_v23 }
 0x497   :  { %1918 = vmatprep.subr.bf16.mxu1 %v4289_v24 }
 0x49a   :  { %1919 = vmatpush1.bf16.msra.mxu1 %v4290_v26 }
 0x49b   :  { %2439 = vmatprep.subr.bf16.mxu1 %v4240_v44 }
 0x49c   :  { %v3977_v28 = vpop.xlane.xlu1 %1344 }
 0x49d   :  { %v1348_v35 = vsub.f32 %v4291_v31, %v3977_v28 }
 0x49f   :  { %v1350_v37 = vmul.f32 1.442695, %v1348_v35 }
 0x4a0   :  { %v3981_v39 = vpop.xlane.xlu1 %1346 }
 0x4a1   :  { %2677 = vpow2.f32 %v1350_v37  ;;  %v1349_v25 = vsub.f32 %v4292_v1, %v3981_v39 }
 0x4a3   :  { %v1352_v3 = vmul.f32 1.442695, %v1349_v25 }
 0x4a5   :  { %2679 = vpow2.f32 %v1352_v3 }
 0x4ae   :  { %v2678_v30 = vpop.eup %2677 }
 0x4af   :  { %1354 = vadd.xlane.f32.xlu0 %v2678_v30 }
 0x4b2   :  { %v2680_v8 = vpop.eup %2679 }
 0x4b3   :  { %1356 = vadd.xlane.f32.xlu1 %v2680_v8 }
 0x51d   :  { %v1585_v29 = vpop.f32.mrf.mxu1  ;;  %v1690_v49 = vpop.f32.mrf.mxu0 }
 0x51e   :  { %v3986_v10 = vadd.f32 %v4293_v52, %v1585_v29  ;;  %v1742_v42 = vadd.f32 %v1690_v49, %v4295_v60  ;;  %v4298_v29 = vld [vmem:[#allocation35_spill] sm:$0xff] }
 0x51f   :  { %v2417_v27 = vpop.f32.mrf.mxu1  ;;  %v1692_v33 = vpop.f32.mrf.mxu0 }
 0x520   :  { %1592 = vmax.xlane.f32.xlu1 %v3986_v10  ;;  %v1743_v54 = vadd.f32 %v1692_v33, %v4294_v53  ;;  %v2265_v40 = vmul.f32 -1.442695, %v1742_v42  ;;  %v4299_v33 = vld [vmem:[#allocation37_spill] sm:$0xff] }
 0x521   :  { %v1588_v50 = vpop.f32.mrf.mxu1  ;;  %v1694_v18 = vpop.f32.mrf.mxu0 }
 0x522   :  { %v3991_v12 = vadd.f32 %v4293_v52, %v1588_v50  ;;  %v2267_v48 = vmul.f32 -1.442695, %v1743_v54  ;;  %v1746_v58 = vadd.f32 %v1694_v18, %v4296_v63  ;;  %v4300_v54 = vld [vmem:[#allocation39_spill] sm:$0xff] }
 0x523   :  { %v2418_v62 = vpop.f32.mrf.mxu1  ;;  %v1696_v47 = vpop.f32.mrf.mxu0 }
 0x524   :  { %1594 = vmax.xlane.f32.xlu0 %v3991_v12  ;;  %v1747_v17 = vadd.f32 %v1696_v47, %v4297_v16  ;;  %2681 = vpow2.f32 %v2267_v48  ;;  %v2266_v19 = vmul.f32 -1.442695, %v1746_v58  ;;  %v4301_v62 = vld [vmem:[#allocation41_spill] sm:$0xff] }
 0x525   :  { %2683 = vpow2.f32 %v2265_v40 }
 0x526   :  { %v2268_v23 = vmul.f32 -1.442695, %v1747_v17  ;;  %2685 = vpow2.f32 %v2266_v19 }
 0x528   :  { %2687 = vpow2.f32 %v2268_v23 }
 0x531   :  { %v2682_v24 = vpop.eup %2681 }
 0x532   :  { %v2684_v26 = vpop.eup %2683  ;;  %v1768_v35 = vadd.f32 1.0, %v2682_v24 }
 0x533   :  { %v2686_v37 = vpop.eup %2685  ;;  %v1756_v25 = vadd.f32 1.0, %v2684_v26 }
 0x534   :  { %2689 = vrcp.f32 %v1768_v35  ;;  %v1757_v8 = vadd.f32 1.0, %v2686_v37 }
 0x535   :  { %v2688_v3 = vpop.eup %2687  ;;  %2691 = vrcp.f32 %v1756_v25 }
 0x536   :  { %v1769_v52 = vadd.f32 1.0, %v2688_v3 }
 0x53d   :  { %v1733_v30 = vpop.f32.mrf.mxu1 }
 0x53e   :  { %v1744_v49 = vadd.f32 %v1733_v30, %v4298_v29 }
 0x53f   :  { %v1735_v27 = vpop.f32.mrf.mxu1 }
 0x540   :  { %2693 = vtanh.f32 %v1744_v49  ;;  %v1745_v50 = vadd.f32 %v1735_v27, %v4299_v33 }
 0x541   :  { %v1737_v18 = vpop.f32.mrf.mxu1  ;;  %2695 = vrcp.f32 %v1757_v8  ;;  %v2690_v63 = vpop.eup %2689 }
 0x542   :  { %v2269_v53 = vmul.f32 -1.442695, %v1745_v50  ;;  %v1748_v60 = vadd.f32 %v1737_v18, %v4300_v54  ;;  %2697 = vrcp.f32 %v1769_v52  ;;  %v2692_v58 = vpop.eup %2691  ;;  %v1788_v16 = vmul.f32 %v2690_v63, %v3913_v51  ;;  %v4306_v63 = vld [vmem:[#allocation43_spill] sm:$0xff] }
 0x543   :  { %v1739_v42 = vpop.f32.mrf.mxu1 }
 0x544   :  { %2699 = vpow2.f32 %v2269_v53  ;;  %v1749_v47 = vadd.f32 %v1739_v42, %v4301_v62 }
 0x545   :  { %2701 = vtanh.f32 %v1748_v60 }
 0x546   :  { %v2270_v48 = vmul.f32 -1.442695, %v1749_v47 }
 0x548   :  { %2703 = vpow2.f32 %v2270_v48 }
 0x54d   :  { %v2694_v40 = vpop.eup %2693 }
 0x54e   :  { %v1790_v17 = vmul.f32 %v2694_v40, %v2692_v58  ;;  %v2696_v19 = vpop.eup %2695 }
 0x54f   :  { %v2698_v23 = vpop.eup %2697 }
 0x550   :  { %v4002_v24 = vadd.f32 %v1790_v17, %v1788_v16  ;;  %v1789_v25 = vmul.f32 %v2698_v23, %v3920_v46  ;;  %v2272_v46 = vld [vmem:[%s4167_s8 + $0x48] sm:$0xff]  ;;  %v4307_v17 = vld [vmem:[#allocation45_spill] sm:$0xff] }
 0x551   :  { %v2700_v26 = vpop.eup %2699 }
 0x552   :  { %v2702_v35 = vpop.eup %2701  ;;  %v1782_v37 = vadd.f32 1.0, %v2700_v26  ;;  %2705 = vtanh.f32 %v4002_v24 }
 0x553   :  { %v1791_v3 = vmul.f32 %v2702_v35, %v2696_v19  ;;  %v4308_v35 = vld [vmem:[#allocation47_spill] sm:$0xff] }
 0x554   :  { %2707 = vrcp.f32 %v1782_v37 }
 0x555   :  { %v2704_v30 = vpop.eup %2703  ;;  %v4006_v8 = vadd.f32 %v1791_v3, %v1789_v25  ;;  %v4309_v3 = vld [vmem:[#allocation49_spill] sm:$0xff] }
 0x556   :  { %v1783_v29 = vadd.f32 1.0, %v2704_v30 }
 0x557   :  { %2709 = vtanh.f32 %v4006_v8 }
 0x558   :  { %2711 = vrcp.f32 %v1783_v29 }
 0x55f   :  { %v2706_v51 = vpop.eup %2705 }
 0x561   :  { %v2708_v49 = vpop.eup %2707 }
 0x562   :  { %v1796_v33 = vmul.f32 %v2708_v49, %v2706_v51 }
 0x564   :  { %v2710_v52 = vpop.eup %2709 }
 0x565   :  { %v2712_v27 = vpop.eup %2711 }
 0x566   :  { %v1797_v50 = vmul.f32 %v2712_v27, %v2710_v52 }
 0x568   :  { %v1798_v18 = vpack.c.bf16 %v1797_v50, %v1796_v33 }
 0x56a   :  { %2436 = vmatmul.mubr.bf16.vlgmr.msra.gmra.mxu0 %v1798_v18  ;;  %1937 = vmatmul.mubr.bf16.vlgmr.msra.gmra.mxu1 %v1798_v18 }
 0x56b   :  { %1948 = vmatpush1.bf16.msra.mxu0 %v3522_v4  ;;  %1979 = vmatprep.mubr.bf16.mxu0 %v4239_v13 }
 0x56c   :  { %1949 = vmatprep.subr.bf16.mxu0 %v3694_v20  ;;  %2440 = vmatpush3.bf16.msra.mxu1 %v3700_v6  ;;  %v4045_v20 = vld [vmem:[%s4166_s7] ss:$0 sm:$0xff] }
 0x56d   :  { %2441 = vmatprep.subr.bf16.mxu1 %v4240_v44  ;;  %2455 = vmatprep.mubr.msk.bf16.mxu1 %vm2838_vm1, %v4240_v44 }
 0x56f   :  { %1950 = vmatpush1.bf16.msra.mxu0 %v3709_v7 }
 0x570   :  { %1951 = vmatprep.subr.bf16.mxu0 %v3715_v22  ;;  %2442 = vmatpush3.bf16.msra.mxu1 %v3721_v0 }
 0x571   :  { %2443 = vmatprep.subr.bf16.mxu1 %v4240_v44 }
 0x573   :  { %1952 = vmatpush1.bf16.msra.mxu0 %v3728_v45 }
 0x574   :  { %1953 = vmatprep.subr.bf16.mxu0 %v3734_v38  ;;  %2444 = vmatpush3.bf16.msra.mxu1 %v3740_v21  ;;  %v4302_v38 = vld [vmem:[#allocation44_spill] sm:$0xff] }
 0x575   :  { %2445 = vmatprep.subr.bf16.mxu1 %v4240_v44 }
 0x577   :  { %1954 = vmatpush1.bf16.msra.mxu0 %v3747_v2 }
 0x578   :  { %1955 = vmatprep.subr.bf16.mxu0 %v3753_v5  ;;  %2446 = vmatpush3.bf16.msra.mxu1 %v3759_v34  ;;  %v4303_v5 = vld [vmem:[#allocation42_spill] sm:$0xff] }
 0x579   :  { %2447 = vmatprep.subr.bf16.mxu1 %v4240_v44 }
 0x57b   :  { %1956 = vmatpush1.bf16.msra.mxu0 %v3766_v61 }
 0x57c   :  { %1957 = vmatprep.subr.bf16.mxu0 %v3772_v56  ;;  %2448 = vmatpush3.bf16.msra.mxu1 %v3778_v32 }
 0x57d   :  { %2449 = vmatprep.subr.bf16.mxu1 %v4240_v44 }
 0x57f   :  { %1958 = vmatpush1.bf16.msra.mxu0 %v3785_v55  ;;  %v4304_v55 = vld [vmem:[#allocation46_spill] sm:$0xff] }
 0x580   :  { %1959 = vmatprep.subr.bf16.mxu0 %v3791_v36  ;;  %2450 = vmatpush3.bf16.msra.mxu1 %v3797_v57 }
 0x581   :  { %2451 = vmatprep.subr.bf16.mxu1 %v4240_v44 }
 0x583   :  { %1960 = vmatpush1.bf16.msra.mxu0 %v3804_v9  ;;  %v4305_v9 = vld [vmem:[#allocation48_spill] sm:$0xff] }
 0x584   :  { %1961 = vmatprep.subr.bf16.mxu0 %v3810_v11  ;;  %2452 = vmatpush3.bf16.msra.mxu1 %v3816_v14 }
 0x585   :  { %2453 = vmatprep.subr.bf16.mxu1 %v4240_v44 }
 0x587   :  { %1962 = vmatpush1.bf16.msra.mxu0 %v3823_v15 }
 0x588   :  { %2454 = vmatpush3.bf16.msra.mxu1 %v3830_v43 }
 0x58a   :  { %1980 = vmatmul.mubr.bf16.vlgmr.msra.gmra.mxu0 %v1798_v18 }
 0x62a   :  { %v1833_v13 = vpop.f32.mrf.mxu0  ;;  %v1938_v4 = vpop.f32.mrf.mxu1 }
 0x62b   :  { %v4048_v6 = vadd.f32 %v4045_v20, %v1833_v13  ;;  %v1990_v34 = vadd.f32 %v1938_v4, %v4303_v5 }
 0x62c   :  { %v2437_v7 = vpop.f32.mrf.mxu0  ;;  %v1940_v22 = vpop.f32.mrf.mxu1 }
 0x62d   :  { %1840 = vmax.xlane.f32.xlu1 %v4048_v6  ;;  %v1991_v21 = vadd.f32 %v1940_v22, %v4302_v38  ;;  %v2275_v57 = vmul.f32 -1.442695, %v1990_v34 }
 0x62e   :  { %v1836_v0 = vpop.f32.mrf.mxu0  ;;  %v1942_v45 = vpop.f32.mrf.mxu1 }
 0x62f   :  { %v4053_v2 = vadd.f32 %v4045_v20, %v1836_v0  ;;  %v2277_v32 = vmul.f32 -1.442695, %v1991_v21  ;;  %v1994_v36 = vadd.f32 %v1942_v45, %v4304_v55 }
 0x630   :  { %v2438_v61 = vpop.f32.mrf.mxu0  ;;  %v1944_v56 = vpop.f32.mrf.mxu1 }
 0x631   :  { %1842 = vmax.xlane.f32.xlu0 %v4053_v2  ;;  %v1995_v11 = vadd.f32 %v1944_v56, %v4305_v9  ;;  %2713 = vpow2.f32 %v2277_v32  ;;  %v2276_v14 = vmul.f32 -1.442695, %v1994_v36 }
 0x632   :  { %2715 = vpow2.f32 %v2275_v57 }
 0x633   :  { %v2278_v15 = vmul.f32 -1.442695, %v1995_v11  ;;  %2717 = vpow2.f32 %v2276_v14 }
 0x635   :  { %2719 = vpow2.f32 %v2278_v15 }
 0x63e   :  { %v2714_v43 = vpop.eup %2713 }
 0x63f   :  { %v2716_v53 = vpop.eup %2715  ;;  %v2016_v54 = vadd.f32 1.0, %v2714_v43  ;;  %v2271_v43 = vld [vmem:[%s4167_s8 + $0x40] sm:$0xff] }
 0x640   :  { %v2718_v60 = vpop.eup %2717  ;;  %v2004_v42 = vadd.f32 1.0, %v2716_v53  ;;  %v2282_v53 = vld [vmem:[%s4167_s8 + $0x58] sm:$0xff] }
 0x641   :  { %2721 = vrcp.f32 %v2016_v54  ;;  %v2005_v48 = vadd.f32 1.0, %v2718_v60  ;;  %v4087_v54 = vpop.xlane.xlu0 %1354 }
 0x642   :  { %v2720_v62 = vpop.eup %2719  ;;  %2723 = vrcp.f32 %v2004_v42 }
 0x643   :  { %v2017_v40 = vadd.f32 1.0, %v2720_v62 }
 0x645   :  { %v4091_v42 = vpop.xlane.xlu0 %1594 }
 0x647   :  { %1867 = vperm.xlu0 %2463, %v2272_v46   ;;  %v2281_v46 = vld [vmem:[%s4167_s8 + $0x50] sm:$0xff]  ;;  %s2839_s8 = smov [#allocation3]  }
 0x648   :  { %s2150_s28 = sshll.u32 %s2839_s8, 4  ;;  %s2151_s28 = int_to_ptr.vmem [resolvable:$true] %s2150_s28 }
 0x649   :  { %s2814_s29 = scalar_lea.vmem %s2151_s28, 16  ;;  %s2818_s0 = scalar_lea.vmem %s2151_s28, 32 }
 0x64a   :  { %v1981_v47 = vpop.f32.mrf.mxu0  ;;  %p2815_p0 = scmp.ne.s32.totalorder %s2151_s28, %s2814_s29  ;;  %p2819_p1 = scmp.lt.s32.totalorder %s2151_s28, %s2151_s28 }
 0x64b   :  { %v1992_v58 = vadd.f32 %v1981_v47, %v4306_v63  ;;  %v1597_v47 = vsub.f32 %v3991_v12, %v4091_v42  ;;  %p2820_p2 = scmp.lt.s32.totalorder %s2818_s0, %s2814_s29 }
 0x64c   :  { %v1983_v16 = vpop.f32.mrf.mxu0 }
 0x64d   :  { %2725 = vtanh.f32 %v1992_v58  ;;  %v1993_v19 = vadd.f32 %v1983_v16, %v4307_v17  ;;  %v1600_v63 = vmul.f32 1.442695, %v1597_v47  ;;  %p2821_p3 = por %p2820_p2, %p2819_p1 }
 0x64e   :  { %v1985_v23 = vpop.f32.mrf.mxu0  ;;  %2727 = vrcp.f32 %v2005_v48  ;;  %v2722_v51 = vpop.eup %2721 }
 0x64f   :  { %v2279_v26 = vmul.f32 -1.442695, %v1993_v19  ;;  %v1996_v37 = vadd.f32 %v1985_v23, %v4308_v35  ;;  %2729 = vrcp.f32 %v2017_v40  ;;  %v2724_v49 = vpop.eup %2723  ;;  %v2036_v27 = vmul.f32 %v2722_v51, %v4002_v24  ;;  %v4310_v19 = vld [vmem:[#allocation12_spill] sm:$0xff]  ;;  %v4311_v23 = vld [vmem:[#allocation6_spill] sm:$0xff]  ;;  %p2822_p4 = pnand %p2821_p3, %p2815_p0 }
 0x650   :  { %v1987_v25 = vpop.f32.mrf.mxu0  ;;  %vm1373_vm7 = vcmp.eq.s32.totalorder %v4311_v23, %v4310_v19  ;;  %v4313_v51 = vld [vmem:[#allocation10_spill] sm:$0xff] }
 0x651   :  { %2731 = vpow2.f32 %v2279_v26  ;;  %v1997_v30 = vadd.f32 %v1987_v25, %v4309_v3  ;;  %v4312_v26 = vld [vmem:[#allocation14_spill] sm:$0xff]  ;;  %v2253_v25 = vsel %vm1373_vm7, 1.0, %v4240_v44  ;;  %vm1622_vm9 = vcmp.eq.s32.totalorder %v4311_v23, %v4313_v51 }
 0x652   :  { %2733 = vtanh.f32 %v1996_v37  ;;  %vm1374_vm8 = vcmp.eq.s32.totalorder %v4311_v23, %v4312_v26 }
 0x653   :  { %v2280_v29 = vmul.f32 -1.442695, %v1997_v30  ;;  %v2254_v3 = vsel %vm1374_vm8, 1.0, %v4240_v44  ;;  %v1379_v30 = vmul.f32 %v2253_v25, %v4291_v31 }
 0x655   :  { %2735 = vpow2.f32 %v2280_v29  ;;  %v1380_v29 = vmul.f32 %v2254_v3, %v4292_v1 }
 0x65a   :  { %v2726_v52 = vpop.eup %2725 }
 0x65b   :  { %v2038_v33 = vmul.f32 %v2726_v52, %v2724_v49  ;;  %v2728_v50 = vpop.eup %2727  ;;  %v4314_v49 = vld [vmem:[#allocation16_spill] sm:$0xff] }
 0x65c   :  { %v2730_v18 = vpop.eup %2729  ;;  %vm1621_vm10 = vcmp.eq.s32.totalorder %v4311_v23, %v4314_v49 }
 0x65d   :  { %v2040_v13 = vadd.f32 %v2038_v33, %v2036_v27  ;;  %v2037_v0 = vmul.f32 %v2730_v18, %v4006_v8  ;;  %v2264_v33 = vsel %vm1622_vm9, 1.0, %v4240_v44 }
 0x65e   :  { %v2732_v4 = vpop.eup %2731  ;;  %v1628_v31 = vmul.f32 %v2264_v33, %v3991_v12 }
 0x65f   :  { %v2734_v7 = vpop.eup %2733  ;;  %v2030_v22 = vadd.f32 1.0, %v2732_v4  ;;  %2737 = vtanh.f32 %v2040_v13 }
 0x660   :  { %v2039_v45 = vmul.f32 %v2734_v7, %v2728_v50  ;;  %v2263_v50 = vsel %vm1621_vm10, 1.0, %v4240_v44 }
 0x661   :  { %2739 = vrcp.f32 %v2030_v22  ;;  %v1627_v1 = vmul.f32 %v2263_v50, %v3986_v10 }
 0x662   :  { %v2736_v38 = vpop.eup %2735  ;;  %v2041_v21 = vadd.f32 %v2039_v45, %v2037_v0 }
 0x663   :  { %v2031_v5 = vadd.f32 1.0, %v2736_v38 }
 0x664   :  { %2741 = vtanh.f32 %v2041_v21 }
 0x665   :  { %2743 = vrcp.f32 %v2031_v5 }
 0x66c   :  { %v2738_v34 = vpop.eup %2737 }
 0x66e   :  { %v2740_v61 = vpop.eup %2739 }
 0x66f   :  { %v2044_v24 = vmul.f32 %v2740_v61, %v2738_v34 }
 0x671   :  { %v2742_v56 = vpop.eup %2741 }
 0x672   :  { %v2744_v32 = vpop.eup %2743 }
 0x673   :  { %v2045_v55 = vmul.f32 %v2744_v32, %v2742_v56 }
 0x675   :  { %v2046_v36 = vpack.c.bf16 %v2045_v55, %v2044_v24 }
 0x677   :  { %2456 = vmatmul.mubr.bf16.vlgmr.msra.gmra.mxu1 %v2046_v36 }
 0x6ba   :  { %v4099_v40 = vpop.xlane.xlu0 %1842 }
 0x6bb   :  { %v1845_v17 = vsub.f32 %v4053_v2, %v4099_v40 }
 0x6bd   :  { %v1848_v37 = vmul.f32 1.442695, %v1845_v17 }
 0x6c2   :  { %v1868_v4 = vpop.permute.xlu0 %1867 }
 0x6c3   :  { %vm1870_vm12 = vcmp.eq.s32.totalorder %v4311_v23, %v1868_v4 }
 0x6c4   :  { %v2274_v32 = vsel %vm1870_vm12, 1.0, %v4240_v44 }
 0x737   :  { %v2081_v57 = vpop.f32.mrf.mxu1 }
 0x738   :  { %v4069_v9 = vadd.f32 %v4045_v20, %v2081_v57  ;;  %v1876_v57 = vmul.f32 %v2274_v32, %v4053_v2 }
 0x739   :  { %v2457_v8 = vpop.f32.mrf.mxu1 }
 0x73a   :  { %2088 = vmax.xlane.f32.xlu1 %v4069_v9 }
 0x73b   :  { %v2084_v11 = vpop.f32.mrf.mxu1 }
 0x73c   :  { %v4073_v14 = vadd.f32 %v4045_v20, %v2084_v11  ;;  %v4085_v20 = vpop.xlane.xlu1 %1356 }
 0x73d   :  { %v2458_v15 = vpop.f32.mrf.mxu1 }
 0x73e   :  { %2090 = vmax.xlane.f32.xlu0 %v4073_v14 }
 0x740   :  { %v4089_v60 = vpop.xlane.xlu1 %1592 }
 0x741   :  { %v1596_v62 = vsub.f32 %v3986_v10, %v4089_v60 }
 0x743   :  { %v1598_v48 = vmul.f32 1.442695, %v1596_v62 }
 0x744   :  { %v4097_v58 = vpop.xlane.xlu1 %1840 }
 0x745   :  { %2745 = vpow2.f32 %v1598_v48  ;;  %v1844_v16 = vsub.f32 %v4048_v6, %v4097_v58 }
 0x746   :  { %2747 = vpow2.f32 %v1600_v63 }
 0x747   :  { %v1846_v35 = vmul.f32 1.442695, %v1844_v16 }
 0x749   :  { %2749 = vpow2.f32 %v1846_v35 }
 0x74a   :  { %2751 = vpow2.f32 %v1848_v37 }
 0x74b   :  { %1864 = vperm.xlu1 %2464, %v2271_v43  }
 0x74f   :  { %2112 = vperm.xlu1 %2464, %v2281_v46  }
 0x752   :  { %v2746_v52 = vpop.eup %2745 }
 0x753   :  { %v2748_v27 = vpop.eup %2747 }
 0x754   :  { %2115 = vperm.xlu0 %2463, %v2282_v53  }
 0x756   :  { %v2750_v18 = vpop.eup %2749 }
 0x757   :  { %v2752_v13 = vpop.eup %2751 }
 0x773   :  { %1381 = vadd.xlane.f32.xlu1 %v1379_v30  ;;  %1383 = vadd.xlane.f32.xlu0 %v1380_v29 }
 0x777   :  { %1604 = vadd.xlane.f32.xlu1 %v2748_v27  ;;  %1602 = vadd.xlane.f32.xlu0 %v2746_v52 }
 0x77b   :  { %1631 = vadd.xlane.f32.xlu1 %v1628_v31  ;;  %1629 = vadd.xlane.f32.xlu0 %v1627_v1 }
 0x77f   :  { %1852 = vadd.xlane.f32.xlu1 %v2752_v13  ;;  %1850 = vadd.xlane.f32.xlu0 %v2750_v18 }
 0x7c3   :  { %v4121_v7 = vpop.xlane.xlu1 %2088 }
 0x7c4   :  { %v2092_v22 = vsub.f32 %v4069_v9, %v4121_v7 }
 0x7c6   :  { %v2094_v0 = vmul.f32 1.442695, %v2092_v22 }
 0x7c7   :  { %v4125_v45 = vpop.xlane.xlu0 %2090  ;;  %v1865_v38 = vpop.permute.xlu1 %1864 }
 0x7c8   :  { %2753 = vpow2.f32 %v2094_v0  ;;  %v2093_v12 = vsub.f32 %v4073_v14, %v4125_v45  ;;  %vm1869_vm11 = vcmp.eq.s32.totalorder %v4311_v23, %v1865_v38 }
 0x7c9   :  { %v2273_v34 = vsel %vm1869_vm11, 1.0, %v4240_v44 }
 0x7ca   :  { %v2096_v10 = vmul.f32 1.442695, %v2093_v12  ;;  %v1875_v24 = vmul.f32 %v2273_v34, %v4048_v6 }
 0x7cb   :  { %v2113_v21 = vpop.permute.xlu1 %2112 }
 0x7cc   :  { %2755 = vpow2.f32 %v2096_v10  ;;  %vm2117_vm13 = vcmp.eq.s32.totalorder %v4311_v23, %v2113_v21 }
 0x7cd   :  { %v2283_v55 = vsel %vm2117_vm13, 1.0, %v4240_v44  ;;  %2757 = vlog2.f32 %v4087_v54 }
 0x7ce   :  { %v2123_v36 = vmul.f32 %v2283_v55, %v4069_v9  ;;  %2759 = vlog2.f32 %v4085_v20 }
 0x7cf   :  { %v2116_v61 = vpop.permute.xlu0 %2115 }
 0x7d0   :  { %vm2118_vm14 = vcmp.eq.s32.totalorder %v4311_v23, %v2116_v61 }
 0x7d1   :  { %v2284_v8 = vsel %vm2118_vm14, 1.0, %v4240_v44 }
 0x7d2   :  { %v2124_v11 = vmul.f32 %v2284_v8, %v4073_v14 }
 0x7d5   :  { %v2754_v5 = vpop.eup %2753 }
 0x7d6   :  { %2098 = vadd.xlane.f32.xlu0 %v2754_v5 }
 0x7d9   :  { %v2756_v56 = vpop.eup %2755 }
 0x7da   :  { %1877 = vadd.xlane.f32.xlu0 %v1875_v24  ;;  %2100 = vadd.xlane.f32.xlu1 %v2756_v56  ;;  %v2758_v44 = vpop.eup %2757 }
 0x7db   :  { %v2760_v47 = vpop.eup %2759  ;;  %v1359_v63 = vmul.f32 0.6931472, %v2758_v44 }
 0x7dc   :  { %v1361_v16 = vmul.f32 0.6931472, %v2760_v47 }
 0x7dd   :  { %v1362_v54 = vadd.f32 %v1359_v63, %v3977_v28 }
 0x7de   :  { %2125 = vadd.xlane.f32.xlu0 %v2123_v36  ;;  %1879 = vadd.xlane.f32.xlu1 %v1876_v57  ;;  %v1363_v20 = vadd.f32 %v1361_v16, %v3981_v39 }
 0x7e2   :  { %2127 = vadd.xlane.f32.xlu1 %v2124_v11 }
 0x7fc   :  { %v1384_v6 = vpop.xlane.xlu0 %1383  ;;  %v1382_v15 = vpop.xlane.xlu1 %1381 }
 0x7fd   :  { %v1385_v37 = vsub.f32 %v1362_v54, %v1382_v15  ;;  %v1386_v25 = vsub.f32 %v1363_v20, %v1384_v6 }
 0x7ff   :  { %v1387_v52 = vmul.f32 %v3905_v41, %v1385_v37  ;;  %v1388_v27 = vmul.f32 0.0, %v1386_v25 }
 0x800   :  { %v1603_v43 = vpop.xlane.xlu0 %1602  ;;  %v1605_v46 = vpop.xlane.xlu1 %1604 }
 0x801   :  { %2761 = vlog2.f32 %v1605_v46  ;;  %v1389_v31 = vadd.f32 %v1388_v27, %v1387_v52 }
 0x802   :  { %2763 = vlog2.f32 %v1603_v43 }
 0x803   :  { %v1390_v0 = vrot.slane %v1389_v31, 4 }
 0x804   :  { %v1630_v53 = vpop.xlane.xlu0 %1629  ;;  %v1632_v9 = vpop.xlane.xlu1 %1631 }
 0x805   :  { %v1391_v34 = vadd.f32 %v1390_v0, %v1389_v31 }
 0x807   :  { %v1392_v55 = vrot.slane %v1391_v34, 2 }
 0x808   :  { %v1851_v2 = vpop.xlane.xlu0 %1850  ;;  %v1853_v62 = vpop.xlane.xlu1 %1852 }
 0x809   :  { %2765 = vlog2.f32 %v1851_v2  ;;  %v1393_v43 = vadd.f32 %v1392_v55, %v1391_v34 }
 0x80a   :  { %2767 = vlog2.f32 %v1853_v62 }
 0x80b   :  { %v1394_v44 = vrot.slane %v1393_v43, 1 }
 0x80d   :  { %v1395_v63 = vadd.f32 %v1394_v44, %v1393_v43 }
 0x80e   :  { %v2762_v14 = vpop.eup %2761 }
 0x80f   :  { %v2764_v48 = vpop.eup %2763  ;;  %v1609_v17 = vmul.f32 0.6931472, %v2762_v14 }
 0x810   :  { %v1607_v19 = vmul.f32 0.6931472, %v2764_v48 }
 0x811   :  { %v1611_v23 = vadd.f32 %v1609_v17, %v4091_v42 }
 0x812   :  { %v1610_v26 = vadd.f32 %v1607_v19, %v4089_v60 }
 0x813   :  { %v1634_v29 = vsub.f32 %v1611_v23, %v1632_v9 }
 0x814   :  { %v1633_v51 = vsub.f32 %v1610_v26, %v1630_v53 }
 0x815   :  { %v1636_v39 = vmul.f32 0.0, %v1634_v29 }
 0x816   :  { %v2766_v35 = vpop.eup %2765  ;;  %v1635_v42 = vmul.f32 %v3905_v41, %v1633_v51 }
 0x817   :  { %v2768_v3 = vpop.eup %2767  ;;  %v1855_v49 = vmul.f32 0.6931472, %v2766_v35 }
 0x818   :  { %v1857_v33 = vmul.f32 0.6931472, %v2768_v3  ;;  %v1637_v4 = vadd.f32 %v1636_v39, %v1635_v42 }
 0x819   :  { %v1858_v60 = vadd.f32 %v1855_v49, %v4097_v58 }
 0x81a   :  { %v1859_v18 = vadd.f32 %v1857_v33, %v4099_v40  ;;  %v1638_v38 = vrot.slane %v1637_v4, 4 }
 0x81c   :  { %v1639_v56 = vadd.f32 %v1638_v38, %v1637_v4 }
 0x81e   :  { %v1640_v8 = vrot.slane %v1639_v56, 2 }
 0x820   :  { %v1641_v9 = vadd.f32 %v1640_v8, %v1639_v56 }
 0x822   :  { %v1642_v14 = vrot.slane %v1641_v9, 1 }
 0x824   :  { %v1643_v54 = vadd.f32 %v1642_v14, %v1641_v9 }
 0x85f   :  { %v2099_v30 = vpop.xlane.xlu0 %2098 }
 0x860   :  { %2769 = vlog2.f32 %v2099_v30 }
 0x863   :  { %v2101_v28 = vpop.xlane.xlu1 %2100  ;;  %v1878_v50 = vpop.xlane.xlu0 %1877 }
 0x864   :  { %2771 = vlog2.f32 %v2101_v28  ;;  %v1881_v1 = vsub.f32 %v1858_v60, %v1878_v50 }
 0x866   :  { %v1883_v12 = vmul.f32 %v3905_v41, %v1881_v1 }
 0x867   :  { %v1880_v13 = vpop.xlane.xlu1 %1879  ;;  %v2126_v57 = vpop.xlane.xlu0 %2125 }
 0x868   :  { %v1882_v22 = vsub.f32 %v1859_v18, %v1880_v13 }
 0x86a   :  { %v1884_v10 = vmul.f32 0.0, %v1882_v22 }
 0x86b   :  { %v2128_v15 = vpop.xlane.xlu1 %2127 }
 0x86c   :  { %v1885_v21 = vadd.f32 %v1884_v10, %v1883_v12 }
 0x86d   :  { %v2770_v5 = vpop.eup %2769 }
 0x86e   :  { %v2103_v61 = vmul.f32 0.6931472, %v2770_v5  ;;  %v1886_v24 = vrot.slane %v1885_v21, 4 }
 0x870   :  { %v2106_v58 = vadd.f32 %v2103_v61, %v4121_v7  ;;  %v1887_v40 = vadd.f32 %v1886_v24, %v1885_v21 }
 0x871   :  { %v2772_v32 = vpop.eup %2771 }
 0x872   :  { %v2105_v36 = vmul.f32 0.6931472, %v2772_v32  ;;  %v2129_v11 = vsub.f32 %v2106_v58, %v2126_v57  ;;  %v1888_v46 = vrot.slane %v1887_v40, 2 }
 0x874   :  { %v2107_v6 = vadd.f32 %v2105_v36, %v4125_v45  ;;  %v2131_v2 = vmul.f32 %v3905_v41, %v2129_v11  ;;  %v1889_v47 = vadd.f32 %v1888_v46, %v1887_v40  ;;  %v1396_v45 = vadd.f32 %v1395_v63, %v3923_v59 }
 0x876   :  { %v2130_v53 = vsub.f32 %v2107_v6, %v2128_v15  ;;  %v1890_v16 = vrot.slane %v1889_v47, 1  ;;  %v1644_v26 = vadd.f32 %v1643_v54, %v1396_v45 }
 0x878   :  { %v2132_v62 = vmul.f32 0.0, %v2130_v53  ;;  %v1891_v23 = vadd.f32 %v1890_v16, %v1889_v47 }
 0x87a   :  { %v2133_v7 = vadd.f32 %v2132_v62, %v2131_v2  ;;  %v1892_v37 = vadd.f32 %v1891_v23, %v1644_v26 }
 0x87c   :  { %v2134_v48 = vrot.slane %v2133_v7, 4 }
 0x87e   :  { %v2135_v17 = vadd.f32 %v2134_v48, %v2133_v7 }
 0x880   :  { %v2136_v19 = vrot.slane %v2135_v17, 2 }
 0x882   :  { %v2137_v20 = vadd.f32 %v2136_v19, %v2135_v17 }
 0x884   :  { %v2138_v35 = vrot.slane %v2137_v20, 1 }
 0x886   :  { %v2139_v25 = vadd.f32 %v2138_v35, %v2137_v20 }
 0x888   :  { %v2140_v41 = vadd.f32 %v2139_v25, %v1892_v37 }
 0x88a   :  { %v2141_v3 = vmul.f32 0.041666668, %v2140_v41 }
 0x88c   :  { %2143 = vst.msk [vmem:[#allocation3] sm:$0x1] %vm2142_vm15, %v2141_v3 }
 0x88d   :  { %2825 = shalt.err (!%p2822_p4)
}
 0x88e   :  { %2153 = dma.vmem_to_hbm [thread:$0]  %s2151_s28, 16, %s4168_s9, [#allocation4]  }
 0x88f   :  { %2834 = dma.done.wait [#allocation4], 16  }
 0x890   :  { %2835 = vsyncadd [#allocation4], 4294967280 }
 0x891   :  { %2157 = vsyncpa [#allocation4], 1 }

</bundles_post_ra>
